<compile_context>
chip_gen: v7x
topology: tpu7x:2x2x1
jax: 0.10.0
libtpu: 0.0.40
codegen_flags: <defaults>
</compile_context>

<pallas_src>
import math
import jax
import jax.numpy as jnp
from jax.experimental import pallas as pl
from jax.experimental.pallas import tpu as pltpu

D_IN = 512
D_HID = 2048
LN_EPS = 1e-5
INV_SQRT2 = 1.0 / math.sqrt(2.0)


def _mlp_block_kernel(x_ref, gamma_ref, beta_ref, w1_ref, b1_ref, w2_ref, b2_ref,
                      out_ref, xn_ref, acc_ref):
    # Grid axis 0 walks chunks of the hidden dimension (reduction axis for the
    # second matmul, independent columns for the first).
    k = pl.program_id(0)

    @pl.when(k == 0)
    def _():
        # ---- LayerNorm over last dim (512), elementwise affine, f32 ----
        x = x_ref[...]
        mean = jnp.mean(x, axis=-1, keepdims=True)
        centered = x - mean
        var = jnp.mean(centered * centered, axis=-1, keepdims=True)
        inv_std = jax.lax.rsqrt(var + LN_EPS)
        xn = centered * inv_std * gamma_ref[...] + beta_ref[...]
        # Keep normalized activations resident (bf16) for all hidden chunks.
        xn_ref[...] = xn.astype(xn_ref.dtype)
        acc_ref[...] = jnp.zeros_like(acc_ref)

    # ---- Linear 512 -> 2048 (this chunk of 512 hidden cols), f32 accumulate ----
    h = jnp.dot(xn_ref[...], w1_ref[...], preferred_element_type=jnp.float32)
    h = h + b1_ref[...]                         # b1 chunk: (1, TK) f32

    # ---- GELU (approximate='none' => exact erf formulation) ----
    g = 0.5 * h * (1.0 + jax.lax.erf(h * INV_SQRT2))

    # ---- Dropout(p=0.0) is the identity in both train and eval ----

    # ---- Linear 2048 -> 512: accumulate this chunk's contribution ----
    acc_ref[...] += jnp.dot(g.astype(w2_ref.dtype), w2_ref[...],
                            preferred_element_type=jnp.float32)

    @pl.when(k == pl.num_programs(0) - 1)
    def _():
        out_ref[...] = (acc_ref[...] + b2_ref[...]).astype(out_ref.dtype)


def mlp_block(x_nhwc, gamma, beta, w1, b1, w2, b2, *, tk=512):
    """x_nhwc: [B, H, W, 512] float32. Returns [B, H, W, 512] float32."""
    B, H, W, C = x_nhwc.shape
    assert C == D_IN
    assert D_HID % tk == 0
    n_tok = B * H * W

    # Pad token count up to a multiple of 256 (sublane-aligned; MXU-M friendly).
    n_pad = ((n_tok + 255) // 256) * 256
    x2d = x_nhwc.reshape(n_tok, C).astype(jnp.float32)
    if n_pad != n_tok:
        x2d = jnp.pad(x2d, ((0, n_pad - n_tok), (0, 0)))

    # bf16 weights for the MXU (f32 accumulation inside the kernel);
    # LayerNorm params and biases remain f32.
    w1_bf = w1.astype(jnp.bfloat16)
    w2_bf = w2.astype(jnp.bfloat16)
    gamma2 = gamma.reshape(1, D_IN).astype(jnp.float32)
    beta2 = beta.reshape(1, D_IN).astype(jnp.float32)
    b1_2 = b1.reshape(1, D_HID).astype(jnp.float32)
    b2_2 = b2.reshape(1, D_IN).astype(jnp.float32)

    n_chunks = D_HID // tk

    out2d = pl.pallas_call(
        _mlp_block_kernel,
        out_shape=jax.ShapeDtypeStruct((n_pad, D_IN), jnp.float32),
        grid_spec=pltpu.PrefetchScalarGridSpec(
            num_scalar_prefetch=0,
            grid=(n_chunks,),
            in_specs=[
                pl.BlockSpec((n_pad, D_IN), lambda k: (0, 0)),   # x (resident)
                pl.BlockSpec((1, D_IN), lambda k: (0, 0)),       # gamma
                pl.BlockSpec((1, D_IN), lambda k: (0, 0)),       # beta
                pl.BlockSpec((D_IN, tk), lambda k: (0, k)),      # w1 column chunk
                pl.BlockSpec((1, tk), lambda k: (0, k)),         # b1 chunk
                pl.BlockSpec((tk, D_IN), lambda k: (k, 0)),      # w2 row chunk
                pl.BlockSpec((1, D_IN), lambda k: (0, 0)),       # b2
            ],
            out_specs=pl.BlockSpec((n_pad, D_IN), lambda k: (0, 0)),
            scratch_shapes=[
                pltpu.VMEM((n_pad, D_IN), jnp.bfloat16),   # normalized input
                pltpu.VMEM((n_pad, D_IN), jnp.float32),    # output accumulator
            ],
        ),
        compiler_params=pltpu.CompilerParams(
            dimension_semantics=("arbitrary",),
            vmem_limit_bytes=32 * 1024 * 1024,
        ),
    )(x2d, gamma2, beta2, w1_bf, b1_2, w2_bf, b2_2)

    # TODO(synk): add a parallel token-grid axis (megacore) once B*H*W is large
    # enough that splitting rows outweighs the duplicated weight DMA.
    return out2d[:n_tok].reshape(B, H, W, D_IN)


def _ref_forward(x, gamma, beta, w1, b1, w2, b2):
    # pure-JAX f32 reference (matches the PyTorch module semantics)
    mean = jnp.mean(x, axis=-1, keepdims=True)
    var = jnp.mean((x - mean) ** 2, axis=-1, keepdims=True)
    xn = (x - mean) / jnp.sqrt(var + LN_EPS) * gamma + beta
    h = xn @ w1 + b1
    g = 0.5 * h * (1.0 + jax.lax.erf(h / math.sqrt(2.0)))
    return g @ w2 + b2


if __name__ == "__main__":
    key = jax.random.PRNGKey(0)
    kx, kg, kb, kw1, kb1, kw2, kb2 = jax.random.split(key, 7)

    # input matching the module's forward: [1, 14, 14, 512]
    x = jax.random.normal(kx, (1, 14, 14, D_IN), dtype=jnp.float32)

    # deterministic parameter init (synthetic, PyTorch-like scales)
    gamma = jnp.ones((D_IN,), jnp.float32) + 0.01 * jax.random.normal(kg, (D_IN,))
    beta = 0.01 * jax.random.normal(kb, (D_IN,), dtype=jnp.float32)
    lim1 = 1.0 / math.sqrt(D_IN)
    w1 = jax.random.uniform(kw1, (D_IN, D_HID), jnp.float32, -lim1, lim1)
    b1 = jax.random.uniform(kb1, (D_HID,), jnp.float32, -lim1, lim1)
    lim2 = 1.0 / math.sqrt(D_HID)
    w2 = jax.random.uniform(kw2, (D_HID, D_IN), jnp.float32, -lim2, lim2)
    b2 = jax.random.uniform(kb2, (D_IN,), jnp.float32, -lim2, lim2)

    out = mlp_block(x, gamma, beta, w1, b1, w2, b2)
    out = jax.block_until_ready(out)

    ref = _ref_forward(x.reshape(-1, D_IN), gamma, beta, w1, b1, w2, b2).reshape(out.shape)
    assert out.shape == (1, 14, 14, D_IN)
    # bf16 matmul operands (f32 accumulation) -> relaxed tolerance vs f32 ref
    assert jnp.allclose(out, ref, atol=5e-2, rtol=5e-2), \
        float(jnp.max(jnp.abs(out - ref)))

    print("KERNEL_OK")
</pallas_src>

<mosaic_0001>
module attributes {stable_mosaic.version = 11 : i64} {
  func.func @_mlp_block_kernel(%arg0: i32, %arg1: memref<256x512xf32, #tpu.memory_space<vmem>>, %arg2: memref<1x512xf32, #tpu.memory_space<vmem>>, %arg3: memref<1x512xf32, #tpu.memory_space<vmem>>, %arg4: memref<512x512xbf16, #tpu.memory_space<vmem>>, %arg5: memref<1x512xf32, #tpu.memory_space<vmem>>, %arg6: memref<512x512xbf16, #tpu.memory_space<vmem>>, %arg7: memref<1x512xf32, #tpu.memory_space<vmem>>, %arg8: memref<256x512xf32, #tpu.memory_space<vmem>>, %arg9: memref<256x512xbf16, #tpu.memory_space<vmem>>, %arg10: memref<256x512xf32, #tpu.memory_space<vmem>>) attributes {dimension_semantics = [#tpu.dimension_semantics<arbitrary>], iteration_bounds = array<i64: 4>, scalar_prefetch = 0 : i64, scratch_operands = 2 : i64, tpu.core_type = #tpu.core_type<tc>, window_params = [{pipeline_mode = #tpu.pipeline_mode<synchronous>, transform_indices = @transform_0, window_bounds = array<i64: 256, 512>}, {pipeline_mode = #tpu.pipeline_mode<synchronous>, transform_indices = @transform_1, window_bounds = array<i64: 1, 512>}, {pipeline_mode = #tpu.pipeline_mode<synchronous>, transform_indices = @transform_2, window_bounds = array<i64: 1, 512>}, {transform_indices = @transform_3, window_bounds = array<i64: 512, 512>}, {transform_indices = @transform_4, window_bounds = array<i64: 1, 512>}, {transform_indices = @transform_5, window_bounds = array<i64: 512, 512>}, {pipeline_mode = #tpu.pipeline_mode<synchronous>, transform_indices = @transform_6, window_bounds = array<i64: 1, 512>}, {pipeline_mode = #tpu.pipeline_mode<synchronous>, transform_indices = @transform_7, window_bounds = array<i64: 256, 512>}]} {
    %c0_i32 = arith.constant 0 : i32
    %0 = arith.cmpi eq, %arg0, %c0_i32 : i32
    %1 = arith.extui %0 : i1 to i32
    %c0_i32_0 = arith.constant 0 : i32
    %2 = arith.cmpi ne, %1, %c0_i32_0 : i32
    scf.if %2 {
      %c0_17 = arith.constant 0 : index
      %c0_18 = arith.constant 0 : index
      %26 = vector.load %arg1[%c0_17, %c0_18] : memref<256x512xf32, #tpu.memory_space<vmem>>, vector<256x512xf32>
      %cst_19 = arith.constant dense<0.000000e+00> : vector<256xf32>
      %27 = vector.multi_reduction <add>, %26, %cst_19 [1] : vector<256x512xf32> to vector<256xf32>
      %28 = vector.shape_cast %27 : vector<256xf32> to vector<256x1xf32>
      %cst_20 = arith.constant 5.120000e+02 : f32
      %29 = vector.broadcast %cst_20 : f32 to vector<256x1xf32>
      %30 = arith.divf %28, %29 : vector<256x1xf32>
      %31 = vector.broadcast %30 : vector<256x1xf32> to vector<256x512xf32>
      %32 = arith.subf %26, %31 : vector<256x512xf32>
      %33 = arith.mulf %32, %32 : vector<256x512xf32>
      %cst_21 = arith.constant dense<0.000000e+00> : vector<256xf32>
      %34 = vector.multi_reduction <add>, %33, %cst_21 [1] : vector<256x512xf32> to vector<256xf32>
      %35 = vector.shape_cast %34 : vector<256xf32> to vector<256x1xf32>
      %cst_22 = arith.constant 5.120000e+02 : f32
      %36 = vector.broadcast %cst_22 : f32 to vector<256x1xf32>
      %37 = arith.divf %35, %36 : vector<256x1xf32>
      %cst_23 = arith.constant 9.99999974E-6 : f32
      %38 = vector.broadcast %cst_23 : f32 to vector<256x1xf32>
      %39 = arith.addf %37, %38 : vector<256x1xf32>
      %40 = math.rsqrt %39 : vector<256x1xf32>
      %41 = vector.broadcast %40 : vector<256x1xf32> to vector<256x512xf32>
      %42 = arith.mulf %32, %41 : vector<256x512xf32>
      %c0_24 = arith.constant 0 : index
      %c0_25 = arith.constant 0 : index
      %43 = vector.load %arg2[%c0_24, %c0_25] : memref<1x512xf32, #tpu.memory_space<vmem>>, vector<1x512xf32>
      %44 = vector.broadcast %43 : vector<1x512xf32> to vector<256x512xf32>
      %45 = arith.mulf %42, %44 : vector<256x512xf32>
      %c0_26 = arith.constant 0 : index
      %c0_27 = arith.constant 0 : index
      %46 = vector.load %arg3[%c0_26, %c0_27] : memref<1x512xf32, #tpu.memory_space<vmem>>, vector<1x512xf32>
      %47 = vector.broadcast %46 : vector<1x512xf32> to vector<256x512xf32>
      %48 = arith.addf %45, %47 : vector<256x512xf32>
      %49 = arith.truncf %48 : vector<256x512xf32> to vector<256x512xbf16>
      %c0_28 = arith.constant 0 : index
      %c0_29 = arith.constant 0 : index
      %50 = vector.load %arg9[%c0_28, %c0_29] : memref<256x512xbf16, #tpu.memory_space<vmem>>, vector<256x512xbf16>
      tpu.vector_store %arg9[%c0_28, %c0_29], %49 {strides = array<i32>} : memref<256x512xbf16, #tpu.memory_space<vmem>>, vector<256x512xbf16>,
      %cst_30 = arith.constant 0.000000e+00 : f32
      %51 = vector.broadcast %cst_30 : f32 to vector<256x512xf32>
      %c0_31 = arith.constant 0 : index
      %c0_32 = arith.constant 0 : index
      %52 = vector.load %arg10[%c0_31, %c0_32] : memref<256x512xf32, #tpu.memory_space<vmem>>, vector<256x512xf32>
      tpu.vector_store %arg10[%c0_31, %c0_32], %51 {strides = array<i32>} : memref<256x512xf32, #tpu.memory_space<vmem>>, vector<256x512xf32>,
    } else {
    }
    %c0 = arith.constant 0 : index
    %c0_1 = arith.constant 0 : index
    %3 = vector.load %arg9[%c0, %c0_1] : memref<256x512xbf16, #tpu.memory_space<vmem>>, vector<256x512xbf16>
    %c0_2 = arith.constant 0 : index
    %c0_3 = arith.constant 0 : index
    %4 = vector.load %arg4[%c0_2, %c0_3] : memref<512x512xbf16, #tpu.memory_space<vmem>>, vector<512x512xbf16>
    %cst = arith.constant dense<0.000000e+00> : vector<256x512xf32>
    %5 = tpu.matmul %3, %4, %cst {dimension_numbers = #tpu.dot_dimension_numbers<[1], [0], [0], [1], [0, 0, 1, 1], [], []>} : vector<256x512xbf16>, vector<512x512xbf16>, vector<256x512xf32> -> vector<256x512xf32>
    %c0_4 = arith.constant 0 : index
    %c0_5 = arith.constant 0 : index
    %6 = vector.load %arg5[%c0_4, %c0_5] : memref<1x512xf32, #tpu.memory_space<vmem>>, vector<1x512xf32>
    %7 = vector.broadcast %6 : vector<1x512xf32> to vector<256x512xf32>
    %8 = arith.addf %5, %7 : vector<256x512xf32>
    %cst_6 = arith.constant 5.000000e-01 : f32
    %9 = vector.broadcast %cst_6 : f32 to vector<256x512xf32>
    %10 = arith.mulf %9, %8 : vector<256x512xf32>
    %cst_7 = arith.constant 0.707106769 : f32
    %11 = vector.broadcast %cst_7 : f32 to vector<256x512xf32>
    %12 = arith.mulf %8, %11 : vector<256x512xf32>
    %13 = math.erf %12 : vector<256x512xf32>
    %cst_8 = arith.constant 1.000000e+00 : f32
    %14 = vector.broadcast %cst_8 : f32 to vector<256x512xf32>
    %15 = arith.addf %14, %13 : vector<256x512xf32>
    %16 = arith.mulf %10, %15 : vector<256x512xf32>
    %c0_9 = arith.constant 0 : index
    %c0_10 = arith.constant 0 : index
    %17 = vector.load %arg10[%c0_9, %c0_10] : memref<256x512xf32, #tpu.memory_space<vmem>>, vector<256x512xf32>
    %18 = arith.truncf %16 : vector<256x512xf32> to vector<256x512xbf16>
    %c0_11 = arith.constant 0 : index
    %c0_12 = arith.constant 0 : index
    %19 = vector.load %arg6[%c0_11, %c0_12] : memref<512x512xbf16, #tpu.memory_space<vmem>>, vector<512x512xbf16>
    %cst_13 = arith.constant dense<0.000000e+00> : vector<256x512xf32>
    %20 = tpu.matmul %18, %19, %cst_13 {dimension_numbers = #tpu.dot_dimension_numbers<[1], [0], [0], [1], [0, 0, 1, 1], [], []>} : vector<256x512xbf16>, vector<512x512xbf16>, vector<256x512xf32> -> vector<256x512xf32>
    %21 = arith.addf %17, %20 : vector<256x512xf32>
    %c0_14 = arith.constant 0 : index
    %c0_15 = arith.constant 0 : index
    %22 = vector.load %arg10[%c0_14, %c0_15] : memref<256x512xf32, #tpu.memory_space<vmem>>, vector<256x512xf32>
    tpu.vector_store %arg10[%c0_14, %c0_15], %21 {strides = array<i32>} : memref<256x512xf32, #tpu.memory_space<vmem>>, vector<256x512xf32>,
    %c3_i32 = arith.constant 3 : i32
    %23 = arith.cmpi eq, %arg0, %c3_i32 : i32
    %24 = arith.extui %23 : i1 to i32
    %c0_i32_16 = arith.constant 0 : i32
    %25 = arith.cmpi ne, %24, %c0_i32_16 : i32
    scf.if %25 {
      %c0_17 = arith.constant 0 : index
      %c0_18 = arith.constant 0 : index
      %26 = vector.load %arg10[%c0_17, %c0_18] : memref<256x512xf32, #tpu.memory_space<vmem>>, vector<256x512xf32>
      %c0_19 = arith.constant 0 : index
      %c0_20 = arith.constant 0 : index
      %27 = vector.load %arg7[%c0_19, %c0_20] : memref<1x512xf32, #tpu.memory_space<vmem>>, vector<1x512xf32>
      %28 = vector.broadcast %27 : vector<1x512xf32> to vector<256x512xf32>
      %29 = arith.addf %26, %28 : vector<256x512xf32>
      %c0_21 = arith.constant 0 : index
      %c0_22 = arith.constant 0 : index
      %30 = vector.load %arg8[%c0_21, %c0_22] : memref<256x512xf32, #tpu.memory_space<vmem>>, vector<256x512xf32>
      tpu.vector_store %arg8[%c0_21, %c0_22], %29 {strides = array<i32>} : memref<256x512xf32, #tpu.memory_space<vmem>>, vector<256x512xf32>,
    } else {
    }
    return
  }
  func.func @transform_0(%arg0: i32) -> (i32, i32) {
    %c0_i32 = arith.constant 0 : i32
    %c0_i32_0 = arith.constant 0 : i32
    %c0_i32_1 = arith.constant 0 : i32
    return %c0_i32, %c0_i32_0 : i32, i32
  }
  func.func @transform_1(%arg0: i32) -> (i32, i32) {
    %c0_i32 = arith.constant 0 : i32
    %c0_i32_0 = arith.constant 0 : i32
    %c0_i32_1 = arith.constant 0 : i32
    return %c0_i32, %c0_i32_0 : i32, i32
  }
  func.func @transform_2(%arg0: i32) -> (i32, i32) {
    %c0_i32 = arith.constant 0 : i32
    %c0_i32_0 = arith.constant 0 : i32
    %c0_i32_1 = arith.constant 0 : i32
    return %c0_i32, %c0_i32_0 : i32, i32
  }
  func.func @transform_3(%arg0: i32) -> (i32, i32) {
    %c0_i32 = arith.constant 0 : i32
    %c0_i32_0 = arith.constant 0 : i32
    return %c0_i32, %arg0 : i32, i32
  }
  func.func @transform_4(%arg0: i32) -> (i32, i32) {
    %c0_i32 = arith.constant 0 : i32
    %c0_i32_0 = arith.constant 0 : i32
    return %c0_i32, %arg0 : i32, i32
  }
  func.func @transform_5(%arg0: i32) -> (i32, i32) {
    %c0_i32 = arith.constant 0 : i32
    %c0_i32_0 = arith.constant 0 : i32
    return %arg0, %c0_i32 : i32, i32
  }
  func.func @transform_6(%arg0: i32) -> (i32, i32) {
    %c0_i32 = arith.constant 0 : i32
    %c0_i32_0 = arith.constant 0 : i32
    %c0_i32_1 = arith.constant 0 : i32
    return %c0_i32, %c0_i32_0 : i32, i32
  }
  func.func @transform_7(%arg0: i32) -> (i32, i32) {
    %c0_i32 = arith.constant 0 : i32
    %c0_i32_0 = arith.constant 0 : i32
    %c0_i32_1 = arith.constant 0 : i32
    return %c0_i32, %c0_i32_0 : i32, i32
  }
}

</mosaic_0001>

<bundles_post_ra>
// kernel: tpu_custom_call.1
= control target key start
LH: loop header
LB: loop body
LE: loop exit
PB: predicated region body
PF: predicated region fallthrough
CT: control target
= control target key end

     0   :  { %s12368_s0 = inlined_call_operand.hbm [shape: f32[256,512], index: 0, kind: input, shape index: {}]   ;;  %s12369_s1 = inlined_call_operand.hbm [shape: f32[1,512], index: 1, kind: input, shape index: {}]   ;;  %s12370_s2 = inlined_call_operand.hbm [shape: f32[1,512], index: 2, kind: input, shape index: {}]   ;;  %s12371_s3 = inlined_call_operand.hbm [shape: bf16[512,2048], index: 3, kind: input, shape index: {}]   ;;  %s12372_s4 = inlined_call_operand.hbm [shape: f32[1,2048], index: 4, kind: input, shape index: {}]   ;;  %s12373_s5 = inlined_call_operand.hbm [shape: bf16[2048,512], index: 5, kind: input, shape index: {}]   ;;  %s12374_s6 = inlined_call_operand.hbm [shape: f32[1,512], index: 6, kind: input, shape index: {}]   ;;  %s12375_s7 = inlined_call_operand.hbm [shape: f32[256,512], index: 7, kind: output, shape index: {}]  }
   0x1   :  { %12579 = sst [smem:[#allocation191_spill]] %s12369_s1 }
   0x2   :  { %12580 = sst [smem:[#allocation192_spill]] %s12371_s3 }
   0x3   :  { %12581 = sst [smem:[#allocation193_spill]] %s12374_s6 }
   0x4   :  { %12582 = sst [smem:[#allocation194_spill]] %s12375_s7 }
   0x5   :  { %12 = vsyncpa [#allocation5], 0 }
   0x6   :  { %13 = vsyncpa [#allocation8], 0 }
   0x7   :  { %14 = vsyncpa [#allocation11], 0 }
   0x8   :  { %16 = vsyncpa [#allocation11 + $0x1], 0 }
   0x9   :  { %17 = vsyncpa [#allocation14], 0 }
   0xa   :  { %19 = vsyncpa [#allocation14 + $0x1], 0 }
   0xb   :  { %20 = vsyncpa [#allocation6], 0  ;;  %s8567_s24 = smov 0   ;;  %s8569_s25 = smov 0  }
   0xc   :  { %s8571_s26 = smov 0   ;;  %s8573_s27 = smov 0  }
   0xd LB: > { %s8586_s28 = sadd.s32 4294967295, %s8509_s27   ;;  %p109_p0 = scmp.ne.s32.totalorder %s8501_s25, %s8497_s24  ;;  %s8509_s27 = sphi %s8573_s27, %s13106_s27   ;;  %s8505_s26 = sphi %s8571_s26, %s13110_s26   ;;  %s8501_s25 = sphi %s8569_s25, %s13109_s25   ;;  %s8497_s24 = sphi %s8567_s24, %s13108_s24  }
   0xe   : > { %p12376_p1 = scmp.eq.s32.totalorder %s8586_s28, 0  ;;  %p6744_p2 = scmp.ge.s32.totalorder %s8509_s27, 1 }
   0xf   : > { %p214_p3 = scmp.lt.s32.totalorder %s8509_s27, 5  ;;  %s8511_s8 = smov [#allocation7]  }
  0x10   : > { %p8595_p5 = por %p12376_p1, %p109_p0  ;;  %s240_s9 = sshll.u32 %s8511_s8, 4  ;;  %s241_s9 = int_to_ptr.vmem [resolvable:$true] %s240_s9 }
  0x11   : > { %p8599_p6 = pnand %p6744_p2, %p214_p3  ;;  %s8512_s10 = smov [#allocation15]  }
  0x12   : > { %s12583_s29 = scalar_select %p8595_p5, 1, 0 }
  0x13   : > { %s12585_s30 = scalar_select %p8599_p6, 1, 0 }
  0x14   : > { %12584 = sst [smem:[#allocation23_spill]] %s12583_s29  ;;  %p7444_p7 = pneg %p8599_p6 }
  0x15   : > { %s262_s11 = sshll.u32 %s8512_s10, 4  ;;  %s8614_s13 = sadd.s32 1, %s8509_s27   ;;  %s8611_s11 = int_to_ptr.vmem [resolvable:$true] %s262_s11 }
  0x16   : > { %p8607_p8 = pnand %p7444_p7, %p12376_p1  ;;  %12587 = sst [smem:[#allocation24_spill]] %s8614_s13 }
  0x17   : > { %s93_s14 = ssub.s32 %s8509_s27, %s8614_s13  ;;  %s12588_s1 = sld [smem:[#allocation191_spill]] }
  0x18   : > { %s12586_s12 = scalar_select %p8607_p8, 1, 0 }
  0x19   : > { %p8626_p10 = pneg %p8607_p8 }
  0x1b   : > { %s12589_s20 = scalar_select %p8626_p10, 1, 0 }
  0x1d   : > { %s8227_s17 = scalar_lea.hbm %s12588_s1, 64 }
  0x1e   : > { %p8228_p9 = scmp.ne.s32.totalorder %s12588_s1, %s8227_s17  ;;  %p8234_p13 = scmp.lt.u32.totalorder %s8227_s17, %s12588_s1 }
  0x20   : > { %p8230_p11 = pnand %p8626_p10, %p8228_p9 }
  0x22   : > { %p8231_p12 = pneg %p8230_p11 }
  0x24   : > { %p8236_p0 = pnand %p8234_p13, %p8231_p12 }
  0x26   : > { %8239 = shalt.err (!%p8236_p0)
}
  0x27   : > { %s8240_s23 = scalar_lea.vmem %s241_s9, 64  ;;  %p8248_p4 = scmp.lt.s32.totalorder %s241_s9, %s241_s9 }
  0x28   : > { %p8241_p2 = scmp.ne.s32.totalorder %s241_s9, %s8240_s23  ;;  %p8249_p1 = scmp.lt.s32.totalorder %s8240_s23, %s8240_s23 }
  0x2a   : > { %p8243_p3 = pnand %p8241_p2, %p8626_p10  ;;  %p8250_p5 = por %p8249_p1, %p8248_p4 }
  0x2c   : > { %p8244_p7 = pneg %p8243_p3 }
  0x2e   : > { %p8251_p6 = pnand %p8250_p5, %p8244_p7 }
  0x30   : > { %8254 = shalt.err (!%p8251_p6)
}
  0x31   : > { %7450 = dma.hbm_to_vmem [thread:$0]  (!%p8607_p8), %s12588_s1, 64, %s241_s9, [#allocation8]  }
  0x32   : > { %s12590_s6 = sld [smem:[#allocation193_spill]] }
  0x38   : > { %s8255_s16 = scalar_lea.hbm %s12590_s6, 64 }
  0x39   : > { %p8256_p9 = scmp.ne.s32.totalorder %s12590_s6, %s8255_s16  ;;  %p8262_p4 = scmp.lt.u32.totalorder %s8255_s16, %s12590_s6 }
  0x3b   : > { %p8258_p11 = pnand %p8256_p9, %p8626_p10 }
  0x3d   : > { %p8259_p1 = pneg %p8258_p11 }
  0x3f   : > { %p8264_p5 = pnand %p8262_p4, %p8259_p1 }
  0x41   : > { %8267 = shalt.err (!%p8264_p5)
}
  0x42   : > { %s8268_s9 = scalar_lea.vmem %s8611_s11, 64  ;;  %p8276_p0 = scmp.lt.s32.totalorder %s8611_s11, %s8611_s11 }
  0x43   : > { %p8269_p6 = scmp.ne.s32.totalorder %s8611_s11, %s8268_s9  ;;  %p8277_p2 = scmp.lt.s32.totalorder %s8268_s9, %s8268_s9 }
  0x45   : > { %p8271_p12 = pnand %p8269_p6, %p8626_p10  ;;  %p8278_p3 = por %p8277_p2, %p8276_p0 }
  0x47   : > { %p8272_p13 = pneg %p8271_p12 }
  0x49   : > { %p8279_p7 = pnand %p8278_p3, %p8272_p13 }
  0x4b   : > { %8282 = shalt.err (!%p8279_p7)
}
  0x4c   : > { %7456 = dma.hbm_to_vmem [thread:$0]  (!%p8607_p8), %s12590_s6, 64, %s8611_s11, [#allocation14]  }
  0x4d   : > { %p94_p9 = scmp.eq.s32.totalorder %s93_s14, 0  ;;  %s96_s24 = sadd.s32 1, %s8505_s26 }
  0x4e   : > { %p103_p11 = scmp.ne.s32.totalorder %s8505_s26, %s8501_s25  ;;  %p104_p1 = scmp.eq.s32.totalorder %s8509_s27, 0 }
  0x4f   : > { %s8673_s8 = scalar_select %p94_p9, %s8505_s26, %s96_s24  }
  0x50   : > { %p105_p4 = por %p104_p1, %p103_p11  ;;  %p7471_p5 = scmp.lt.s32.totalorder %s8509_s27, 4 }
  0x51   : > { %12591 = sst [smem:[#allocation25_spill]] %s8673_s8  ;;  %s12380_s10 = sand.u32 1, %s8509_s27  }
  0x52   : > { %s12379_s15 = sand.u32 1, %s8505_s26   ;;  %s7030_s17 = sshll.u32 %s8509_s27, 8 }
  0x53   : > { %s8680_s16 = sshll.u32 %s12379_s15, 10  ;;  %s12592_s3 = sld [smem:[#allocation192_spill]] }
  0x54   : > { %s277_s14 = scalar_lea.vmem [#allocation10], %s8680_s16  ;;  %p8691_p6 = pnand %p7471_p5, %p105_p4 }
  0x55   : > { %s284_s21 = sshll.u32 %s277_s14, 4  ;;  %s8697_s22 = scalar_lea.sflag [#allocation11], %s12380_s10  ;;  %s8689_s21 = int_to_ptr.vmem [resolvable:$true] %s284_s21 }
  0x56   : > { %s12593_s9 = scalar_select %p8691_p6, 1, 0 }
  0x57   : > { %p8703_p13 = pneg %p8691_p6 }
  0x59   : > { %s8686_s11 = scalar_lea.hbm %s12592_s3, %s7030_s17  ;;  %s8288_s19 = scalar_lea.hbm %s12592_s3, 65536 }
  0x5a   : > { %s8283_s23 = scalar_lea.hbm %s8686_s11, 16384  ;;  %p8289_p3 = scmp.lt.u32.totalorder %s8686_s11, %s12592_s3 }
  0x5b   : > { %p8284_p12 = scmp.ne.s32.totalorder %s8686_s11, %s8283_s23  ;;  %p8290_p7 = scmp.lt.u32.totalorder %s8288_s19, %s8283_s23 }
  0x5c   : > { %s12594_s24 = scalar_select %p8703_p13, 1, 0 }
  0x5d   : > { %p8286_p0 = pnand %p8703_p13, %p8284_p12  ;;  %p8291_p9 = por %p8290_p7, %p8289_p3 }
  0x5e   : > { %p8292_p11 = scmp.lt.u32.totalorder %s8283_s23, %s8686_s11 }
  0x5f   : > { %p8287_p2 = pneg %p8286_p0 }
  0x60   : > { %p8293_p1 = por %p8292_p11, %p8291_p9 }
  0x62   : > { %p8294_p4 = pnand %p8293_p1, %p8287_p2 }
  0x64   : > { %8297 = shalt.err (!%p8294_p4)
}
  0x65   : > { %s8298_s10 = scalar_lea.vmem %s8689_s21, 16384  ;;  %s8513_s17 = smov [#allocation10]  }
  0x66   : > { %p8299_p5 = scmp.ne.s32.totalorder %s8689_s21, %s8298_s10  ;;  %s8303_s18 = sshll.u32 %s8513_s17, 4  ;;  %s8304_s18 = int_to_ptr.vmem [resolvable:$false] %s8303_s18 }
  0x67   : > { %s8305_s15 = scalar_lea.vmem %s8304_s18, 32768  ;;  %p8306_p8 = scmp.lt.s32.totalorder %s8689_s21, %s8304_s18 }
  0x68   : > { %p8301_p12 = pnand %p8299_p5, %p8703_p13  ;;  %p8307_p10 = scmp.lt.s32.totalorder %s8305_s15, %s8298_s10 }
  0x6a   : > { %p8302_p0 = pneg %p8301_p12  ;;  %p8308_p3 = por %p8307_p10, %p8306_p8 }
  0x6c   : > { %p8309_p7 = pnand %p8308_p3, %p8302_p0 }
  0x6e   : > { %8312 = shalt.err (!%p8309_p7)
}
  0x6f   : > { %s8514_s23 = smov 1024   ;;  %s12389_s19 = smov 256  }
  0x70   : > { %s12390_s14 = smov 16   ;;  %s8517_s17 = smov [#allocation4]  }
  0x71   : > { %7460 = dma.hbm_to_vmem [thread:$0]  (!%p8691_p6), %s8686_s11, 16384, %s8689_s21, %s8697_s22, %s8514_s23, %s12389_s19, %s12390_s14  }
  0x72   : > { %s226_s1 = sshll.u32 %s8517_s17, 4  ;;  %s8313_s15 = scalar_lea.hbm %s12368_s0, 16384  ;;  %s227_s1 = int_to_ptr.vmem [resolvable:$true] %s226_s1 }
  0x73   : > { %p8314_p8 = scmp.ne.s32.totalorder %s12368_s0, %s8313_s15  ;;  %p12595_p10 = scmp.ne.s32.totalorder %s12589_s20, 0 }
  0x74   : > { %p8320_p11 = scmp.lt.u32.totalorder %s8313_s15, %s12368_s0 }
  0x75   : > { %p8316_p2 = pnand %p8314_p8, %p12595_p10 }
  0x77   : > { %p8317_p9 = pneg %p8316_p2 }
  0x79   : > { %p8322_p1 = pnand %p8320_p11, %p8317_p9 }
  0x7b   : > { %8325 = shalt.err (!%p8322_p1)
}
  0x7c   : > { %s8326_s11 = scalar_lea.vmem %s227_s1, 16384  ;;  %p8334_p0 = scmp.lt.s32.totalorder %s227_s1, %s227_s1 }
  0x7d   : > { %p8327_p4 = scmp.ne.s32.totalorder %s227_s1, %s8326_s11  ;;  %p8335_p3 = scmp.lt.s32.totalorder %s8326_s11, %s8326_s11 }
  0x7f   : > { %p8329_p5 = pnand %p8327_p4, %p12595_p10  ;;  %p8336_p7 = por %p8335_p3, %p8334_p0 }
  0x81   : > { %p8330_p12 = pneg %p8329_p5 }
  0x83   : > { %p8337_p6 = pnand %p8336_p7, %p8330_p12 }
  0x85   : > { %8340 = shalt.err (!%p8337_p6)
}
  0x86   : > { %s8518_s3 = smov 512   ;;  %s8519_s6 = smov 32  }
  0x87   : > { %p12596_p8 = scmp.ne.s32.totalorder %s12586_s12, 0  ;;  %s8520_s21 = smov [#allocation9]  }
  0x88   : > { %s251_s23 = sshll.u32 %s8520_s21, 4  ;;  %s12597_s17 = sand.u32 1, %s8505_s26   ;;  %s252_s23 = int_to_ptr.vmem [resolvable:$true] %s251_s23 }
  0x89   : > { %7447 = dma.hbm_to_vmem [thread:$0]  (!%p12596_p8), %s12368_s0, 16384, %s227_s1, [#allocation5], %s8518_s3, %s8518_s3, %s8519_s6  }
  0x8a   : > { %s6753_s18 = sshll.u32 %s12597_s17, 2  ;;  %s8341_s11 = scalar_lea.hbm %s12370_s2, 64 }
  0x8b   : > { %p8342_p6 = scmp.ne.s32.totalorder %s12370_s2, %s8341_s11  ;;  %p8348_p11 = scmp.lt.u32.totalorder %s8341_s11, %s12370_s2 }
  0x8d   : > { %p8344_p2 = pnand %p8342_p6, %p12595_p10 }
  0x8f   : > { %p8345_p9 = pneg %p8344_p2 }
  0x91   : > { %p8350_p1 = pnand %p8348_p11, %p8345_p9 }
  0x93   : > { %8353 = shalt.err (!%p8350_p1)
}
  0x94   : > { %s8354_s1 = scalar_lea.vmem %s252_s23, 64  ;;  %p8362_p0 = scmp.lt.s32.totalorder %s252_s23, %s252_s23 }
  0x95   : > { %p8355_p4 = scmp.ne.s32.totalorder %s252_s23, %s8354_s1  ;;  %p8363_p3 = scmp.lt.s32.totalorder %s8354_s1, %s8354_s1 }
  0x97   : > { %p8357_p5 = pnand %p8355_p4, %p12595_p10  ;;  %p8364_p7 = por %p8363_p3, %p8362_p0 }
  0x99   : > { %p8358_p12 = pneg %p8357_p5 }
  0x9b   : > { %p8365_p13 = pnand %p8364_p7, %p8358_p12 }
  0x9d   : > { %8368 = shalt.err (!%p8365_p13)
}
  0x9e   : > { %7453 = dma.hbm_to_vmem [thread:$0]  (!%p12596_p8), %s12370_s2, 64, %s252_s23, [#allocation8]  }
  0x9f   : > { %s7031_s7 = sshll.u32 %s8509_s27, 6  ;;  %s298_s29 = scalar_lea.vmem [#allocation12], %s6753_s18 }
  0xa0   : > { %s306_s3 = sshll.u32 %s298_s29, 4  ;;  %s304_s13 = scalar_lea.hbm %s12372_s4, %s7031_s7  ;;  %s307_s3 = int_to_ptr.vmem [resolvable:$true] %s306_s3 }
  0xa1   : > { %s8369_s8 = scalar_lea.hbm %s304_s13, 64  ;;  %p12598_p6 = scmp.ne.s32.totalorder %s12594_s24, 0 }
  0xa2   : > { %p8370_p10 = scmp.ne.s32.totalorder %s304_s13, %s8369_s8  ;;  %s8374_s17 = scalar_lea.hbm %s12372_s4, 256 }
  0xa3   : > { %p8375_p8 = scmp.lt.u32.totalorder %s304_s13, %s12372_s4  ;;  %p8376_p9 = scmp.lt.u32.totalorder %s8374_s17, %s8369_s8 }
  0xa4   : > { %p8372_p13 = pnand %p8370_p10, %p12598_p6  ;;  %p8378_p1 = scmp.lt.u32.totalorder %s8369_s8, %s304_s13 }
  0xa5   : > { %p8377_p11 = por %p8376_p9, %p8375_p8 }
  0xa6   : > { %p8373_p2 = pneg %p8372_p13 }
  0xa7   : > { %p8379_p4 = por %p8378_p1, %p8377_p11 }
  0xa9   : > { %p8380_p5 = pnand %p8379_p4, %p8373_p2 }
  0xab   : > { %8383 = shalt.err (!%p8380_p5)
}
  0xac   : > { %s8384_s23 = scalar_lea.vmem %s307_s3, 64  ;;  %s8521_s18 = smov [#allocation12]  }
  0xad   : > { %p8385_p12 = scmp.ne.s32.totalorder %s307_s3, %s8384_s23  ;;  %s8389_s11 = sshll.u32 %s8521_s18, 4  ;;  %s8390_s11 = int_to_ptr.vmem [resolvable:$false] %s8389_s11 }
  0xae   : > { %s8391_s1 = scalar_lea.vmem %s8390_s11, 128  ;;  %p8392_p7 = scmp.lt.s32.totalorder %s307_s3, %s8390_s11 }
  0xaf   : > { %p8387_p0 = pnand %p8385_p12, %p12598_p6  ;;  %p8393_p10 = scmp.lt.s32.totalorder %s8391_s1, %s8384_s23 }
  0xb1   : > { %p8388_p3 = pneg %p8387_p0  ;;  %p8394_p13 = por %p8393_p10, %p8392_p7 }
  0xb3   : > { %p8395_p8 = pnand %p8394_p13, %p8388_p3 }
  0xb5   : > { %8398 = shalt.err (!%p8395_p8)
}
  0xb6   : > { %p12599_p9 = scmp.ne.s32.totalorder %s12593_s9, 0  ;;  %s7033_s19 = sshll.u32 %s8509_s27, 14 }
  0xb7   : > { %s317_s14 = scalar_lea.vmem [#allocation13], %s8680_s16  ;;  %s8789_s20 = scalar_lea.hbm %s12373_s5, %s7033_s19 }
  0xb8   : > { %7463 = dma.hbm_to_vmem [thread:$0]  (!%p12599_p9), %s304_s13, 64, %s307_s3, %s8697_s22  }
  0xb9   : > { %s325_s7 = sshll.u32 %s317_s14, 4  ;;  %s12600_s8 = sand.u32 1, %s8509_s27   ;;  %s8791_s7 = int_to_ptr.vmem [resolvable:$true] %s325_s7 }
  0xba   : > { %s8795_s12 = scalar_lea.sflag [#allocation14], %s12600_s8  ;;  %s8399_s21 = scalar_lea.hbm %s8789_s20, 16384 }
  0xbb   : > { %p8400_p2 = scmp.ne.s32.totalorder %s8789_s20, %s8399_s21  ;;  %s8404_s3 = scalar_lea.hbm %s12373_s5, 65536 }
  0xbc   : > { %p8405_p4 = scmp.lt.u32.totalorder %s8789_s20, %s12373_s5  ;;  %p8406_p5 = scmp.lt.u32.totalorder %s8404_s3, %s8399_s21 }
  0xbd   : > { %p8402_p11 = pnand %p8400_p2, %p12598_p6  ;;  %p8408_p0 = scmp.lt.u32.totalorder %s8399_s21, %s8789_s20 }
  0xbe   : > { %p8407_p12 = por %p8406_p5, %p8405_p4 }
  0xbf   : > { %p8403_p1 = pneg %p8402_p11 }
  0xc0   : > { %p8409_p3 = por %p8408_p0, %p8407_p12 }
  0xc2   : > { %p8410_p7 = pnand %p8409_p3, %p8403_p1 }
  0xc4   : > { %8413 = shalt.err (!%p8410_p7)
}
  0xc5   : > { %s8414_s27 = scalar_lea.vmem %s8791_s7, 16384  ;;  %s8522_s10 = smov [#allocation13]  }
  0xc6   : > { %p8415_p10 = scmp.ne.s32.totalorder %s8791_s7, %s8414_s27  ;;  %s8419_s15 = sshll.u32 %s8522_s10, 4  ;;  %s8420_s15 = int_to_ptr.vmem [resolvable:$false] %s8419_s15 }
  0xc7   : > { %s8421_s23 = scalar_lea.vmem %s8420_s15, 32768  ;;  %p8422_p2 = scmp.lt.s32.totalorder %s8791_s7, %s8420_s15 }
  0xc8   : > { %p8417_p13 = pnand %p8415_p10, %p12598_p6  ;;  %p8423_p11 = scmp.lt.s32.totalorder %s8421_s23, %s8414_s27 }
  0xca   : > { %p8418_p8 = pneg %p8417_p13  ;;  %p8424_p4 = por %p8423_p11, %p8422_p2 }
  0xcc   : > { %p8425_p5 = pnand %p8424_p4, %p8418_p8 }
  0xce   : > { %8428 = shalt.err (!%p8425_p5)
}
  0xcf   : > { %s12601_s18 = smov 16   ;;  %s12602_s11 = smov 256  }
  0xd0   : > { %7466 = dma.hbm_to_vmem [thread:$0]  (!%p12599_p9), %s8789_s20, 16384, %s8791_s7, %s8795_s12, %s12602_s11, %s12602_s11, %s12601_s18  }
  0xd1   : > { %p12603_p6 = scmp.ne.s32.totalorder %s12585_s30, 0 }
  0xd3   : > { %337 = sbr.rel (%p12603_p6) target bundleno = 1822 (0x71e), region = 48 }
  0xda   : > { %p12604_p1 = scmp.eq.s32.totalorder %s8586_s28, 0 }
  0xdc   : > { %8472 = dma.done.wait (%p12604_p1), [#allocation5], 16384   ;;  %p12605_p12 = pmov %p12604_p1 }
  0xdd   : > { %p12606_p0 = pmov %p12604_p1 }
  0xde   : > { %8474 = vsyncadd (%p12605_p12), [#allocation5], 4294950912 }
  0xdf   : > { %8476 = dma.done.wait (%p12606_p0), [#allocation8], 128   ;;  %p12607_p3 = pmov %p12606_p0 }
  0xe0   : > { %s12608_s9 = sld [smem:[#allocation23_spill]]  ;;  %s351_s24 = sand.u32 1, %s8586_s28  }
  0xe1   : > { %8478 = vsyncadd (%p12607_p3), [#allocation8], 4294967168  ;;  %s353_s1 = sand.u32 1, %s8501_s25   ;;  %s352_s30 = scalar_lea.sflag [#allocation11], %s351_s24 }
  0xe2   : > { %s6764_s19 = sshll.u32 %s353_s1, 10 }
  0xe3   : > { %s8834_s14 = scalar_lea.vmem [#allocation10], %s6764_s19 }
  0xe6   : > { %p12609_p9 = scmp.ne.s32.totalorder %s12608_s9, 0 }
  0xe8   : > { %8480 = dma.done.wait (%p12609_p9), %s352_s30, 16448  }
  0xe9   : > { %8482 = vsyncadd (%p12609_p9), %s352_s30, 4294950848  ;;  %s8840_s7 = sshll.u32 %s353_s1, 2  ;;  %s370_s6 = scalar_lea.sflag [#allocation14], %s351_s24 }
  0xea   : > { %s364_s29 = scalar_lea.vmem [#allocation12], %s8840_s7  ;;  %s8843_s20 = scalar_lea.vmem [#allocation13], %s6764_s19 }
  0xeb   : > { %8484 = dma.done.wait (%p12609_p9), %s370_s6, 16384  }
  0xec   : > { %8486 = vsyncadd (%p12609_p9), %s370_s6, 4294950912  ;;  %p12610_p7 = pmov %p12606_p0 }
  0xed   : > { %p12611_p10 = pmov %p12606_p0 }
  0xee   : > { %8488 = dma.done.wait (%p12610_p7), [#allocation14], 64  }
  0xef   : > { %8490 = vsyncadd (%p12611_p10), [#allocation14], 4294967232  ;;  %p12612_p13 = scmp.ne.s32.totalorder %s8586_s28, 0 }
  0xf1   : > { %419 = sbr.rel (%p12612_p13) target bundleno = 760 (0x2f8), region = 80 }
  0xf8   : > { %v8855_v0 = vld [vmem:[#allocation4 + $0x40] sm:$0xff]  ;;  %v8857_v1 = vld [vmem:[#allocation4 + $0x48] sm:$0xff]  ;;  %v8859_v2 = vld [vmem:[#allocation4 + $0x50] sm:$0xff] }
  0xf9   : > { %v558_v3 = vadd.f32 %v8857_v1, %v8855_v0  ;;  %v8863_v4 = vld [vmem:[#allocation4] sm:$0xff]  ;;  %v8865_v5 = vld [vmem:[#allocation4 + $0x8] sm:$0xff]  ;;  %v8867_v6 = vld [vmem:[#allocation4 + $0x58] sm:$0xff] }
  0xfa   : > { %v8869_v7 = vld [vmem:[#allocation4 + $0x10] sm:$0xff]  ;;  %v548_v8 = vadd.f32 %v8865_v5, %v8863_v4  ;;  %v8873_v9 = vld [vmem:[#allocation4 + $0x60] sm:$0xff]  ;;  %v8876_v11 = vld [vmem:[#allocation4 + $0x18] sm:$0xff] }
  0xfb   : > { %v559_v10 = vadd.f32 %v558_v3, %v8859_v2  ;;  %v8878_v12 = vld [vmem:[#allocation4 + $0x68] sm:$0xff]  ;;  %v8880_v13 = vld [vmem:[#allocation4 + $0x70] sm:$0xff]  ;;  %v8885_v16 = vld [vmem:[#allocation4 + $0x20] sm:$0xff] }
  0xfc   : > { %v549_v14 = vadd.f32 %v548_v8, %v8869_v7  ;;  %v563_v15 = vadd.f32 %v8878_v12, %v8873_v9  ;;  %v8887_v17 = vld [vmem:[#allocation4 + $0x28] sm:$0xff]  ;;  %v8889_v18 = vld [vmem:[#allocation4 + $0x30] sm:$0xff]  ;;  %v8892_v20 = vld [vmem:[#allocation4 + $0x78] sm:$0xff] }
  0xfd   : > { %v560_v19 = vadd.f32 %v559_v10, %v8867_v6  ;;  %v553_v21 = vadd.f32 %v8887_v17, %v8885_v16  ;;  %v8896_v22 = vld [vmem:[#allocation4 + $0xa0] sm:$0xff]  ;;  %v8898_v23 = vld [vmem:[#allocation4 + $0xa8] sm:$0xff]  ;;  %v8902_v26 = vld [vmem:[#allocation4 + $0x38] sm:$0xff] }
  0xfe   : > { %v550_v24 = vadd.f32 %v549_v14, %v8876_v11  ;;  %v564_v25 = vadd.f32 %v563_v15, %v8880_v13  ;;  %v8904_v27 = vld [vmem:[#allocation4 + $0xb0] sm:$0xff]  ;;  %v573_v28 = vadd.f32 %v8898_v23, %v8896_v22  ;;  %v8908_v29 = vld [vmem:[#allocation4 + $0x80] sm:$0xff]  ;;  %v8911_v31 = vld [vmem:[#allocation4 + $0xb8] sm:$0xff] }
  0xff   : > { %561 = vadd.xlane.f32.xlu1 %v560_v19  ;;  %v554_v30 = vadd.f32 %v553_v21, %v8889_v18  ;;  %v8913_v32 = vld [vmem:[#allocation4 + $0x88] sm:$0xff]  ;;  %v8915_v33 = vld [vmem:[#allocation4 + $0x90] sm:$0xff]  ;;  %v8921_v37 = vld [vmem:[#allocation4 + $0xe0] sm:$0xff] }
 0x100   : > { %551 = vadd.xlane.f32.xlu0 %v550_v24  ;;  %v565_v34 = vadd.f32 %v564_v25, %v8892_v20  ;;  %v574_v35 = vadd.f32 %v573_v28, %v8904_v27  ;;  %v568_v36 = vadd.f32 %v8913_v32, %v8908_v29  ;;  %v8923_v38 = vld [vmem:[#allocation4 + $0xe8] sm:$0xff]  ;;  %v8925_v39 = vld [vmem:[#allocation4 + $0xf0] sm:$0xff]  ;;  %v8928_v41 = vld [vmem:[#allocation4 + $0x98] sm:$0xff] }
 0x101   : > { %v555_v40 = vadd.f32 %v554_v30, %v8902_v26  ;;  %v583_v42 = vadd.f32 %v8923_v38, %v8921_v37  ;;  %v8932_v43 = vld [vmem:[#allocation4 + $0xc0] sm:$0xff]  ;;  %v8934_v44 = vld [vmem:[#allocation4 + $0xc8] sm:$0xff]  ;;  %v8937_v46 = vld [vmem:[#allocation4 + $0xd0] sm:$0xff] }
 0x102   : > { %v569_v45 = vadd.f32 %v568_v36, %v8915_v33  ;;  %v578_v47 = vadd.f32 %v8934_v44, %v8932_v43  ;;  %v8941_v48 = vld [vmem:[#allocation4 + $0x120] sm:$0xff]  ;;  %v575_v49 = vadd.f32 %v574_v35, %v8911_v31  ;;  %v8944_v50 = vld [vmem:[#allocation4 + $0xf8] sm:$0xff]  ;;  %v8949_v53 = vld [vmem:[#allocation4 + $0x128] sm:$0xff] }
 0x103   : > { %566 = vadd.xlane.f32.xlu1 %v565_v34  ;;  %12613 = vst [vmem:[#allocation26_spill] sm:$0xff] %v8944_v50  ;;  %v584_v51 = vadd.f32 %v583_v42, %v8925_v39  ;;  %v8947_v52 = vld [vmem:[#allocation4 + $0xd8] sm:$0xff]  ;;  %v8953_v56 = vld [vmem:[#allocation4 + $0x130] sm:$0xff]  ;;  %v593_v57 = vadd.f32 %v8949_v53, %v8941_v48  ;;  %v8957_v58 = vld [vmem:[#allocation4 + $0x100] sm:$0xff] }
 0x104   : > { %556 = vadd.xlane.f32.xlu0 %v555_v40  ;;  %v570_v54 = vadd.f32 %v569_v45, %v8928_v41  ;;  %v579_v55 = vadd.f32 %v578_v47, %v8937_v46  ;;  %12614 = vst [vmem:[#allocation27_spill] sm:$0xff] %v8953_v56  ;;  %v8959_v59 = vld [vmem:[#allocation4 + $0x108] sm:$0xff]  ;;  %v8961_v60 = vld [vmem:[#allocation4 + $0x110] sm:$0xff]  ;;  %v8965_v62 = vld [vmem:[#allocation4 + $0x160] sm:$0xff] }
 0x105   : > { %12615 = vst [vmem:[#allocation28_spill] sm:$0xff] %v8961_v60  ;;  %v588_v61 = vadd.f32 %v8959_v59, %v8957_v58  ;;  %v8967_v63 = vld [vmem:[#allocation4 + $0x168] sm:$0xff]  ;;  %v8969_v3 = vld [vmem:[#allocation4 + $0x140] sm:$0xff]  ;;  %v585_v8 = vadd.f32 %v584_v51, %v8944_v50  ;;  %v8972_v10 = vld [vmem:[#allocation4 + $0x138] sm:$0xff]  ;;  %v594_v14 = vadd.f32 %v593_v57, %v8953_v56 }
 0x106   : > { %12616 = vst [vmem:[#allocation29_spill] sm:$0xff] %v8972_v10  ;;  %v8975_v15 = vld [vmem:[#allocation4 + $0x118] sm:$0xff]  ;;  %v603_v19 = vadd.f32 %v8967_v63, %v8965_v62  ;;  %v8979_v21 = vld [vmem:[#allocation4 + $0x148] sm:$0xff]  ;;  %v580_v24 = vadd.f32 %v579_v55, %v8947_v52  ;;  %v8983_v28 = vld [vmem:[#allocation4 + $0x170] sm:$0xff] }
 0x107   : > { %576 = vadd.xlane.f32.xlu1 %v575_v49  ;;  %12617 = vst [vmem:[#allocation30_spill] sm:$0xff] %v8975_v15  ;;  %v589_v25 = vadd.f32 %v588_v61, %v8961_v60  ;;  %12618 = vst [vmem:[#allocation31_spill] sm:$0xff] %v8983_v28  ;;  %v598_v30 = vadd.f32 %v8979_v21, %v8969_v3  ;;  %v8987_v34 = vld [vmem:[#allocation4 + $0x1a0] sm:$0xff]  ;;  %v8989_v35 = vld [vmem:[#allocation4 + $0x1a8] sm:$0xff]  ;;  %v595_v45 = vadd.f32 %v594_v14, %v8972_v10 }
 0x108   : > { %571 = vadd.xlane.f32.xlu0 %v570_v54  ;;  %v8991_v36 = vld [vmem:[#allocation4 + $0x150] sm:$0xff]  ;;  %v8993_v40 = vld [vmem:[#allocation4 + $0x180] sm:$0xff]  ;;  %v8995_v42 = vld [vmem:[#allocation4 + $0x188] sm:$0xff]  ;;  %v604_v49 = vadd.f32 %v603_v19, %v8983_v28  ;;  %v613_v54 = vadd.f32 %v8989_v35, %v8987_v34 }
 0x109   : > { %12619 = vst [vmem:[#allocation32_spill] sm:$0xff] %v8991_v36  ;;  %12620 = vst [vmem:[#allocation33_spill] sm:$0xff] %v8993_v40  ;;  %v8998_v47 = vld [vmem:[#allocation4 + $0x178] sm:$0xff]  ;;  %v590_v55 = vadd.f32 %v589_v25, %v8975_v15  ;;  %v599_v57 = vadd.f32 %v598_v30, %v8991_v36  ;;  %v9007_v61 = vld [vmem:[#allocation4 + $0x1b0] sm:$0xff] }
 0x10a   : > { %12621 = vst [vmem:[#allocation34_spill] sm:$0xff] %v8995_v42  ;;  %12622 = vst [vmem:[#allocation35_spill] sm:$0xff] %v8998_v47  ;;  %v9001_v51 = vld [vmem:[#allocation4 + $0x158] sm:$0xff]  ;;  %v9011_v14 = vld [vmem:[#allocation4 + $0x1e0] sm:$0xff]  ;;  %v614_v30 = vadd.f32 %v613_v54, %v9007_v61 }
 0x10b   : > { %586 = vadd.xlane.f32.xlu1 %v585_v8  ;;  %12623 = vst [vmem:[#allocation36_spill] sm:$0xff] %v9001_v51  ;;  %12624 = vst [vmem:[#allocation37_spill] sm:$0xff] %v9007_v61  ;;  %v608_v8 = vadd.f32 %v8995_v42, %v8993_v40  ;;  %v9013_v10 = vld [vmem:[#allocation4 + $0x1e8] sm:$0xff]  ;;  %v9015_v19 = vld [vmem:[#allocation4 + $0x190] sm:$0xff]  ;;  %v600_v60 = vadd.f32 %v599_v57, %v9001_v51 }
 0x10c   : > { %581 = vadd.xlane.f32.xlu0 %v580_v24  ;;  %12625 = vst [vmem:[#allocation38_spill] sm:$0xff] %v9011_v14  ;;  %12626 = vst [vmem:[#allocation39_spill] sm:$0xff] %v9013_v10  ;;  %v9017_v28 = vld [vmem:[#allocation4 + $0x1c0] sm:$0xff]  ;;  %v9019_v56 = vld [vmem:[#allocation4 + $0x1c8] sm:$0xff]  ;;  %v605_v24 = vadd.f32 %v604_v49, %v8998_v47  ;;  %v623_v15 = vadd.f32 %v9013_v10, %v9011_v14 }
 0x10d   : > { %12627 = vst [vmem:[#allocation40_spill] sm:$0xff] %v9015_v19  ;;  %12628 = vst [vmem:[#allocation41_spill] sm:$0xff] %v9017_v28  ;;  %v9022_v25 = vld [vmem:[#allocation4 + $0x1b8] sm:$0xff]  ;;  %v609_v50 = vadd.f32 %v608_v8, %v9015_v19  ;;  %v9031_v42 = vld [vmem:[#allocation4 + $0x1f0] sm:$0xff] }
 0x10e   : > { %12629 = vst [vmem:[#allocation42_spill] sm:$0xff] %v9019_v56  ;;  %12630 = vst [vmem:[#allocation43_spill] sm:$0xff] %v9022_v25  ;;  %v9025_v36 = vld [vmem:[#allocation4 + $0x198] sm:$0xff]  ;;  %v9035_v49 = vld [vmem:[#allocation4 + $0x220] sm:$0xff]  ;;  %v624_v8 = vadd.f32 %v623_v15, %v9031_v42 }
 0x10f   : > { %596 = vadd.xlane.f32.xlu1 %v595_v45  ;;  %12631 = vst [vmem:[#allocation44_spill] sm:$0xff] %v9025_v36  ;;  %12632 = vst [vmem:[#allocation45_spill] sm:$0xff] %v9031_v42  ;;  %v618_v45 = vadd.f32 %v9019_v56, %v9017_v28  ;;  %v9037_v47 = vld [vmem:[#allocation4 + $0x228] sm:$0xff]  ;;  %v9039_v54 = vld [vmem:[#allocation4 + $0x1d0] sm:$0xff]  ;;  %v610_v56 = vadd.f32 %v609_v50, %v9025_v36 }
 0x110   : > { %591 = vadd.xlane.f32.xlu0 %v590_v55  ;;  %12633 = vst [vmem:[#allocation46_spill] sm:$0xff] %v9035_v49  ;;  %12634 = vst [vmem:[#allocation47_spill] sm:$0xff] %v9037_v47  ;;  %v9041_v61 = vld [vmem:[#allocation4 + $0x200] sm:$0xff]  ;;  %v9043_v40 = vld [vmem:[#allocation4 + $0x208] sm:$0xff]  ;;  %v615_v55 = vadd.f32 %v614_v30, %v9022_v25  ;;  %v633_v51 = vadd.f32 %v9037_v47, %v9035_v49 }
 0x111   : > { %12635 = vst [vmem:[#allocation48_spill] sm:$0xff] %v9039_v54  ;;  %12636 = vst [vmem:[#allocation49_spill] sm:$0xff] %v9041_v61  ;;  %v9046_v57 = vld [vmem:[#allocation4 + $0x1f8] sm:$0xff]  ;;  %v619_v28 = vadd.f32 %v618_v45, %v9039_v54  ;;  %v9055_v10 = vld [vmem:[#allocation4 + $0x230] sm:$0xff] }
 0x112   : > { %12637 = vst [vmem:[#allocation50_spill] sm:$0xff] %v9043_v40  ;;  %12638 = vst [vmem:[#allocation51_spill] sm:$0xff] %v9046_v57  ;;  %v9049_v19 = vld [vmem:[#allocation4 + $0x1d8] sm:$0xff]  ;;  %v9059_v30 = vld [vmem:[#allocation4 + $0x260] sm:$0xff]  ;;  %v625_v50 = vadd.f32 %v624_v8, %v9046_v57  ;;  %v634_v45 = vadd.f32 %v633_v51, %v9055_v10 }
 0x113   : > { %606 = vadd.xlane.f32.xlu1 %v605_v24  ;;  %12639 = vst [vmem:[#allocation52_spill] sm:$0xff] %v9049_v19  ;;  %12640 = vst [vmem:[#allocation53_spill] sm:$0xff] %v9055_v10  ;;  %v628_v24 = vadd.f32 %v9043_v40, %v9041_v61  ;;  %v9061_v25 = vld [vmem:[#allocation4 + $0x268] sm:$0xff]  ;;  %v9063_v15 = vld [vmem:[#allocation4 + $0x210] sm:$0xff]  ;;  %v620_v40 = vadd.f32 %v619_v28, %v9049_v19 }
 0x114   : > { %601 = vadd.xlane.f32.xlu0 %v600_v60  ;;  %12641 = vst [vmem:[#allocation54_spill] sm:$0xff] %v9059_v30  ;;  %12642 = vst [vmem:[#allocation55_spill] sm:$0xff] %v9061_v25  ;;  %v9065_v42 = vld [vmem:[#allocation4 + $0x240] sm:$0xff]  ;;  %v9067_v14 = vld [vmem:[#allocation4 + $0x248] sm:$0xff]  ;;  %v643_v36 = vadd.f32 %v9061_v25, %v9059_v30 }
 0x115   : > { %12643 = vst [vmem:[#allocation56_spill] sm:$0xff] %v9063_v15  ;;  %12644 = vst [vmem:[#allocation57_spill] sm:$0xff] %v9065_v42  ;;  %v9070_v60 = vld [vmem:[#allocation4 + $0x238] sm:$0xff]  ;;  %v629_v61 = vadd.f32 %v628_v24, %v9063_v15  ;;  %v9079_v47 = vld [vmem:[#allocation4 + $0x270] sm:$0xff] }
 0x116   : > { %12645 = vst [vmem:[#allocation58_spill] sm:$0xff] %v9067_v14  ;;  %12646 = vst [vmem:[#allocation59_spill] sm:$0xff] %v9070_v60  ;;  %v9073_v54 = vld [vmem:[#allocation4 + $0x218] sm:$0xff]  ;;  %v9083_v8 = vld [vmem:[#allocation4 + $0x2a0] sm:$0xff]  ;;  %v644_v24 = vadd.f32 %v643_v36, %v9079_v47 }
 0x117   : > { %616 = vadd.xlane.f32.xlu1 %v615_v55  ;;  %12647 = vst [vmem:[#allocation60_spill] sm:$0xff] %v9073_v54  ;;  %12648 = vst [vmem:[#allocation61_spill] sm:$0xff] %v9079_v47  ;;  %v638_v55 = vadd.f32 %v9067_v14, %v9065_v42  ;;  %v9085_v57 = vld [vmem:[#allocation4 + $0x2a8] sm:$0xff]  ;;  %v9087_v51 = vld [vmem:[#allocation4 + $0x250] sm:$0xff]  ;;  %v630_v14 = vadd.f32 %v629_v61, %v9073_v54 }
 0x118   : > { %611 = vadd.xlane.f32.xlu0 %v610_v56  ;;  %12649 = vst [vmem:[#allocation62_spill] sm:$0xff] %v9083_v8  ;;  %12650 = vst [vmem:[#allocation63_spill] sm:$0xff] %v9085_v57  ;;  %v9089_v10 = vld [vmem:[#allocation4 + $0x280] sm:$0xff]  ;;  %v9091_v49 = vld [vmem:[#allocation4 + $0x288] sm:$0xff]  ;;  %v635_v56 = vadd.f32 %v634_v45, %v9070_v60  ;;  %v653_v19 = vadd.f32 %v9085_v57, %v9083_v8 }
 0x119   : > { %12651 = vst [vmem:[#allocation64_spill] sm:$0xff] %v9087_v51  ;;  %12652 = vst [vmem:[#allocation65_spill] sm:$0xff] %v9089_v10  ;;  %v9094_v28 = vld [vmem:[#allocation4 + $0x278] sm:$0xff]  ;;  %v639_v42 = vadd.f32 %v638_v55, %v9087_v51  ;;  %v9103_v25 = vld [vmem:[#allocation4 + $0x2b0] sm:$0xff] }
 0x11a   : > { %12653 = vst [vmem:[#allocation66_spill] sm:$0xff] %v9091_v49  ;;  %12654 = vst [vmem:[#allocation67_spill] sm:$0xff] %v9094_v28  ;;  %v9097_v15 = vld [vmem:[#allocation4 + $0x258] sm:$0xff]  ;;  %v9107_v45 = vld [vmem:[#allocation4 + $0x2e0] sm:$0xff]  ;;  %v654_v55 = vadd.f32 %v653_v19, %v9103_v25 }
 0x11b   : > { %626 = vadd.xlane.f32.xlu1 %v625_v50  ;;  %12655 = vst [vmem:[#allocation68_spill] sm:$0xff] %v9097_v15  ;;  %12656 = vst [vmem:[#allocation69_spill] sm:$0xff] %v9103_v25  ;;  %v648_v50 = vadd.f32 %v9091_v49, %v9089_v10  ;;  %v9109_v60 = vld [vmem:[#allocation4 + $0x2e8] sm:$0xff]  ;;  %v9111_v36 = vld [vmem:[#allocation4 + $0x290] sm:$0xff]  ;;  %v640_v49 = vadd.f32 %v639_v42, %v9097_v15 }
 0x11c   : > { %621 = vadd.xlane.f32.xlu0 %v620_v40  ;;  %12657 = vst [vmem:[#allocation70_spill] sm:$0xff] %v9107_v45  ;;  %12658 = vst [vmem:[#allocation71_spill] sm:$0xff] %v9109_v60  ;;  %v9113_v47 = vld [vmem:[#allocation4 + $0x2c0] sm:$0xff]  ;;  %v9115_v30 = vld [vmem:[#allocation4 + $0x2c8] sm:$0xff]  ;;  %v645_v40 = vadd.f32 %v644_v24, %v9094_v28  ;;  %v663_v54 = vadd.f32 %v9109_v60, %v9107_v45 }
 0x11d   : > { %12659 = vst [vmem:[#allocation72_spill] sm:$0xff] %v9111_v36  ;;  %12660 = vst [vmem:[#allocation73_spill] sm:$0xff] %v9113_v47  ;;  %v9118_v61 = vld [vmem:[#allocation4 + $0x2b8] sm:$0xff]  ;;  %v649_v10 = vadd.f32 %v648_v50, %v9111_v36  ;;  %v9127_v57 = vld [vmem:[#allocation4 + $0x2f0] sm:$0xff] }
 0x11e   : > { %12661 = vst [vmem:[#allocation74_spill] sm:$0xff] %v9115_v30  ;;  %12662 = vst [vmem:[#allocation75_spill] sm:$0xff] %v9118_v61  ;;  %v9121_v51 = vld [vmem:[#allocation4 + $0x298] sm:$0xff]  ;;  %v9131_v24 = vld [vmem:[#allocation4 + $0x320] sm:$0xff]  ;;  %v655_v42 = vadd.f32 %v654_v55, %v9118_v61  ;;  %v664_v50 = vadd.f32 %v663_v54, %v9127_v57 }
 0x11f   : > { %636 = vadd.xlane.f32.xlu1 %v635_v56  ;;  %12663 = vst [vmem:[#allocation76_spill] sm:$0xff] %v9121_v51  ;;  %12664 = vst [vmem:[#allocation77_spill] sm:$0xff] %v9127_v57  ;;  %v658_v56 = vadd.f32 %v9115_v30, %v9113_v47  ;;  %v9133_v28 = vld [vmem:[#allocation4 + $0x328] sm:$0xff]  ;;  %v9135_v19 = vld [vmem:[#allocation4 + $0x2d0] sm:$0xff]  ;;  %v650_v30 = vadd.f32 %v649_v10, %v9121_v51 }
 0x120   : > { %631 = vadd.xlane.f32.xlu0 %v630_v14  ;;  %12665 = vst [vmem:[#allocation78_spill] sm:$0xff] %v9131_v24  ;;  %12666 = vst [vmem:[#allocation79_spill] sm:$0xff] %v9133_v28  ;;  %v9137_v25 = vld [vmem:[#allocation4 + $0x300] sm:$0xff]  ;;  %v9139_v8 = vld [vmem:[#allocation4 + $0x308] sm:$0xff]  ;;  %v673_v15 = vadd.f32 %v9133_v28, %v9131_v24 }
 0x121   : > { %12667 = vst [vmem:[#allocation80_spill] sm:$0xff] %v9135_v19  ;;  %12668 = vst [vmem:[#allocation81_spill] sm:$0xff] %v9137_v25  ;;  %v9142_v14 = vld [vmem:[#allocation4 + $0x2f8] sm:$0xff]  ;;  %v659_v47 = vadd.f32 %v658_v56, %v9135_v19  ;;  %v9151_v60 = vld [vmem:[#allocation4 + $0x330] sm:$0xff] }
 0x122   : > { %12669 = vst [vmem:[#allocation82_spill] sm:$0xff] %v9139_v8  ;;  %12670 = vst [vmem:[#allocation83_spill] sm:$0xff] %v9142_v14  ;;  %v9145_v36 = vld [vmem:[#allocation4 + $0x2d8] sm:$0xff]  ;;  %v9155_v55 = vld [vmem:[#allocation4 + $0x360] sm:$0xff]  ;;  %v665_v10 = vadd.f32 %v664_v50, %v9142_v14  ;;  %v674_v56 = vadd.f32 %v673_v15, %v9151_v60 }
 0x123   : > { %646 = vadd.xlane.f32.xlu1 %v645_v40  ;;  %12671 = vst [vmem:[#allocation84_spill] sm:$0xff] %v9145_v36  ;;  %12672 = vst [vmem:[#allocation85_spill] sm:$0xff] %v9151_v60  ;;  %v668_v40 = vadd.f32 %v9139_v8, %v9137_v25  ;;  %v9157_v61 = vld [vmem:[#allocation4 + $0x368] sm:$0xff]  ;;  %v9159_v54 = vld [vmem:[#allocation4 + $0x310] sm:$0xff]  ;;  %v660_v8 = vadd.f32 %v659_v47, %v9145_v36 }
 0x124   : > { %641 = vadd.xlane.f32.xlu0 %v640_v49  ;;  %12673 = vst [vmem:[#allocation86_spill] sm:$0xff] %v9155_v55  ;;  %12674 = vst [vmem:[#allocation87_spill] sm:$0xff] %v9157_v61  ;;  %v9161_v57 = vld [vmem:[#allocation4 + $0x340] sm:$0xff]  ;;  %v9163_v45 = vld [vmem:[#allocation4 + $0x348] sm:$0xff]  ;;  %v683_v51 = vadd.f32 %v9157_v61, %v9155_v55 }
 0x125   : > { %12675 = vst [vmem:[#allocation88_spill] sm:$0xff] %v9159_v54  ;;  %12676 = vst [vmem:[#allocation89_spill] sm:$0xff] %v9161_v57  ;;  %v9166_v49 = vld [vmem:[#allocation4 + $0x338] sm:$0xff]  ;;  %v669_v25 = vadd.f32 %v668_v40, %v9159_v54  ;;  %v9175_v28 = vld [vmem:[#allocation4 + $0x370] sm:$0xff] }
 0x126   : > { %12677 = vst [vmem:[#allocation90_spill] sm:$0xff] %v9163_v45  ;;  %12678 = vst [vmem:[#allocation91_spill] sm:$0xff] %v9166_v49  ;;  %v9169_v19 = vld [vmem:[#allocation4 + $0x318] sm:$0xff]  ;;  %v9179_v50 = vld [vmem:[#allocation4 + $0x3a0] sm:$0xff]  ;;  %v675_v47 = vadd.f32 %v674_v56, %v9166_v49  ;;  %v684_v40 = vadd.f32 %v683_v51, %v9175_v28 }
 0x127   : > { %656 = vadd.xlane.f32.xlu1 %v655_v42  ;;  %12679 = vst [vmem:[#allocation92_spill] sm:$0xff] %v9169_v19  ;;  %12680 = vst [vmem:[#allocation93_spill] sm:$0xff] %v9175_v28  ;;  %v678_v42 = vadd.f32 %v9163_v45, %v9161_v57  ;;  %v9181_v14 = vld [vmem:[#allocation4 + $0x3a8] sm:$0xff]  ;;  %v9183_v15 = vld [vmem:[#allocation4 + $0x350] sm:$0xff]  ;;  %v670_v45 = vadd.f32 %v669_v25, %v9169_v19 }
 0x128   : > { %651 = vadd.xlane.f32.xlu0 %v650_v30  ;;  %12681 = vst [vmem:[#allocation94_spill] sm:$0xff] %v9181_v14  ;;  %12682 = vst [vmem:[#allocation95_spill] sm:$0xff] %v9183_v15  ;;  %v9185_v60 = vld [vmem:[#allocation4 + $0x380] sm:$0xff]  ;;  %v9187_v24 = vld [vmem:[#allocation4 + $0x388] sm:$0xff]  ;;  %v693_v36 = vadd.f32 %v9181_v14, %v9179_v50 }
 0x129   : > { %12683 = vst [vmem:[#allocation96_spill] sm:$0xff] %v9185_v60  ;;  %12684 = vst [vmem:[#allocation97_spill] sm:$0xff] %v9187_v24  ;;  %v9190_v30 = vld [vmem:[#allocation4 + $0x378] sm:$0xff]  ;;  %v679_v57 = vadd.f32 %v678_v42, %v9183_v15  ;;  %v9199_v61 = vld [vmem:[#allocation4 + $0x3b0] sm:$0xff] }
 0x12a   : > { %12685 = vst [vmem:[#allocation98_spill] sm:$0xff] %v9190_v30  ;;  %v9193_v54 = vld [vmem:[#allocation4 + $0x358] sm:$0xff]  ;;  %12687 = vst [vmem:[#allocation100_spill] sm:$0xff] %v9199_v61  ;;  %v9203_v56 = vld [vmem:[#allocation4 + $0x3e0] sm:$0xff]  ;;  %v685_v25 = vadd.f32 %v684_v40, %v9190_v30 }
 0x12b   : > { %666 = vadd.xlane.f32.xlu1 %v665_v10  ;;  %12686 = vst [vmem:[#allocation99_spill] sm:$0xff] %v9193_v54  ;;  %v688_v10 = vadd.f32 %v9187_v24, %v9185_v60  ;;  %v9205_v49 = vld [vmem:[#allocation4 + $0x3e8] sm:$0xff]  ;;  %v9207_v51 = vld [vmem:[#allocation4 + $0x390] sm:$0xff]  ;;  %v9209_v28 = vld [vmem:[#allocation4 + $0x3c0] sm:$0xff]  ;;  %v680_v15 = vadd.f32 %v679_v57, %v9193_v54 }
 0x12c   : > { %661 = vadd.xlane.f32.xlu0 %v660_v8  ;;  %12688 = vst [vmem:[#allocation101_spill] sm:$0xff] %v9207_v51  ;;  %v9211_v55 = vld [vmem:[#allocation4 + $0x3c8] sm:$0xff]  ;;  %v694_v8 = vadd.f32 %v693_v36, %v9199_v61  ;;  %v703_v42 = vadd.f32 %v9205_v49, %v9203_v56  ;;  %v9218_v19 = vld [vmem:[#allocation4 + $0x3b8] sm:$0xff]  ;;  %v9221_v60 = vld [vmem:[#allocation4 + $0x3f0] sm:$0xff] }
 0x12d   : > { %v689_v24 = vadd.f32 %v688_v10, %v9207_v51  ;;  %12689 = vst [vmem:[#allocation102_spill] sm:$0xff] %v9221_v60  ;;  %v698_v14 = vadd.f32 %v9211_v55, %v9209_v28  ;;  %v9227_v40 = vld [vmem:[#allocation4 + $0x3d0] sm:$0xff]  ;;  %v9232_v61 = vld [vmem:[#allocation4 + $0x3f8] sm:$0xff] }
 0x12e   : > { %v695_v36 = vadd.f32 %v694_v8, %v9218_v19  ;;  %12690 = vst [vmem:[#allocation103_spill] sm:$0xff] %v9232_v61  ;;  %v9235_v51 = vld [vmem:[#allocation4 + $0x3d8] sm:$0xff] }
 0x12f   : > { %676 = vadd.xlane.f32.xlu1 %v675_v47  ;;  %v9225_v47 = vld [vmem:[#allocation4 + $0x398] sm:$0xff]  ;;  %v699_v10 = vadd.f32 %v698_v14, %v9227_v40 }
 0x130   : > { %671 = vadd.xlane.f32.xlu0 %v670_v45  ;;  %v704_v45 = vadd.f32 %v703_v42, %v9221_v60  ;;  %v690_v57 = vadd.f32 %v689_v24, %v9225_v47 }
 0x131   : > { %v700_v54 = vadd.f32 %v699_v10, %v9235_v51 }
 0x132   : > { %v705_v30 = vadd.f32 %v704_v45, %v9232_v61 }
 0x133   : > { %686 = vadd.xlane.f32.xlu1 %v685_v25 }
 0x134   : > { %681 = vadd.xlane.f32.xlu0 %v680_v15 }
 0x137   : > { %696 = vadd.xlane.f32.xlu1 %v695_v36 }
 0x138   : > { %691 = vadd.xlane.f32.xlu0 %v690_v57 }
 0x13b   : > { %706 = vadd.xlane.f32.xlu1 %v705_v30 }
 0x13c   : > { %701 = vadd.xlane.f32.xlu0 %v700_v54 }
 0x18c   : > { %v562_v25 = vpop.xlane.xlu1 %561 }
 0x18d   : > { %v711_v8 = vmul.f32 0.001953125, %v562_v25  ;;  %v552_v42 = vpop.xlane.xlu0 %551 }
 0x18e   : > { %v709_v15 = vmul.f32 0.001953125, %v552_v42 }
 0x18f   : > { %v9240_v24 = vsub.f32 %v8855_v0, %v711_v8  ;;  %v9243_v60 = vsub.f32 %v8857_v1, %v711_v8  ;;  %v9246_v14 = vsub.f32 %v8859_v2, %v711_v8  ;;  %v9249_v36 = vsub.f32 %v8867_v6, %v711_v8 }
 0x190   : > { %v9252_v45 = vsub.f32 %v8863_v4, %v709_v15  ;;  %v9255_v54 = vsub.f32 %v8865_v5, %v709_v15  ;;  %v567_v30 = vpop.xlane.xlu1 %566  ;;  %v9258_v57 = vsub.f32 %v8869_v7, %v709_v15  ;;  %v9261_v0 = vsub.f32 %v8876_v11, %v709_v15 }
 0x191   : > { %12691 = vst [vmem:[#allocation104_spill] sm:$0xff] %v9240_v24  ;;  %12692 = vst [vmem:[#allocation105_spill] sm:$0xff] %v9243_v60  ;;  %v712_v1 = vmul.f32 0.001953125, %v567_v30  ;;  %v557_v10 = vpop.xlane.xlu0 %556  ;;  %v877_v2 = vmul.f32 %v9240_v24, %v9240_v24  ;;  %v878_v6 = vmul.f32 %v9243_v60, %v9243_v60  ;;  %v879_v4 = vmul.f32 %v9246_v14, %v9246_v14 }
 0x192   : > { %12693 = vst [vmem:[#allocation106_spill] sm:$0xff] %v9246_v14  ;;  %12694 = vst [vmem:[#allocation107_spill] sm:$0xff] %v9249_v36  ;;  %v710_v5 = vmul.f32 0.001953125, %v557_v10  ;;  %v869_v25 = vmul.f32 %v9252_v45, %v9252_v45  ;;  %v870_v7 = vmul.f32 %v9255_v54, %v9255_v54  ;;  %v871_v11 = vmul.f32 %v9258_v57, %v9258_v57 }
 0x193   : > { %12695 = vst [vmem:[#allocation108_spill] sm:$0xff] %v9252_v45  ;;  %12696 = vst [vmem:[#allocation109_spill] sm:$0xff] %v9255_v54  ;;  %v9276_v8 = vsub.f32 %v8873_v9, %v712_v1  ;;  %v9279_v42 = vsub.f32 %v8878_v12, %v712_v1  ;;  %v872_v15 = vmul.f32 %v9261_v0, %v9261_v0 }
 0x194   : > { %12697 = vst [vmem:[#allocation110_spill] sm:$0xff] %v9258_v57  ;;  %12698 = vst [vmem:[#allocation111_spill] sm:$0xff] %v9261_v0  ;;  %v880_v30 = vmul.f32 %v9249_v36, %v9249_v36  ;;  %v9286_v10 = vsub.f32 %v8885_v16, %v710_v5  ;;  %v9289_v14 = vsub.f32 %v8887_v17, %v710_v5  ;;  %v577_v60 = vpop.xlane.xlu1 %576 }
 0x195   : > { %v997_v24 = vadd.f32 %v870_v7, %v869_v25  ;;  %v1007_v57 = vadd.f32 %v878_v6, %v877_v2  ;;  %v714_v9 = vmul.f32 0.001953125, %v577_v60  ;;  %v572_v54 = vpop.xlane.xlu0 %571  ;;  %v9292_v12 = vsub.f32 %v8889_v18, %v710_v5 }
 0x196   : > { %v9295_v45 = vsub.f32 %v8902_v26, %v710_v5  ;;  %v9298_v0 = vsub.f32 %v8880_v13, %v712_v1  ;;  %v713_v36 = vmul.f32 0.001953125, %v572_v54  ;;  %v873_v17 = vmul.f32 %v9286_v10, %v9286_v10 }
 0x197   : > { %v998_v16 = vadd.f32 %v997_v24, %v871_v11  ;;  %v1008_v61 = vadd.f32 %v1007_v57, %v879_v4  ;;  %v9303_v25 = vsub.f32 %v8896_v22, %v714_v9  ;;  %v9306_v60 = vsub.f32 %v8898_v23, %v714_v9 }
 0x198   : > { %v874_v18 = vmul.f32 %v9289_v14, %v9289_v14  ;;  %v875_v26 = vmul.f32 %v9292_v12, %v9292_v12  ;;  %v9313_v13 = vsub.f32 %v8908_v29, %v713_v36  ;;  %v9316_v24 = vsub.f32 %v8913_v32, %v713_v36  ;;  %v587_v54 = vpop.xlane.xlu1 %586 }
 0x199   : > { %12699 = vst [vmem:[#allocation112_spill] sm:$0xff] %v9303_v25  ;;  %12700 = vst [vmem:[#allocation113_spill] sm:$0xff] %v9306_v60  ;;  %v999_v57 = vadd.f32 %v998_v16, %v872_v15  ;;  %v1009_v2 = vadd.f32 %v1008_v61, %v880_v30  ;;  %v9318_v22 = vmul.f32 0.001953125, %v587_v54  ;;  %v582_v6 = vpop.xlane.xlu0 %581  ;;  %v876_v23 = vmul.f32 %v9295_v45, %v9295_v45 }
 0x19a   : > { %v1002_v4 = vadd.f32 %v874_v18, %v873_v17  ;;  %v9323_v5 = vsub.f32 %v8892_v20, %v712_v1  ;;  %v715_v7 = vmul.f32 0.001953125, %v582_v6  ;;  %v881_v29 = vmul.f32 %v9276_v8, %v9276_v8 }
 0x19b   : > { %1000 = vadd.xlane.f32.xlu0 %v999_v57  ;;  %v882_v32 = vmul.f32 %v9279_v42, %v9279_v42  ;;  %v883_v61 = vmul.f32 %v9298_v0, %v9298_v0  ;;  %v9333_v11 = vsub.f32 %v8921_v37, %v9318_v22  ;;  %v9337_v15 = vsub.f32 %v8923_v38, %v9318_v22 }
 0x19c   : > { %v1003_v20 = vadd.f32 %v1002_v4, %v875_v26  ;;  %v884_v1 = vmul.f32 %v9323_v5, %v9323_v5  ;;  %v9342_v30 = vsub.f32 %v8932_v43, %v715_v7  ;;  %v9345_v16 = vsub.f32 %v8934_v44, %v715_v7  ;;  %v597_v17 = vpop.xlane.xlu1 %596 }
 0x19d   : > { %12701 = vst [vmem:[#allocation114_spill] sm:$0xff] %v9333_v11  ;;  %12702 = vst [vmem:[#allocation115_spill] sm:$0xff] %v9337_v15  ;;  %v1012_v18 = vadd.f32 %v882_v32, %v881_v29  ;;  %v9348_v54 = vsub.f32 %v8915_v33, %v713_v36  ;;  %v9350_v37 = vmul.f32 0.001953125, %v597_v17  ;;  %v592_v57 = vpop.xlane.xlu0 %591  ;;  %v9353_v26 = vsub.f32 %v8928_v41, %v713_v36 }
 0x19e   : > { %12703 = vst [vmem:[#allocation116_spill] sm:$0xff] %v9342_v30  ;;  %12704 = vst [vmem:[#allocation117_spill] sm:$0xff] %v9345_v16  ;;  %v1004_v38 = vadd.f32 %v1003_v20, %v876_v23  ;;  %v885_v6 = vmul.f32 %v9313_v13, %v9313_v13  ;;  %v717_v43 = vmul.f32 0.001953125, %v592_v57  ;;  %v886_v44 = vmul.f32 %v9316_v24, %v9316_v24 }
 0x19f   : > { %12705 = vst [vmem:[#allocation118_spill] sm:$0xff] %v9353_v26  ;;  %1010 = vadd.xlane.f32.xlu0 %v1009_v2  ;;  %v1013_v4 = vadd.f32 %v1012_v18, %v883_v61  ;;  %v887_v33 = vmul.f32 %v9348_v54, %v9348_v54  ;;  %v9363_v29 = vsub.f32 %v8941_v48, %v9350_v37 }
 0x1a0   : > { %v9367_v41 = vsub.f32 %v8949_v53, %v9350_v37  ;;  %1005 = vadd.xlane.f32.xlu1 %v1004_v38  ;;  %v888_v36 = vmul.f32 %v9353_v26, %v9353_v26  ;;  %v9372_v2 = vsub.f32 %v8904_v27, %v714_v9  ;;  %v9375_v23 = vsub.f32 %v8957_v58, %v717_v43  ;;  %v607_v61 = vpop.xlane.xlu1 %606 }
 0x1a1   : > { %12706 = vst [vmem:[#allocation119_spill] sm:$0xff] %v9363_v29  ;;  %v9378_v32 = vsub.f32 %v8959_v59, %v717_v43  ;;  %v1014_v48 = vadd.f32 %v1013_v4, %v884_v1  ;;  %v1017_v20 = vadd.f32 %v886_v44, %v885_v6  ;;  %v9380_v17 = vmul.f32 0.001953125, %v607_v61  ;;  %v602_v53 = vpop.xlane.xlu0 %601 }
 0x1a2   : > { %12707 = vst [vmem:[#allocation120_spill] sm:$0xff] %v9367_v41  ;;  %12708 = vst [vmem:[#allocation121_spill] sm:$0xff] %v9372_v2  ;;  %v9383_v18 = vsub.f32 %v8911_v31, %v714_v9  ;;  %v889_v57 = vmul.f32 %v9303_v25, %v9303_v25  ;;  %v890_v27 = vmul.f32 %v9306_v60, %v9306_v60  ;;  %v9389_v58 = vmul.f32 0.001953125, %v602_v53 }
 0x1a3   : > { %12709 = vst [vmem:[#allocation122_spill] sm:$0xff] %v9375_v23  ;;  %12710 = vst [vmem:[#allocation123_spill] sm:$0xff] %v9378_v32  ;;  %v1018_v38 = vadd.f32 %v1017_v20, %v887_v33  ;;  %v891_v59 = vmul.f32 %v9372_v2, %v9372_v2  ;;  %v9394_v1 = vsub.f32 %v8937_v46, %v715_v7 }
 0x1a4   : > { %12711 = vst [vmem:[#allocation124_spill] sm:$0xff] %v9383_v18  ;;  %v9398_v6 = vsub.f32 %v8965_v62, %v9380_v17  ;;  %v9402_v31 = vsub.f32 %v8967_v63, %v9380_v17  ;;  %1015 = vadd.xlane.f32.xlu1 %v1014_v48  ;;  %v892_v9 = vmul.f32 %v9383_v18, %v9383_v18  ;;  %v617_v62 = vpop.xlane.xlu1 %616 }
 0x1a5   : > { %12712 = vst [vmem:[#allocation125_spill] sm:$0xff] %v9394_v1  ;;  %v1022_v4 = vadd.f32 %v890_v27, %v889_v57  ;;  %v9408_v44 = vsub.f32 %v8969_v3, %v9389_v58  ;;  %v9412_v46 = vsub.f32 %v8979_v21, %v9389_v58  ;;  %v1019_v33 = vadd.f32 %v1018_v38, %v888_v36  ;;  %v612_v48 = vpop.xlane.xlu0 %611 }
 0x1a6   : > { %12713 = vst [vmem:[#allocation126_spill] sm:$0xff] %v9398_v6  ;;  %12714 = vst [vmem:[#allocation127_spill] sm:$0xff] %v9402_v31  ;;  %v9415_v61 = vsub.f32 %v8947_v52, %v715_v7  ;;  %v9417_v63 = vmul.f32 0.001953125, %v617_v62  ;;  %v893_v53 = vmul.f32 %v9342_v30, %v9342_v30  ;;  %v894_v3 = vmul.f32 %v9345_v16, %v9345_v16  ;;  %v12723_v62 = vld [vmem:[#allocation34_spill] sm:$0xff] }
 0x1a7   : > { %12715 = vst [vmem:[#allocation128_spill] sm:$0xff] %v9408_v44  ;;  %12716 = vst [vmem:[#allocation129_spill] sm:$0xff] %v9412_v46  ;;  %v1023_v20 = vadd.f32 %v1022_v4, %v891_v59  ;;  %1020 = vadd.xlane.f32.xlu0 %v1019_v33  ;;  %v9423_v57 = vmul.f32 0.001953125, %v612_v48  ;;  %v895_v21 = vmul.f32 %v9394_v1, %v9394_v1  ;;  %v12721_v4 = vld [vmem:[#allocation33_spill] sm:$0xff] }
 0x1a8   : > { %12717 = vst [vmem:[#allocation130_spill] sm:$0xff] %v9415_v61  ;;  %v896_v52 = vmul.f32 %v9415_v61, %v9415_v61  ;;  %v9431_v7 = vsub.f32 %v8925_v39, %v9318_v22  ;;  %v9435_v36 = vsub.f32 %v8987_v34, %v9417_v63  ;;  %v9439_v27 = vsub.f32 %v8989_v35, %v9417_v63  ;;  %v627_v39 = vpop.xlane.xlu1 %626  ;;  %v12725_v61 = vld [vmem:[#allocation26_spill] sm:$0xff] }
 0x1a9   : > { %v1024_v38 = vadd.f32 %v1023_v20, %v892_v9  ;;  %v1027_v59 = vadd.f32 %v894_v3, %v893_v53  ;;  %v9443_v33 = vsub.f32 %v12721_v4, %v9423_v57  ;;  %v9447_v48 = vsub.f32 %v12723_v62, %v9423_v57  ;;  %v622_v20 = vpop.xlane.xlu0 %621 }
 0x1aa   : > { %12718 = vst [vmem:[#allocation131_spill] sm:$0xff] %v9431_v7  ;;  %12719 = vst [vmem:[#allocation132_spill] sm:$0xff] %v9435_v36  ;;  %v9451_v1 = vsub.f32 %v12725_v61, %v9318_v22  ;;  %v897_v34 = vmul.f32 %v9333_v11, %v9333_v11  ;;  %v9455_v9 = vmul.f32 0.001953125, %v627_v39  ;;  %v898_v53 = vmul.f32 %v9337_v15, %v9337_v15  ;;  %v12727_v61 = vld [vmem:[#allocation28_spill] sm:$0xff]  ;;  %v12729_v11 = vld [vmem:[#allocation30_spill] sm:$0xff] }
 0x1ab   : > { %12720 = vst [vmem:[#allocation133_spill] sm:$0xff] %v9439_v27  ;;  %12722 = vst [vmem:[#allocation33_spill] sm:$0xff] %v9443_v33  ;;  %1025 = vadd.xlane.f32.xlu1 %v1024_v38  ;;  %v1028_v35 = vadd.f32 %v1027_v59, %v895_v21  ;;  %v899_v3 = vmul.f32 %v9431_v7, %v9431_v7  ;;  %v9461_v4 = vmul.f32 0.001953125, %v622_v20  ;;  %v12731_v59 = vld [vmem:[#allocation38_spill] sm:$0xff]  ;;  %v12733_v15 = vld [vmem:[#allocation39_spill] sm:$0xff] }
 0x1ac   : > { %12724 = vst [vmem:[#allocation34_spill] sm:$0xff] %v9447_v48  ;;  %12726 = vst [vmem:[#allocation26_spill] sm:$0xff] %v9451_v1  ;;  %v900_v22 = vmul.f32 %v9451_v1, %v9451_v1  ;;  %v9466_v62 = vsub.f32 %v12727_v61, %v717_v43  ;;  %v9469_v38 = vsub.f32 %v12729_v11, %v717_v43  ;;  %v12735_v7 = vld [vmem:[#allocation41_spill] sm:$0xff]  ;;  %v12737_v61 = vld [vmem:[#allocation42_spill] sm:$0xff] }
 0x1ad   : > { %v1029_v21 = vadd.f32 %v1028_v35, %v896_v52  ;;  %v9473_v39 = vsub.f32 %v12731_v59, %v9455_v9  ;;  %v9477_v16 = vsub.f32 %v12733_v15, %v9455_v9  ;;  %v1032_v20 = vadd.f32 %v898_v53, %v897_v34  ;;  %v637_v52 = vpop.xlane.xlu1 %636  ;;  %v632_v53 = vpop.xlane.xlu0 %631 }
 0x1ae   : > { %12728 = vst [vmem:[#allocation28_spill] sm:$0xff] %v9466_v62  ;;  %12730 = vst [vmem:[#allocation30_spill] sm:$0xff] %v9469_v38  ;;  %v9481_v30 = vsub.f32 %v12735_v7, %v9461_v4  ;;  %v9485_v1 = vsub.f32 %v12737_v61, %v9461_v4  ;;  %v901_v11 = vmul.f32 %v9375_v23, %v9375_v23  ;;  %v9495_v34 = vmul.f32 0.001953125, %v637_v52  ;;  %v12739_v23 = vld [vmem:[#allocation27_spill] sm:$0xff] }
 0x1af   : > { %12732 = vst [vmem:[#allocation38_spill] sm:$0xff] %v9473_v39  ;;  %12734 = vst [vmem:[#allocation39_spill] sm:$0xff] %v9477_v16  ;;  %v902_v43 = vmul.f32 %v9378_v32, %v9378_v32  ;;  %1030 = vadd.xlane.f32.xlu0 %v1029_v21  ;;  %v1033_v35 = vadd.f32 %v1032_v20, %v899_v3  ;;  %v903_v15 = vmul.f32 %v9466_v62, %v9466_v62  ;;  %v12741_v32 = vld [vmem:[#allocation29_spill] sm:$0xff]  ;;  %v12743_v20 = vld [vmem:[#allocation46_spill] sm:$0xff] }
 0x1b0   : > { %12736 = vst [vmem:[#allocation41_spill] sm:$0xff] %v9481_v30  ;;  %12738 = vst [vmem:[#allocation42_spill] sm:$0xff] %v9485_v1  ;;  %v904_v7 = vmul.f32 %v9469_v38, %v9469_v38  ;;  %v9497_v61 = vmul.f32 0.001953125, %v632_v53  ;;  %v9501_v18 = vsub.f32 %v12739_v23, %v9350_v37  ;;  %v9505_v21 = vsub.f32 %v12741_v32, %v9350_v37  ;;  %v12745_v52 = vld [vmem:[#allocation47_spill] sm:$0xff]  ;;  %v12747_v23 = vld [vmem:[#allocation49_spill] sm:$0xff] }
 0x1b1   : > { %v1037_v59 = vadd.f32 %v902_v43, %v901_v11  ;;  %v1034_v3 = vadd.f32 %v1033_v35, %v900_v22  ;;  %v9509_v62 = vsub.f32 %v12743_v20, %v9495_v34  ;;  %v9513_v38 = vsub.f32 %v12745_v52, %v9495_v34  ;;  %v12749_v37 = vld [vmem:[#allocation50_spill] sm:$0xff]  ;;  %v647_v35 = vpop.xlane.xlu1 %646 }
 0x1b2   : > { %12740 = vst [vmem:[#allocation27_spill] sm:$0xff] %v9501_v18  ;;  %12742 = vst [vmem:[#allocation29_spill] sm:$0xff] %v9505_v21  ;;  %v905_v11 = vmul.f32 %v9363_v29, %v9363_v29  ;;  %v9519_v53 = vsub.f32 %v12747_v23, %v9497_v61  ;;  %v9523_v32 = vsub.f32 %v12749_v37, %v9497_v61  ;;  %v12753_v23 = vld [vmem:[#allocation36_spill] sm:$0xff]  ;;  %v642_v37 = vpop.xlane.xlu0 %641 }
 0x1b3   : > { %12744 = vst [vmem:[#allocation46_spill] sm:$0xff] %v9509_v62  ;;  %12746 = vst [vmem:[#allocation47_spill] sm:$0xff] %v9513_v38  ;;  %v1038_v43 = vadd.f32 %v1037_v59, %v903_v15  ;;  %v906_v22 = vmul.f32 %v9367_v41, %v9367_v41  ;;  %1035 = vadd.xlane.f32.xlu1 %v1034_v3  ;;  %v907_v20 = vmul.f32 %v9501_v18, %v9501_v18  ;;  %v12751_v15 = vld [vmem:[#allocation32_spill] sm:$0xff] }
 0x1b4   : > { %12748 = vst [vmem:[#allocation49_spill] sm:$0xff] %v9519_v53  ;;  %12750 = vst [vmem:[#allocation50_spill] sm:$0xff] %v9523_v32  ;;  %v908_v52 = vmul.f32 %v9505_v21, %v9505_v21  ;;  %v9533_v59 = vsub.f32 %v12751_v15, %v9389_v58  ;;  %v9537_v29 = vsub.f32 %v12753_v23, %v9389_v58  ;;  %v9547_v41 = vmul.f32 0.001953125, %v647_v35  ;;  %v12761_v35 = vld [vmem:[#allocation55_spill] sm:$0xff] }
 0x1b5   : > { %v1039_v2 = vadd.f32 %v1038_v43, %v904_v7  ;;  %v1042_v60 = vadd.f32 %v906_v22, %v905_v11  ;;  %v909_v3 = vmul.f32 %v9408_v44, %v9408_v44  ;;  %v910_v18 = vmul.f32 %v9412_v46, %v9412_v46  ;;  %v12755_v11 = vld [vmem:[#allocation31_spill] sm:$0xff]  ;;  %v12767_v44 = vld [vmem:[#allocation40_spill] sm:$0xff] }
 0x1b6   : > { %12752 = vst [vmem:[#allocation32_spill] sm:$0xff] %v9533_v59  ;;  %12754 = vst [vmem:[#allocation36_spill] sm:$0xff] %v9537_v29  ;;  %v911_v21 = vmul.f32 %v9533_v59, %v9533_v59  ;;  %v912_v15 = vmul.f32 %v9537_v29, %v9537_v29  ;;  %v9549_v25 = vmul.f32 0.001953125, %v642_v37  ;;  %v9553_v43 = vsub.f32 %v12755_v11, %v9380_v17  ;;  %v12757_v22 = vld [vmem:[#allocation35_spill] sm:$0xff]  ;;  %v12759_v59 = vld [vmem:[#allocation54_spill] sm:$0xff]  ;;  %v657_v11 = vpop.xlane.xlu1 %656 }
 0x1b7   : > { %1040 = vadd.xlane.f32.xlu0 %v1039_v2  ;;  %v1043_v58 = vadd.f32 %v1042_v60, %v907_v20  ;;  %v1047_v7 = vadd.f32 %v910_v18, %v909_v3  ;;  %v9557_v23 = vsub.f32 %v12757_v22, %v9380_v17  ;;  %v9561_v46 = vsub.f32 %v12759_v59, %v9547_v41  ;;  %v12763_v2 = vld [vmem:[#allocation57_spill] sm:$0xff]  ;;  %v12765_v18 = vld [vmem:[#allocation58_spill] sm:$0xff]  ;;  %v652_v22 = vpop.xlane.xlu0 %651 }
 0x1b8   : > { %12756 = vst [vmem:[#allocation31_spill] sm:$0xff] %v9553_v43  ;;  %v9565_v29 = vsub.f32 %v12761_v35, %v9547_v41  ;;  %v9569_v60 = vsub.f32 %v12763_v2, %v9549_v25  ;;  %v9573_v20 = vsub.f32 %v12765_v18, %v9549_v25  ;;  %v913_v17 = vmul.f32 %v9398_v6, %v9398_v6 }
 0x1b9   : > { %12758 = vst [vmem:[#allocation35_spill] sm:$0xff] %v9557_v23  ;;  %12760 = vst [vmem:[#allocation54_spill] sm:$0xff] %v9561_v46  ;;  %v1044_v37 = vadd.f32 %v1043_v58, %v908_v52  ;;  %v1048_v3 = vadd.f32 %v1047_v7, %v911_v21  ;;  %v914_v59 = vmul.f32 %v9402_v31, %v9402_v31  ;;  %v12769_v21 = vld [vmem:[#allocation44_spill] sm:$0xff]  ;;  %v9599_v6 = vmul.f32 0.001953125, %v657_v11  ;;  %v12777_v11 = vld [vmem:[#allocation63_spill] sm:$0xff] }
 0x1ba   : > { %12762 = vst [vmem:[#allocation55_spill] sm:$0xff] %v9565_v29  ;;  %12764 = vst [vmem:[#allocation57_spill] sm:$0xff] %v9569_v60  ;;  %v915_v35 = vmul.f32 %v9553_v43, %v9553_v43  ;;  %v916_v2 = vmul.f32 %v9557_v23, %v9557_v23  ;;  %v9585_v18 = vsub.f32 %v12767_v44, %v9423_v57  ;;  %v9601_v26 = vmul.f32 0.001953125, %v652_v22  ;;  %v12779_v22 = vld [vmem:[#allocation65_spill] sm:$0xff] }
 0x1bb   : > { %12766 = vst [vmem:[#allocation58_spill] sm:$0xff] %v9573_v20  ;;  %v9589_v52 = vsub.f32 %v12769_v21, %v9423_v57  ;;  %1045 = vadd.xlane.f32.xlu1 %v1044_v37  ;;  %v1049_v58 = vadd.f32 %v1048_v3, %v912_v15  ;;  %v1052_v7 = vadd.f32 %v914_v59, %v913_v17  ;;  %v12771_v37 = vld [vmem:[#allocation37_spill] sm:$0xff]  ;;  %v12773_v17 = vld [vmem:[#allocation43_spill] sm:$0xff]  ;;  %v12775_v21 = vld [vmem:[#allocation62_spill] sm:$0xff] }
 0x1bc   : > { %12768 = vst [vmem:[#allocation40_spill] sm:$0xff] %v9585_v18  ;;  %v917_v31 = vmul.f32 %v9443_v33, %v9443_v33  ;;  %v918_v43 = vmul.f32 %v9447_v48, %v9447_v48  ;;  %v919_v23 = vmul.f32 %v9585_v18, %v9585_v18  ;;  %v9605_v3 = vsub.f32 %v12771_v37, %v9417_v63  ;;  %v12782_v48 = vld [vmem:[#allocation48_spill] sm:$0xff] }
 0x1bd   : > { %12770 = vst [vmem:[#allocation44_spill] sm:$0xff] %v9589_v52  ;;  %v920_v44 = vmul.f32 %v9589_v52, %v9589_v52  ;;  %1050 = vadd.xlane.f32.xlu0 %v1049_v58  ;;  %v1053_v57 = vadd.f32 %v1052_v7, %v915_v35  ;;  %v9609_v59 = vsub.f32 %v12773_v17, %v9417_v63  ;;  %v667_v17 = vpop.xlane.xlu1 %666 }
 0x1be   : > { %v1057_v15 = vadd.f32 %v918_v43, %v917_v31  ;;  %12772 = vst [vmem:[#allocation37_spill] sm:$0xff] %v9605_v3  ;;  %v9613_v18 = vsub.f32 %v12775_v21, %v9599_v6  ;;  %v9617_v52 = vsub.f32 %v12777_v11, %v9599_v6  ;;  %v9621_v35 = vsub.f32 %v12779_v22, %v9601_v26  ;;  %v12780_v31 = vld [vmem:[#allocation66_spill] sm:$0xff]  ;;  %v662_v21 = vpop.xlane.xlu0 %661 }
 0x1bf   : > { %12774 = vst [vmem:[#allocation43_spill] sm:$0xff] %v9609_v59  ;;  %v9625_v43 = vsub.f32 %v12780_v31, %v9601_v26  ;;  %v1054_v58 = vadd.f32 %v1053_v57, %v916_v2  ;;  %v921_v63 = vmul.f32 %v9435_v36, %v9435_v36  ;;  %v922_v37 = vmul.f32 %v9439_v27, %v9439_v27 }
 0x1c0   : > { %12776 = vst [vmem:[#allocation62_spill] sm:$0xff] %v9613_v18  ;;  %12778 = vst [vmem:[#allocation63_spill] sm:$0xff] %v9617_v52  ;;  %v1058_v7 = vadd.f32 %v1057_v15, %v919_v23  ;;  %v923_v11 = vmul.f32 %v9605_v3, %v9605_v3  ;;  %v924_v22 = vmul.f32 %v9609_v59, %v9609_v59  ;;  %v12784_v23 = vld [vmem:[#allocation52_spill] sm:$0xff]  ;;  %v9651_v36 = vmul.f32 0.001953125, %v667_v17  ;;  %v12791_v17 = vld [vmem:[#allocation71_spill] sm:$0xff] }
 0x1c1   : > { %12781 = vst [vmem:[#allocation65_spill] sm:$0xff] %v9625_v43  ;;  %v9637_v31 = vsub.f32 %v12782_v48, %v9461_v4  ;;  %v9641_v2 = vsub.f32 %v12784_v23, %v9461_v4  ;;  %1055 = vadd.xlane.f32.xlu1 %v1054_v58  ;;  %v1062_v15 = vadd.f32 %v922_v37, %v921_v63  ;;  %v9653_v33 = vmul.f32 0.001953125, %v662_v21  ;;  %v12786_v58 = vld [vmem:[#allocation45_spill] sm:$0xff]  ;;  %v12788_v63 = vld [vmem:[#allocation51_spill] sm:$0xff]  ;;  %v12790_v23 = vld [vmem:[#allocation70_spill] sm:$0xff] }
 0x1c2   : > { %v1059_v57 = vadd.f32 %v1058_v7, %v920_v44  ;;  %v925_v27 = vmul.f32 %v9481_v30, %v9481_v30  ;;  %v926_v3 = vmul.f32 %v9485_v1, %v9485_v1  ;;  %v9657_v7 = vsub.f32 %v12786_v58, %v9455_v9  ;;  %v12792_v21 = vld [vmem:[#allocation73_spill] sm:$0xff]  ;;  %v12794_v1 = vld [vmem:[#allocation56_spill] sm:$0xff] }
 0x1c3   : > { %12783 = vst [vmem:[#allocation66_spill] sm:$0xff] %v9637_v31  ;;  %12785 = vst [vmem:[#allocation48_spill] sm:$0xff] %v9641_v2  ;;  %v927_v59 = vmul.f32 %v9637_v31, %v9637_v31  ;;  %v928_v48 = vmul.f32 %v9641_v2, %v9641_v2  ;;  %v1063_v4 = vadd.f32 %v1062_v15, %v923_v11 }
 0x1c4   : > { %1060 = vadd.xlane.f32.xlu0 %v1059_v57  ;;  %v1067_v44 = vadd.f32 %v926_v3, %v925_v27  ;;  %12787 = vst [vmem:[#allocation52_spill] sm:$0xff] %v9657_v7  ;;  %v9661_v37 = vsub.f32 %v12788_v63, %v9455_v9  ;;  %v9665_v31 = vsub.f32 %v12790_v23, %v9651_v36  ;;  %v12793_v27 = vld [vmem:[#allocation74_spill] sm:$0xff]  ;;  %v677_v63 = vpop.xlane.xlu1 %676  ;;  %v672_v23 = vpop.xlane.xlu0 %671 }
 0x1c5   : > { %v9669_v2 = vsub.f32 %v12791_v17, %v9651_v36  ;;  %v9673_v11 = vsub.f32 %v12792_v21, %v9653_v33  ;;  %v9677_v3 = vsub.f32 %v12793_v27, %v9653_v33  ;;  %v1064_v57 = vadd.f32 %v1063_v4, %v924_v22 }
 0x1c6   : > { %12789 = vst [vmem:[#allocation45_spill] sm:$0xff] %v9661_v37  ;;  %v1068_v15 = vadd.f32 %v1067_v44, %v927_v59  ;;  %v929_v9 = vmul.f32 %v9473_v39, %v9473_v39  ;;  %v930_v58 = vmul.f32 %v9477_v16, %v9477_v16  ;;  %v931_v17 = vmul.f32 %v9657_v7, %v9657_v7  ;;  %v12796_v59 = vld [vmem:[#allocation60_spill] sm:$0xff] }
 0x1c7   : > { %v932_v21 = vmul.f32 %v9661_v37, %v9661_v37  ;;  %v9689_v27 = vsub.f32 %v12794_v1, %v9497_v61  ;;  %v9693_v22 = vsub.f32 %v12796_v59, %v9497_v61  ;;  %1065 = vadd.xlane.f32.xlu1 %v1064_v57  ;;  %v933_v16 = vmul.f32 %v9519_v53, %v9519_v53  ;;  %v12798_v57 = vld [vmem:[#allocation53_spill] sm:$0xff]  ;;  %v12802_v59 = vld [vmem:[#allocation78_spill] sm:$0xff] }
 0x1c8   : > { %v1069_v4 = vadd.f32 %v1068_v15, %v928_v48  ;;  %v1072_v44 = vadd.f32 %v930_v58, %v929_v9  ;;  %v934_v7 = vmul.f32 %v9523_v32, %v9523_v32  ;;  %v9703_v39 = vmul.f32 0.001953125, %v677_v63  ;;  %v12800_v9 = vld [vmem:[#allocation59_spill] sm:$0xff]  ;;  %v12807_v32 = vld [vmem:[#allocation64_spill] sm:$0xff] }
 0x1c9   : > { %12795 = vst [vmem:[#allocation51_spill] sm:$0xff] %v9689_v27  ;;  %12797 = vst [vmem:[#allocation70_spill] sm:$0xff] %v9693_v22  ;;  %v935_v37 = vmul.f32 %v9689_v27, %v9689_v27  ;;  %v936_v1 = vmul.f32 %v9693_v22, %v9693_v22  ;;  %v9705_v30 = vmul.f32 0.001953125, %v672_v23  ;;  %v9709_v15 = vsub.f32 %v12798_v57, %v9495_v34  ;;  %v12803_v63 = vld [vmem:[#allocation79_spill] sm:$0xff]  ;;  %v12805_v23 = vld [vmem:[#allocation81_spill] sm:$0xff] }
 0x1ca   : > { %1070 = vadd.xlane.f32.xlu0 %v1069_v4  ;;  %v1073_v61 = vadd.f32 %v1072_v44, %v931_v17  ;;  %v1077_v48 = vadd.f32 %v934_v7, %v933_v16  ;;  %v9713_v58 = vsub.f32 %v12800_v9, %v9495_v34  ;;  %v9717_v27 = vsub.f32 %v12802_v59, %v9703_v39  ;;  %v12806_v16 = vld [vmem:[#allocation82_spill] sm:$0xff]  ;;  %v687_v9 = vpop.xlane.xlu1 %686  ;;  %v682_v59 = vpop.xlane.xlu0 %681 }
 0x1cb   : > { %12799 = vst [vmem:[#allocation71_spill] sm:$0xff] %v9709_v15  ;;  %v9721_v22 = vsub.f32 %v12803_v63, %v9703_v39  ;;  %v9725_v17 = vsub.f32 %v12805_v23, %v9705_v30  ;;  %v9729_v7 = vsub.f32 %v12806_v16, %v9705_v30  ;;  %v937_v34 = vmul.f32 %v9509_v62, %v9509_v62 }
 0x1cc   : > { %12801 = vst [vmem:[#allocation73_spill] sm:$0xff] %v9713_v58  ;;  %v1074_v4 = vadd.f32 %v1073_v61, %v932_v21  ;;  %v1078_v44 = vadd.f32 %v1077_v48, %v935_v37  ;;  %v938_v57 = vmul.f32 %v9513_v38, %v9513_v38  ;;  %v939_v63 = vmul.f32 %v9709_v15, %v9709_v15  ;;  %v12809_v37 = vld [vmem:[#allocation68_spill] sm:$0xff] }
 0x1cd   : > { %12804 = vst [vmem:[#allocation74_spill] sm:$0xff] %v9721_v22  ;;  %v940_v23 = vmul.f32 %v9713_v58, %v9713_v58  ;;  %v9741_v16 = vsub.f32 %v12807_v32, %v9549_v25  ;;  %v9745_v21 = vsub.f32 %v12809_v37, %v9549_v25  ;;  %v941_v38 = vmul.f32 %v9569_v60, %v9569_v60  ;;  %v12815_v37 = vld [vmem:[#allocation86_spill] sm:$0xff] }
 0x1ce   : > { %1075 = vadd.xlane.f32.xlu1 %v1074_v4  ;;  %v1079_v61 = vadd.f32 %v1078_v44, %v936_v1  ;;  %v1082_v48 = vadd.f32 %v938_v57, %v937_v34  ;;  %v942_v15 = vmul.f32 %v9573_v20, %v9573_v20  ;;  %v9755_v62 = vmul.f32 0.001953125, %v687_v9  ;;  %v12811_v4 = vld [vmem:[#allocation61_spill] sm:$0xff]  ;;  %v12813_v34 = vld [vmem:[#allocation67_spill] sm:$0xff]  ;;  %v12819_v20 = vld [vmem:[#allocation72_spill] sm:$0xff] }
 0x1cf   : > { %12808 = vst [vmem:[#allocation56_spill] sm:$0xff] %v9741_v16  ;;  %12810 = vst [vmem:[#allocation60_spill] sm:$0xff] %v9745_v21  ;;  %v943_v58 = vmul.f32 %v9741_v16, %v9741_v16  ;;  %v944_v32 = vmul.f32 %v9745_v21, %v9745_v21  ;;  %v9757_v53 = vmul.f32 0.001953125, %v682_v59  ;;  %v9761_v44 = vsub.f32 %v12811_v4, %v9547_v41  ;;  %v12816_v9 = vld [vmem:[#allocation87_spill] sm:$0xff]  ;;  %v12817_v59 = vld [vmem:[#allocation89_spill] sm:$0xff] }
 0x1d0   : > { %1080 = vadd.xlane.f32.xlu0 %v1079_v61  ;;  %v1083_v25 = vadd.f32 %v1082_v48, %v939_v63  ;;  %v1087_v1 = vadd.f32 %v942_v15, %v941_v38  ;;  %v9765_v57 = vsub.f32 %v12813_v34, %v9547_v41  ;;  %v9769_v16 = vsub.f32 %v12815_v37, %v9755_v62  ;;  %v12818_v38 = vld [vmem:[#allocation90_spill] sm:$0xff]  ;;  %v697_v34 = vpop.xlane.xlu1 %696  ;;  %v692_v37 = vpop.xlane.xlu0 %691 }
 0x1d1   : > { %12812 = vst [vmem:[#allocation53_spill] sm:$0xff] %v9761_v44  ;;  %v9773_v21 = vsub.f32 %v12816_v9, %v9755_v62  ;;  %v9777_v63 = vsub.f32 %v12817_v59, %v9757_v53  ;;  %v9781_v15 = vsub.f32 %v12818_v38, %v9757_v53  ;;  %v945_v41 = vmul.f32 %v9561_v46, %v9561_v46 }
 0x1d2   : > { %12814 = vst [vmem:[#allocation59_spill] sm:$0xff] %v9765_v57  ;;  %v1084_v61 = vadd.f32 %v1083_v25, %v940_v23  ;;  %v1088_v48 = vadd.f32 %v1087_v1, %v943_v58  ;;  %v946_v4 = vmul.f32 %v9565_v29, %v9565_v29  ;;  %v947_v9 = vmul.f32 %v9761_v44, %v9761_v44  ;;  %v12821_v58 = vld [vmem:[#allocation76_spill] sm:$0xff] }
 0x1d3   : > { %v948_v59 = vmul.f32 %v9765_v57, %v9765_v57  ;;  %v9793_v38 = vsub.f32 %v12819_v20, %v9601_v26  ;;  %v9797_v23 = vsub.f32 %v12821_v58, %v9601_v26  ;;  %v949_v29 = vmul.f32 %v9621_v35, %v9621_v35 }
 0x1d4   : > { %1085 = vadd.xlane.f32.xlu1 %v1084_v61  ;;  %v1089_v25 = vadd.f32 %v1088_v48, %v944_v32  ;;  %v1092_v1 = vadd.f32 %v946_v4, %v945_v41  ;;  %v950_v44 = vmul.f32 %v9625_v43, %v9625_v43  ;;  %v9807_v46 = vmul.f32 0.001953125, %v697_v34  ;;  %v12823_v61 = vld [vmem:[#allocation69_spill] sm:$0xff]  ;;  %v12825_v41 = vld [vmem:[#allocation75_spill] sm:$0xff]  ;;  %v12828_v34 = vld [vmem:[#allocation94_spill] sm:$0xff] }
 0x1d5   : > { %12820 = vst [vmem:[#allocation78_spill] sm:$0xff] %v9793_v38  ;;  %12822 = vst [vmem:[#allocation79_spill] sm:$0xff] %v9797_v23  ;;  %v951_v57 = vmul.f32 %v9793_v38, %v9793_v38  ;;  %v952_v20 = vmul.f32 %v9797_v23, %v9797_v23  ;;  %v9809_v60 = vmul.f32 0.001953125, %v692_v37  ;;  %v9813_v48 = vsub.f32 %v12823_v61, %v9599_v6  ;;  %v12830_v37 = vld [vmem:[#allocation96_spill] sm:$0xff]  ;;  %v707_v61 = vpop.xlane.xlu1 %706 }
 0x1d6   : > { %1090 = vadd.xlane.f32.xlu0 %v1089_v25  ;;  %v1093_v26 = vadd.f32 %v1092_v1, %v947_v9  ;;  %v1097_v32 = vadd.f32 %v950_v44, %v949_v29  ;;  %v9817_v4 = vsub.f32 %v12825_v41, %v9599_v6  ;;  %v9821_v58 = vsub.f32 %v9179_v50, %v9807_v46  ;;  %v12831_v29 = vld [vmem:[#allocation97_spill] sm:$0xff]  ;;  %v702_v41 = vpop.xlane.xlu0 %701  ;;  %v12832_v38 = vld [vmem:[#allocation80_spill] sm:$0xff] }
 0x1d7   : > { %12824 = vst [vmem:[#allocation81_spill] sm:$0xff] %v9813_v48  ;;  %v9825_v23 = vsub.f32 %v12828_v34, %v9807_v46  ;;  %v9829_v9 = vsub.f32 %v12830_v37, %v9809_v60  ;;  %v9833_v44 = vsub.f32 %v12831_v29, %v9809_v60  ;;  %v953_v6 = vmul.f32 %v9613_v18, %v9613_v18 }
 0x1d8   : > { %12826 = vst [vmem:[#allocation82_spill] sm:$0xff] %v9817_v4  ;;  %12827 = vst [vmem:[#allocation64_spill] sm:$0xff] %v9821_v58  ;;  %v1094_v25 = vadd.f32 %v1093_v26, %v948_v59  ;;  %v1098_v1 = vadd.f32 %v1097_v32, %v951_v57  ;;  %v954_v50 = vmul.f32 %v9617_v52, %v9617_v52  ;;  %v12833_v57 = vld [vmem:[#allocation84_spill] sm:$0xff]  ;;  %v9859_v18 = vmul.f32 0.001953125, %v707_v61 }
 0x1d9   : > { %12829 = vst [vmem:[#allocation68_spill] sm:$0xff] %v9825_v23  ;;  %v955_v34 = vmul.f32 %v9813_v48, %v9813_v48  ;;  %v956_v37 = vmul.f32 %v9817_v4, %v9817_v4  ;;  %v9845_v29 = vsub.f32 %v12832_v38, %v9653_v33  ;;  %v9849_v59 = vsub.f32 %v12833_v57, %v9653_v33 }
 0x1da   : > { %1095 = vadd.xlane.f32.xlu1 %v1094_v25  ;;  %v1099_v26 = vadd.f32 %v1098_v1, %v952_v20  ;;  %v1102_v32 = vadd.f32 %v954_v50, %v953_v6  ;;  %v957_v52 = vmul.f32 %v9673_v11, %v9673_v11  ;;  %v958_v48 = vmul.f32 %v9677_v3, %v9677_v3  ;;  %v12834_v25 = vld [vmem:[#allocation77_spill] sm:$0xff]  ;;  %v12836_v6 = vld [vmem:[#allocation83_spill] sm:$0xff] }
 0x1db   : > { %v959_v4 = vmul.f32 %v9845_v29, %v9845_v29  ;;  %v960_v38 = vmul.f32 %v9849_v59, %v9849_v59  ;;  %v9861_v43 = vmul.f32 0.001953125, %v702_v41  ;;  %v9865_v1 = vsub.f32 %v12834_v25, %v9651_v36 }
 0x1dc   : > { %1100 = vadd.xlane.f32.xlu0 %v1099_v26  ;;  %v1103_v33 = vadd.f32 %v1102_v32, %v955_v34  ;;  %v1107_v20 = vadd.f32 %v958_v48, %v957_v52  ;;  %v9869_v50 = vsub.f32 %v12836_v6, %v9651_v36  ;;  %v9873_v57 = vsub.f32 %v9203_v56, %v9859_v18 }
 0x1dd   : > { %12835 = vst [vmem:[#allocation61_spill] sm:$0xff] %v9865_v1  ;;  %v9877_v61 = vsub.f32 %v9205_v49, %v9859_v18  ;;  %v9881_v41 = vsub.f32 %v9209_v28, %v9861_v43  ;;  %v9885_v52 = vsub.f32 %v9211_v55, %v9861_v43  ;;  %v961_v36 = vmul.f32 %v9665_v31, %v9665_v31  ;;  %v12842_v28 = vld [vmem:[#allocation88_spill] sm:$0xff] }
 0x1de   : > { %12837 = vst [vmem:[#allocation67_spill] sm:$0xff] %v9869_v50  ;;  %12838 = vst [vmem:[#allocation86_spill] sm:$0xff] %v9873_v57  ;;  %v1104_v48 = vadd.f32 %v1103_v33, %v956_v37  ;;  %v1108_v34 = vadd.f32 %v1107_v20, %v959_v4  ;;  %v962_v56 = vmul.f32 %v9669_v2, %v9669_v2  ;;  %v12844_v55 = vld [vmem:[#allocation92_spill] sm:$0xff] }
 0x1df   : > { %12839 = vst [vmem:[#allocation87_spill] sm:$0xff] %v9877_v61  ;;  %12840 = vst [vmem:[#allocation89_spill] sm:$0xff] %v9881_v41  ;;  %v963_v49 = vmul.f32 %v9865_v1, %v9865_v1  ;;  %v964_v26 = vmul.f32 %v9869_v50, %v9869_v50  ;;  %v9897_v32 = vsub.f32 %v12842_v28, %v9705_v30  ;;  %v12846_v50 = vld [vmem:[#allocation85_spill] sm:$0xff] }
 0x1e0   : > { %12841 = vst [vmem:[#allocation90_spill] sm:$0xff] %v9885_v52  ;;  %v9901_v37 = vsub.f32 %v12844_v55, %v9705_v30  ;;  %1105 = vadd.xlane.f32.xlu1 %v1104_v48  ;;  %v1109_v4 = vadd.f32 %v1108_v34, %v960_v38  ;;  %v1112_v33 = vadd.f32 %v962_v56, %v961_v36  ;;  %v12848_v30 = vld [vmem:[#allocation91_spill] sm:$0xff] }
 0x1e1   : > { %12843 = vst [vmem:[#allocation72_spill] sm:$0xff] %v9897_v32  ;;  %v965_v20 = vmul.f32 %v9725_v17, %v9725_v17  ;;  %v966_v25 = vmul.f32 %v9729_v7, %v9729_v7  ;;  %v967_v6 = vmul.f32 %v9897_v32, %v9897_v32  ;;  %v9913_v1 = vsub.f32 %v12846_v50, %v9703_v39 }
 0x1e2   : > { %12845 = vst [vmem:[#allocation76_spill] sm:$0xff] %v9901_v37  ;;  %v968_v28 = vmul.f32 %v9901_v37, %v9901_v37  ;;  %v9917_v38 = vsub.f32 %v12848_v30, %v9703_v39  ;;  %1110 = vadd.xlane.f32.xlu0 %v1109_v4  ;;  %v1113_v48 = vadd.f32 %v1112_v33, %v963_v49  ;;  %v12850_v37 = vld [vmem:[#allocation95_spill] sm:$0xff] }
 0x1e3   : > { %12847 = vst [vmem:[#allocation69_spill] sm:$0xff] %v9913_v1  ;;  %v1117_v34 = vadd.f32 %v966_v25, %v965_v20  ;;  %v969_v36 = vmul.f32 %v9717_v27, %v9717_v27  ;;  %v970_v56 = vmul.f32 %v9721_v22, %v9721_v22  ;;  %v971_v55 = vmul.f32 %v9913_v1, %v9913_v1  ;;  %v12851_v39 = vld [vmem:[#allocation99_spill] sm:$0xff]  ;;  %v12853_v1 = vld [vmem:[#allocation93_spill] sm:$0xff] }
 0x1e4   : > { %12849 = vst [vmem:[#allocation75_spill] sm:$0xff] %v9917_v38  ;;  %v972_v50 = vmul.f32 %v9917_v38, %v9917_v38  ;;  %v9929_v32 = vsub.f32 %v12850_v37, %v9757_v53  ;;  %v9933_v49 = vsub.f32 %v12851_v39, %v9757_v53  ;;  %v1114_v4 = vadd.f32 %v1113_v48, %v964_v26 }
 0x1e5   : > { %v1118_v33 = vadd.f32 %v1117_v34, %v967_v6  ;;  %v1122_v20 = vadd.f32 %v970_v56, %v969_v36  ;;  %v973_v25 = vmul.f32 %v9777_v63, %v9777_v63  ;;  %v974_v30 = vmul.f32 %v9781_v15, %v9781_v15  ;;  %v12854_v6 = vld [vmem:[#allocation98_spill] sm:$0xff] }
 0x1e6   : > { %12852 = vst [vmem:[#allocation94_spill] sm:$0xff] %v9933_v49  ;;  %v975_v38 = vmul.f32 %v9929_v32, %v9929_v32  ;;  %v976_v37 = vmul.f32 %v9933_v49, %v9933_v49  ;;  %v9945_v22 = vsub.f32 %v12853_v1, %v9755_v62  ;;  %1115 = vadd.xlane.f32.xlu1 %v1114_v4  ;;  %v12855_v1 = vld [vmem:[#allocation101_spill] sm:$0xff] }
 0x1e7   : > { %v1119_v53 = vadd.f32 %v1118_v33, %v968_v28  ;;  %v1123_v26 = vadd.f32 %v1122_v20, %v971_v55  ;;  %v9949_v48 = vsub.f32 %v12854_v6, %v9755_v62  ;;  %v977_v34 = vmul.f32 %v9769_v16, %v9769_v16 }
 0x1e8   : > { %v1127_v36 = vadd.f32 %v974_v30, %v973_v25  ;;  %v978_v56 = vmul.f32 %v9773_v21, %v9773_v21  ;;  %v979_v39 = vmul.f32 %v9945_v22, %v9945_v22  ;;  %v9959_v49 = vsub.f32 %v12855_v1, %v9809_v60 }
 0x1e9   : > { %1120 = vadd.xlane.f32.xlu0 %v1119_v53  ;;  %v1124_v28 = vadd.f32 %v1123_v26, %v972_v50  ;;  %v980_v62 = vmul.f32 %v9949_v48, %v9949_v48  ;;  %v9965_v55 = vsub.f32 %v9225_v47, %v9809_v60  ;;  %v981_v4 = vmul.f32 %v9829_v9, %v9829_v9  ;;  %v12858_v53 = vld [vmem:[#allocation100_spill] sm:$0xff] }
 0x1ea   : > { %12856 = vst [vmem:[#allocation96_spill] sm:$0xff] %v9959_v49  ;;  %v1128_v33 = vadd.f32 %v1127_v36, %v975_v38  ;;  %v1132_v20 = vadd.f32 %v978_v56, %v977_v34  ;;  %v982_v25 = vmul.f32 %v9833_v44, %v9833_v44  ;;  %v983_v30 = vmul.f32 %v9959_v49, %v9959_v49  ;;  %v12935_v49 = vld [vmem:[#allocation59_spill] sm:$0xff] }
 0x1eb   : > { %12857 = vst [vmem:[#allocation97_spill] sm:$0xff] %v9965_v55  ;;  %1125 = vadd.xlane.f32.xlu1 %v1124_v28  ;;  %v984_v50 = vmul.f32 %v9965_v55, %v9965_v55  ;;  %v9977_v26 = vsub.f32 %v12858_v53, %v9807_v46  ;;  %v9981_v47 = vsub.f32 %v9218_v19, %v9807_v46 }
 0x1ec   : > { %v985_v60 = vmul.f32 %v9821_v58, %v9821_v58  ;;  %v1129_v38 = vadd.f32 %v1128_v33, %v976_v37  ;;  %v1133_v6 = vadd.f32 %v1132_v20, %v979_v39  ;;  %v1137_v34 = vadd.f32 %v982_v25, %v981_v4 }
 0x1ed   : > { %12859 = vst [vmem:[#allocation80_spill] sm:$0xff] %v9977_v26  ;;  %12860 = vst [vmem:[#allocation84_spill] sm:$0xff] %v9981_v47  ;;  %v986_v36 = vmul.f32 %v9825_v23, %v9825_v23  ;;  %v987_v56 = vmul.f32 %v9977_v26, %v9977_v26  ;;  %v988_v1 = vmul.f32 %v9981_v47, %v9981_v47 }
 0x1ee   : > { %v9993_v28 = vsub.f32 %v9227_v40, %v9861_v43  ;;  %v9997_v19 = vsub.f32 %v9235_v51, %v9861_v43  ;;  %1130 = vadd.xlane.f32.xlu0 %v1129_v38  ;;  %v1134_v46 = vadd.f32 %v1133_v6, %v980_v62  ;;  %v1138_v37 = vadd.f32 %v1137_v34, %v983_v30  ;;  %v12863_v40 = vld [vmem:[#allocation102_spill] sm:$0xff]  ;;  %v12865_v62 = vld [vmem:[#allocation103_spill] sm:$0xff] }
 0x1ef   : > { %v1142_v39 = vadd.f32 %v986_v36, %v985_v60  ;;  %v989_v4 = vmul.f32 %v9881_v41, %v9881_v41  ;;  %v990_v33 = vmul.f32 %v9885_v52, %v9885_v52  ;;  %v10007_v25 = vsub.f32 %v12863_v40, %v9859_v18 }
 0x1f0   : > { %12861 = vst [vmem:[#allocation77_spill] sm:$0xff] %v9993_v28  ;;  %12862 = vst [vmem:[#allocation83_spill] sm:$0xff] %v9997_v19  ;;  %v991_v20 = vmul.f32 %v9993_v28, %v9993_v28  ;;  %1135 = vadd.xlane.f32.xlu1 %v1134_v46  ;;  %v1139_v51 = vadd.f32 %v1138_v37, %v984_v50  ;;  %v10011_v30 = vsub.f32 %v12865_v62, %v9859_v18  ;;  %v1383_v40 = vlaneseq }
 0x1f1   : > { %12864 = vst [vmem:[#allocation88_spill] sm:$0xff] %v10007_v25  ;;  %v1143_v43 = vadd.f32 %v1142_v39, %v987_v56  ;;  %v993_v53 = vmul.f32 %v9873_v57, %v9873_v57  ;;  %v992_v60 = vmul.f32 %v9997_v19, %v9997_v19  ;;  %v1147_v38 = vadd.f32 %v990_v33, %v989_v4 }
 0x1f2   : > { %12866 = vst [vmem:[#allocation92_spill] sm:$0xff] %v10011_v30  ;;  %v994_v6 = vmul.f32 %v9877_v61, %v9877_v61  ;;  %v995_v34 = vmul.f32 %v10007_v25, %v10007_v25  ;;  %1140 = vadd.xlane.f32.xlu0 %v1139_v51  ;;  %v996_v18 = vmul.f32 %v10011_v30, %v10011_v30 }
 0x1f3   : > { %v1144_v50 = vadd.f32 %v1143_v43, %v988_v1  ;;  %v1148_v36 = vadd.f32 %v1147_v38, %v991_v20  ;;  %v1384_v1 = vshrl.u32 %v1383_v40, 7  ;;  %v1531_v40 = vld [vmem:[#allocation9] sm:$0xf] }
 0x1f4   : > { %v1152_v56 = vadd.f32 %v994_v6, %v993_v53 }
 0x1f5   : > { %1145 = vadd.xlane.f32.xlu1 %v1144_v50  ;;  %v1149_v46 = vadd.f32 %v1148_v36, %v992_v60  ;;  %v1385_v6 = vsub.s32 0, %v1384_v1  ;;  %v1389_v60 = vsub.s32 1, %v1384_v1  ;;  %v1381_v50 = vld [vmem:[#allocation7] sm:$0xf]  ;;  %v1393_v36 = vsub.s32 2, %v1384_v1 }
 0x1f6   : > { %v1153_v37 = vadd.f32 %v1152_v56, %v995_v34 }
 0x1f7   : > { %1150 = vadd.xlane.f32.xlu0 %v1149_v46  ;;  %v10035_v57 = vrot.slane %v1531_v40, %v1385_v6  ;;  %v10037_v19 = vrot.slane %v1531_v40, %v1389_v60  ;;  %v10039_v52 = vrot.slane %v1531_v40, %v1393_v36 }
 0x1f8   : > { %v1154_v39 = vadd.f32 %v1153_v37, %v996_v18  ;;  %v1397_v18 = vsub.s32 3, %v1384_v1  ;;  %v12869_v1 = vld [vmem:[#allocation110_spill] sm:$0xff] }
 0x1fa   : > { %1155 = vadd.xlane.f32.xlu1 %v1154_v39  ;;  %v10023_v39 = vrot.slane %v1381_v50, %v1385_v6 }
 0x228   : > { %v1001_v4 = vpop.xlane.xlu0 %1000 }
 0x229   : > { %v1157_v33 = vmul.f32 0.001953125, %v1001_v4  ;;  %v10025_v4 = vrot.slane %v1381_v50, %v1389_v60 }
 0x22b   : > { %v1189_v62 = vadd.f32 1e-05, %v1157_v33  ;;  %v10029_v33 = vrot.slane %v1381_v50, %v1397_v18 }
 0x22c   : > { %v1011_v61 = vpop.xlane.xlu0 %1010 }
 0x22d   : > { %7523 = vrsqrt.f32 %v1189_v62  ;;  %v1006_v25 = vpop.xlane.xlu1 %1005  ;;  %v1159_v51 = vmul.f32 0.001953125, %v1011_v61 }
 0x22e   : > { %v1158_v20 = vmul.f32 0.001953125, %v1006_v25  ;;  %v10027_v25 = vrot.slane %v1381_v50, %v1393_v36  ;;  %v10041_v50 = vrot.slane %v1531_v40, %v1397_v18  ;;  %v12871_v40 = vld [vmem:[#allocation104_spill] sm:$0xff] }
 0x22f   : > { %v1191_v43 = vadd.f32 1e-05, %v1159_v51  ;;  %v12867_v51 = vld [vmem:[#allocation108_spill] sm:$0xff] }
 0x230   : > { %v1190_v38 = vadd.f32 1e-05, %v1158_v20 }
 0x231   : > { %7525 = vrsqrt.f32 %v1191_v43  ;;  %v1016_v53 = vpop.xlane.xlu1 %1015  ;;  %v12868_v43 = vld [vmem:[#allocation109_spill] sm:$0xff] }
 0x232   : > { %7527 = vrsqrt.f32 %v1190_v38  ;;  %v1160_v34 = vmul.f32 0.001953125, %v1016_v53 }
 0x234   : > { %v1192_v56 = vadd.f32 1e-05, %v1160_v34  ;;  %v1021_v46 = vpop.xlane.xlu0 %1020  ;;  %v12870_v34 = vld [vmem:[#allocation111_spill] sm:$0xff] }
 0x235   : > { %v1161_v37 = vmul.f32 0.001953125, %v1021_v46 }
 0x236   : > { %7529 = vrsqrt.f32 %v1192_v56 }
 0x237   : > { %v7524_v61 = vpop.eup %7523  ;;  %v1193_v62 = vadd.f32 1e-05, %v1161_v37 }
 0x238   : > { %v1253_v20 = vmul.f32 %v7524_v61, %v12867_v51  ;;  %v1254_v38 = vmul.f32 %v7524_v61, %v12868_v43  ;;  %v1255_v53 = vmul.f32 %v7524_v61, %v12869_v1  ;;  %v1256_v46 = vmul.f32 %v7524_v61, %v12870_v34  ;;  %v1026_v30 = vpop.xlane.xlu1 %1025 }
 0x239   : > { %7531 = vrsqrt.f32 %v1193_v62  ;;  %v1162_v56 = vmul.f32 0.001953125, %v1026_v30  ;;  %v12872_v62 = vld [vmem:[#allocation105_spill] sm:$0xff] }
 0x23a   : > { %v1403_v51 = vmul.f32 %v10023_v39, %v1253_v20  ;;  %v1404_v43 = vmul.f32 %v10025_v4, %v1254_v38  ;;  %v1405_v1 = vmul.f32 %v10027_v25, %v1255_v53  ;;  %v1406_v61 = vmul.f32 %v10029_v33, %v1256_v46  ;;  %v12873_v20 = vld [vmem:[#allocation106_spill] sm:$0xff]  ;;  %v12874_v38 = vld [vmem:[#allocation107_spill] sm:$0xff] }
 0x23b   : > { %v7526_v28 = vpop.eup %7525 }
 0x23c   : > { %v7528_v37 = vpop.eup %7527  ;;  %v1031_v6 = vpop.xlane.xlu0 %1030  ;;  %v1261_v30 = vmul.f32 %v7526_v28, %v12871_v40  ;;  %v1262_v41 = vmul.f32 %v7526_v28, %v12872_v62  ;;  %v1263_v47 = vmul.f32 %v7526_v28, %v12873_v20  ;;  %v1264_v26 = vmul.f32 %v7526_v28, %v12874_v38 }
 0x23d   : > { %v1257_v60 = vmul.f32 %v7528_v37, %v9286_v10  ;;  %v1258_v34 = vmul.f32 %v7528_v37, %v9289_v14  ;;  %v1259_v36 = vmul.f32 %v7528_v37, %v9292_v12  ;;  %v1260_v18 = vmul.f32 %v7528_v37, %v9295_v45 }
 0x23e   : > { %v1553_v12 = vadd.f32 %v10035_v57, %v1403_v51  ;;  %v1554_v45 = vadd.f32 %v10037_v19, %v1404_v43  ;;  %v1555_v37 = vadd.f32 %v10039_v52, %v1405_v1  ;;  %v1556_v40 = vadd.f32 %v10041_v50, %v1406_v61 }
 0x23f   : > { %v1407_v53 = vmul.f32 %v10023_v39, %v1257_v60  ;;  %v1408_v46 = vmul.f32 %v10025_v4, %v1258_v34  ;;  %v1409_v10 = vmul.f32 %v10027_v25, %v1259_v36  ;;  %v1410_v14 = vmul.f32 %v10029_v33, %v1260_v18 }
 0x240   : > { %v1036_v62 = vpop.xlane.xlu1 %1035  ;;  %v7530_v20 = vpop.eup %7529  ;;  %v1411_v18 = vmul.f32 %v10023_v39, %v1261_v30  ;;  %v1412_v51 = vmul.f32 %v10025_v4, %v1262_v41  ;;  %v1413_v43 = vmul.f32 %v10027_v25, %v1263_v47  ;;  %v1414_v1 = vmul.f32 %v10029_v33, %v1264_v26 }
 0x241   : > { %v1557_v28 = vadd.f32 %v10035_v57, %v1407_v53  ;;  %v1558_v60 = vadd.f32 %v10037_v19, %v1408_v46  ;;  %v1559_v34 = vadd.f32 %v10039_v52, %v1409_v10  ;;  %v1560_v36 = vadd.f32 %v10041_v50, %v1410_v14 }
 0x242   : > { %v1265_v53 = vmul.f32 %v7530_v20, %v9276_v8  ;;  %v1266_v46 = vmul.f32 %v7530_v20, %v9279_v42  ;;  %v1267_v10 = vmul.f32 %v7530_v20, %v9298_v0  ;;  %v1268_v14 = vmul.f32 %v7530_v20, %v9323_v5 }
 0x243   : > { %v1681_v61 = vpack.c.bf16 %v1557_v28, %v1553_v12  ;;  %v1682_v23 = vpack.c.bf16 %v1558_v60, %v1554_v45  ;;  %v1683_v58 = vpack.c.bf16 %v1559_v34, %v1555_v37  ;;  %v1684_v55 = vpack.c.bf16 %v1560_v36, %v1556_v40  ;;  %v7532_v30 = vpop.eup %7531 }
 0x244   : > { %v1041_v38 = vpop.xlane.xlu0 %1040  ;;  %v1194_v41 = vadd.f32 1e-05, %v1162_v56  ;;  %v1415_v26 = vmul.f32 %v10023_v39, %v1265_v53  ;;  %v1416_v47 = vmul.f32 %v10025_v4, %v1266_v46  ;;  %v1417_v12 = vmul.f32 %v10027_v25, %v1267_v10 }
 0x245   : > { %1745 = vst [vmem:[#allocation2] sm:$0xff] %v1681_v61  ;;  %1746 = vst [vmem:[#allocation2 + $0x8] sm:$0xff] %v1682_v23  ;;  %v1418_v8 = vmul.f32 %v10029_v33, %v1268_v14  ;;  %v1561_v42 = vadd.f32 %v10035_v57, %v1411_v18  ;;  %v1562_v0 = vadd.f32 %v10037_v19, %v1412_v51  ;;  %v1163_v36 = vmul.f32 0.001953125, %v1031_v6 }
 0x246   : > { %1747 = vst [vmem:[#allocation2 + $0x10] sm:$0xff] %v1683_v58  ;;  %1748 = vst [vmem:[#allocation2 + $0x18] sm:$0xff] %v1684_v55  ;;  %v1563_v5 = vadd.f32 %v10039_v52, %v1413_v43  ;;  %v1564_v23 = vadd.f32 %v10041_v50, %v1414_v1  ;;  %v1565_v58 = vadd.f32 %v10035_v57, %v1415_v26  ;;  %7533 = vrsqrt.f32 %v1194_v41 }
 0x247   : > { %v1566_v55 = vadd.f32 %v10037_v19, %v1416_v47  ;;  %v1567_v56 = vadd.f32 %v10039_v52, %v1417_v12  ;;  %v1568_v37 = vadd.f32 %v10041_v50, %v1418_v8  ;;  %v1164_v18 = vmul.f32 0.001953125, %v1036_v62  ;;  %v12875_v8 = vld [vmem:[#allocation118_spill] sm:$0xff] }
 0x248   : > { %v1046_v45 = vpop.xlane.xlu1 %1045  ;;  %v1685_v20 = vpack.c.bf16 %v1565_v58, %v1561_v42  ;;  %v1165_v51 = vmul.f32 0.001953125, %v1041_v38  ;;  %v1195_v53 = vadd.f32 1e-05, %v1163_v36  ;;  %v1269_v10 = vmul.f32 %v7532_v30, %v9313_v13  ;;  %v12878_v36 = vld [vmem:[#allocation121_spill] sm:$0xff] }
 0x249   : > { %v1686_v28 = vpack.c.bf16 %v1566_v55, %v1562_v0  ;;  %v1687_v60 = vpack.c.bf16 %v1567_v56, %v1563_v5  ;;  %v1688_v34 = vpack.c.bf16 %v1568_v37, %v1564_v23  ;;  %v1166_v43 = vmul.f32 0.001953125, %v1046_v45 }
 0x24a   : > { %v1051_v40 = vpop.xlane.xlu0 %1050  ;;  %1749 = vst [vmem:[#allocation2 + $0x20] sm:$0xff] %v1685_v20  ;;  %v1196_v46 = vadd.f32 1e-05, %v1164_v18  ;;  %v1197_v14 = vadd.f32 1e-05, %v1165_v51  ;;  %v10089_v12 = vmul.f32 %v7532_v30, %v9316_v24  ;;  %7535 = vrsqrt.f32 %v1195_v53  ;;  %v12876_v20 = vld [vmem:[#allocation112_spill] sm:$0xff] }
 0x24b   : > { %1750 = vst [vmem:[#allocation2 + $0x28] sm:$0xff] %v1686_v28  ;;  %1751 = vst [vmem:[#allocation2 + $0x30] sm:$0xff] %v1687_v60  ;;  %v1167_v1 = vmul.f32 0.001953125, %v1051_v40  ;;  %v10091_v6 = vadd.f32 1e-05, %v1166_v43  ;;  %v10096_v38 = vmul.f32 %v7532_v30, %v9348_v54  ;;  %v10101_v45 = vmul.f32 %v7532_v30, %v12875_v8  ;;  %v12877_v60 = vld [vmem:[#allocation113_spill] sm:$0xff] }
 0x24c   : > { %1752 = vst [vmem:[#allocation2 + $0x38] sm:$0xff] %v1688_v34  ;;  %7537 = vrsqrt.f32 %v1196_v46  ;;  %v10106_v42 = vmul.f32 %v10023_v39, %v1269_v10  ;;  %v8523_v0 = vmov 0.0   ;;  %v1420_v54 = vmul.f32 %v10025_v4, %v10089_v12  ;;  %v12879_v51 = vld [vmem:[#allocation124_spill] sm:$0xff] }
 0x24d   : > { %v10098_v41 = vadd.f32 1e-05, %v1167_v1  ;;  %7539 = vrsqrt.f32 %v1197_v14  ;;  %1809 = vst [vmem:[#allocation3] sm:$0xff] %v8523_v0  ;;  %1810 = vst [vmem:[#allocation3 + $0x8] sm:$0xff] %v8523_v0  ;;  %v1421_v23 = vmul.f32 %v10027_v25, %v10096_v38  ;;  %v1422_v56 = vmul.f32 %v10029_v33, %v10101_v45 }
 0x24e   : > { %v1056_v61 = vpop.xlane.xlu1 %1055  ;;  %1811 = vst [vmem:[#allocation3 + $0x10] sm:$0xff] %v8523_v0  ;;  %1812 = vst [vmem:[#allocation3 + $0x18] sm:$0xff] %v8523_v0  ;;  %7541 = vrsqrt.f32 %v10091_v6  ;;  %v1569_v1 = vadd.f32 %v10035_v57, %v10106_v42 }
 0x24f   : > { %v1168_v26 = vmul.f32 0.001953125, %v1056_v61  ;;  %1813 = vst [vmem:[#allocation3 + $0x20] sm:$0xff] %v8523_v0  ;;  %1814 = vst [vmem:[#allocation3 + $0x28] sm:$0xff] %v8523_v0  ;;  %7543 = vrsqrt.f32 %v10098_v41  ;;  %v1570_v61 = vadd.f32 %v10037_v19, %v1420_v54  ;;  %v1572_v12 = vadd.f32 %v10041_v50, %v1422_v56  ;;  %v12882_v54 = vld [vmem:[#allocation125_spill] sm:$0xff] }
 0x250   : > { %1815 = vst [vmem:[#allocation3 + $0x30] sm:$0xff] %v8523_v0  ;;  %1816 = vst [vmem:[#allocation3 + $0x38] sm:$0xff] %v8523_v0  ;;  %v7534_v55 = vpop.eup %7533 }
 0x251   : > { %v1061_v47 = vpop.xlane.xlu0 %1060  ;;  %v10103_v13 = vadd.f32 1e-05, %v1168_v26  ;;  %1817 = vst [vmem:[#allocation3 + $0x40] sm:$0xff] %v8523_v0  ;;  %1818 = vst [vmem:[#allocation3 + $0x48] sm:$0xff] %v8523_v0  ;;  %v1273_v28 = vmul.f32 %v7534_v55, %v12876_v20  ;;  %v1274_v34 = vmul.f32 %v7534_v55, %v12877_v60  ;;  %v1275_v18 = vmul.f32 %v7534_v55, %v12878_v36 }
 0x252   : > { %v10093_v62 = vmul.f32 0.001953125, %v1061_v47  ;;  %1819 = vst [vmem:[#allocation3 + $0x50] sm:$0xff] %v8523_v0  ;;  %1820 = vst [vmem:[#allocation3 + $0x58] sm:$0xff] %v8523_v0  ;;  %v1276_v43 = vmul.f32 %v7534_v55, %v12879_v51  ;;  %v1571_v47 = vadd.f32 %v10039_v52, %v1421_v23  ;;  %v12884_v51 = vld [vmem:[#allocation114_spill] sm:$0xff] }
 0x253   : > { %1821 = vst [vmem:[#allocation3 + $0x60] sm:$0xff] %v8523_v0  ;;  %1822 = vst [vmem:[#allocation3 + $0x68] sm:$0xff] %v8523_v0  ;;  %7545 = vrsqrt.f32 %v10103_v13  ;;  %v1423_v53 = vmul.f32 %v10023_v39, %v1273_v28  ;;  %v1424_v46 = vmul.f32 %v10025_v4, %v1274_v34  ;;  %v1425_v10 = vmul.f32 %v10027_v25, %v1275_v18  ;;  %v12880_v13 = vld [vmem:[#allocation116_spill] sm:$0xff] }
 0x254   : > { %v10108_v24 = vpop.xlane.xlu1 %1065  ;;  %1823 = vst [vmem:[#allocation3 + $0x70] sm:$0xff] %v8523_v0  ;;  %1824 = vst [vmem:[#allocation3 + $0x78] sm:$0xff] %v8523_v0  ;;  %v1201_v30 = vadd.f32 1e-05, %v10093_v62  ;;  %v1426_v14 = vmul.f32 %v10029_v33, %v1276_v43  ;;  %v7536_v26 = vpop.eup %7535 }
 0x255   : > { %1825 = vst [vmem:[#allocation3 + $0x80] sm:$0xff] %v8523_v0  ;;  %1826 = vst [vmem:[#allocation3 + $0x88] sm:$0xff] %v8523_v0  ;;  %v1170_v5 = vmul.f32 0.001953125, %v10108_v24  ;;  %v1573_v62 = vadd.f32 %v10035_v57, %v1423_v53  ;;  %v1574_v38 = vadd.f32 %v10037_v19, %v1424_v46  ;;  %v1575_v41 = vadd.f32 %v10039_v52, %v1425_v10  ;;  %v12881_v24 = vld [vmem:[#allocation117_spill] sm:$0xff]  ;;  %v12886_v53 = vld [vmem:[#allocation131_spill] sm:$0xff] }
 0x256   : > { %1827 = vst [vmem:[#allocation3 + $0x90] sm:$0xff] %v8523_v0  ;;  %1828 = vst [vmem:[#allocation3 + $0x98] sm:$0xff] %v8523_v0  ;;  %7547 = vrsqrt.f32 %v1201_v30  ;;  %v1576_v8 = vadd.f32 %v10041_v50, %v1426_v14  ;;  %v7538_v45 = vpop.eup %7537  ;;  %v1277_v42 = vmul.f32 %v7536_v26, %v12880_v13  ;;  %v1279_v30 = vmul.f32 %v7536_v26, %v12882_v54  ;;  %v12887_v10 = vld [vmem:[#allocation26_spill] sm:$0xff]  ;;  %v12889_v54 = vld [vmem:[#allocation123_spill] sm:$0xff] }
 0x257   : > { %1829 = vst [vmem:[#allocation3 + $0xa0] sm:$0xff] %v8523_v0  ;;  %1830 = vst [vmem:[#allocation3 + $0xa8] sm:$0xff] %v8523_v0  ;;  %v1071_v58 = vpop.xlane.xlu0 %1070  ;;  %v1202_v37 = vadd.f32 1e-05, %v1170_v5  ;;  %v12883_v5 = vld [vmem:[#allocation130_spill] sm:$0xff]  ;;  %v1689_v55 = vpack.c.bf16 %v1573_v62, %v1569_v1  ;;  %v1690_v56 = vpack.c.bf16 %v1574_v38, %v1570_v61  ;;  %v1281_v43 = vmul.f32 %v7538_v45, %v12884_v51  ;;  %v12885_v1 = vld [vmem:[#allocation115_spill] sm:$0xff] }
 0x258   : > { %1831 = vst [vmem:[#allocation3 + $0xb0] sm:$0xff] %v8523_v0  ;;  %1832 = vst [vmem:[#allocation3 + $0xb8] sm:$0xff] %v8523_v0  ;;  %v1171_v40 = vmul.f32 0.001953125, %v1071_v58  ;;  %v1280_v23 = vmul.f32 %v7536_v26, %v12883_v5  ;;  %v7540_v58 = vpop.eup %7539  ;;  %v1427_v28 = vmul.f32 %v10023_v39, %v1277_v42  ;;  %v1429_v34 = vmul.f32 %v10027_v25, %v1279_v30  ;;  %v12890_v5 = vld [vmem:[#allocation28_spill] sm:$0xff] }
 0x259   : > { %1833 = vst [vmem:[#allocation3 + $0xc0] sm:$0xff] %v8523_v0  ;;  %1834 = vst [vmem:[#allocation3 + $0xc8] sm:$0xff] %v8523_v0  ;;  %7549 = vrsqrt.f32 %v1202_v37  ;;  %v1691_v37 = vpack.c.bf16 %v1575_v41, %v1571_v47  ;;  %v7542_v20 = vpop.eup %7541  ;;  %v1282_v61 = vmul.f32 %v7538_v45, %v12885_v1  ;;  %v1283_v46 = vmul.f32 %v7538_v45, %v12886_v53 }
 0x25a   : > { %1835 = vst [vmem:[#allocation3 + $0xd0] sm:$0xff] %v8523_v0  ;;  %1836 = vst [vmem:[#allocation3 + $0xd8] sm:$0xff] %v8523_v0  ;;  %v1203_v6 = vadd.f32 1e-05, %v1171_v40  ;;  %v1692_v40 = vpack.c.bf16 %v1576_v8, %v1572_v12  ;;  %v1430_v36 = vmul.f32 %v10029_v33, %v1280_v23  ;;  %v7544_v18 = vpop.eup %7543  ;;  %v1284_v14 = vmul.f32 %v7538_v45, %v12887_v10  ;;  %v12888_v45 = vld [vmem:[#allocation122_spill] sm:$0xff] }
 0x25b   : > { %1837 = vst [vmem:[#allocation3 + $0xe0] sm:$0xff] %v8523_v0  ;;  %1838 = vst [vmem:[#allocation3 + $0xe8] sm:$0xff] %v8523_v0  ;;  %v1577_v47 = vadd.f32 %v10035_v57, %v1427_v28  ;;  %v1579_v62 = vadd.f32 %v10039_v52, %v1429_v34  ;;  %v1431_v41 = vmul.f32 %v10023_v39, %v1281_v43  ;;  %v10298_v34 = vpop.xlane.xlu1 %1075 }
 0x25c   : > { %1839 = vst [vmem:[#allocation3 + $0xf0] sm:$0xff] %v8523_v0  ;;  %1840 = vst [vmem:[#allocation3 + $0xf8] sm:$0xff] %v8523_v0  ;;  %v1580_v38 = vadd.f32 %v10041_v50, %v1430_v36  ;;  %v1432_v8 = vmul.f32 %v10025_v4, %v1282_v61  ;;  %v1433_v13 = vmul.f32 %v10027_v25, %v1283_v46  ;;  %7551 = vrsqrt.f32 %v1203_v6 }
 0x25d   : > { %1841 = vst [vmem:[#allocation3 + $0x100] sm:$0xff] %v8523_v0  ;;  %1842 = vst [vmem:[#allocation3 + $0x108] sm:$0xff] %v8523_v0  ;;  %v1434_v42 = vmul.f32 %v10029_v33, %v1284_v14  ;;  %v1286_v30 = vmul.f32 %v7540_v58, %v12889_v54  ;;  %v1287_v23 = vmul.f32 %v7540_v58, %v12890_v5  ;;  %v10300_v36 = vpop.xlane.xlu0 %1080 }
 0x25e   : > { %1843 = vst [vmem:[#allocation3 + $0x110] sm:$0xff] %v8523_v0  ;;  %1844 = vst [vmem:[#allocation3 + $0x118] sm:$0xff] %v8523_v0  ;;  %v1583_v28 = vadd.f32 %v10039_v52, %v1433_v13  ;;  %v12893_v13 = vld [vmem:[#allocation120_spill] sm:$0xff] }
 0x25f   : > { %1845 = vst [vmem:[#allocation3 + $0x120] sm:$0xff] %v8523_v0  ;;  %1846 = vst [vmem:[#allocation3 + $0x128] sm:$0xff] %v8523_v0  ;;  %v1436_v46 = vmul.f32 %v10025_v4, %v1286_v30  ;;  %v1437_v10 = vmul.f32 %v10027_v25, %v1287_v23  ;;  %v1290_v6 = vmul.f32 %v7542_v20, %v12893_v13  ;;  %v12898_v30 = vld [vmem:[#allocation32_spill] sm:$0xff] }
 0x260   : > { %1847 = vst [vmem:[#allocation3 + $0x130] sm:$0xff] %v8523_v0  ;;  %1848 = vst [vmem:[#allocation3 + $0x138] sm:$0xff] %v8523_v0  ;;  %v1695_v61 = vpack.c.bf16 %v1583_v28, %v1579_v62  ;;  %v12895_v62 = vld [vmem:[#allocation29_spill] sm:$0xff]  ;;  %v1295_v5 = vmul.f32 %v7544_v18, %v12898_v30  ;;  %v12899_v23 = vld [vmem:[#allocation36_spill] sm:$0xff] }
 0x261   : > { %1849 = vst [vmem:[#allocation3 + $0x140] sm:$0xff] %v8523_v0  ;;  %1850 = vst [vmem:[#allocation3 + $0x148] sm:$0xff] %v8523_v0  ;;  %v12901_v30 = vld [vmem:[#allocation127_spill] sm:$0xff] }
 0x262   : > { %1851 = vst [vmem:[#allocation3 + $0x150] sm:$0xff] %v8523_v0  ;;  %1852 = vst [vmem:[#allocation3 + $0x158] sm:$0xff] %v8523_v0 }
 0x263   : > { %1853 = vst [vmem:[#allocation3 + $0x160] sm:$0xff] %v8523_v0  ;;  %1854 = vst [vmem:[#allocation3 + $0x168] sm:$0xff] %v8523_v0 }
 0x264   : > { %1855 = vst [vmem:[#allocation3 + $0x170] sm:$0xff] %v8523_v0  ;;  %1856 = vst [vmem:[#allocation3 + $0x178] sm:$0xff] %v8523_v0 }
 0x265   : > { %1857 = vst [vmem:[#allocation3 + $0x180] sm:$0xff] %v8523_v0  ;;  %1858 = vst [vmem:[#allocation3 + $0x188] sm:$0xff] %v8523_v0 }
 0x266   : > { %1859 = vst [vmem:[#allocation3 + $0x190] sm:$0xff] %v8523_v0  ;;  %1860 = vst [vmem:[#allocation3 + $0x198] sm:$0xff] %v8523_v0 }
 0x267   : > { %1861 = vst [vmem:[#allocation3 + $0x1a0] sm:$0xff] %v8523_v0  ;;  %1862 = vst [vmem:[#allocation3 + $0x1a8] sm:$0xff] %v8523_v0 }
 0x268   : > { %1863 = vst [vmem:[#allocation3 + $0x1b0] sm:$0xff] %v8523_v0  ;;  %1864 = vst [vmem:[#allocation3 + $0x1b8] sm:$0xff] %v8523_v0 }
 0x269   : > { %1865 = vst [vmem:[#allocation3 + $0x1c0] sm:$0xff] %v8523_v0  ;;  %1866 = vst [vmem:[#allocation3 + $0x1c8] sm:$0xff] %v8523_v0 }
 0x26a   : > { %1867 = vst [vmem:[#allocation3 + $0x1d0] sm:$0xff] %v8523_v0  ;;  %1868 = vst [vmem:[#allocation3 + $0x1d8] sm:$0xff] %v8523_v0 }
 0x26b   : > { %1869 = vst [vmem:[#allocation3 + $0x1e0] sm:$0xff] %v8523_v0  ;;  %1870 = vst [vmem:[#allocation3 + $0x1e8] sm:$0xff] %v8523_v0 }
 0x26c   : > { %1871 = vst [vmem:[#allocation3 + $0x1f0] sm:$0xff] %v8523_v0  ;;  %1872 = vst [vmem:[#allocation3 + $0x1f8] sm:$0xff] %v8523_v0 }
 0x26d   : > { %1873 = vst [vmem:[#allocation3 + $0x200] sm:$0xff] %v8523_v0  ;;  %1874 = vst [vmem:[#allocation3 + $0x208] sm:$0xff] %v8523_v0 }
 0x26e   : > { %1875 = vst [vmem:[#allocation3 + $0x210] sm:$0xff] %v8523_v0  ;;  %1876 = vst [vmem:[#allocation3 + $0x218] sm:$0xff] %v8523_v0 }
 0x26f   : > { %1877 = vst [vmem:[#allocation3 + $0x220] sm:$0xff] %v8523_v0  ;;  %1878 = vst [vmem:[#allocation3 + $0x228] sm:$0xff] %v8523_v0 }
 0x270   : > { %1879 = vst [vmem:[#allocation3 + $0x230] sm:$0xff] %v8523_v0  ;;  %1880 = vst [vmem:[#allocation3 + $0x238] sm:$0xff] %v8523_v0 }
 0x271   : > { %1881 = vst [vmem:[#allocation3 + $0x240] sm:$0xff] %v8523_v0  ;;  %1882 = vst [vmem:[#allocation3 + $0x248] sm:$0xff] %v8523_v0 }
 0x272   : > { %1883 = vst [vmem:[#allocation3 + $0x250] sm:$0xff] %v8523_v0  ;;  %1884 = vst [vmem:[#allocation3 + $0x258] sm:$0xff] %v8523_v0 }
 0x273   : > { %1885 = vst [vmem:[#allocation3 + $0x260] sm:$0xff] %v8523_v0  ;;  %1886 = vst [vmem:[#allocation3 + $0x268] sm:$0xff] %v8523_v0 }
 0x274   : > { %1887 = vst [vmem:[#allocation3 + $0x270] sm:$0xff] %v8523_v0  ;;  %1888 = vst [vmem:[#allocation3 + $0x278] sm:$0xff] %v8523_v0 }
 0x275   : > { %1889 = vst [vmem:[#allocation3 + $0x280] sm:$0xff] %v8523_v0  ;;  %1890 = vst [vmem:[#allocation3 + $0x288] sm:$0xff] %v8523_v0 }
 0x276   : > { %1891 = vst [vmem:[#allocation3 + $0x290] sm:$0xff] %v8523_v0  ;;  %1892 = vst [vmem:[#allocation3 + $0x298] sm:$0xff] %v8523_v0 }
 0x277   : > { %1893 = vst [vmem:[#allocation3 + $0x2a0] sm:$0xff] %v8523_v0  ;;  %1894 = vst [vmem:[#allocation3 + $0x2a8] sm:$0xff] %v8523_v0 }
 0x278   : > { %1895 = vst [vmem:[#allocation3 + $0x2b0] sm:$0xff] %v8523_v0  ;;  %1896 = vst [vmem:[#allocation3 + $0x2b8] sm:$0xff] %v8523_v0 }
 0x279   : > { %1897 = vst [vmem:[#allocation3 + $0x2c0] sm:$0xff] %v8523_v0  ;;  %1898 = vst [vmem:[#allocation3 + $0x2c8] sm:$0xff] %v8523_v0 }
 0x27a   : > { %1899 = vst [vmem:[#allocation3 + $0x2d0] sm:$0xff] %v8523_v0  ;;  %1900 = vst [vmem:[#allocation3 + $0x2d8] sm:$0xff] %v8523_v0 }
 0x27b   : > { %1901 = vst [vmem:[#allocation3 + $0x2e0] sm:$0xff] %v8523_v0  ;;  %1902 = vst [vmem:[#allocation3 + $0x2e8] sm:$0xff] %v8523_v0 }
 0x27c   : > { %1903 = vst [vmem:[#allocation3 + $0x2f0] sm:$0xff] %v8523_v0  ;;  %1904 = vst [vmem:[#allocation3 + $0x2f8] sm:$0xff] %v8523_v0 }
 0x27d   : > { %1905 = vst [vmem:[#allocation3 + $0x300] sm:$0xff] %v8523_v0  ;;  %1906 = vst [vmem:[#allocation3 + $0x308] sm:$0xff] %v8523_v0 }
 0x27e   : > { %1907 = vst [vmem:[#allocation3 + $0x310] sm:$0xff] %v8523_v0  ;;  %1908 = vst [vmem:[#allocation3 + $0x318] sm:$0xff] %v8523_v0 }
 0x27f   : > { %1909 = vst [vmem:[#allocation3 + $0x320] sm:$0xff] %v8523_v0  ;;  %1910 = vst [vmem:[#allocation3 + $0x328] sm:$0xff] %v8523_v0 }
 0x280   : > { %1911 = vst [vmem:[#allocation3 + $0x330] sm:$0xff] %v8523_v0  ;;  %1912 = vst [vmem:[#allocation3 + $0x338] sm:$0xff] %v8523_v0 }
 0x281   : > { %1913 = vst [vmem:[#allocation3 + $0x340] sm:$0xff] %v8523_v0  ;;  %1914 = vst [vmem:[#allocation3 + $0x348] sm:$0xff] %v8523_v0 }
 0x282   : > { %1915 = vst [vmem:[#allocation3 + $0x350] sm:$0xff] %v8523_v0  ;;  %1916 = vst [vmem:[#allocation3 + $0x358] sm:$0xff] %v8523_v0 }
 0x283   : > { %1917 = vst [vmem:[#allocation3 + $0x360] sm:$0xff] %v8523_v0  ;;  %1918 = vst [vmem:[#allocation3 + $0x368] sm:$0xff] %v8523_v0 }
 0x284   : > { %1919 = vst [vmem:[#allocation3 + $0x370] sm:$0xff] %v8523_v0  ;;  %1920 = vst [vmem:[#allocation3 + $0x378] sm:$0xff] %v8523_v0 }
 0x285   : > { %1921 = vst [vmem:[#allocation3 + $0x380] sm:$0xff] %v8523_v0  ;;  %1922 = vst [vmem:[#allocation3 + $0x388] sm:$0xff] %v8523_v0 }
 0x286   : > { %1923 = vst [vmem:[#allocation3 + $0x390] sm:$0xff] %v8523_v0  ;;  %1924 = vst [vmem:[#allocation3 + $0x398] sm:$0xff] %v8523_v0 }
 0x287   : > { %1925 = vst [vmem:[#allocation3 + $0x3a0] sm:$0xff] %v8523_v0  ;;  %1926 = vst [vmem:[#allocation3 + $0x3a8] sm:$0xff] %v8523_v0 }
 0x288   : > { %1927 = vst [vmem:[#allocation3 + $0x3b0] sm:$0xff] %v8523_v0  ;;  %1928 = vst [vmem:[#allocation3 + $0x3b8] sm:$0xff] %v8523_v0 }
 0x289   : > { %1929 = vst [vmem:[#allocation3 + $0x3c0] sm:$0xff] %v8523_v0  ;;  %1930 = vst [vmem:[#allocation3 + $0x3c8] sm:$0xff] %v8523_v0 }
 0x28a   : > { %1931 = vst [vmem:[#allocation3 + $0x3d0] sm:$0xff] %v8523_v0  ;;  %1932 = vst [vmem:[#allocation3 + $0x3d8] sm:$0xff] %v8523_v0 }
 0x28b   : > { %1933 = vst [vmem:[#allocation3 + $0x3e0] sm:$0xff] %v8523_v0  ;;  %1934 = vst [vmem:[#allocation3 + $0x3e8] sm:$0xff] %v8523_v0 }
 0x28c   : > { %1935 = vst [vmem:[#allocation3 + $0x3f0] sm:$0xff] %v8523_v0  ;;  %1936 = vst [vmem:[#allocation3 + $0x3f8] sm:$0xff] %v8523_v0  ;;  %v1278_v0 = vmul.f32 %v7536_v26, %v12881_v24  ;;  %v10278_v26 = vpop.eup %7545 }
 0x28d   : > { %1753 = vst [vmem:[#allocation2 + $0x40] sm:$0xff] %v1689_v55  ;;  %1754 = vst [vmem:[#allocation2 + $0x48] sm:$0xff] %v1690_v56  ;;  %v10288_v24 = vpop.eup %7547  ;;  %v12891_v55 = vld [vmem:[#allocation30_spill] sm:$0xff] }
 0x28e   : > { %v1428_v60 = vmul.f32 %v10025_v4, %v1278_v0  ;;  %1755 = vst [vmem:[#allocation2 + $0x50] sm:$0xff] %v1691_v37  ;;  %1756 = vst [vmem:[#allocation2 + $0x58] sm:$0xff] %v1692_v40  ;;  %v1285_v0 = vmul.f32 %v7540_v58, %v12888_v45  ;;  %v1288_v56 = vmul.f32 %v7540_v58, %v12891_v55  ;;  %v10302_v51 = vpop.eup %7549 }
 0x28f   : > { %v1581_v37 = vadd.f32 %v10035_v57, %v1431_v41  ;;  %v1582_v40 = vadd.f32 %v10037_v19, %v1432_v8  ;;  %1759 = vst [vmem:[#allocation2 + $0x70] sm:$0xff] %v1695_v61  ;;  %v12892_v41 = vld [vmem:[#allocation119_spill] sm:$0xff]  ;;  %v1296_v55 = vmul.f32 %v7544_v18, %v12899_v23  ;;  %v1587_v61 = vadd.f32 %v10039_v52, %v1437_v10 }
 0x290   : > { %v1578_v12 = vadd.f32 %v10037_v19, %v1428_v60  ;;  %v1584_v60 = vadd.f32 %v10041_v50, %v1434_v42  ;;  %v1435_v58 = vmul.f32 %v10023_v39, %v1285_v0  ;;  %v1438_v14 = vmul.f32 %v10029_v33, %v1288_v56  ;;  %v12896_v42 = vld [vmem:[#allocation128_spill] sm:$0xff]  ;;  %v12897_v0 = vld [vmem:[#allocation129_spill] sm:$0xff] }
 0x291   : > { %v1693_v43 = vpack.c.bf16 %v1581_v37, %v1577_v47  ;;  %v1289_v8 = vmul.f32 %v7542_v20, %v12892_v41  ;;  %v12894_v47 = vld [vmem:[#allocation27_spill] sm:$0xff]  ;;  %v1293_v45 = vmul.f32 %v7544_v18, %v12896_v42  ;;  %v1294_v54 = vmul.f32 %v7544_v18, %v12897_v0  ;;  %v12900_v42 = vld [vmem:[#allocation126_spill] sm:$0xff] }
 0x292   : > { %v1694_v1 = vpack.c.bf16 %v1582_v40, %v1578_v12  ;;  %v1696_v53 = vpack.c.bf16 %v1584_v60, %v1580_v38  ;;  %v1291_v12 = vmul.f32 %v7542_v20, %v12894_v47  ;;  %v1292_v38 = vmul.f32 %v7542_v20, %v12895_v62  ;;  %v10320_v60 = vpop.xlane.xlu1 %1085 }
 0x293   : > { %1757 = vst [vmem:[#allocation2 + $0x60] sm:$0xff] %v1693_v43  ;;  %v1439_v56 = vmul.f32 %v10023_v39, %v1289_v8  ;;  %v1440_v37 = vmul.f32 %v10025_v4, %v1290_v6  ;;  %v10322_v43 = vpop.xlane.xlu0 %1090  ;;  %v1585_v20 = vadd.f32 %v10035_v57, %v1435_v58  ;;  %v1588_v18 = vadd.f32 %v10041_v50, %v1438_v14 }
 0x294   : > { %1758 = vst [vmem:[#allocation2 + $0x68] sm:$0xff] %v1694_v1  ;;  %1760 = vst [vmem:[#allocation2 + $0x78] sm:$0xff] %v1696_v53  ;;  %v1441_v40 = vmul.f32 %v10027_v25, %v1291_v12  ;;  %v1442_v28 = vmul.f32 %v10029_v33, %v1292_v38  ;;  %v1586_v1 = vadd.f32 %v10037_v19, %v1436_v46  ;;  %v10336_v38 = vpop.eup %7551 }
 0x295   : > { %v1589_v53 = vadd.f32 %v10035_v57, %v1439_v56  ;;  %v1590_v41 = vadd.f32 %v10037_v19, %v1440_v37  ;;  %v1443_v6 = vmul.f32 %v10023_v39, %v1293_v45  ;;  %v1444_v47 = vmul.f32 %v10025_v4, %v1294_v54  ;;  %v12902_v56 = vld [vmem:[#allocation31_spill] sm:$0xff] }
 0x296   : > { %v1591_v8 = vadd.f32 %v10039_v52, %v1441_v40  ;;  %v1592_v13 = vadd.f32 %v10041_v50, %v1442_v28  ;;  %v1445_v58 = vmul.f32 %v10027_v25, %v1295_v5  ;;  %v1446_v46 = vmul.f32 %v10029_v33, %v1296_v55  ;;  %v12903_v54 = vld [vmem:[#allocation35_spill] sm:$0xff]  ;;  %v12904_v55 = vld [vmem:[#allocation33_spill] sm:$0xff]  ;;  %v12905_v40 = vld [vmem:[#allocation34_spill] sm:$0xff] }
 0x297   : > { %v1697_v12 = vpack.c.bf16 %v1589_v53, %v1585_v20  ;;  %v1698_v10 = vpack.c.bf16 %v1590_v41, %v1586_v1  ;;  %v1297_v0 = vmul.f32 %v10278_v26, %v12900_v42  ;;  %v1298_v23 = vmul.f32 %v10278_v26, %v12901_v30  ;;  %v12906_v20 = vld [vmem:[#allocation40_spill] sm:$0xff]  ;;  %v1096_v53 = vpop.xlane.xlu1 %1095  ;;  %v1101_v41 = vpop.xlane.xlu0 %1100 }
 0x298   : > { %v1699_v62 = vpack.c.bf16 %v1591_v8, %v1587_v61  ;;  %v1700_v14 = vpack.c.bf16 %v1592_v13, %v1588_v18  ;;  %v1299_v45 = vmul.f32 %v10278_v26, %v12902_v56  ;;  %v1300_v5 = vmul.f32 %v10278_v26, %v12903_v54  ;;  %v12907_v61 = vld [vmem:[#allocation44_spill] sm:$0xff] }
 0x299   : > { %1761 = vst [vmem:[#allocation2 + $0x80] sm:$0xff] %v1697_v12  ;;  %1762 = vst [vmem:[#allocation2 + $0x88] sm:$0xff] %v1698_v10  ;;  %v1301_v37 = vmul.f32 %v10288_v24, %v12904_v55  ;;  %v1302_v28 = vmul.f32 %v10288_v24, %v12905_v40  ;;  %v1303_v1 = vmul.f32 %v10288_v24, %v12906_v20  ;;  %v12908_v55 = vld [vmem:[#allocation132_spill] sm:$0xff]  ;;  %v12909_v20 = vld [vmem:[#allocation133_spill] sm:$0xff] }
 0x29a   : > { %1763 = vst [vmem:[#allocation2 + $0x90] sm:$0xff] %v1699_v62  ;;  %1764 = vst [vmem:[#allocation2 + $0x98] sm:$0xff] %v1700_v14  ;;  %v1304_v18 = vmul.f32 %v10288_v24, %v12907_v61  ;;  %v1447_v26 = vmul.f32 %v10023_v39, %v1297_v0  ;;  %v1448_v8 = vmul.f32 %v10025_v4, %v1298_v23 }
 0x29b   : > { %v1449_v13 = vmul.f32 %v10027_v25, %v1299_v45  ;;  %v1450_v12 = vmul.f32 %v10029_v33, %v1300_v5  ;;  %v1593_v10 = vadd.f32 %v10035_v57, %v1443_v6  ;;  %v1594_v62 = vadd.f32 %v10037_v19, %v1444_v47 }
 0x29c   : > { %v1595_v14 = vadd.f32 %v10039_v52, %v1445_v58  ;;  %v1596_v42 = vadd.f32 %v10041_v50, %v1446_v46  ;;  %v1597_v24 = vadd.f32 %v10035_v57, %v1447_v26  ;;  %v1598_v30 = vadd.f32 %v10037_v19, %v1448_v8  ;;  %v12910_v26 = vld [vmem:[#allocation37_spill] sm:$0xff] }
 0x29d   : > { %v1599_v0 = vadd.f32 %v10039_v52, %v1449_v13  ;;  %v1600_v23 = vadd.f32 %v10041_v50, %v1450_v12  ;;  %v1451_v56 = vmul.f32 %v10023_v39, %v1301_v37  ;;  %v1452_v45 = vmul.f32 %v10025_v4, %v1302_v28  ;;  %v12911_v37 = vld [vmem:[#allocation43_spill] sm:$0xff]  ;;  %v1106_v13 = vpop.xlane.xlu1 %1105 }
 0x29e   : > { %v1453_v6 = vmul.f32 %v10027_v25, %v1303_v1  ;;  %v1454_v47 = vmul.f32 %v10029_v33, %v1304_v18  ;;  %v1701_v54 = vpack.c.bf16 %v1597_v24, %v1593_v10  ;;  %v1702_v58 = vpack.c.bf16 %v1598_v30, %v1594_v62  ;;  %v1111_v1 = vpop.xlane.xlu0 %1110 }
 0x29f   : > { %v1703_v5 = vpack.c.bf16 %v1599_v0, %v1595_v14  ;;  %v1704_v46 = vpack.c.bf16 %v1600_v23, %v1596_v42  ;;  %v1305_v40 = vmul.f32 %v10302_v51, %v12908_v55  ;;  %v1306_v61 = vmul.f32 %v10302_v51, %v12909_v20 }
 0x2a0   : > { %v1307_v8 = vmul.f32 %v10302_v51, %v12910_v26  ;;  %v1308_v28 = vmul.f32 %v10302_v51, %v12911_v37  ;;  %1765 = vst [vmem:[#allocation2 + $0xa0] sm:$0xff] %v1701_v54  ;;  %1766 = vst [vmem:[#allocation2 + $0xa8] sm:$0xff] %v1702_v58  ;;  %v1172_v18 = vmul.f32 0.001953125, %v10298_v34  ;;  %v1601_v42 = vadd.f32 %v10035_v57, %v1451_v56 }
 0x2a1   : > { %1767 = vst [vmem:[#allocation2 + $0xb0] sm:$0xff] %v1703_v5  ;;  %1768 = vst [vmem:[#allocation2 + $0xb8] sm:$0xff] %v1704_v46  ;;  %v1455_v12 = vmul.f32 %v10023_v39, %v1305_v40  ;;  %v1456_v10 = vmul.f32 %v10025_v4, %v1306_v61  ;;  %v1602_v51 = vadd.f32 %v10037_v19, %v1452_v45  ;;  %v1116_v40 = vpop.xlane.xlu1 %1115  ;;  %v1173_v45 = vmul.f32 0.001953125, %v10300_v36  ;;  %v12912_v61 = vld [vmem:[#allocation41_spill] sm:$0xff] }
 0x2a2   : > { %v1457_v62 = vmul.f32 %v10027_v25, %v1307_v8  ;;  %v1458_v14 = vmul.f32 %v10029_v33, %v1308_v28  ;;  %v1603_v24 = vadd.f32 %v10039_v52, %v1453_v6  ;;  %v1604_v30 = vadd.f32 %v10041_v50, %v1454_v47  ;;  %v1121_v56 = vpop.xlane.xlu0 %1120 }
 0x2a3   : > { %v1605_v0 = vadd.f32 %v10035_v57, %v1455_v12  ;;  %v1606_v34 = vadd.f32 %v10037_v19, %v1456_v10  ;;  %v1204_v20 = vadd.f32 1e-05, %v1172_v18  ;;  %v1174_v6 = vmul.f32 0.001953125, %v10320_v60  ;;  %v12913_v18 = vld [vmem:[#allocation42_spill] sm:$0xff] }
 0x2a4   : > { %v1607_v23 = vadd.f32 %v10039_v52, %v1457_v62  ;;  %v1608_v54 = vadd.f32 %v10041_v50, %v1458_v14  ;;  %v1175_v47 = vmul.f32 0.001953125, %v10322_v43  ;;  %v1309_v26 = vmul.f32 %v10336_v38, %v12912_v61  ;;  %v12914_v62 = vld [vmem:[#allocation66_spill] sm:$0xff] }
 0x2a5   : > { %v1705_v58 = vpack.c.bf16 %v1605_v0, %v1601_v42  ;;  %v1706_v5 = vpack.c.bf16 %v1606_v34, %v1602_v51  ;;  %v1176_v8 = vmul.f32 0.001953125, %v1096_v53  ;;  %v1177_v37 = vmul.f32 0.001953125, %v1101_v41  ;;  %v12915_v42 = vld [vmem:[#allocation48_spill] sm:$0xff]  ;;  %v1126_v41 = vpop.xlane.xlu1 %1125 }
 0x2a6   : > { %v1707_v46 = vpack.c.bf16 %v1607_v23, %v1603_v24  ;;  %v1708_v55 = vpack.c.bf16 %v1608_v54, %v1604_v30  ;;  %7553 = vrsqrt.f32 %v1204_v20  ;;  %v1205_v28 = vadd.f32 1e-05, %v1173_v45  ;;  %v1131_v0 = vpop.xlane.xlu0 %1130 }
 0x2a7   : > { %1769 = vst [vmem:[#allocation2 + $0xc0] sm:$0xff] %v1705_v58  ;;  %1770 = vst [vmem:[#allocation2 + $0xc8] sm:$0xff] %v1706_v5  ;;  %v1206_v12 = vadd.f32 1e-05, %v1174_v6  ;;  %v1178_v10 = vmul.f32 0.001953125, %v1106_v13  ;;  %v1310_v36 = vmul.f32 %v10336_v38, %v12913_v18  ;;  %v1311_v60 = vmul.f32 %v10336_v38, %v12914_v62 }
 0x2a8   : > { %1771 = vst [vmem:[#allocation2 + $0xd0] sm:$0xff] %v1707_v46  ;;  %1772 = vst [vmem:[#allocation2 + $0xd8] sm:$0xff] %v1708_v55  ;;  %v1207_v43 = vadd.f32 1e-05, %v1175_v47  ;;  %v1179_v14 = vmul.f32 0.001953125, %v1111_v1  ;;  %v1312_v51 = vmul.f32 %v10336_v38, %v12915_v42  ;;  %7555 = vrsqrt.f32 %v1205_v28  ;;  %v12917_v28 = vld [vmem:[#allocation39_spill] sm:$0xff] }
 0x2a9   : > { %v1208_v24 = vadd.f32 1e-05, %v1176_v8  ;;  %v1180_v30 = vmul.f32 0.001953125, %v1116_v40  ;;  %v1209_v53 = vadd.f32 1e-05, %v1177_v37  ;;  %7557 = vrsqrt.f32 %v1206_v12  ;;  %v1136_v20 = vpop.xlane.xlu1 %1135  ;;  %v12916_v8 = vld [vmem:[#allocation38_spill] sm:$0xff] }
 0x2aa   : > { %v1210_v34 = vadd.f32 1e-05, %v1178_v10  ;;  %v1181_v13 = vmul.f32 0.001953125, %v1121_v56  ;;  %v1459_v23 = vmul.f32 %v10023_v39, %v1309_v26  ;;  %v1460_v54 = vmul.f32 %v10025_v4, %v1310_v36  ;;  %v1141_v45 = vpop.xlane.xlu0 %1140  ;;  %v12918_v10 = vld [vmem:[#allocation52_spill] sm:$0xff]  ;;  %v12919_v36 = vld [vmem:[#allocation45_spill] sm:$0xff] }
 0x2ab   : > { %7559 = vrsqrt.f32 %v1207_v43  ;;  %v1211_v58 = vadd.f32 1e-05, %v1179_v14  ;;  %v1461_v1 = vmul.f32 %v10027_v25, %v1311_v60  ;;  %v1462_v5 = vmul.f32 %v10029_v33, %v1312_v51 }
 0x2ac   : > { %7561 = vrsqrt.f32 %v1208_v24  ;;  %v1212_v38 = vadd.f32 1e-05, %v1180_v30  ;;  %v1213_v46 = vadd.f32 1e-05, %v1181_v13  ;;  %v1182_v55 = vmul.f32 0.001953125, %v1126_v41  ;;  %v12921_v13 = vld [vmem:[#allocation50_spill] sm:$0xff] }
 0x2ad   : > { %7563 = vrsqrt.f32 %v1209_v53  ;;  %v1609_v40 = vadd.f32 %v10035_v57, %v1459_v23  ;;  %v1610_v56 = vadd.f32 %v10037_v19, %v1460_v54  ;;  %v1611_v47 = vadd.f32 %v10039_v52, %v1461_v1  ;;  %v12922_v54 = vld [vmem:[#allocation51_spill] sm:$0xff]  ;;  %v12923_v1 = vld [vmem:[#allocation70_spill] sm:$0xff] }
 0x2ae   : > { %7565 = vrsqrt.f32 %v1210_v34  ;;  %v1612_v61 = vadd.f32 %v10041_v50, %v1462_v5  ;;  %v1183_v26 = vmul.f32 0.001953125, %v1131_v0  ;;  %v1214_v43 = vadd.f32 1e-05, %v1182_v55  ;;  %v12920_v0 = vld [vmem:[#allocation49_spill] sm:$0xff] }
 0x2af   : > { %7567 = vrsqrt.f32 %v1211_v58  ;;  %v1184_v14 = vmul.f32 0.001953125, %v1136_v20  ;;  %v10414_v42 = vmul.f32 0.001953125, %v1141_v45 }
 0x2b0   : > { %v7554_v6 = vpop.eup %7553  ;;  %7569 = vrsqrt.f32 %v1212_v38 }
 0x2b1   : > { %v1313_v37 = vmul.f32 %v7554_v6, %v12916_v8  ;;  %v1314_v12 = vmul.f32 %v7554_v6, %v12917_v28  ;;  %v1315_v18 = vmul.f32 %v7554_v6, %v12918_v10  ;;  %v1316_v62 = vmul.f32 %v7554_v6, %v12919_v36 }
 0x2b2   : > { %v7556_v60 = vpop.eup %7555  ;;  %7571 = vrsqrt.f32 %v1213_v46  ;;  %v10431_v28 = vadd.f32 1e-05, %v1184_v14 }
 0x2b3   : > { %v1463_v51 = vmul.f32 %v10023_v39, %v1313_v37  ;;  %v1464_v24 = vmul.f32 %v10025_v4, %v1314_v12  ;;  %v1465_v30 = vmul.f32 %v10027_v25, %v1315_v18  ;;  %v1466_v53 = vmul.f32 %v10029_v33, %v1316_v62  ;;  %v7558_v41 = vpop.eup %7557 }
 0x2b4   : > { %v1317_v34 = vmul.f32 %v7556_v60, %v12920_v0  ;;  %v1318_v23 = vmul.f32 %v7556_v60, %v12921_v13  ;;  %v1319_v58 = vmul.f32 %v7556_v60, %v12922_v54  ;;  %v1320_v5 = vmul.f32 %v7556_v60, %v12923_v1  ;;  %v12927_v0 = vld [vmem:[#allocation73_spill] sm:$0xff] }
 0x2b5   : > { %v7560_v38 = vpop.eup %7559  ;;  %v1613_v46 = vadd.f32 %v10035_v57, %v1463_v51  ;;  %v1614_v55 = vadd.f32 %v10037_v19, %v1464_v24  ;;  %v1615_v20 = vadd.f32 %v10039_v52, %v1465_v30  ;;  %v1616_v45 = vadd.f32 %v10041_v50, %v1466_v53 }
 0x2b6   : > { %v7562_v6 = vpop.eup %7561  ;;  %v1467_v8 = vmul.f32 %v10023_v39, %v1317_v34  ;;  %7573 = vrsqrt.f32 %v1214_v43  ;;  %v10429_v37 = vadd.f32 1e-05, %v1183_v26  ;;  %v1468_v51 = vmul.f32 %v10025_v4, %v1318_v23  ;;  %v12926_v26 = vld [vmem:[#allocation71_spill] sm:$0xff]  ;;  %v12928_v23 = vld [vmem:[#allocation57_spill] sm:$0xff] }
 0x2b7   : > { %v7564_v12 = vpop.eup %7563  ;;  %v1709_v10 = vpack.c.bf16 %v1613_v46, %v1609_v40  ;;  %v1710_v18 = vpack.c.bf16 %v1614_v55, %v1610_v56  ;;  %v1711_v36 = vpack.c.bf16 %v1615_v20, %v1611_v47  ;;  %v1712_v62 = vpack.c.bf16 %v1616_v45, %v1612_v61  ;;  %v12924_v40 = vld [vmem:[#allocation46_spill] sm:$0xff]  ;;  %v12925_v47 = vld [vmem:[#allocation47_spill] sm:$0xff]  ;;  %v12931_v55 = vld [vmem:[#allocation60_spill] sm:$0xff] }
 0x2b8   : > { %v10433_v60 = vpop.eup %7565  ;;  %v1469_v24 = vmul.f32 %v10027_v25, %v1319_v58  ;;  %v1470_v30 = vmul.f32 %v10029_v33, %v1320_v5  ;;  %v1617_v53 = vadd.f32 %v10035_v57, %v1467_v8  ;;  %v1321_v56 = vmul.f32 %v7558_v41, %v12924_v40  ;;  %v12929_v58 = vld [vmem:[#allocation58_spill] sm:$0xff]  ;;  %v12930_v5 = vld [vmem:[#allocation56_spill] sm:$0xff] }
 0x2b9   : > { %v10439_v43 = vpop.eup %7567  ;;  %1773 = vst [vmem:[#allocation2 + $0xe0] sm:$0xff] %v1709_v10  ;;  %1774 = vst [vmem:[#allocation2 + $0xe8] sm:$0xff] %v1710_v18  ;;  %v1322_v61 = vmul.f32 %v7558_v41, %v12925_v47  ;;  %v1323_v14 = vmul.f32 %v7558_v41, %v12926_v26  ;;  %v1324_v34 = vmul.f32 %v7558_v41, %v12927_v0  ;;  %7575 = vrsqrt.f32 %v10429_v37 }
 0x2ba   : > { %1775 = vst [vmem:[#allocation2 + $0xf0] sm:$0xff] %v1711_v36  ;;  %1776 = vst [vmem:[#allocation2 + $0xf8] sm:$0xff] %v1712_v62  ;;  %v10445_v13 = vpop.eup %7569  ;;  %v1325_v54 = vmul.f32 %v7560_v38, %v12928_v23  ;;  %v1326_v1 = vmul.f32 %v7560_v38, %v12929_v58  ;;  %v1327_v46 = vmul.f32 %v7560_v38, %v12930_v5  ;;  %v12932_v5 = vld [vmem:[#allocation54_spill] sm:$0xff]  ;;  %7577 = vrsqrt.f32 %v10431_v28 }
 0x2bb   : > { %v1328_v20 = vmul.f32 %v7560_v38, %v12931_v55  ;;  %v1471_v45 = vmul.f32 %v10023_v39, %v1321_v56  ;;  %v1472_v8 = vmul.f32 %v10025_v4, %v1322_v61  ;;  %v1473_v10 = vmul.f32 %v10027_v25, %v1323_v14 }
 0x2bc   : > { %v1474_v18 = vmul.f32 %v10029_v33, %v1324_v34  ;;  %v10455_v36 = vpop.eup %7571  ;;  %v1618_v41 = vadd.f32 %v10037_v19, %v1468_v51  ;;  %v1619_v62 = vadd.f32 %v10039_v52, %v1469_v24  ;;  %v1620_v40 = vadd.f32 %v10041_v50, %v1470_v30 }
 0x2bd   : > { %v1475_v47 = vmul.f32 %v10023_v39, %v1325_v54  ;;  %v1621_v38 = vadd.f32 %v10035_v57, %v1471_v45  ;;  %v1622_v56 = vadd.f32 %v10037_v19, %v1472_v8  ;;  %v1623_v61 = vadd.f32 %v10039_v52, %v1473_v10  ;;  %v12933_v45 = vld [vmem:[#allocation55_spill] sm:$0xff]  ;;  %v12934_v10 = vld [vmem:[#allocation53_spill] sm:$0xff] }
 0x2be   : > { %v1624_v26 = vadd.f32 %v10041_v50, %v1474_v18  ;;  %v1476_v14 = vmul.f32 %v10025_v4, %v1326_v1  ;;  %v1477_v0 = vmul.f32 %v10027_v25, %v1327_v46  ;;  %v1478_v51 = vmul.f32 %v10029_v33, %v1328_v20 }
 0x2bf   : > { %v1625_v24 = vadd.f32 %v10035_v57, %v1475_v47  ;;  %v1713_v34 = vpack.c.bf16 %v1621_v38, %v1617_v53  ;;  %v1714_v30 = vpack.c.bf16 %v1622_v56, %v1618_v41  ;;  %v1715_v23 = vpack.c.bf16 %v1623_v61, %v1619_v62  ;;  %v12936_v53 = vld [vmem:[#allocation65_spill] sm:$0xff]  ;;  %v12937_v41 = vld [vmem:[#allocation78_spill] sm:$0xff] }
 0x2c0   : > { %v1716_v54 = vpack.c.bf16 %v1624_v26, %v1620_v40  ;;  %v10469_v58 = vpop.eup %7573  ;;  %v1329_v55 = vmul.f32 %v7562_v6, %v12932_v5  ;;  %v1330_v8 = vmul.f32 %v7562_v6, %v12933_v45  ;;  %v1331_v18 = vmul.f32 %v7562_v6, %v12934_v10  ;;  %v12938_v40 = vld [vmem:[#allocation79_spill] sm:$0xff] }
 0x2c1   : > { %v1332_v1 = vmul.f32 %v7562_v6, %v12935_v49  ;;  %1777 = vst [vmem:[#allocation2 + $0x100] sm:$0xff] %v1713_v34  ;;  %1778 = vst [vmem:[#allocation2 + $0x108] sm:$0xff] %v1714_v30  ;;  %v1333_v46 = vmul.f32 %v7564_v12, %v9621_v35  ;;  %v1334_v20 = vmul.f32 %v7564_v12, %v12936_v53 }
 0x2c2   : > { %1779 = vst [vmem:[#allocation2 + $0x110] sm:$0xff] %v1715_v23  ;;  %1780 = vst [vmem:[#allocation2 + $0x118] sm:$0xff] %v1716_v54  ;;  %v1335_v62 = vmul.f32 %v7564_v12, %v12937_v41  ;;  %v1336_v47 = vmul.f32 %v7564_v12, %v12938_v40  ;;  %v1479_v38 = vmul.f32 %v10023_v39, %v1329_v55  ;;  %v12941_v41 = vld [vmem:[#allocation81_spill] sm:$0xff] }
 0x2c3   : > { %v1480_v56 = vmul.f32 %v10025_v4, %v1330_v8  ;;  %v1481_v61 = vmul.f32 %v10027_v25, %v1331_v18  ;;  %v1482_v49 = vmul.f32 %v10029_v33, %v1332_v1  ;;  %v1626_v6 = vadd.f32 %v10037_v19, %v1476_v14  ;;  %v12939_v18 = vld [vmem:[#allocation62_spill] sm:$0xff] }
 0x2c4   : > { %v1627_v26 = vadd.f32 %v10039_v52, %v1477_v0  ;;  %v1628_v35 = vadd.f32 %v10041_v50, %v1478_v51  ;;  %v1483_v34 = vmul.f32 %v10023_v39, %v1333_v46  ;;  %v1629_v30 = vadd.f32 %v10035_v57, %v1479_v38  ;;  %v12940_v46 = vld [vmem:[#allocation63_spill] sm:$0xff] }
 0x2c5   : > { %v1630_v12 = vadd.f32 %v10037_v19, %v1480_v56  ;;  %v1631_v23 = vadd.f32 %v10039_v52, %v1481_v61  ;;  %v1632_v54 = vadd.f32 %v10041_v50, %v1482_v49  ;;  %v1484_v5 = vmul.f32 %v10025_v4, %v1334_v20  ;;  %v12942_v20 = vld [vmem:[#allocation82_spill] sm:$0xff] }
 0x2c6   : > { %v1485_v55 = vmul.f32 %v10027_v25, %v1335_v62  ;;  %v1486_v14 = vmul.f32 %v10029_v33, %v1336_v47  ;;  %v1633_v0 = vadd.f32 %v10035_v57, %v1483_v34  ;;  %v1717_v45 = vpack.c.bf16 %v1629_v30, %v1625_v24 }
 0x2c7   : > { %v1718_v51 = vpack.c.bf16 %v1630_v12, %v1626_v6  ;;  %v1719_v8 = vpack.c.bf16 %v1631_v23, %v1627_v26  ;;  %v1720_v10 = vpack.c.bf16 %v1632_v54, %v1628_v35  ;;  %v1337_v1 = vmul.f32 %v10433_v60, %v12939_v18 }
 0x2c8   : > { %v1338_v53 = vmul.f32 %v10433_v60, %v12940_v46  ;;  %v1339_v40 = vmul.f32 %v10433_v60, %v12941_v41  ;;  %v1340_v62 = vmul.f32 %v10433_v60, %v12942_v20  ;;  %1781 = vst [vmem:[#allocation2 + $0x120] sm:$0xff] %v1717_v45  ;;  %v1341_v24 = vmul.f32 %v10439_v43, %v9673_v11 }
 0x2c9   : > { %1782 = vst [vmem:[#allocation2 + $0x128] sm:$0xff] %v1718_v51  ;;  %1783 = vst [vmem:[#allocation2 + $0x130] sm:$0xff] %v1719_v8  ;;  %v1342_v47 = vmul.f32 %v10439_v43, %v9677_v3  ;;  %v1343_v38 = vmul.f32 %v10439_v43, %v9845_v29  ;;  %v1344_v56 = vmul.f32 %v10439_v43, %v9849_v59 }
 0x2ca   : > { %1784 = vst [vmem:[#allocation2 + $0x138] sm:$0xff] %v1720_v10  ;;  %v1487_v61 = vmul.f32 %v10023_v39, %v1337_v1  ;;  %v1488_v60 = vmul.f32 %v10025_v4, %v1338_v53  ;;  %v1489_v49 = vmul.f32 %v10027_v25, %v1339_v40  ;;  %v1490_v6 = vmul.f32 %v10029_v33, %v1340_v62  ;;  %v12943_v10 = vld [vmem:[#allocation61_spill] sm:$0xff]  ;;  %v12944_v1 = vld [vmem:[#allocation67_spill] sm:$0xff] }
 0x2cb   : > { %v1634_v26 = vadd.f32 %v10037_v19, %v1484_v5  ;;  %v1635_v11 = vadd.f32 %v10039_v52, %v1485_v55  ;;  %v1636_v3 = vadd.f32 %v10041_v50, %v1486_v14  ;;  %v1491_v35 = vmul.f32 %v10023_v39, %v1341_v24 }
 0x2cc   : > { %v1637_v29 = vadd.f32 %v10035_v57, %v1487_v61  ;;  %v1638_v59 = vadd.f32 %v10037_v19, %v1488_v60  ;;  %v1639_v43 = vadd.f32 %v10039_v52, %v1489_v49  ;;  %v1640_v34 = vadd.f32 %v10041_v50, %v1490_v6 }
 0x2cd   : > { %v1492_v30 = vmul.f32 %v10025_v4, %v1342_v47  ;;  %v1493_v12 = vmul.f32 %v10027_v25, %v1343_v38  ;;  %v1494_v23 = vmul.f32 %v10029_v33, %v1344_v56  ;;  %v1641_v54 = vadd.f32 %v10035_v57, %v1491_v35  ;;  %v1146_v56 = vpop.xlane.xlu1 %1145  ;;  %v1151_v35 = vpop.xlane.xlu0 %1150 }
 0x2ce   : > { %v1721_v5 = vpack.c.bf16 %v1637_v29, %v1633_v0  ;;  %v1722_v55 = vpack.c.bf16 %v1638_v59, %v1634_v26  ;;  %v1723_v14 = vpack.c.bf16 %v1639_v43, %v1635_v11  ;;  %v1724_v45 = vpack.c.bf16 %v1640_v34, %v1636_v3 }
 0x2cf   : > { %v1345_v51 = vmul.f32 %v10445_v13, %v9665_v31  ;;  %v1346_v8 = vmul.f32 %v10445_v13, %v9669_v2  ;;  %v1347_v18 = vmul.f32 %v10445_v13, %v12943_v10  ;;  %v1348_v46 = vmul.f32 %v10445_v13, %v12944_v1  ;;  %v12945_v31 = vld [vmem:[#allocation72_spill] sm:$0xff] }
 0x2d0   : > { %1785 = vst [vmem:[#allocation2 + $0x140] sm:$0xff] %v1721_v5  ;;  %1786 = vst [vmem:[#allocation2 + $0x148] sm:$0xff] %v1722_v55  ;;  %v1349_v0 = vmul.f32 %v10455_v36, %v9725_v17  ;;  %v1350_v53 = vmul.f32 %v10455_v36, %v9729_v7  ;;  %v1351_v41 = vmul.f32 %v10455_v36, %v12945_v31  ;;  %v12946_v2 = vld [vmem:[#allocation76_spill] sm:$0xff]  ;;  %v1217_v3 = vadd.f32 1e-05, %v10414_v42  ;;  %v12948_v5 = vld [vmem:[#allocation69_spill] sm:$0xff] }
 0x2d1   : > { %1787 = vst [vmem:[#allocation2 + $0x150] sm:$0xff] %v1723_v14  ;;  %1788 = vst [vmem:[#allocation2 + $0x158] sm:$0xff] %v1724_v45  ;;  %v1352_v40 = vmul.f32 %v10455_v36, %v12946_v2  ;;  %v1495_v20 = vmul.f32 %v10023_v39, %v1345_v51  ;;  %v1496_v13 = vmul.f32 %v10025_v4, %v1346_v8  ;;  %v12949_v14 = vld [vmem:[#allocation75_spill] sm:$0xff]  ;;  %v1187_v51 = vmul.f32 0.001953125, %v1151_v35  ;;  %v1156_v1 = vpop.xlane.xlu1 %1155 }
 0x2d2   : > { %v1497_v62 = vmul.f32 %v10027_v25, %v1347_v18  ;;  %v1498_v24 = vmul.f32 %v10029_v33, %v1348_v46  ;;  %v1642_v47 = vadd.f32 %v10037_v19, %v1492_v30  ;;  %v1643_v17 = vadd.f32 %v10039_v52, %v1493_v12  ;;  %v12947_v12 = vld [vmem:[#allocation74_spill] sm:$0xff] }
 0x2d3   : > { %v1644_v7 = vadd.f32 %v10041_v50, %v1494_v23  ;;  %v1499_v38 = vmul.f32 %v10023_v39, %v1349_v0  ;;  %v1645_v61 = vadd.f32 %v10035_v57, %v1495_v20  ;;  %v1646_v36 = vadd.f32 %v10037_v19, %v1496_v13 }
 0x2d4   : > { %v1647_v60 = vadd.f32 %v10039_v52, %v1497_v62  ;;  %v1648_v49 = vadd.f32 %v10041_v50, %v1498_v24  ;;  %v1500_v6 = vmul.f32 %v10025_v4, %v1350_v53  ;;  %v1501_v26 = vmul.f32 %v10027_v25, %v1351_v41 }
 0x2d5   : > { %v1502_v11 = vmul.f32 %v10029_v33, %v1352_v40  ;;  %v1725_v29 = vpack.c.bf16 %v1645_v61, %v1641_v54  ;;  %v1726_v59 = vpack.c.bf16 %v1646_v36, %v1642_v47  ;;  %v1353_v30 = vmul.f32 %v10469_v58, %v9717_v27  ;;  %v12950_v61 = vld [vmem:[#allocation94_spill] sm:$0xff] }
 0x2d6   : > { %v1727_v43 = vpack.c.bf16 %v1647_v60, %v1643_v17  ;;  %v1728_v34 = vpack.c.bf16 %v1648_v49, %v1644_v7  ;;  %v1354_v23 = vmul.f32 %v10469_v58, %v12947_v12  ;;  %v1355_v55 = vmul.f32 %v10469_v58, %v12948_v5  ;;  %v7576_v17 = vpop.eup %7575 }
 0x2d7   : > { %v1356_v45 = vmul.f32 %v10469_v58, %v12949_v14  ;;  %1789 = vst [vmem:[#allocation2 + $0x160] sm:$0xff] %v1725_v29  ;;  %1790 = vst [vmem:[#allocation2 + $0x168] sm:$0xff] %v1726_v59  ;;  %v1649_v42 = vadd.f32 %v10035_v57, %v1499_v38  ;;  %v1186_v54 = vmul.f32 0.001953125, %v1146_v56  ;;  %v1503_v27 = vmul.f32 %v10023_v39, %v1353_v30  ;;  %v7578_v60 = vpop.eup %7577 }
 0x2d8   : > { %1791 = vst [vmem:[#allocation2 + $0x170] sm:$0xff] %v1727_v43  ;;  %1792 = vst [vmem:[#allocation2 + $0x178] sm:$0xff] %v1728_v34  ;;  %v1504_v8 = vmul.f32 %v10025_v4, %v1354_v23  ;;  %v1505_v10 = vmul.f32 %v10027_v25, %v1355_v55  ;;  %v1650_v58 = vadd.f32 %v10037_v19, %v1500_v6  ;;  %7579 = vrsqrt.f32 %v1217_v3  ;;  %v12951_v23 = vld [vmem:[#allocation96_spill] sm:$0xff]  ;;  %v12952_v55 = vld [vmem:[#allocation97_spill] sm:$0xff] }
 0x2d9   : > { %v1506_v18 = vmul.f32 %v10029_v33, %v1356_v45  ;;  %v1651_v46 = vadd.f32 %v10039_v52, %v1501_v26  ;;  %v1652_v0 = vadd.f32 %v10041_v50, %v1502_v11  ;;  %v1653_v37 = vadd.f32 %v10035_v57, %v1503_v27 }
 0x2da   : > { %v1654_v53 = vadd.f32 %v10037_v19, %v1504_v8  ;;  %v1655_v31 = vadd.f32 %v10039_v52, %v1505_v10  ;;  %v1218_v2 = vadd.f32 1e-05, %v1186_v54  ;;  %v1188_v40 = vmul.f32 0.001953125, %v1156_v1 }
 0x2db   : > { %v1656_v41 = vadd.f32 %v10041_v50, %v1506_v18  ;;  %v1729_v20 = vpack.c.bf16 %v1653_v37, %v1649_v42  ;;  %v1219_v47 = vadd.f32 1e-05, %v1187_v51  ;;  %v1357_v7 = vmul.f32 %v7576_v17, %v9777_v63 }
 0x2dc   : > { %v1730_v13 = vpack.c.bf16 %v1654_v53, %v1650_v58  ;;  %v1731_v62 = vpack.c.bf16 %v1655_v31, %v1651_v46  ;;  %v1220_v28 = vadd.f32 1e-05, %v1188_v40  ;;  %7581 = vrsqrt.f32 %v1218_v2  ;;  %v12953_v53 = vld [vmem:[#allocation64_spill] sm:$0xff] }
 0x2dd   : > { %v1732_v24 = vpack.c.bf16 %v1656_v41, %v1652_v0  ;;  %1793 = vst [vmem:[#allocation2 + $0x180] sm:$0xff] %v1729_v20  ;;  %7583 = vrsqrt.f32 %v1219_v47  ;;  %v1358_v38 = vmul.f32 %v7576_v17, %v9781_v15  ;;  %v1359_v56 = vmul.f32 %v7576_v17, %v9929_v32  ;;  %v12954_v41 = vld [vmem:[#allocation68_spill] sm:$0xff] }
 0x2de   : > { %1794 = vst [vmem:[#allocation2 + $0x188] sm:$0xff] %v1730_v13  ;;  %1795 = vst [vmem:[#allocation2 + $0x190] sm:$0xff] %v1731_v62  ;;  %v1360_v36 = vmul.f32 %v7576_v17, %v12950_v61  ;;  %7585 = vrsqrt.f32 %v1220_v28  ;;  %v1507_v49 = vmul.f32 %v10023_v39, %v1357_v7  ;;  %v1361_v35 = vmul.f32 %v7578_v60, %v9769_v16  ;;  %v12955_v40 = vld [vmem:[#allocation80_spill] sm:$0xff]  ;;  %v12958_v28 = vld [vmem:[#allocation90_spill] sm:$0xff] }
 0x2df   : > { %1796 = vst [vmem:[#allocation2 + $0x198] sm:$0xff] %v1732_v24  ;;  %v1508_v6 = vmul.f32 %v10025_v4, %v1358_v38  ;;  %v1509_v26 = vmul.f32 %v10027_v25, %v1359_v56  ;;  %v1362_v63 = vmul.f32 %v7578_v60, %v9773_v21  ;;  %v1363_v15 = vmul.f32 %v7578_v60, %v9945_v22  ;;  %v12956_v13 = vld [vmem:[#allocation84_spill] sm:$0xff]  ;;  %v12957_v24 = vld [vmem:[#allocation89_spill] sm:$0xff]  ;;  %v12960_v56 = vld [vmem:[#allocation83_spill] sm:$0xff] }
 0x2e0   : > { %v1510_v11 = vmul.f32 %v10029_v33, %v1360_v36  ;;  %v1364_v32 = vmul.f32 %v7578_v60, %v9949_v48  ;;  %v1657_v29 = vadd.f32 %v10035_v57, %v1507_v49  ;;  %v1511_v30 = vmul.f32 %v10023_v39, %v1361_v35  ;;  %v12959_v7 = vld [vmem:[#allocation77_spill] sm:$0xff] }
 0x2e1   : > { %v1658_v59 = vadd.f32 %v10037_v19, %v1508_v6  ;;  %v1659_v43 = vadd.f32 %v10039_v52, %v1509_v26  ;;  %v1512_v12 = vmul.f32 %v10025_v4, %v1362_v63  ;;  %v1513_v16 = vmul.f32 %v10027_v25, %v1363_v15 }
 0x2e2   : > { %v7580_v3 = vpop.eup %7579  ;;  %v1660_v34 = vadd.f32 %v10041_v50, %v1510_v11  ;;  %v1514_v21 = vmul.f32 %v10029_v33, %v1364_v32  ;;  %v1661_v45 = vadd.f32 %v10035_v57, %v1511_v30 }
 0x2e3   : > { %v1365_v22 = vmul.f32 %v7580_v3, %v9829_v9  ;;  %v1366_v48 = vmul.f32 %v7580_v3, %v9833_v44  ;;  %v1367_v5 = vmul.f32 %v7580_v3, %v12951_v23  ;;  %v1368_v14 = vmul.f32 %v7580_v3, %v12952_v55 }
 0x2e4   : > { %v1662_v42 = vadd.f32 %v10037_v19, %v1512_v12  ;;  %v1663_v54 = vadd.f32 %v10039_v52, %v1513_v16  ;;  %v1664_v51 = vadd.f32 %v10041_v50, %v1514_v21  ;;  %v1733_v10 = vpack.c.bf16 %v1661_v45, %v1657_v29 }
 0x2e5   : > { %v1515_v44 = vmul.f32 %v10023_v39, %v1365_v22  ;;  %v1516_v58 = vmul.f32 %v10025_v4, %v1366_v48  ;;  %v1517_v46 = vmul.f32 %v10027_v25, %v1367_v5  ;;  %v1518_v0 = vmul.f32 %v10029_v33, %v1368_v14  ;;  %v12961_v48 = vld [vmem:[#allocation86_spill] sm:$0xff]  ;;  %v12962_v5 = vld [vmem:[#allocation87_spill] sm:$0xff]  ;;  %v12963_v14 = vld [vmem:[#allocation88_spill] sm:$0xff] }
 0x2e6   : > { %v7582_v27 = vpop.eup %7581  ;;  %v1734_v18 = vpack.c.bf16 %v1662_v42, %v1658_v59  ;;  %v1735_v1 = vpack.c.bf16 %v1663_v54, %v1659_v43  ;;  %v1736_v9 = vpack.c.bf16 %v1664_v51, %v1660_v34  ;;  %1797 = vst [vmem:[#allocation2 + $0x1a0] sm:$0xff] %v1733_v10  ;;  %v12964_v42 = vld [vmem:[#allocation92_spill] sm:$0xff] }
 0x2e7   : > { %v7584_v8 = vpop.eup %7583  ;;  %v1369_v31 = vmul.f32 %v7582_v27, %v12953_v53  ;;  %v1370_v2 = vmul.f32 %v7582_v27, %v12954_v41  ;;  %v1371_v20 = vmul.f32 %v7582_v27, %v12955_v40  ;;  %v1372_v62 = vmul.f32 %v7582_v27, %v12956_v13 }
 0x2e8   : > { %v7586_v37 = vpop.eup %7585  ;;  %1798 = vst [vmem:[#allocation2 + $0x1a8] sm:$0xff] %v1734_v18  ;;  %1799 = vst [vmem:[#allocation2 + $0x1b0] sm:$0xff] %v1735_v1  ;;  %v1373_v47 = vmul.f32 %v7584_v8, %v12957_v24  ;;  %v1374_v17 = vmul.f32 %v7584_v8, %v12958_v28  ;;  %v1375_v38 = vmul.f32 %v7584_v8, %v12959_v7 }
 0x2e9   : > { %1800 = vst [vmem:[#allocation2 + $0x1b8] sm:$0xff] %v1736_v9  ;;  %v1376_v61 = vmul.f32 %v7584_v8, %v12960_v56  ;;  %v1519_v36 = vmul.f32 %v10023_v39, %v1369_v31  ;;  %v1520_v60 = vmul.f32 %v10025_v4, %v1370_v2  ;;  %v1521_v49 = vmul.f32 %v10027_v25, %v1371_v20 }
 0x2ea   : > { %v1522_v6 = vmul.f32 %v10029_v33, %v1372_v62  ;;  %v1665_v26 = vadd.f32 %v10035_v57, %v1515_v44  ;;  %v1666_v11 = vadd.f32 %v10037_v19, %v1516_v58  ;;  %v1667_v3 = vadd.f32 %v10039_v52, %v1517_v46 }
 0x2eb   : > { %v1668_v35 = vadd.f32 %v10041_v50, %v1518_v0  ;;  %v1669_v63 = vadd.f32 %v10035_v57, %v1519_v36  ;;  %v1670_v15 = vadd.f32 %v10037_v19, %v1520_v60  ;;  %v1671_v32 = vadd.f32 %v10039_v52, %v1521_v49 }
 0x2ec   : > { %v1672_v29 = vadd.f32 %v10041_v50, %v1522_v6  ;;  %v1523_v59 = vmul.f32 %v10023_v39, %v1373_v47  ;;  %v1524_v43 = vmul.f32 %v10025_v4, %v1374_v17  ;;  %v1525_v34 = vmul.f32 %v10027_v25, %v1375_v38 }
 0x2ed   : > { %v1526_v30 = vmul.f32 %v10029_v33, %v1376_v61  ;;  %v1737_v12 = vpack.c.bf16 %v1669_v63, %v1665_v26  ;;  %v1738_v16 = vpack.c.bf16 %v1670_v15, %v1666_v11  ;;  %v1739_v21 = vpack.c.bf16 %v1671_v32, %v1667_v3 }
 0x2ee   : > { %v1740_v22 = vpack.c.bf16 %v1672_v29, %v1668_v35  ;;  %v1377_v23 = vmul.f32 %v7586_v37, %v12961_v48  ;;  %v1378_v55 = vmul.f32 %v7586_v37, %v12962_v5  ;;  %v1379_v45 = vmul.f32 %v7586_v37, %v12963_v14 }
 0x2ef   : > { %v1380_v54 = vmul.f32 %v7586_v37, %v12964_v42  ;;  %1801 = vst [vmem:[#allocation2 + $0x1c0] sm:$0xff] %v1737_v12  ;;  %1802 = vst [vmem:[#allocation2 + $0x1c8] sm:$0xff] %v1738_v16  ;;  %v1673_v18 = vadd.f32 %v10035_v57, %v1523_v59  ;;  %v1674_v1 = vadd.f32 %v10037_v19, %v1524_v43 }
 0x2f0   : > { %1803 = vst [vmem:[#allocation2 + $0x1d0] sm:$0xff] %v1739_v21  ;;  %1804 = vst [vmem:[#allocation2 + $0x1d8] sm:$0xff] %v1740_v22  ;;  %v1527_v51 = vmul.f32 %v10023_v39, %v1377_v23  ;;  %v1528_v27 = vmul.f32 %v10025_v4, %v1378_v55  ;;  %v1529_v8 = vmul.f32 %v10027_v25, %v1379_v45 }
 0x2f1   : > { %v1530_v10 = vmul.f32 %v10029_v33, %v1380_v54  ;;  %v1675_v9 = vadd.f32 %v10039_v52, %v1525_v34  ;;  %v1676_v44 = vadd.f32 %v10041_v50, %v1526_v30 }
 0x2f2   : > { %v1677_v58 = vadd.f32 %v10035_v57, %v1527_v51  ;;  %v1678_v46 = vadd.f32 %v10037_v19, %v1528_v27  ;;  %v1679_v39 = vadd.f32 %v10039_v52, %v1529_v8 }
 0x2f3   : > { %v1680_v4 = vadd.f32 %v10041_v50, %v1530_v10 }
 0x2f4   : > { %v1741_v0 = vpack.c.bf16 %v1677_v58, %v1673_v18  ;;  %v1742_v25 = vpack.c.bf16 %v1678_v46, %v1674_v1  ;;  %v1743_v37 = vpack.c.bf16 %v1679_v39, %v1675_v9 }
 0x2f5   : > { %v1744_v33 = vpack.c.bf16 %v1680_v4, %v1676_v44 }
 0x2f6   : > { %1805 = vst [vmem:[#allocation2 + $0x1e0] sm:$0xff] %v1741_v0  ;;  %1806 = vst [vmem:[#allocation2 + $0x1e8] sm:$0xff] %v1742_v25 }
 0x2f7   : > { %1807 = vst [vmem:[#allocation2 + $0x1f0] sm:$0xff] %v1743_v37  ;;  %1808 = vst [vmem:[#allocation2 + $0x1f8] sm:$0xff] %v1744_v33 }
 0x2f8 PF: > { %v7587_v57 = vld [vmem:[%s8834_s14 + $0x4] ss:$16 sps:$4 sm:$0xff]   ;;  %v7589_v52 = vld [vmem:[%s8834_s14 + $0xc] ss:$16 sps:$4 sm:$0xff]   ;;  %v7591_v19 = vld [vmem:[%s8834_s14] ss:$16 sps:$4 sm:$0xff]  }
 0x2f9   : > { %2791 = vmatprep.subr.bf16.mxu0 %v7587_v57  ;;  %v7592_v50 = vld [vmem:[%s8834_s14 + $0x8] ss:$16 sps:$4 sm:$0xff]   ;;  %3177 = vmatprep.subr.bf16.mxu1 %v7589_v52  ;;  %v7593_v53 = vld [vmem:[%s8834_s14 + $0x24] ss:$16 sps:$4 sm:$0xff]   ;;  %v7595_v31 = vld [vmem:[%s8834_s14 + $0x2c] ss:$16 sps:$4 sm:$0xff]  }
 0x2fa   : > { %2792 = vmatpush1.bf16.msra.mxu0 %v7591_v19  ;;  %3178 = vmatpush1.bf16.msra.mxu1 %v7592_v50  ;;  %v7597_v41 = vld [vmem:[%s8834_s14 + $0x20] ss:$16 sps:$4 sm:$0xff]   ;;  %v7598_v2 = vld [vmem:[%s8834_s14 + $0x28] ss:$16 sps:$4 sm:$0xff]   ;;  %v7599_v40 = vld [vmem:[%s8834_s14 + $0x44] ss:$16 sps:$4 sm:$0xff]  }
 0x2fb   : > { %2793 = vmatprep.subr.bf16.mxu0 %v7593_v53  ;;  %3179 = vmatprep.subr.bf16.mxu1 %v7595_v31  ;;  %v7601_v20 = vld [vmem:[%s8834_s14 + $0x4c] ss:$16 sps:$4 sm:$0xff]   ;;  %v7603_v13 = vld [vmem:[%s8834_s14 + $0x40] ss:$16 sps:$4 sm:$0xff]   ;;  %v7604_v62 = vld [vmem:[%s8834_s14 + $0x48] ss:$16 sps:$4 sm:$0xff]  }
 0x2fc   : > { %v7605_v24 = vld [vmem:[%s8834_s14 + $0x64] ss:$16 sps:$4 sm:$0xff]   ;;  %v7607_v47 = vld [vmem:[%s8834_s14 + $0x6c] ss:$16 sps:$4 sm:$0xff]   ;;  %v7609_v28 = vld [vmem:[%s8834_s14 + $0x60] ss:$16 sps:$4 sm:$0xff]  }
 0x2fd   : > { %v7610_v17 = vld [vmem:[%s8834_s14 + $0x68] ss:$16 sps:$4 sm:$0xff]   ;;  %v7611_v7 = vld [vmem:[%s8834_s14 + $0x84] ss:$16 sps:$4 sm:$0xff]   ;;  %v7613_v38 = vld [vmem:[%s8834_s14 + $0x8c] ss:$16 sps:$4 sm:$0xff]  }
 0x2fe   : > { %2794 = vmatpush1.bf16.msra.mxu0 %v7597_v41  ;;  %3180 = vmatpush1.bf16.msra.mxu1 %v7598_v2  ;;  %v7615_v56 = vld [vmem:[%s8834_s14 + $0x80] ss:$16 sps:$4 sm:$0xff]   ;;  %v7616_v61 = vld [vmem:[%s8834_s14 + $0x88] ss:$16 sps:$4 sm:$0xff]   ;;  %v7617_v36 = vld [vmem:[%s8834_s14 + $0xa4] ss:$16 sps:$4 sm:$0xff]  }
 0x2ff   : > { %2795 = vmatprep.subr.bf16.mxu0 %v7599_v40  ;;  %3181 = vmatprep.subr.bf16.mxu1 %v7601_v20  ;;  %v7619_v60 = vld [vmem:[%s8834_s14 + $0xac] ss:$16 sps:$4 sm:$0xff]   ;;  %v7621_v49 = vld [vmem:[%s8834_s14 + $0xa0] ss:$16 sps:$4 sm:$0xff]   ;;  %v7622_v6 = vld [vmem:[%s8834_s14 + $0xa8] ss:$16 sps:$4 sm:$0xff]  }
 0x300   : > { %v7623_v26 = vld [vmem:[%s8834_s14 + $0xc4] ss:$16 sps:$4 sm:$0xff]   ;;  %v7625_v11 = vld [vmem:[%s8834_s14 + $0xcc] ss:$16 sps:$4 sm:$0xff]   ;;  %v7627_v3 = vld [vmem:[%s8834_s14 + $0xc0] ss:$16 sps:$4 sm:$0xff]  }
 0x301   : > { %v7628_v35 = vld [vmem:[%s8834_s14 + $0xc8] ss:$16 sps:$4 sm:$0xff]   ;;  %v7629_v63 = vld [vmem:[%s8834_s14 + $0xe4] ss:$16 sps:$4 sm:$0xff]   ;;  %v7631_v15 = vld [vmem:[%s8834_s14 + $0xec] ss:$16 sps:$4 sm:$0xff]  }
 0x302   : > { %2796 = vmatpush1.bf16.msra.mxu0 %v7603_v13  ;;  %3182 = vmatpush1.bf16.msra.mxu1 %v7604_v62  ;;  %v7633_v32 = vld [vmem:[%s8834_s14 + $0xe0] ss:$16 sps:$4 sm:$0xff]   ;;  %v7634_v29 = vld [vmem:[%s8834_s14 + $0xe8] ss:$16 sps:$4 sm:$0xff]   ;;  %v7635_v59 = vld [vmem:[%s8834_s14 + $0x104] ss:$16 sps:$4 sm:$0xff]  }
 0x303   : > { %2797 = vmatprep.subr.bf16.mxu0 %v7605_v24  ;;  %3183 = vmatprep.subr.bf16.mxu1 %v7607_v47  ;;  %v7637_v43 = vld [vmem:[%s8834_s14 + $0x10c] ss:$16 sps:$4 sm:$0xff]   ;;  %v7639_v34 = vld [vmem:[%s8834_s14 + $0x100] ss:$16 sps:$4 sm:$0xff]   ;;  %v7640_v30 = vld [vmem:[%s8834_s14 + $0x108] ss:$16 sps:$4 sm:$0xff]  }
 0x304   : > { %v7641_v12 = vld [vmem:[%s8834_s14 + $0x124] ss:$16 sps:$4 sm:$0xff]   ;;  %v7643_v16 = vld [vmem:[%s8834_s14 + $0x12c] ss:$16 sps:$4 sm:$0xff]   ;;  %v7645_v21 = vld [vmem:[%s8834_s14 + $0x120] ss:$16 sps:$4 sm:$0xff]  }
 0x305   : > { %v7646_v22 = vld [vmem:[%s8834_s14 + $0x128] ss:$16 sps:$4 sm:$0xff]   ;;  %v7647_v48 = vld [vmem:[%s8834_s14 + $0x144] ss:$16 sps:$4 sm:$0xff]   ;;  %v7649_v23 = vld [vmem:[%s8834_s14 + $0x14c] ss:$16 sps:$4 sm:$0xff]  }
 0x306   : > { %2798 = vmatpush1.bf16.msra.mxu0 %v7609_v28  ;;  %3184 = vmatpush1.bf16.msra.mxu1 %v7610_v17  ;;  %v7651_v5 = vld [vmem:[%s8834_s14 + $0x140] ss:$16 sps:$4 sm:$0xff]   ;;  %v7652_v55 = vld [vmem:[%s8834_s14 + $0x148] ss:$16 sps:$4 sm:$0xff]   ;;  %v7653_v14 = vld [vmem:[%s8834_s14 + $0x164] ss:$16 sps:$4 sm:$0xff]  }
 0x307   : > { %2799 = vmatprep.subr.bf16.mxu0 %v7611_v7  ;;  %3185 = vmatprep.subr.bf16.mxu1 %v7613_v38  ;;  %v7655_v45 = vld [vmem:[%s8834_s14 + $0x16c] ss:$16 sps:$4 sm:$0xff]   ;;  %v1938_v42 = vld [vmem:[#allocation2 + $0x8] sm:$0xff]  ;;  %v7658_v51 = vld [vmem:[%s8834_s14 + $0x168] ss:$16 sps:$4 sm:$0xff]   ;;  %p7025_p8 = scmp.ne.s32.totalorder %s8586_s28, 3 }
 0x308   : > { %2823 = vmatprep.mubr.bf16.mxu0 %v1938_v42  ;;  %3209 = vmatprep.mubr.bf16.mxu1 %v1938_v42  ;;  %v7657_v54 = vld [vmem:[%s8834_s14 + $0x160] ss:$16 sps:$4 sm:$0xff]   ;;  %v7659_v27 = vld [vmem:[%s8834_s14 + $0x184] ss:$16 sps:$4 sm:$0xff]   ;;  %v7661_v8 = vld [vmem:[%s8834_s14 + $0x18c] ss:$16 sps:$4 sm:$0xff]  }
 0x309   : > { %v7663_v10 = vld [vmem:[%s8834_s14 + $0x180] ss:$16 sps:$4 sm:$0xff]   ;;  %v7664_v18 = vld [vmem:[%s8834_s14 + $0x188] ss:$16 sps:$4 sm:$0xff]   ;;  %v7665_v1 = vld [vmem:[%s8834_s14 + $0x1a4] ss:$16 sps:$4 sm:$0xff]  }
 0x30a   : > { %2800 = vmatpush1.bf16.msra.mxu0 %v7615_v56  ;;  %3186 = vmatpush1.bf16.msra.mxu1 %v7616_v61  ;;  %v7667_v9 = vld [vmem:[%s8834_s14 + $0x1ac] ss:$16 sps:$4 sm:$0xff]   ;;  %v7669_v44 = vld [vmem:[%s8834_s14 + $0x1a0] ss:$16 sps:$4 sm:$0xff]   ;;  %v7670_v58 = vld [vmem:[%s8834_s14 + $0x1a8] ss:$16 sps:$4 sm:$0xff]  }
 0x30b   : > { %2801 = vmatprep.subr.bf16.mxu0 %v7617_v36  ;;  %3187 = vmatprep.subr.bf16.mxu1 %v7619_v60  ;;  %v7671_v46 = vld [vmem:[%s8834_s14 + $0x1c4] ss:$16 sps:$4 sm:$0xff]   ;;  %v7673_v39 = vld [vmem:[%s8834_s14 + $0x1cc] ss:$16 sps:$4 sm:$0xff]   ;;  %v7675_v4 = vld [vmem:[%s8834_s14 + $0x1c0] ss:$16 sps:$4 sm:$0xff]  }
 0x30c   : > { %v7676_v0 = vld [vmem:[%s8834_s14 + $0x1c8] ss:$16 sps:$4 sm:$0xff]   ;;  %v7677_v25 = vld [vmem:[%s8834_s14 + $0x1e4] ss:$16 sps:$4 sm:$0xff]   ;;  %v7679_v37 = vld [vmem:[%s8834_s14 + $0x1ec] ss:$16 sps:$4 sm:$0xff]  }
 0x30d   : > { %v7681_v33 = vld [vmem:[%s8834_s14 + $0x1e0] ss:$16 sps:$4 sm:$0xff]   ;;  %v7682_v57 = vld [vmem:[%s8834_s14 + $0x1e8] ss:$16 sps:$4 sm:$0xff]   ;;  %v7685_v52 = vld [vmem:[%s8834_s14 + $0x204] ss:$16 sps:$4 sm:$0xff]  }
 0x30e   : > { %2802 = vmatpush1.bf16.msra.mxu0 %v7621_v49  ;;  %3188 = vmatpush1.bf16.msra.mxu1 %v7622_v6  ;;  %v7712_v19 = vld [vmem:[%s8834_s14 + $0x20c] ss:$16 sps:$4 sm:$0xff]   ;;  %v7683_v53 = vld [vmem:[%s8834_s14 + $0x200] ss:$16 sps:$4 sm:$0xff]   ;;  %v7688_v41 = vld [vmem:[%s8834_s14 + $0x224] ss:$16 sps:$4 sm:$0xff]  }
 0x30f   : > { %2803 = vmatprep.subr.bf16.mxu0 %v7623_v26  ;;  %3189 = vmatprep.subr.bf16.mxu1 %v7625_v11  ;;  %v1937_v50 = vld [vmem:[#allocation2] sm:$0xff]  ;;  %v1942_v31 = vld [vmem:[#allocation2 + $0x28] sm:$0xff] }
 0x310   : > { %v7710_v2 = vld [vmem:[%s8834_s14 + $0x208] ss:$16 sps:$4 sm:$0xff]   ;;  %v7715_v40 = vld [vmem:[%s8834_s14 + $0x22c] ss:$16 sps:$4 sm:$0xff]   ;;  %v7686_v20 = vld [vmem:[%s8834_s14 + $0x220] ss:$16 sps:$4 sm:$0xff]  }
 0x311   : > { %v7691_v13 = vld [vmem:[%s8834_s14 + $0x244] ss:$16 sps:$4 sm:$0xff]   ;;  %v7713_v62 = vld [vmem:[%s8834_s14 + $0x228] ss:$16 sps:$4 sm:$0xff]   ;;  %v7689_v28 = vld [vmem:[%s8834_s14 + $0x240] ss:$16 sps:$4 sm:$0xff]  }
 0x312   : > { %2804 = vmatpush1.bf16.msra.mxu0 %v7627_v3  ;;  %3190 = vmatpush1.bf16.msra.mxu1 %v7628_v35  ;;  %v1941_v24 = vld [vmem:[#allocation2 + $0x20] sm:$0xff]  ;;  %v1946_v47 = vld [vmem:[#allocation2 + $0x48] sm:$0xff] }
 0x313   : > { %2805 = vmatprep.subr.bf16.mxu0 %v7629_v63  ;;  %3191 = vmatprep.subr.bf16.mxu1 %v7631_v15  ;;  %v7721_v17 = vld [vmem:[%s8834_s14 + $0x24c] ss:$16 sps:$4 sm:$0xff]   ;;  %v7694_v7 = vld [vmem:[%s8834_s14 + $0x264] ss:$16 sps:$4 sm:$0xff]   ;;  %v7719_v38 = vld [vmem:[%s8834_s14 + $0x248] ss:$16 sps:$4 sm:$0xff]  }
 0x314   : > { %v7724_v56 = vld [vmem:[%s8834_s14 + $0x26c] ss:$16 sps:$4 sm:$0xff]   ;;  %v7692_v61 = vld [vmem:[%s8834_s14 + $0x260] ss:$16 sps:$4 sm:$0xff]   ;;  %v7697_v36 = vld [vmem:[%s8834_s14 + $0x284] ss:$16 sps:$4 sm:$0xff]  }
 0x315   : > { %v7722_v60 = vld [vmem:[%s8834_s14 + $0x268] ss:$16 sps:$4 sm:$0xff]   ;;  %v1950_v6 = vld [vmem:[#allocation2 + $0x68] sm:$0xff]  ;;  %v7730_v11 = vld [vmem:[%s8834_s14 + $0x28c] ss:$16 sps:$4 sm:$0xff]  }
 0x316   : > { %2806 = vmatpush1.bf16.msra.mxu0 %v7633_v32  ;;  %3192 = vmatpush1.bf16.msra.mxu1 %v7634_v29  ;;  %v1945_v49 = vld [vmem:[#allocation2 + $0x40] sm:$0xff]  ;;  %v7695_v26 = vld [vmem:[%s8834_s14 + $0x280] ss:$16 sps:$4 sm:$0xff]   ;;  %v7700_v3 = vld [vmem:[%s8834_s14 + $0x2a4] ss:$16 sps:$4 sm:$0xff]  }
 0x317   : > { %2807 = vmatprep.subr.bf16.mxu0 %v7635_v59  ;;  %3193 = vmatprep.subr.bf16.mxu1 %v7637_v43  ;;  %v7728_v35 = vld [vmem:[%s8834_s14 + $0x288] ss:$16 sps:$4 sm:$0xff]   ;;  %v7733_v63 = vld [vmem:[%s8834_s14 + $0x2ac] ss:$16 sps:$4 sm:$0xff]   ;;  %v7698_v15 = vld [vmem:[%s8834_s14 + $0x2a0] ss:$16 sps:$4 sm:$0xff]  }
 0x318   : > { %v7703_v32 = vld [vmem:[%s8834_s14 + $0x2c4] ss:$16 sps:$4 sm:$0xff]   ;;  %v7731_v29 = vld [vmem:[%s8834_s14 + $0x2a8] ss:$16 sps:$4 sm:$0xff]  }
 0x319   : > { %v1949_v59 = vld [vmem:[#allocation2 + $0x60] sm:$0xff]  ;;  %v1954_v43 = vld [vmem:[#allocation2 + $0x88] sm:$0xff] }
 0x31a   : > { %2808 = vmatpush1.bf16.msra.mxu0 %v7639_v34  ;;  %3194 = vmatpush1.bf16.msra.mxu1 %v7640_v30  ;;  %v7701_v34 = vld [vmem:[%s8834_s14 + $0x2c0] ss:$16 sps:$4 sm:$0xff]   ;;  %v7706_v30 = vld [vmem:[%s8834_s14 + $0x2e4] ss:$16 sps:$4 sm:$0xff]  }
 0x31b   : > { %2809 = vmatprep.subr.bf16.mxu0 %v7641_v12  ;;  %3195 = vmatprep.subr.bf16.mxu1 %v7643_v16  ;;  %v7739_v12 = vld [vmem:[%s8834_s14 + $0x2cc] ss:$16 sps:$4 sm:$0xff]   ;;  %v7737_v16 = vld [vmem:[%s8834_s14 + $0x2c8] ss:$16 sps:$4 sm:$0xff]   ;;  %v7718_v42 = vld [vmem:[%s8834_s14 + $0x324] ss:$16 sps:$4 sm:$0xff]  }
 0x31e   : > { %2810 = vmatpush1.bf16.msra.mxu0 %v7645_v21  ;;  %3196 = vmatpush1.bf16.msra.mxu1 %v7646_v22  ;;  %v7742_v21 = vld [vmem:[%s8834_s14 + $0x2ec] ss:$16 sps:$4 sm:$0xff]   ;;  %v7704_v22 = vld [vmem:[%s8834_s14 + $0x2e0] ss:$16 sps:$4 sm:$0xff]  }
 0x31f   : > { %2811 = vmatprep.subr.bf16.mxu0 %v7647_v48  ;;  %3197 = vmatprep.subr.bf16.mxu1 %v7649_v23  ;;  %v7709_v48 = vld [vmem:[%s8834_s14 + $0x304] ss:$16 sps:$4 sm:$0xff]   ;;  %v7740_v23 = vld [vmem:[%s8834_s14 + $0x2e8] ss:$16 sps:$4 sm:$0xff]  }
 0x322   : > { %2812 = vmatpush1.bf16.msra.mxu0 %v7651_v5  ;;  %3198 = vmatpush1.bf16.msra.mxu1 %v7652_v55  ;;  %v1953_v5 = vld [vmem:[#allocation2 + $0x80] sm:$0xff]  ;;  %v1958_v55 = vld [vmem:[#allocation2 + $0xa8] sm:$0xff] }
 0x323   : > { %2813 = vmatprep.subr.bf16.mxu0 %v7653_v14  ;;  %3199 = vmatprep.subr.bf16.mxu1 %v7655_v45  ;;  %v7707_v14 = vld [vmem:[%s8834_s14 + $0x300] ss:$16 sps:$4 sm:$0xff]   ;;  %v7748_v45 = vld [vmem:[%s8834_s14 + $0x30c] ss:$16 sps:$4 sm:$0xff]  }
 0x326   : > { %2814 = vmatpush1.bf16.msra.mxu0 %v7657_v54  ;;  %3200 = vmatpush1.bf16.msra.mxu1 %v7658_v51  ;;  %v7746_v54 = vld [vmem:[%s8834_s14 + $0x308] ss:$16 sps:$4 sm:$0xff]   ;;  %v7716_v51 = vld [vmem:[%s8834_s14 + $0x320] ss:$16 sps:$4 sm:$0xff]  }
 0x327   : > { %2815 = vmatprep.subr.bf16.mxu0 %v7659_v27  ;;  %3201 = vmatprep.subr.bf16.mxu1 %v7661_v8  ;;  %v7751_v27 = vld [vmem:[%s8834_s14 + $0x32c] ss:$16 sps:$4 sm:$0xff]   ;;  %v7727_v8 = vld [vmem:[%s8834_s14 + $0x344] ss:$16 sps:$4 sm:$0xff]  }
 0x32a   : > { %2816 = vmatpush1.bf16.msra.mxu0 %v7663_v10  ;;  %3202 = vmatpush1.bf16.msra.mxu1 %v7664_v18  ;;  %v7749_v10 = vld [vmem:[%s8834_s14 + $0x328] ss:$16 sps:$4 sm:$0xff]  }
 0x32b   : > { %2817 = vmatprep.subr.bf16.mxu0 %v7665_v1  ;;  %3203 = vmatprep.subr.bf16.mxu1 %v7667_v9  ;;  %v1957_v18 = vld [vmem:[#allocation2 + $0xa0] sm:$0xff]  ;;  %v1962_v1 = vld [vmem:[#allocation2 + $0xc8] sm:$0xff] }
 0x32c   : > { %v7725_v9 = vld [vmem:[%s8834_s14 + $0x340] ss:$16 sps:$4 sm:$0xff]  }
 0x32e   : > { %2818 = vmatpush1.bf16.msra.mxu0 %v7669_v44  ;;  %3204 = vmatpush1.bf16.msra.mxu1 %v7670_v58  ;;  %v7757_v44 = vld [vmem:[%s8834_s14 + $0x34c] ss:$16 sps:$4 sm:$0xff]   ;;  %v7736_v58 = vld [vmem:[%s8834_s14 + $0x364] ss:$16 sps:$4 sm:$0xff]  }
 0x32f   : > { %2819 = vmatprep.subr.bf16.mxu0 %v7671_v46  ;;  %3205 = vmatprep.subr.bf16.mxu1 %v7673_v39  ;;  %v7755_v46 = vld [vmem:[%s8834_s14 + $0x348] ss:$16 sps:$4 sm:$0xff]   ;;  %v7734_v39 = vld [vmem:[%s8834_s14 + $0x360] ss:$16 sps:$4 sm:$0xff]  }
 0x332   : > { %2820 = vmatpush1.bf16.msra.mxu0 %v7675_v4  ;;  %3206 = vmatpush1.bf16.msra.mxu1 %v7676_v0  ;;  %v7760_v4 = vld [vmem:[%s8834_s14 + $0x36c] ss:$16 sps:$4 sm:$0xff]   ;;  %v7745_v0 = vld [vmem:[%s8834_s14 + $0x384] ss:$16 sps:$4 sm:$0xff]  }
 0x333   : > { %2821 = vmatprep.subr.bf16.mxu0 %v7677_v25  ;;  %3207 = vmatprep.subr.bf16.mxu1 %v7679_v37  ;;  %v7758_v25 = vld [vmem:[%s8834_s14 + $0x368] ss:$16 sps:$4 sm:$0xff]  }
 0x334   : > { %v1961_v37 = vld [vmem:[#allocation2 + $0xc0] sm:$0xff] }
 0x336   : > { %2822 = vmatpush1.bf16.msra.mxu0 %v7681_v33  ;;  %3208 = vmatpush1.bf16.msra.mxu1 %v7682_v57  ;;  %v1966_v33 = vld [vmem:[#allocation2 + $0xe8] sm:$0xff] }
 0x337   : > { %2984 = vmatprep.subr.bf16.mxu0 %v7685_v52  ;;  %3370 = vmatprep.subr.bf16.mxu1 %v7712_v19  ;;  %v7743_v57 = vld [vmem:[%s8834_s14 + $0x380] ss:$16 sps:$4 sm:$0xff]   ;;  %v7766_v52 = vld [vmem:[%s8834_s14 + $0x38c] ss:$16 sps:$4 sm:$0xff]   ;;  %v7754_v19 = vld [vmem:[%s8834_s14 + $0x3a4] ss:$16 sps:$4 sm:$0xff]  }
 0x339   : > { %2824 = vmatmul.mubr.bf16.vlgmr.msra.gmra.mrb[0].mxu0 %v1937_v50  ;;  %3210 = vmatmul.mubr.bf16.vlgmr.msra.gmra.mrb[0].mxu1 %v1937_v50  ;;  %v7764_v50 = vld [vmem:[%s8834_s14 + $0x388] ss:$16 sps:$4 sm:$0xff]  }
 0x33a   : > { %2985 = vmatpush1.bf16.msra.mxu0 %v7683_v53  ;;  %2833 = vmatprep.mubr.bf16.mxu0 %v1942_v31  ;;  %v7752_v53 = vld [vmem:[%s8834_s14 + $0x3a0] ss:$16 sps:$4 sm:$0xff]  }
 0x33b   : > { %3219 = vmatprep.mubr.bf16.mxu1 %v1942_v31  ;;  %2986 = vmatprep.subr.bf16.mxu0 %v7688_v41  ;;  %v7769_v31 = vld [vmem:[%s8834_s14 + $0x3ac] ss:$16 sps:$4 sm:$0xff]   ;;  %v7763_v41 = vld [vmem:[%s8834_s14 + $0x3c4] ss:$16 sps:$4 sm:$0xff]  }
 0x33c   : > { %3371 = vmatpush1.bf16.msra.mxu1 %v7710_v2  ;;  %v7767_v2 = vld [vmem:[%s8834_s14 + $0x3a8] ss:$16 sps:$4 sm:$0xff]  }
 0x33d   : > { %3372 = vmatprep.subr.bf16.mxu1 %v7715_v40  ;;  %v1965_v40 = vld [vmem:[#allocation2 + $0xe0] sm:$0xff] }
 0x33e   : > { %2987 = vmatpush1.bf16.msra.mxu0 %v7686_v20  ;;  %v1970_v20 = vld [vmem:[#allocation2 + $0x108] sm:$0xff] }
 0x33f   : > { %2988 = vmatprep.subr.bf16.mxu0 %v7691_v13  ;;  %v7761_v13 = vld [vmem:[%s8834_s14 + $0x3c0] ss:$16 sps:$4 sm:$0xff]  }
 0x340   : > { %3373 = vmatpush1.bf16.msra.mxu1 %v7713_v62  ;;  %v7775_v62 = vld [vmem:[%s8834_s14 + $0x3cc] ss:$16 sps:$4 sm:$0xff]  }
 0x341   : > { %2834 = vmatmul.mubr.bf16.gmra.mrb[4].mxu0 %v1941_v24  ;;  %3220 = vmatmul.mubr.bf16.gmra.mrb[4].mxu1 %v1941_v24  ;;  %v7772_v24 = vld [vmem:[%s8834_s14 + $0x3e4] ss:$16 sps:$4 sm:$0xff]  }
 0x342   : > { %2843 = vmatprep.mubr.bf16.mxu0 %v1946_v47  ;;  %3229 = vmatprep.mubr.bf16.mxu1 %v1946_v47  ;;  %v7773_v47 = vld [vmem:[%s8834_s14 + $0x3c8] ss:$16 sps:$4 sm:$0xff]  }
 0x343   : > { %2989 = vmatpush1.bf16.msra.mxu0 %v7689_v28  ;;  %3374 = vmatprep.subr.bf16.mxu1 %v7721_v17  ;;  %v7770_v28 = vld [vmem:[%s8834_s14 + $0x3e0] ss:$16 sps:$4 sm:$0xff]   ;;  %v7778_v17 = vld [vmem:[%s8834_s14 + $0x3ec] ss:$16 sps:$4 sm:$0xff]  }
 0x344   : > { %2990 = vmatprep.subr.bf16.mxu0 %v7694_v7  ;;  %3375 = vmatpush1.bf16.msra.mxu1 %v7719_v38  ;;  %v7776_v7 = vld [vmem:[%s8834_s14 + $0x3e8] ss:$16 sps:$4 sm:$0xff]  }
 0x345   : > { %3376 = vmatprep.subr.bf16.mxu1 %v7724_v56  ;;  %v1969_v38 = vld [vmem:[#allocation2 + $0x100] sm:$0xff]  ;;  %v1974_v56 = vld [vmem:[#allocation2 + $0x128] sm:$0xff] }
 0x347   : > { %2991 = vmatpush1.bf16.msra.mxu0 %v7692_v61  ;;  %v1973_v61 = vld [vmem:[#allocation2 + $0x120] sm:$0xff] }
 0x348   : > { %2992 = vmatprep.subr.bf16.mxu0 %v7697_v36  ;;  %3377 = vmatpush1.bf16.msra.mxu1 %v7722_v60  ;;  %v1978_v36 = vld [vmem:[#allocation2 + $0x148] sm:$0xff]  ;;  %v1977_v60 = vld [vmem:[#allocation2 + $0x140] sm:$0xff] }
 0x349   : > { %2844 = vmatmul.mubr.bf16.gmra.mrb[8].mxu0 %v1945_v49  ;;  %3230 = vmatmul.mubr.bf16.gmra.mrb[8].mxu1 %v1945_v49  ;;  %v1982_v49 = vld [vmem:[#allocation2 + $0x168] sm:$0xff] }
 0x34a   : > { %2853 = vmatprep.mubr.bf16.mxu0 %v1950_v6  ;;  %3239 = vmatprep.mubr.bf16.mxu1 %v1950_v6  ;;  %v1981_v6 = vld [vmem:[#allocation2 + $0x160] sm:$0xff] }
 0x34b   : > { %2993 = vmatpush1.bf16.msra.mxu0 %v7695_v26  ;;  %3378 = vmatprep.subr.bf16.mxu1 %v7730_v11  ;;  %v1986_v26 = vld [vmem:[#allocation2 + $0x188] sm:$0xff]  ;;  %v1985_v11 = vld [vmem:[#allocation2 + $0x180] sm:$0xff] }
 0x34c   : > { %2994 = vmatprep.subr.bf16.mxu0 %v7700_v3  ;;  %3379 = vmatpush1.bf16.msra.mxu1 %v7728_v35  ;;  %v1990_v3 = vld [vmem:[#allocation2 + $0x1a8] sm:$0xff]  ;;  %v1989_v35 = vld [vmem:[#allocation2 + $0x1a0] sm:$0xff] }
 0x34d   : > { %3380 = vmatprep.subr.bf16.mxu1 %v7733_v63  ;;  %v1994_v63 = vld [vmem:[#allocation2 + $0x1c8] sm:$0xff] }
 0x34f   : > { %2995 = vmatpush1.bf16.msra.mxu0 %v7698_v15  ;;  %v7781_v15 = vld [vmem:[%s8843_s20 + $0x4] ss:$16 sps:$4 sm:$0xff]  }
 0x350   : > { %2996 = vmatprep.subr.bf16.mxu0 %v7703_v32  ;;  %3381 = vmatpush1.bf16.msra.mxu1 %v7731_v29  ;;  %v7784_v32 = vld [vmem:[%s8843_s20 + $0xc] ss:$16 sps:$4 sm:$0xff]   ;;  %v1993_v29 = vld [vmem:[#allocation2 + $0x1c0] sm:$0xff] }
 0x351   : > { %2854 = vmatmul.mubr.bf16.gmra.mrb[12].mxu0 %v1949_v59  ;;  %3240 = vmatmul.mubr.bf16.gmra.mrb[12].mxu1 %v1949_v59  ;;  %v1998_v59 = vld [vmem:[#allocation2 + $0x1e8] sm:$0xff] }
 0x352   : > { %2863 = vmatprep.mubr.bf16.mxu0 %v1954_v43  ;;  %3249 = vmatprep.mubr.bf16.mxu1 %v1954_v43  ;;  %v1997_v43 = vld [vmem:[#allocation2 + $0x1e0] sm:$0xff] }
 0x353   : > { %2997 = vmatpush1.bf16.msra.mxu0 %v7701_v34  ;;  %3382 = vmatprep.subr.bf16.mxu1 %v7739_v12  ;;  %v1940_v34 = vld [vmem:[#allocation2 + $0x18] sm:$0xff] }
 0x354   : > { %2998 = vmatprep.subr.bf16.mxu0 %v7706_v30  ;;  %3383 = vmatpush1.bf16.msra.mxu1 %v7737_v16  ;;  %v1939_v30 = vld [vmem:[#allocation2 + $0x10] sm:$0xff]  ;;  %v1944_v12 = vld [vmem:[#allocation2 + $0x38] sm:$0xff] }
 0x355   : > { %3384 = vmatprep.subr.bf16.mxu1 %v7742_v21  ;;  %v7779_v16 = vld [vmem:[%s8843_s20] ss:$16 sps:$4 sm:$0xff]   ;;  %v7782_v21 = vld [vmem:[%s8843_s20 + $0x8] ss:$16 sps:$4 sm:$0xff]  }
 0x357   : > { %2999 = vmatpush1.bf16.msra.mxu0 %v7704_v22  ;;  %v7787_v22 = vld [vmem:[%s8843_s20 + $0x24] ss:$16 sps:$4 sm:$0xff]  }
 0x358   : > { %3000 = vmatprep.subr.bf16.mxu0 %v7709_v48  ;;  %3385 = vmatpush1.bf16.msra.mxu1 %v7740_v23  ;;  %v7790_v48 = vld [vmem:[%s8843_s20 + $0x2c] ss:$16 sps:$4 sm:$0xff]   ;;  %v7785_v23 = vld [vmem:[%s8843_s20 + $0x20] ss:$16 sps:$4 sm:$0xff]  }
 0x359   : > { %2864 = vmatmul.mubr.bf16.gmra.mrb[16].mxu0 %v1953_v5  ;;  %3250 = vmatmul.mubr.bf16.gmra.mrb[16].mxu1 %v1953_v5  ;;  %v7788_v5 = vld [vmem:[%s8843_s20 + $0x28] ss:$16 sps:$4 sm:$0xff]  }
 0x35a   : > { %2873 = vmatprep.mubr.bf16.mxu0 %v1958_v55  ;;  %3259 = vmatprep.mubr.bf16.mxu1 %v1958_v55  ;;  %v7793_v55 = vld [vmem:[%s8843_s20 + $0x44] ss:$16 sps:$4 sm:$0xff]  }
 0x35b   : > { %3001 = vmatpush1.bf16.msra.mxu0 %v7707_v14  ;;  %3386 = vmatprep.subr.bf16.mxu1 %v7748_v45  ;;  %v7796_v14 = vld [vmem:[%s8843_s20 + $0x4c] ss:$16 sps:$4 sm:$0xff]   ;;  %v1943_v45 = vld [vmem:[#allocation2 + $0x30] sm:$0xff] }
 0x35c   : > { %3002 = vmatprep.subr.bf16.mxu0 %v7718_v42  ;;  %3387 = vmatpush1.bf16.msra.mxu1 %v7746_v54  ;;  %v1948_v42 = vld [vmem:[#allocation2 + $0x58] sm:$0xff]  ;;  %v7791_v54 = vld [vmem:[%s8843_s20 + $0x40] ss:$16 sps:$4 sm:$0xff]  }
 0x35d   : > { %3388 = vmatprep.subr.bf16.mxu1 %v7751_v27  ;;  %v7799_v27 = vld [vmem:[%s8843_s20 + $0x64] ss:$16 sps:$4 sm:$0xff]  }
 0x35f   : > { %3003 = vmatpush1.bf16.msra.mxu0 %v7716_v51  ;;  %v7794_v51 = vld [vmem:[%s8843_s20 + $0x48] ss:$16 sps:$4 sm:$0xff]  }
 0x360   : > { %3004 = vmatprep.subr.bf16.mxu0 %v7727_v8  ;;  %3389 = vmatpush1.bf16.msra.mxu1 %v7749_v10  ;;  %v7802_v8 = vld [vmem:[%s8843_s20 + $0x6c] ss:$16 sps:$4 sm:$0xff]   ;;  %v7797_v10 = vld [vmem:[%s8843_s20 + $0x60] ss:$16 sps:$4 sm:$0xff]  }
 0x361   : > { %2874 = vmatmul.mubr.bf16.gmra.mrb[20].mxu0 %v1957_v18  ;;  %3260 = vmatmul.mubr.bf16.gmra.mrb[20].mxu1 %v1957_v18  ;;  %v7800_v18 = vld [vmem:[%s8843_s20 + $0x68] ss:$16 sps:$4 sm:$0xff]  }
 0x362   : > { %2883 = vmatprep.mubr.bf16.mxu0 %v1962_v1  ;;  %3269 = vmatprep.mubr.bf16.mxu1 %v1962_v1  ;;  %v7805_v1 = vld [vmem:[%s8843_s20 + $0x84] ss:$16 sps:$4 sm:$0xff]  }
 0x363   : > { %3005 = vmatpush1.bf16.msra.mxu0 %v7725_v9  ;;  %3390 = vmatprep.subr.bf16.mxu1 %v7757_v44  ;;  %v7808_v9 = vld [vmem:[%s8843_s20 + $0x8c] ss:$16 sps:$4 sm:$0xff]   ;;  %v1947_v44 = vld [vmem:[#allocation2 + $0x50] sm:$0xff] }
 0x364   : > { %3006 = vmatprep.subr.bf16.mxu0 %v7736_v58  ;;  %3391 = vmatpush1.bf16.msra.mxu1 %v7755_v46  ;;  %v1952_v58 = vld [vmem:[#allocation2 + $0x78] sm:$0xff]  ;;  %v7803_v46 = vld [vmem:[%s8843_s20 + $0x80] ss:$16 sps:$4 sm:$0xff]  }
 0x365   : > { %3392 = vmatprep.subr.bf16.mxu1 %v7760_v4  ;;  %v7811_v4 = vld [vmem:[%s8843_s20 + $0xa4] ss:$16 sps:$4 sm:$0xff]  }
 0x367   : > { %3007 = vmatpush1.bf16.msra.mxu0 %v7734_v39  ;;  %v7806_v39 = vld [vmem:[%s8843_s20 + $0x88] ss:$16 sps:$4 sm:$0xff]  }
 0x368   : > { %3008 = vmatprep.subr.bf16.mxu0 %v7745_v0  ;;  %3393 = vmatpush1.bf16.msra.mxu1 %v7758_v25  ;;  %v7814_v0 = vld [vmem:[%s8843_s20 + $0xac] ss:$16 sps:$4 sm:$0xff]   ;;  %v7809_v25 = vld [vmem:[%s8843_s20 + $0xa0] ss:$16 sps:$4 sm:$0xff]  }
 0x369   : > { %2884 = vmatmul.mubr.bf16.gmra.mrb[24].mxu0 %v1961_v37  ;;  %3270 = vmatmul.mubr.bf16.gmra.mrb[24].mxu1 %v1961_v37  ;;  %v7812_v37 = vld [vmem:[%s8843_s20 + $0xa8] ss:$16 sps:$4 sm:$0xff]  }
 0x36a   : > { %2893 = vmatprep.mubr.bf16.mxu0 %v1966_v33  ;;  %3279 = vmatprep.mubr.bf16.mxu1 %v1966_v33  ;;  %v7817_v33 = vld [vmem:[%s8843_s20 + $0xc4] ss:$16 sps:$4 sm:$0xff]  }
 0x36b   : > { %3009 = vmatpush1.bf16.msra.mxu0 %v7743_v57  ;;  %3394 = vmatprep.subr.bf16.mxu1 %v7766_v52  ;;  %v7820_v57 = vld [vmem:[%s8843_s20 + $0xcc] ss:$16 sps:$4 sm:$0xff]   ;;  %v1951_v52 = vld [vmem:[#allocation2 + $0x70] sm:$0xff] }
 0x36c   : > { %3010 = vmatprep.subr.bf16.mxu0 %v7754_v19  ;;  %3395 = vmatpush1.bf16.msra.mxu1 %v7764_v50  ;;  %v1956_v19 = vld [vmem:[#allocation2 + $0x98] sm:$0xff]  ;;  %v7815_v50 = vld [vmem:[%s8843_s20 + $0xc0] ss:$16 sps:$4 sm:$0xff]  }
 0x36d   : > { %3396 = vmatprep.subr.bf16.mxu1 %v7769_v31  ;;  %v7823_v31 = vld [vmem:[%s8843_s20 + $0xe4] ss:$16 sps:$4 sm:$0xff]  }
 0x36f   : > { %3011 = vmatpush1.bf16.msra.mxu0 %v7752_v53  ;;  %v7818_v53 = vld [vmem:[%s8843_s20 + $0xc8] ss:$16 sps:$4 sm:$0xff]  }
 0x370   : > { %3012 = vmatprep.subr.bf16.mxu0 %v7763_v41  ;;  %3397 = vmatpush1.bf16.msra.mxu1 %v7767_v2  ;;  %v7826_v41 = vld [vmem:[%s8843_s20 + $0xec] ss:$16 sps:$4 sm:$0xff]   ;;  %v7821_v2 = vld [vmem:[%s8843_s20 + $0xe0] ss:$16 sps:$4 sm:$0xff]  }
 0x371   : > { %2894 = vmatmul.mubr.bf16.gmra.mrb[28].mxu0 %v1965_v40  ;;  %3280 = vmatmul.mubr.bf16.gmra.mrb[28].mxu1 %v1965_v40  ;;  %v7824_v40 = vld [vmem:[%s8843_s20 + $0xe8] ss:$16 sps:$4 sm:$0xff]  }
 0x372   : > { %2903 = vmatprep.mubr.bf16.mxu0 %v1970_v20  ;;  %3289 = vmatprep.mubr.bf16.mxu1 %v1970_v20  ;;  %v7829_v20 = vld [vmem:[%s8843_s20 + $0x104] ss:$16 sps:$4 sm:$0xff]  }
 0x373   : > { %3013 = vmatpush1.bf16.msra.mxu0 %v7761_v13  ;;  %3398 = vmatprep.subr.bf16.mxu1 %v7775_v62  ;;  %v7832_v13 = vld [vmem:[%s8843_s20 + $0x10c] ss:$16 sps:$4 sm:$0xff]   ;;  %v1955_v62 = vld [vmem:[#allocation2 + $0x90] sm:$0xff] }
 0x374   : > { %3014 = vmatprep.subr.bf16.mxu0 %v7772_v24  ;;  %3399 = vmatpush1.bf16.msra.mxu1 %v7773_v47  ;;  %v1960_v24 = vld [vmem:[#allocation2 + $0xb8] sm:$0xff]  ;;  %v7827_v47 = vld [vmem:[%s8843_s20 + $0x100] ss:$16 sps:$4 sm:$0xff]  }
 0x375   : > { %3400 = vmatprep.subr.bf16.mxu1 %v7778_v17  ;;  %v7835_v17 = vld [vmem:[%s8843_s20 + $0x124] ss:$16 sps:$4 sm:$0xff]  }
 0x377   : > { %3015 = vmatpush1.bf16.msra.mxu0 %v7770_v28  ;;  %v7830_v28 = vld [vmem:[%s8843_s20 + $0x108] ss:$16 sps:$4 sm:$0xff]  }
 0x378   : > { %3401 = vmatpush1.bf16.msra.mxu1 %v7776_v7  ;;  %5163 = vmatprep.subr.bf16.mxu0 %v7781_v15  ;;  %v7838_v7 = vld [vmem:[%s8843_s20 + $0x12c] ss:$16 sps:$4 sm:$0xff]   ;;  %v7853_v15 = vld [vmem:[%s8843_s20 + $0x184] ss:$16 sps:$4 sm:$0xff]  }
 0x379   : > { %2904 = vmatmul.mubr.bf16.gmra.mrb[32].mxu0 %v1969_v38  ;;  %3290 = vmatmul.mubr.bf16.gmra.mrb[32].mxu1 %v1969_v38  ;;  %v7833_v38 = vld [vmem:[%s8843_s20 + $0x120] ss:$16 sps:$4 sm:$0xff]  }
 0x37a   : > { %2913 = vmatprep.mubr.bf16.mxu0 %v1974_v56  ;;  %3299 = vmatprep.mubr.bf16.mxu1 %v1974_v56  ;;  %v7836_v56 = vld [vmem:[%s8843_s20 + $0x128] ss:$16 sps:$4 sm:$0xff]  }
 0x37b   : > { %5549 = vmatprep.subr.bf16.mxu1 %v7784_v32  ;;  %v7856_v32 = vld [vmem:[%s8843_s20 + $0x18c] ss:$16 sps:$4 sm:$0xff]  }
 0x381   : > { %2914 = vmatmul.mubr.bf16.gmra.mrb[36].mxu0 %v1973_v61  ;;  %3300 = vmatmul.mubr.bf16.gmra.mrb[36].mxu1 %v1973_v61  ;;  %v7841_v61 = vld [vmem:[%s8843_s20 + $0x144] ss:$16 sps:$4 sm:$0xff]  }
 0x382   : > { %2923 = vmatprep.mubr.bf16.mxu0 %v1978_v36  ;;  %3309 = vmatprep.mubr.bf16.mxu1 %v1978_v36  ;;  %v7844_v36 = vld [vmem:[%s8843_s20 + $0x14c] ss:$16 sps:$4 sm:$0xff]  }
 0x389   : > { %2924 = vmatmul.mubr.bf16.gmra.mrb[40].mxu0 %v1977_v60  ;;  %3310 = vmatmul.mubr.bf16.gmra.mrb[40].mxu1 %v1977_v60  ;;  %v1959_v60 = vld [vmem:[#allocation2 + $0xb0] sm:$0xff] }
 0x38a   : > { %2933 = vmatprep.mubr.bf16.mxu0 %v1982_v49  ;;  %3319 = vmatprep.mubr.bf16.mxu1 %v1982_v49  ;;  %v1964_v49 = vld [vmem:[#allocation2 + $0xd8] sm:$0xff] }
 0x391   : > { %2934 = vmatmul.mubr.bf16.gmra.mrb[44].mxu0 %v1981_v6  ;;  %3320 = vmatmul.mubr.bf16.gmra.mrb[44].mxu1 %v1981_v6  ;;  %v7839_v6 = vld [vmem:[%s8843_s20 + $0x140] ss:$16 sps:$4 sm:$0xff]  }
 0x392   : > { %2943 = vmatprep.mubr.bf16.mxu0 %v1986_v26  ;;  %3329 = vmatprep.mubr.bf16.mxu1 %v1986_v26  ;;  %v7842_v26 = vld [vmem:[%s8843_s20 + $0x148] ss:$16 sps:$4 sm:$0xff]  }
 0x399   : > { %2944 = vmatmul.mubr.bf16.gmra.mrb[48].mxu0 %v1985_v11  ;;  %3330 = vmatmul.mubr.bf16.gmra.mrb[48].mxu1 %v1985_v11  ;;  %v7847_v11 = vld [vmem:[%s8843_s20 + $0x164] ss:$16 sps:$4 sm:$0xff]  }
 0x39a   : > { %2953 = vmatprep.mubr.bf16.mxu0 %v1990_v3  ;;  %3339 = vmatprep.mubr.bf16.mxu1 %v1990_v3  ;;  %v7850_v3 = vld [vmem:[%s8843_s20 + $0x16c] ss:$16 sps:$4 sm:$0xff]  }
 0x3a1   : > { %2954 = vmatmul.mubr.bf16.gmra.mrb[52].mxu0 %v1989_v35  ;;  %3340 = vmatmul.mubr.bf16.gmra.mrb[52].mxu1 %v1989_v35  ;;  %v7845_v35 = vld [vmem:[%s8843_s20 + $0x160] ss:$16 sps:$4 sm:$0xff]  }
 0x3a2   : > { %2963 = vmatprep.mubr.bf16.mxu0 %v1994_v63  ;;  %3349 = vmatprep.mubr.bf16.mxu1 %v1994_v63  ;;  %v7848_v63 = vld [vmem:[%s8843_s20 + $0x168] ss:$16 sps:$4 sm:$0xff]  }
 0x3a9   : > { %2964 = vmatmul.mubr.bf16.gmra.mrb[56].mxu0 %v1993_v29  ;;  %3350 = vmatmul.mubr.bf16.gmra.mrb[56].mxu1 %v1993_v29  ;;  %v1963_v29 = vld [vmem:[#allocation2 + $0xd0] sm:$0xff] }
 0x3aa   : > { %2973 = vmatprep.mubr.bf16.mxu0 %v1998_v59  ;;  %3359 = vmatprep.mubr.bf16.mxu1 %v1998_v59  ;;  %v1968_v59 = vld [vmem:[#allocation2 + $0xf8] sm:$0xff] }
 0x3b1   : > { %2974 = vmatmul.mubr.bf16.gmra.mrb[60].mxu0 %v1997_v43  ;;  %3360 = vmatmul.mubr.bf16.gmra.mrb[60].mxu1 %v1997_v43  ;;  %v7851_v43 = vld [vmem:[%s8843_s20 + $0x180] ss:$16 sps:$4 sm:$0xff]  }
 0x3b2   : > { %3016 = vmatprep.mubr.bf16.mxu0 %v1940_v34  ;;  %3402 = vmatprep.mubr.bf16.mxu1 %v1940_v34  ;;  %v7854_v34 = vld [vmem:[%s8843_s20 + $0x188] ss:$16 sps:$4 sm:$0xff]  }
 0x3b9   : > { %3017 = vmatmul.mubr.bf16.vlgmr.msra.gmra.mrb[0].mxu0 %v1939_v30  ;;  %3403 = vmatmul.mubr.bf16.vlgmr.msra.gmra.mrb[0].mxu1 %v1939_v30  ;;  %v1967_v30 = vld [vmem:[#allocation2 + $0xf0] sm:$0xff] }
 0x3ba   : > { %3026 = vmatprep.mubr.bf16.mxu0 %v1944_v12  ;;  %3412 = vmatprep.mubr.bf16.mxu1 %v1944_v12  ;;  %v1972_v12 = vld [vmem:[#allocation2 + $0x118] sm:$0xff] }
 0x3bb   : > { %5164 = vmatpush1.bf16.msra.mxu0 %v7779_v16  ;;  %5550 = vmatpush1.bf16.msra.mxu1 %v7782_v21  ;;  %v1971_v16 = vld [vmem:[#allocation2 + $0x110] sm:$0xff]  ;;  %v1976_v21 = vld [vmem:[#allocation2 + $0x138] sm:$0xff] }
 0x3bc   : > { %5165 = vmatprep.subr.bf16.mxu0 %v7787_v22  ;;  %5551 = vmatprep.subr.bf16.mxu1 %v7790_v48  ;;  %v1975_v22 = vld [vmem:[#allocation2 + $0x130] sm:$0xff]  ;;  %v1980_v48 = vld [vmem:[#allocation2 + $0x158] sm:$0xff] }
 0x3bf   : > { %5166 = vmatpush1.bf16.msra.mxu0 %v7785_v23  ;;  %5552 = vmatpush1.bf16.msra.mxu1 %v7788_v5  ;;  %v1979_v23 = vld [vmem:[#allocation2 + $0x150] sm:$0xff]  ;;  %v1984_v5 = vld [vmem:[#allocation2 + $0x178] sm:$0xff] }
 0x3c0   : > { %5167 = vmatprep.subr.bf16.mxu0 %v7793_v55  ;;  %5553 = vmatprep.subr.bf16.mxu1 %v7796_v14  ;;  %v1983_v55 = vld [vmem:[#allocation2 + $0x170] sm:$0xff]  ;;  %v1988_v14 = vld [vmem:[#allocation2 + $0x198] sm:$0xff] }
 0x3c1   : > { %3027 = vmatmul.mubr.bf16.gmra.mrb[4].mxu0 %v1943_v45  ;;  %3413 = vmatmul.mubr.bf16.gmra.mrb[4].mxu1 %v1943_v45  ;;  %v1987_v45 = vld [vmem:[#allocation2 + $0x190] sm:$0xff] }
 0x3c2   : > { %3036 = vmatprep.mubr.bf16.mxu0 %v1948_v42  ;;  %3422 = vmatprep.mubr.bf16.mxu1 %v1948_v42  ;;  %v1992_v42 = vld [vmem:[#allocation2 + $0x1b8] sm:$0xff] }
 0x3c3   : > { %5168 = vmatpush1.bf16.msra.mxu0 %v7791_v54  ;;  %5554 = vmatpush1.bf16.msra.mxu1 %v7794_v51  ;;  %v7859_v54 = vld [vmem:[%s8843_s20 + $0x1a4] ss:$16 sps:$4 sm:$0xff]   ;;  %v7862_v51 = vld [vmem:[%s8843_s20 + $0x1ac] ss:$16 sps:$4 sm:$0xff]  }
 0x3c4   : > { %5169 = vmatprep.subr.bf16.mxu0 %v7799_v27  ;;  %5555 = vmatprep.subr.bf16.mxu1 %v7802_v8  ;;  %v7857_v27 = vld [vmem:[%s8843_s20 + $0x1a0] ss:$16 sps:$4 sm:$0xff]   ;;  %v7860_v8 = vld [vmem:[%s8843_s20 + $0x1a8] ss:$16 sps:$4 sm:$0xff]  }
 0x3c7   : > { %5170 = vmatpush1.bf16.msra.mxu0 %v7797_v10  ;;  %5556 = vmatpush1.bf16.msra.mxu1 %v7800_v18  ;;  %v1991_v10 = vld [vmem:[#allocation2 + $0x1b0] sm:$0xff]  ;;  %v1996_v18 = vld [vmem:[#allocation2 + $0x1d8] sm:$0xff] }
 0x3c8   : > { %5171 = vmatprep.subr.bf16.mxu0 %v7805_v1  ;;  %5557 = vmatprep.subr.bf16.mxu1 %v7808_v9  ;;  %v7865_v1 = vld [vmem:[%s8843_s20 + $0x1c4] ss:$16 sps:$4 sm:$0xff]   ;;  %v7868_v9 = vld [vmem:[%s8843_s20 + $0x1cc] ss:$16 sps:$4 sm:$0xff]  }
 0x3c9   : > { %3037 = vmatmul.mubr.bf16.gmra.mrb[8].mxu0 %v1947_v44  ;;  %3423 = vmatmul.mubr.bf16.gmra.mrb[8].mxu1 %v1947_v44  ;;  %v7863_v44 = vld [vmem:[%s8843_s20 + $0x1c0] ss:$16 sps:$4 sm:$0xff]  }
 0x3ca   : > { %3046 = vmatprep.mubr.bf16.mxu0 %v1952_v58  ;;  %3432 = vmatprep.mubr.bf16.mxu1 %v1952_v58  ;;  %v7866_v58 = vld [vmem:[%s8843_s20 + $0x1c8] ss:$16 sps:$4 sm:$0xff]  }
 0x3cb   : > { %5172 = vmatpush1.bf16.msra.mxu0 %v7803_v46  ;;  %5558 = vmatpush1.bf16.msra.mxu1 %v7806_v39  ;;  %v1995_v46 = vld [vmem:[#allocation2 + $0x1d0] sm:$0xff]  ;;  %v2000_v39 = vld [vmem:[#allocation2 + $0x1f8] sm:$0xff] }
 0x3cc   : > { %5173 = vmatprep.subr.bf16.mxu0 %v7811_v4  ;;  %5559 = vmatprep.subr.bf16.mxu1 %v7814_v0  ;;  %v7871_v4 = vld [vmem:[%s8843_s20 + $0x1e4] ss:$16 sps:$4 sm:$0xff]   ;;  %v7874_v0 = vld [vmem:[%s8843_s20 + $0x1ec] ss:$16 sps:$4 sm:$0xff]  }
 0x3cf   : > { %5174 = vmatpush1.bf16.msra.mxu0 %v7809_v25  ;;  %5560 = vmatpush1.bf16.msra.mxu1 %v7812_v37  ;;  %v7869_v25 = vld [vmem:[%s8843_s20 + $0x1e0] ss:$16 sps:$4 sm:$0xff]   ;;  %v7872_v37 = vld [vmem:[%s8843_s20 + $0x1e8] ss:$16 sps:$4 sm:$0xff]  }
 0x3d0   : > { %5175 = vmatprep.subr.bf16.mxu0 %v7817_v33  ;;  %5561 = vmatprep.subr.bf16.mxu1 %v7820_v57  ;;  %v1999_v33 = vld [vmem:[#allocation2 + $0x1f0] sm:$0xff] }
 0x3d1   : > { %3047 = vmatmul.mubr.bf16.gmra.mrb[12].mxu0 %v1951_v52  ;;  %3433 = vmatmul.mubr.bf16.gmra.mrb[12].mxu1 %v1951_v52  ;;  %v7877_v57 = vld [vmem:[%s8843_s20 + $0x204] ss:$16 sps:$4 sm:$0xff]   ;;  %v7880_v52 = vld [vmem:[%s8843_s20 + $0x20c] ss:$16 sps:$4 sm:$0xff]  }
 0x3d2   : > { %3056 = vmatprep.mubr.bf16.mxu0 %v1956_v19  ;;  %3442 = vmatprep.mubr.bf16.mxu1 %v1956_v19  ;;  %v2131_v19 = vlaneseq }
 0x3d3   : > { %5176 = vmatpush1.bf16.msra.mxu0 %v7815_v50  ;;  %5562 = vmatpush1.bf16.msra.mxu1 %v7818_v53 }
 0x3d4   : > { %5177 = vmatprep.subr.bf16.mxu0 %v7823_v31  ;;  %5563 = vmatprep.subr.bf16.mxu1 %v7826_v41  ;;  %v10847_v50 = vshrl.u32 %v2131_v19, 7  ;;  %v2129_v41 = vld [vmem:[%s364_s29] sm:$0xf] }
 0x3d6   : > { %12965 = vst [vmem:[#allocation134_spill] sm:$0xff] %v10847_v50  ;;  %v12575_v53 = vsub.s32 0, %v10847_v50  ;;  %v12573_v31 = vsub.s32 2, %v10847_v50 }
 0x3d7   : > { %5178 = vmatpush1.bf16.msra.mxu0 %v7821_v2  ;;  %5564 = vmatpush1.bf16.msra.mxu1 %v7824_v40  ;;  %v12574_v2 = vsub.s32 1, %v10847_v50  ;;  %v12572_v40 = vsub.s32 3, %v10847_v50 }
 0x3d8   : > { %5179 = vmatprep.subr.bf16.mxu0 %v7829_v20  ;;  %5565 = vmatprep.subr.bf16.mxu1 %v7832_v13  ;;  %v10857_v20 = vrot.slane %v2129_v41, %v12575_v53  ;;  %v10861_v13 = vrot.slane %v2129_v41, %v12573_v31 }
 0x3d9   : > { %3057 = vmatmul.mubr.bf16.gmra.mrb[16].mxu0 %v1955_v62  ;;  %3443 = vmatmul.mubr.bf16.gmra.mrb[16].mxu1 %v1955_v62  ;;  %v10865_v62 = vrot.slane %v2129_v41, %v12574_v2 }
 0x3da   : > { %3066 = vmatprep.mubr.bf16.mxu0 %v1960_v24  ;;  %3452 = vmatprep.mubr.bf16.mxu1 %v1960_v24  ;;  %v10869_v24 = vrot.slane %v2129_v41, %v12572_v40 }
 0x3db   : > { %5180 = vmatpush1.bf16.msra.mxu0 %v7827_v47  ;;  %5566 = vmatpush1.bf16.msra.mxu1 %v7830_v28 }
 0x3dc   : > { %5181 = vmatprep.subr.bf16.mxu0 %v7835_v17  ;;  %5567 = vmatprep.subr.bf16.mxu1 %v7838_v7 }
 0x3df   : > { %5182 = vmatpush1.bf16.msra.mxu0 %v7833_v38  ;;  %5568 = vmatpush1.bf16.msra.mxu1 %v7836_v56 }
 0x3e0   : > { %5183 = vmatprep.subr.bf16.mxu0 %v7841_v61  ;;  %5569 = vmatprep.subr.bf16.mxu1 %v7844_v36 }
 0x3e1   : > { %3067 = vmatmul.mubr.bf16.gmra.mrb[20].mxu0 %v1959_v60  ;;  %3453 = vmatmul.mubr.bf16.gmra.mrb[20].mxu1 %v1959_v60 }
 0x3e2   : > { %3076 = vmatprep.mubr.bf16.mxu0 %v1964_v49  ;;  %3462 = vmatprep.mubr.bf16.mxu1 %v1964_v49 }
 0x3e3   : > { %5184 = vmatpush1.bf16.msra.mxu0 %v7839_v6  ;;  %5570 = vmatpush1.bf16.msra.mxu1 %v7842_v26 }
 0x3e4   : > { %5185 = vmatprep.subr.bf16.mxu0 %v7847_v11  ;;  %5571 = vmatprep.subr.bf16.mxu1 %v7850_v3 }
 0x3e7   : > { %5186 = vmatpush1.bf16.msra.mxu0 %v7845_v35  ;;  %5572 = vmatpush1.bf16.msra.mxu1 %v7848_v63 }
 0x3e8   : > { %5187 = vmatprep.subr.bf16.mxu0 %v7853_v15  ;;  %5573 = vmatprep.subr.bf16.mxu1 %v7856_v32 }
 0x3e9   : > { %3077 = vmatmul.mubr.bf16.gmra.mrb[24].mxu0 %v1963_v29  ;;  %3463 = vmatmul.mubr.bf16.gmra.mrb[24].mxu1 %v1963_v29 }
 0x3ea   : > { %3086 = vmatprep.mubr.bf16.mxu0 %v1968_v59  ;;  %3472 = vmatprep.mubr.bf16.mxu1 %v1968_v59 }
 0x3eb   : > { %5188 = vmatpush1.bf16.msra.mxu0 %v7851_v43  ;;  %5574 = vmatpush1.bf16.msra.mxu1 %v7854_v34 }
 0x3ec   : > { %5189 = vmatprep.subr.bf16.mxu0 %v7859_v54  ;;  %5575 = vmatprep.subr.bf16.mxu1 %v7862_v51 }
 0x3ef   : > { %5190 = vmatpush1.bf16.msra.mxu0 %v7857_v27  ;;  %5576 = vmatpush1.bf16.msra.mxu1 %v7860_v8 }
 0x3f0   : > { %5191 = vmatprep.subr.bf16.mxu0 %v7865_v1  ;;  %5577 = vmatprep.subr.bf16.mxu1 %v7868_v9 }
 0x3f1   : > { %3087 = vmatmul.mubr.bf16.gmra.mrb[28].mxu0 %v1967_v30  ;;  %3473 = vmatmul.mubr.bf16.gmra.mrb[28].mxu1 %v1967_v30 }
 0x3f2   : > { %3096 = vmatprep.mubr.bf16.mxu0 %v1972_v12  ;;  %3482 = vmatprep.mubr.bf16.mxu1 %v1972_v12 }
 0x3f3   : > { %5192 = vmatpush1.bf16.msra.mxu0 %v7863_v44  ;;  %5578 = vmatpush1.bf16.msra.mxu1 %v7866_v58 }
 0x3f4   : > { %5193 = vmatprep.subr.bf16.mxu0 %v7871_v4  ;;  %5579 = vmatprep.subr.bf16.mxu1 %v7874_v0 }
 0x3f7   : > { %5194 = vmatpush1.bf16.msra.mxu0 %v7869_v25  ;;  %5580 = vmatpush1.bf16.msra.mxu1 %v7872_v37 }
 0x3f8   : > { %5356 = vmatprep.subr.bf16.mxu0 %v7877_v57  ;;  %5742 = vmatprep.subr.bf16.mxu1 %v7880_v52 }
 0x3f9   : > { %3097 = vmatmul.mubr.bf16.gmra.mrb[32].mxu0 %v1971_v16  ;;  %3483 = vmatmul.mubr.bf16.gmra.mrb[32].mxu1 %v1971_v16 }
 0x3fa   : > { %3106 = vmatprep.mubr.bf16.mxu0 %v1976_v21  ;;  %3492 = vmatprep.mubr.bf16.mxu1 %v1976_v21 }
 0x401   : > { %3107 = vmatmul.mubr.bf16.gmra.mrb[36].mxu0 %v1975_v22  ;;  %3493 = vmatmul.mubr.bf16.gmra.mrb[36].mxu1 %v1975_v22 }
 0x402   : > { %3116 = vmatprep.mubr.bf16.mxu0 %v1980_v48  ;;  %3502 = vmatprep.mubr.bf16.mxu1 %v1980_v48 }
 0x409   : > { %3117 = vmatmul.mubr.bf16.gmra.mrb[40].mxu0 %v1979_v23  ;;  %3503 = vmatmul.mubr.bf16.gmra.mrb[40].mxu1 %v1979_v23 }
 0x40a   : > { %3126 = vmatprep.mubr.bf16.mxu0 %v1984_v5  ;;  %3512 = vmatprep.mubr.bf16.mxu1 %v1984_v5 }
 0x411   : > { %3127 = vmatmul.mubr.bf16.gmra.mrb[44].mxu0 %v1983_v55  ;;  %3513 = vmatmul.mubr.bf16.gmra.mrb[44].mxu1 %v1983_v55 }
 0x412   : > { %3136 = vmatprep.mubr.bf16.mxu0 %v1988_v14  ;;  %3522 = vmatprep.mubr.bf16.mxu1 %v1988_v14 }
 0x419   : > { %3137 = vmatmul.mubr.bf16.gmra.mrb[48].mxu0 %v1987_v45  ;;  %3523 = vmatmul.mubr.bf16.gmra.mrb[48].mxu1 %v1987_v45 }
 0x41a   : > { %3146 = vmatprep.mubr.bf16.mxu0 %v1992_v42  ;;  %3532 = vmatprep.mubr.bf16.mxu1 %v1992_v42 }
 0x421   : > { %3147 = vmatmul.mubr.bf16.gmra.mrb[52].mxu0 %v1991_v10  ;;  %3533 = vmatmul.mubr.bf16.gmra.mrb[52].mxu1 %v1991_v10 }
 0x422   : > { %3156 = vmatprep.mubr.bf16.mxu0 %v1996_v18  ;;  %3542 = vmatprep.mubr.bf16.mxu1 %v1996_v18 }
 0x429   : > { %3157 = vmatmul.mubr.bf16.gmra.mrb[56].mxu0 %v1995_v46  ;;  %3543 = vmatmul.mubr.bf16.gmra.mrb[56].mxu1 %v1995_v46 }
 0x42a   : > { %3166 = vmatprep.mubr.bf16.mxu0 %v2000_v39  ;;  %3552 = vmatprep.mubr.bf16.mxu1 %v2000_v39 }
 0x431   : > { %3167 = vmatmul.mubr.bf16.gmra.mrb[60].mxu0 %v1999_v33  ;;  %3553 = vmatmul.mubr.bf16.gmra.mrb[60].mxu1 %v1999_v33 }
 0x48c   : > { %v3018_v47 = vpop.f32.mrb[0].mxu0  ;;  %v3404_v28 = vpop.f32.mrb[0].mxu1 }
 0x48d   : > { %v7034_v17 = vadd.f32 %v3018_v47, %v10857_v20  ;;  %v7098_v7 = vadd.f32 %v3404_v28, %v10861_v13  ;;  %v3020_v38 = vpop.f32.mrb[1].mxu0  ;;  %v3406_v56 = vpop.f32.mrb[1].mxu1 }
 0x48e   : > { %v7035_v61 = vadd.f32 %v3020_v38, %v10865_v62  ;;  %v7099_v36 = vadd.f32 %v3406_v56, %v10869_v24  ;;  %v3022_v60 = vpop.f32.mrb[2].mxu0  ;;  %v3408_v49 = vpop.f32.mrb[2].mxu1 }
 0x48f   : > { %v3691_v6 = vmul.f32 0.70710677, %v7034_v17  ;;  %v3693_v26 = vmul.f32 0.70710677, %v7098_v7  ;;  %v7036_v35 = vadd.f32 %v3022_v60, %v10857_v20  ;;  %v7100_v63 = vadd.f32 %v3408_v49, %v10861_v13  ;;  %v3024_v15 = vpop.f32.mrb[3].mxu0  ;;  %v3410_v32 = vpop.f32.mrb[3].mxu1 }
 0x490   : > { %v3692_v11 = vmul.f32 0.70710677, %v7035_v61  ;;  %v3694_v3 = vmul.f32 0.70710677, %v7099_v36  ;;  %v7037_v29 = vadd.f32 %v3024_v15, %v10865_v62  ;;  %v7101_v59 = vadd.f32 %v3410_v32, %v10869_v24 }
 0x491   : > { %7971 = verf.f32 %v3691_v6  ;;  %v3695_v43 = vmul.f32 0.70710677, %v7036_v35  ;;  %v3697_v34 = vmul.f32 0.70710677, %v7100_v63  ;;  %v10880_v23 = vmul.f32 0.5, %v7034_v17 }
 0x492   : > { %7973 = verf.f32 %v3693_v26  ;;  %v3696_v30 = vmul.f32 0.70710677, %v7037_v29  ;;  %v3698_v16 = vmul.f32 0.70710677, %v7101_v59  ;;  %v10884_v42 = vmul.f32 0.5, %v7098_v7 }
 0x493   : > { %7975 = verf.f32 %v3692_v11  ;;  %v10887_v10 = vmul.f32 0.5, %v7035_v61  ;;  %v10889_v18 = vmul.f32 0.5, %v7099_v36  ;;  %v3567_v44 = vmul.f32 0.5, %v7036_v35 }
 0x494   : > { %7977 = verf.f32 %v3694_v3  ;;  %v3028_v12 = vpop.f32.mrb[4].mxu0  ;;  %v3414_v22 = vpop.f32.mrb[4].mxu1  ;;  %v3569_v37 = vmul.f32 0.5, %v7100_v63  ;;  %v10894_v33 = vmul.f32 0.5, %v7037_v29  ;;  %v10896_v57 = vmul.f32 0.5, %v7101_v59 }
 0x495   : > { %7979 = verf.f32 %v3695_v43  ;;  %v7038_v21 = vadd.f32 %v3028_v12, %v10857_v20  ;;  %v3030_v48 = vpop.f32.mrb[5].mxu0  ;;  %v7102_v5 = vadd.f32 %v3414_v22, %v10861_v13  ;;  %v3416_v14 = vpop.f32.mrb[5].mxu1 }
 0x496   : > { %7981 = verf.f32 %v3697_v34  ;;  %v7039_v55 = vadd.f32 %v3030_v48, %v10865_v62  ;;  %v3032_v45 = vpop.f32.mrb[6].mxu0  ;;  %v7103_v51 = vadd.f32 %v3416_v14, %v10869_v24  ;;  %v3418_v27 = vpop.f32.mrb[6].mxu1 }
 0x497   : > { %7983 = verf.f32 %v3696_v30  ;;  %v3699_v54 = vmul.f32 0.70710677, %v7038_v21  ;;  %v3034_v8 = vpop.f32.mrb[7].mxu0  ;;  %v3701_v1 = vmul.f32 0.70710677, %v7102_v5  ;;  %v3420_v9 = vpop.f32.mrb[7].mxu1  ;;  %v7040_v39 = vadd.f32 %v3032_v45, %v10857_v20 }
 0x498   : > { %7985 = verf.f32 %v3698_v16  ;;  %v3700_v58 = vmul.f32 0.70710677, %v7039_v55  ;;  %v3702_v46 = vmul.f32 0.70710677, %v7103_v51  ;;  %v7104_v4 = vadd.f32 %v3418_v27, %v10861_v13 }
 0x499   : > { %7987 = verf.f32 %v3699_v54  ;;  %v7041_v0 = vadd.f32 %v3034_v8, %v10865_v62  ;;  %v10898_v19 = vmul.f32 0.5, %v7038_v21  ;;  %v3703_v41 = vmul.f32 0.70710677, %v7040_v39 }
 0x49a   : > { %7989 = verf.f32 %v3701_v1  ;;  %v7105_v47 = vadd.f32 %v3420_v9, %v10869_v24  ;;  %v10901_v56 = vmul.f32 0.5, %v7102_v5  ;;  %v10903_v61 = vmul.f32 0.5, %v7039_v55 }
 0x49b   : > { %v7972_v25 = vpop.eup %7971  ;;  %7991 = verf.f32 %v3700_v58  ;;  %v3705_v36 = vmul.f32 0.70710677, %v7104_v4  ;;  %v10905_v6 = vmul.f32 0.5, %v7103_v51  ;;  %v10907_v26 = vmul.f32 0.5, %v7040_v39 }
 0x49c   : > { %v7974_v52 = vpop.eup %7973  ;;  %7993 = verf.f32 %v3702_v46  ;;  %v3038_v28 = vpop.f32.mrb[8].mxu0  ;;  %v3947_v38 = vadd.f32 1.0, %v7972_v25  ;;  %v3704_v11 = vmul.f32 0.70710677, %v7041_v0  ;;  %v10909_v32 = vmul.f32 0.5, %v7104_v4 }
 0x49d   : > { %v3424_v17 = vpop.f32.mrb[8].mxu1  ;;  %v7976_v7 = vpop.eup %7975  ;;  %7995 = verf.f32 %v3703_v41  ;;  %v3949_v15 = vadd.f32 1.0, %v7974_v52  ;;  %v10911_v29 = vmul.f32 0.5, %v7041_v0  ;;  %v3706_v21 = vmul.f32 0.70710677, %v7105_v47 }
 0x49e   : > { %v3040_v60 = vpop.f32.mrb[9].mxu0  ;;  %v7978_v49 = vpop.eup %7977  ;;  %7997 = verf.f32 %v3705_v36  ;;  %v3948_v30 = vadd.f32 1.0, %v7976_v7  ;;  %v4075_v5 = vmul.f32 %v3947_v38, %v10880_v23  ;;  %v7042_v14 = vadd.f32 %v3038_v28, %v10857_v20 }
 0x49f   : > { %v3426_v3 = vpop.f32.mrb[9].mxu1  ;;  %v3042_v35 = vpop.f32.mrb[10].mxu0  ;;  %v3950_v12 = vadd.f32 1.0, %v7978_v49  ;;  %7999 = verf.f32 %v3704_v11  ;;  %v7106_v27 = vadd.f32 %v3424_v17, %v10861_v13  ;;  %v4077_v1 = vmul.f32 %v3949_v15, %v10884_v42 }
 0x4a0   : > { %v7980_v63 = vpop.eup %7979  ;;  %v3428_v59 = vpop.f32.mrb[10].mxu1  ;;  %8001 = verf.f32 %v3706_v21  ;;  %v3707_v58 = vmul.f32 0.70710677, %v7042_v14  ;;  %v7043_v46 = vadd.f32 %v3040_v60, %v10865_v62  ;;  %v10923_v23 = vmul.f32 %v3948_v30, %v10887_v10 }
 0x4a1   : > { %v10913_v43 = vpop.f32.mrb[11].mxu0  ;;  %v7982_v34 = vpop.eup %7981  ;;  %v3951_v16 = vadd.f32 1.0, %v7980_v63  ;;  %v10926_v4 = vmul.f32 %v3950_v12, %v10889_v18  ;;  %v10941_v36 = vmul.f32 0.5, %v7042_v14  ;;  %v10950_v21 = vmul.f32 0.5, %v7106_v27 }
 0x4a2   : > { %v10915_v22 = vpop.f32.mrb[11].mxu1  ;;  %v7984_v48 = vpop.eup %7983  ;;  %v3953_v55 = vadd.f32 1.0, %v7982_v34  ;;  %8003 = verf.f32 %v3707_v58  ;;  %v3708_v15 = vmul.f32 0.70710677, %v7043_v46  ;;  %v7107_v34 = vadd.f32 %v3426_v3, %v10869_v24 }
 0x4a3   : > { %v7986_v45 = vpop.eup %7985  ;;  %v4079_v54 = vmul.f32 %v3951_v16, %v3567_v44  ;;  %v3952_v51 = vadd.f32 1.0, %v7984_v48  ;;  %12966 = vst [vmem:[#allocation135_spill] sm:$0xff] %v10926_v4  ;;  %v10930_v44 = vmul.f32 0.5, %v7105_v47  ;;  %v3709_v47 = vmul.f32 0.70710677, %v7106_v27 }
 0x4a4   : > { %v7988_v8 = vpop.eup %7987  ;;  %v4081_v9 = vmul.f32 %v3953_v55, %v3569_v37  ;;  %v3048_v25 = vpop.f32.mrb[12].mxu0  ;;  %v3954_v37 = vadd.f32 1.0, %v7986_v45  ;;  %v7108_v48 = vadd.f32 %v3428_v59, %v10861_v13  ;;  %v7109_v58 = vadd.f32 %v10915_v22, %v10869_v24 }
 0x4a5   : > { %v7990_v39 = vpop.eup %7989  ;;  %v10928_v0 = vpack.c.bf16 %v4079_v54, %v4075_v5  ;;  %v10932_v52 = vpop.f32.mrb[12].mxu1  ;;  %v3955_v28 = vadd.f32 1.0, %v7988_v8  ;;  %v10939_v18 = vmul.f32 %v3952_v51, %v10894_v33  ;;  %8005 = verf.f32 %v3709_v47 }
 0x4a6   : > { %v7992_v41 = vpop.eup %7991  ;;  %v10934_v42 = vpack.c.bf16 %v4081_v9, %v4077_v1  ;;  %v3050_v17 = vpop.f32.mrb[13].mxu0  ;;  %v3957_v38 = vadd.f32 1.0, %v7990_v39  ;;  %v7044_v33 = vadd.f32 %v3042_v35, %v10857_v20  ;;  %v10955_v55 = vmul.f32 %v3954_v37, %v10896_v57 }
 0x4a7   : > { %v10936_v7 = vpop.f32.mrb[13].mxu1  ;;  %v7994_v10 = vpop.eup %7993  ;;  %v3956_v11 = vadd.f32 1.0, %v7992_v41  ;;  %v10958_v14 = vmul.f32 %v3955_v28, %v10898_v19  ;;  %8007 = verf.f32 %v3708_v15  ;;  %v10963_v54 = vmul.f32 0.5, %v7043_v46 }
 0x4a8   : > { %12967 = vst [vmem:[#allocation136_spill] sm:$0xff] %v10934_v42  ;;  %v3052_v60 = vpop.f32.mrb[14].mxu0  ;;  %v10943_v49 = vpop.f32.mrb[14].mxu1  ;;  %v3958_v63 = vadd.f32 1.0, %v7994_v10  ;;  %12968 = vst [vmem:[#allocation137_spill] sm:$0xff] %v10955_v55  ;;  %v10961_v45 = vmul.f32 %v3957_v38, %v10901_v56  ;;  %v10971_v9 = vmul.f32 0.5, %v7107_v34  ;;  %v7045_v56 = vadd.f32 %v10913_v43, %v10865_v62 }
 0x4a9   : > { %v10946_v30 = vpop.f32.mrb[15].mxu0  ;;  %v10948_v12 = vpop.f32.mrb[15].mxu1  ;;  %v3710_v51 = vmul.f32 0.70710677, %v7107_v34  ;;  %v3711_v27 = vmul.f32 0.70710677, %v7044_v33  ;;  %v10966_v35 = vmul.f32 %v3956_v11, %v10903_v61  ;;  %v7046_v41 = vadd.f32 %v3048_v25, %v10857_v20 }
 0x4aa   : > { %v7996_v16 = vpop.eup %7995  ;;  %12969 = vst [vmem:[#allocation138_spill] sm:$0xff] %v10961_v45  ;;  %v10969_v59 = vmul.f32 %v3958_v63, %v10905_v6  ;;  %v3713_v1 = vmul.f32 0.70710677, %v7108_v48  ;;  %v10984_v6 = vmul.f32 0.5, %v7044_v33  ;;  %v10991_v10 = vmul.f32 0.5, %v7108_v48 }
 0x4ab   : > { %v7998_v5 = vpop.eup %7997  ;;  %v3959_v3 = vadd.f32 1.0, %v7996_v16  ;;  %8009 = verf.f32 %v3710_v51  ;;  %v3712_v22 = vmul.f32 0.70710677, %v7045_v56  ;;  %v3714_v63 = vmul.f32 0.70710677, %v7109_v58 }
 0x4ac   : > { %v8000_v8 = vpop.eup %7999  ;;  %12970 = vst [vmem:[#allocation139_spill] sm:$0xff] %v10969_v59  ;;  %v3961_v57 = vadd.f32 1.0, %v7998_v5  ;;  %v10977_v46 = vpop.f32.mrb[16].mxu0  ;;  %8011 = verf.f32 %v3711_v27  ;;  %v3715_v15 = vmul.f32 0.70710677, %v7046_v41  ;;  %v7110_v33 = vadd.f32 %v10932_v52, %v10861_v13 }
 0x4ad   : > { %v8002_v19 = vpop.eup %8001  ;;  %v10979_v39 = vpop.f32.mrb[16].mxu1  ;;  %v10982_v61 = vmul.f32 %v3959_v3, %v10907_v26  ;;  %v3960_v43 = vadd.f32 1.0, %v8000_v8  ;;  %8013 = verf.f32 %v3713_v1  ;;  %v7047_v48 = vadd.f32 %v3050_v17, %v10865_v62  ;;  %v7875_v27 = vld [vmem:[%s8843_s20 + $0x200] ss:$16 sps:$4 sm:$0xff]   ;;  %v7878_v8 = vld [vmem:[%s8843_s20 + $0x208] ss:$16 sps:$4 sm:$0xff]  }
 0x4ae   : > { %v10987_v37 = vpop.f32.mrb[17].mxu0  ;;  %v10989_v28 = vpop.f32.mrb[17].mxu1  ;;  %v10998_v11 = vmul.f32 %v3961_v57, %v10909_v32  ;;  %v3962_v25 = vadd.f32 1.0, %v8002_v19  ;;  %8015 = verf.f32 %v3712_v22  ;;  %v7111_v32 = vadd.f32 %v10936_v7, %v10869_v24  ;;  %v7883_v57 = vld [vmem:[%s8843_s20 + $0x224] ss:$16 sps:$4 sm:$0xff]  }
 0x4af   : > { %v10993_v38 = vpop.f32.mrb[18].mxu0  ;;  %v10995_v47 = vpop.f32.mrb[18].mxu1  ;;  %8017 = verf.f32 %v3714_v63  ;;  %v4332_v3 = vpack.c.bf16 %v10939_v18, %v10923_v23  ;;  %v7048_v51 = vadd.f32 %v3052_v60, %v10857_v20  ;;  %v11016_v52 = vmul.f32 %v3960_v43, %v10911_v29  ;;  %v7886_v22 = vld [vmem:[%s8843_s20 + $0x22c] ss:$16 sps:$4 sm:$0xff]   ;;  %v7881_v63 = vld [vmem:[%s8843_s20 + $0x220] ss:$16 sps:$4 sm:$0xff]  }
 0x4b0   : > { %v8004_v26 = vpop.eup %8003  ;;  %12971 = vst [vmem:[#allocation140_spill] sm:$0xff] %v10998_v11  ;;  %v11000_v34 = vpop.f32.mrb[19].mxu0  ;;  %v11018_v17 = vmul.f32 0.5, %v7045_v56  ;;  %8019 = verf.f32 %v3715_v15  ;;  %v3717_v19 = vmul.f32 0.70710677, %v7110_v33  ;;  %v11024_v23 = vmul.f32 0.5, %v7109_v58 }
 0x4b1   : > { %v3963_v16 = vadd.f32 1.0, %v8004_v26  ;;  %v11005_v5 = vpop.f32.mrb[19].mxu1  ;;  %v8006_v1 = vpop.eup %8005  ;;  %v11022_v26 = vmul.f32 %v3962_v25, %v10930_v44  ;;  %v11026_v18 = vmul.f32 0.5, %v7046_v41  ;;  %v3716_v60 = vmul.f32 0.70710677, %v7047_v48  ;;  %5195 = vmatprep.mubr.bf16.mxu0 %v4332_v3  ;;  %5581 = vmatprep.mubr.bf16.mxu1 %v4332_v3 }
 0x4b2   : > { %v8008_v7 = vpop.eup %8007  ;;  %v7884_v29 = vld [vmem:[%s8843_s20 + $0x228] ss:$16 sps:$4 sm:$0xff]   ;;  %v3965_v43 = vadd.f32 1.0, %v8006_v1  ;;  %8021 = verf.f32 %v3717_v19  ;;  %v3718_v15 = vmul.f32 0.70710677, %v7111_v32  ;;  %5196 = vmatmul.mubr.bf16.vlgmr.msra.gmra.mrb[64].mxu0 %v10928_v0  ;;  %5582 = vmatmul.mubr.bf16.vlgmr.msra.gmra.mrb[64].mxu1 %v10928_v0  ;;  %v11040_v25 = vmul.f32 0.5, %v7110_v33 }
 0x4b3   : > { %12972 = vst [vmem:[#allocation141_spill] sm:$0xff] %v11022_v26  ;;  %v11031_v56 = vmul.f32 %v3963_v16, %v10941_v36  ;;  %v7889_v41 = vld [vmem:[%s8843_s20 + $0x244] ss:$16 sps:$4 sm:$0xff]   ;;  %8023 = verf.f32 %v3716_v60  ;;  %v3719_v3 = vmul.f32 0.70710677, %v7048_v51  ;;  %v7112_v36 = vadd.f32 %v10943_v49, %v10861_v13  ;;  %5357 = vmatpush1.bf16.msra.mxu0 %v7875_v27  ;;  %5743 = vmatpush1.bf16.msra.mxu1 %v7878_v8 }
 0x4b4   : > { %v11035_v44 = vpop.f32.mrb[20].mxu0  ;;  %v11037_v58 = vpop.f32.mrb[20].mxu1  ;;  %v3964_v19 = vadd.f32 1.0, %v8008_v7  ;;  %8025 = verf.f32 %v3718_v15  ;;  %v7049_v40 = vadd.f32 %v10946_v30, %v10865_v62  ;;  %v7113_v33 = vadd.f32 %v10948_v12, %v10869_v24  ;;  %5358 = vmatprep.subr.bf16.mxu0 %v7883_v57  ;;  %5744 = vmatprep.subr.bf16.mxu1 %v7886_v22  ;;  %v7892_v27 = vld [vmem:[%s8843_s20 + $0x24c] ss:$16 sps:$4 sm:$0xff]  }
 0x4b5   : > { %v11044_v16 = vpop.f32.mrb[21].mxu0  ;;  %v11046_v1 = vpop.f32.mrb[21].mxu1  ;;  %v11057_v31 = vmul.f32 0.5, %v7047_v48  ;;  %v11059_v2 = vmul.f32 0.5, %v7111_v32  ;;  %8027 = verf.f32 %v3719_v3  ;;  %v3721_v7 = vmul.f32 0.70710677, %v7112_v36 }
 0x4b6   : > { %v8010_v0 = vpop.eup %8009  ;;  %v11052_v60 = vpop.f32.mrb[22].mxu0  ;;  %v11066_v57 = vmul.f32 %v3965_v43, %v10950_v21  ;;  %v11068_v53 = vmul.f32 0.5, %v7048_v51  ;;  %v3720_v50 = vmul.f32 0.70710677, %v7049_v40  ;;  %v7887_v48 = vld [vmem:[%s8843_s20 + $0x240] ss:$16 sps:$4 sm:$0xff]   ;;  %v11073_v26 = vmul.f32 %v3964_v19, %v10963_v54 }
 0x4b7   : > { %v11054_v49 = vpop.f32.mrb[22].mxu1  ;;  %v8012_v8 = vpop.eup %8011  ;;  %v3966_v22 = vadd.f32 1.0, %v8010_v0  ;;  %8029 = verf.f32 %v3721_v7  ;;  %v3722_v3 = vmul.f32 0.70710677, %v7113_v33  ;;  %5359 = vmatpush1.bf16.msra.mxu0 %v7881_v63  ;;  %5745 = vmatpush1.bf16.msra.mxu1 %v7884_v29  ;;  %v7890_v11 = vld [vmem:[%s8843_s20 + $0x248] ss:$16 sps:$4 sm:$0xff]   ;;  %v7050_v21 = vadd.f32 %v10977_v46, %v10857_v20 }
 0x4b8   : > { %v11061_v30 = vpop.f32.mrb[23].mxu0  ;;  %v11063_v15 = vpop.f32.mrb[23].mxu1  ;;  %12973 = vst [vmem:[#allocation142_spill] sm:$0xff] %v11066_v57  ;;  %v3967_v32 = vadd.f32 1.0, %v8012_v8  ;;  %8031 = verf.f32 %v3720_v50  ;;  %v7114_v51 = vadd.f32 %v10979_v39, %v10861_v13  ;;  %5360 = vmatprep.subr.bf16.mxu0 %v7889_v41  ;;  %5746 = vmatprep.subr.bf16.mxu1 %v7892_v27  ;;  %v7895_v43 = vld [vmem:[%s8843_s20 + $0x264] ss:$16 sps:$4 sm:$0xff]   ;;  %v7051_v50 = vadd.f32 %v10987_v37, %v10865_v62 }
 0x4b9   : > { %v8014_v12 = vpop.eup %8013  ;;  %v7898_v0 = vld [vmem:[%s8843_s20 + $0x26c] ss:$16 sps:$4 sm:$0xff]   ;;  %v11081_v29 = vmul.f32 0.5, %v7112_v36  ;;  %v11083_v8 = vmul.f32 0.5, %v7049_v40  ;;  %8033 = verf.f32 %v3722_v3  ;;  %v11088_v46 = vmul.f32 %v3966_v22, %v10971_v9  ;;  %v7893_v7 = vld [vmem:[%s8843_s20 + $0x260] ss:$16 sps:$4 sm:$0xff]  }
 0x4ba   : > { %v3969_v42 = vadd.f32 1.0, %v8014_v12  ;;  %v8016_v45 = vpop.eup %8015  ;;  %v11090_v41 = vmul.f32 0.5, %v7113_v33  ;;  %v3723_v19 = vmul.f32 0.70710677, %v7050_v21  ;;  %v7896_v36 = vld [vmem:[%s8843_s20 + $0x268] ss:$16 sps:$4 sm:$0xff]   ;;  %v11097_v40 = vmul.f32 %v3967_v32, %v10984_v6 }
 0x4bb   : > { %v8018_v63 = vpop.eup %8017  ;;  %12974 = vst [vmem:[#allocation143_spill] sm:$0xff] %v11088_v46  ;;  %v3968_v39 = vadd.f32 1.0, %v8016_v45  ;;  %v3725_v3 = vmul.f32 0.70710677, %v7114_v51  ;;  %5361 = vmatpush1.bf16.msra.mxu0 %v7887_v48  ;;  %5747 = vmatpush1.bf16.msra.mxu1 %v7890_v11  ;;  %v7901_v33 = vld [vmem:[%s8843_s20 + $0x284] ss:$16 sps:$4 sm:$0xff]   ;;  %v7115_v6 = vadd.f32 %v10989_v28, %v10869_v24 }
 0x4bc   : > { %v8020_v54 = vpop.eup %8019  ;;  %v11092_v27 = vpop.f32.mrb[24].mxu0  ;;  %v11100_v12 = vmul.f32 %v3969_v42, %v10991_v10  ;;  %v3970_v37 = vadd.f32 1.0, %v8018_v63  ;;  %8035 = verf.f32 %v3723_v19  ;;  %v3724_v46 = vmul.f32 0.70710677, %v7051_v50  ;;  %5362 = vmatprep.subr.bf16.mxu0 %v7895_v43  ;;  %5748 = vmatprep.subr.bf16.mxu1 %v7898_v0 }
 0x4bd   : > { %v11102_v9 = vpop.f32.mrb[24].mxu1  ;;  %v11104_v45 = vpop.f32.mrb[25].mxu0  ;;  %v3971_v57 = vadd.f32 1.0, %v8020_v54  ;;  %v11113_v48 = vmul.f32 0.5, %v7050_v21  ;;  %8037 = verf.f32 %v3725_v3  ;;  %v4336_v63 = vpack.c.bf16 %v11016_v52, %v10966_v35 }
 0x4be   : > { %12975 = vst [vmem:[#allocation144_spill] sm:$0xff] %v11100_v12  ;;  %v8022_v22 = vpop.eup %8021  ;;  %v11109_v32 = vpop.f32.mrb[25].mxu1  ;;  %v7904_v12 = vld [vmem:[%s8843_s20 + $0x28c] ss:$16 sps:$4 sm:$0xff]   ;;  %v11123_v59 = vmul.f32 %v3968_v39, %v11018_v17  ;;  %v11125_v55 = vmul.f32 0.5, %v7114_v51  ;;  %8039 = verf.f32 %v3724_v46  ;;  %v11129_v52 = vmul.f32 0.5, %v7051_v50 }
 0x4bf   : > { %v11111_v42 = vpop.f32.mrb[26].mxu0  ;;  %v8024_v10 = vpop.eup %8023  ;;  %v3973_v11 = vadd.f32 1.0, %v8022_v22  ;;  %v3726_v43 = vmul.f32 0.70710677, %v7115_v6  ;;  %5205 = vmatprep.mubr.bf16.mxu0 %v4336_v63  ;;  %5591 = vmatprep.mubr.bf16.mxu1 %v4336_v63  ;;  %v7052_v3 = vadd.f32 %v10993_v38, %v10857_v20  ;;  %v7116_v17 = vadd.f32 %v10995_v47, %v10861_v13  ;;  %v7899_v39 = vld [vmem:[%s8843_s20 + $0x280] ss:$16 sps:$4 sm:$0xff]  }
 0x4c0   : > { %v11117_v54 = vpop.f32.mrb[26].mxu1  ;;  %v11119_v19 = vpop.f32.mrb[27].mxu0  ;;  %v3972_v35 = vadd.f32 1.0, %v8024_v10  ;;  %v11136_v51 = vmul.f32 %v3970_v37, %v11024_v23  ;;  %v11139_v46 = vmul.f32 %v3971_v57, %v11026_v18  ;;  %v4335_v50 = vpack.c.bf16 %v10982_v61, %v10958_v14  ;;  %5363 = vmatpush1.bf16.msra.mxu0 %v7893_v7  ;;  %5749 = vmatpush1.bf16.msra.mxu1 %v7896_v36  ;;  %v7902_v22 = vld [vmem:[%s8843_s20 + $0x288] ss:$16 sps:$4 sm:$0xff]  }
 0x4c1   : > { %v8026_v28 = vpop.eup %8025  ;;  %v11127_v21 = vpop.f32.mrb[27].mxu1  ;;  %8041 = verf.f32 %v3726_v43  ;;  %v7907_v10 = vld [vmem:[%s8843_s20 + $0x2a4] ss:$16 sps:$4 sm:$0xff]   ;;  %v11147_v63 = vmul.f32 %v3973_v11, %v11040_v25  ;;  %v11149_v23 = vmul.f32 0.5, %v7115_v6  ;;  %v3727_v18 = vmul.f32 0.70710677, %v7052_v3  ;;  %5364 = vmatprep.subr.bf16.mxu0 %v7901_v33  ;;  %5750 = vmatprep.subr.bf16.mxu1 %v7904_v12 }
 0x4c2   : > { %v8028_v0 = vpop.eup %8027  ;;  %12976 = vst [vmem:[#allocation145_spill] sm:$0xff] %v11136_v51  ;;  %v3974_v47 = vadd.f32 1.0, %v8026_v28  ;;  %v7910_v57 = vld [vmem:[%s8843_s20 + $0x2ac] ss:$16 sps:$4 sm:$0xff]   ;;  %v3729_v7 = vmul.f32 0.70710677, %v7116_v17  ;;  %5206 = vmatmul.mubr.bf16.gmra.mrb[68].mxu0 %v4335_v50  ;;  %5592 = vmatmul.mubr.bf16.gmra.mrb[68].mxu1 %v4335_v50  ;;  %v7053_v25 = vadd.f32 %v11000_v34, %v10865_v62  ;;  %v11161_v12 = vmul.f32 %v3972_v35, %v11057_v31 }
 0x4c3   : > { %v8030_v38 = vpop.eup %8029  ;;  %12977 = vst [vmem:[#allocation146_spill] sm:$0xff] %v11147_v63  ;;  %v3975_v14 = vadd.f32 1.0, %v8028_v0  ;;  %v7905_v6 = vld [vmem:[%s8843_s20 + $0x2a0] ss:$16 sps:$4 sm:$0xff]   ;;  %v7908_v28 = vld [vmem:[%s8843_s20 + $0x2a8] ss:$16 sps:$4 sm:$0xff]   ;;  %8043 = verf.f32 %v3727_v18  ;;  %v7117_v43 = vadd.f32 %v11005_v5, %v10869_v24  ;;  %v7054_v0 = vadd.f32 %v11035_v44, %v10857_v20 }
 0x4c4   : > { %v8032_v37 = vpop.eup %8031  ;;  %v3977_v61 = vadd.f32 1.0, %v8030_v38  ;;  %v11154_v36 = vpop.f32.mrb[28].mxu0  ;;  %v7913_v38 = vld [vmem:[%s8843_s20 + $0x2c4] ss:$16 sps:$4 sm:$0xff]   ;;  %v7916_v63 = vld [vmem:[%s8843_s20 + $0x2cc] ss:$16 sps:$4 sm:$0xff]   ;;  %8045 = verf.f32 %v3729_v7  ;;  %5365 = vmatpush1.bf16.msra.mxu0 %v7899_v39  ;;  %5751 = vmatpush1.bf16.msra.mxu1 %v7902_v22  ;;  %v11182_v5 = vmul.f32 %v3974_v47, %v11059_v2  ;;  %v7118_v2 = vadd.f32 %v11037_v58, %v10861_v13 }
 0x4c5   : > { %v11156_v11 = vpop.f32.mrb[28].mxu1  ;;  %v8034_v33 = vpop.eup %8033  ;;  %v3976_v51 = vadd.f32 1.0, %v8032_v37  ;;  %v11173_v4 = vmul.f32 0.5, %v7052_v3  ;;  %v3728_v18 = vmul.f32 0.70710677, %v7053_v25  ;;  %5366 = vmatprep.subr.bf16.mxu0 %v7907_v10  ;;  %5752 = vmatprep.subr.bf16.mxu1 %v7910_v57  ;;  %v11196_v7 = vmul.f32 0.5, %v7053_v25 }
 0x4c6   : > { %12978 = vst [vmem:[#allocation147_spill] sm:$0xff] %v11156_v11  ;;  %v11167_v50 = vpop.f32.mrb[29].mxu0  ;;  %v11169_v34 = vpop.f32.mrb[29].mxu1  ;;  %v11175_v11 = vmul.f32 0.5, %v7116_v17  ;;  %12981 = vst [vmem:[#allocation150_spill] sm:$0xff] %v11182_v5  ;;  %v3978_v44 = vadd.f32 1.0, %v8034_v33  ;;  %v11187_v17 = vmul.f32 %v3975_v14, %v11068_v53  ;;  %v11190_v37 = vmul.f32 %v3977_v61, %v11081_v29 }
 0x4c7   : > { %12979 = vst [vmem:[#allocation148_spill] sm:$0xff] %v11167_v50  ;;  %12980 = vst [vmem:[#allocation149_spill] sm:$0xff] %v11169_v34  ;;  %v11177_v31 = vpop.f32.mrb[30].mxu0  ;;  %v11179_v35 = vpop.f32.mrb[30].mxu1  ;;  %v3730_v34 = vmul.f32 0.70710677, %v7117_v43  ;;  %8047 = verf.f32 %v3728_v18  ;;  %v7055_v10 = vadd.f32 %v11044_v16, %v10865_v62  ;;  %v7119_v53 = vadd.f32 %v11046_v1, %v10869_v24 }
 0x4c8   : > { %v11184_v50 = vpop.f32.mrb[31].mxu0  ;;  %v8036_v3 = vpop.eup %8035  ;;  %12982 = vst [vmem:[#allocation151_spill] sm:$0xff] %v11190_v37  ;;  %v3731_v39 = vmul.f32 0.70710677, %v7054_v0  ;;  %v7911_v29 = vld [vmem:[%s8843_s20 + $0x2c0] ss:$16 sps:$4 sm:$0xff]   ;;  %v11204_v14 = vmul.f32 %v3976_v51, %v11083_v8  ;;  %5367 = vmatpush1.bf16.msra.mxu0 %v7905_v6  ;;  %5753 = vmatpush1.bf16.msra.mxu1 %v7908_v28  ;;  %v11210_v33 = vmul.f32 %v3978_v44, %v11090_v41 }
 0x4c9   : > { %v11194_v22 = vpop.f32.mrb[31].mxu1  ;;  %v8038_v47 = vpop.eup %8037  ;;  %v11206_v58 = vmul.f32 0.5, %v7117_v43  ;;  %8049 = verf.f32 %v3730_v34  ;;  %v3733_v61 = vmul.f32 0.70710677, %v7118_v2  ;;  %v7914_v25 = vld [vmem:[%s8843_s20 + $0x2c8] ss:$16 sps:$4 sm:$0xff]   ;;  %5368 = vmatprep.subr.bf16.mxu0 %v7913_v38  ;;  %5754 = vmatprep.subr.bf16.mxu1 %v7916_v63  ;;  %v4340_v63 = vpack.c.bf16 %v11123_v59, %v11073_v26 }
 0x4ca   : > { %v8040_v57 = vpop.eup %8039  ;;  %12983 = vst [vmem:[#allocation152_spill] sm:$0xff] %v11210_v33  ;;  %v3979_v16 = vadd.f32 1.0, %v8036_v3  ;;  %v11212_v18 = vmul.f32 0.5, %v7054_v0  ;;  %8051 = verf.f32 %v3731_v39  ;;  %v7919_v1 = vld [vmem:[%s8843_s20 + $0x2e4] ss:$16 sps:$4 sm:$0xff]   ;;  %v3981_v51 = vadd.f32 1.0, %v8038_v47 }
 0x4cb   : > { %v7922_v37 = vld [vmem:[%s8843_s20 + $0x2ec] ss:$16 sps:$4 sm:$0xff]   ;;  %v8042_v8 = vpop.eup %8041  ;;  %v11216_v43 = vmul.f32 0.5, %v7118_v2  ;;  %8053 = verf.f32 %v3733_v61  ;;  %v3732_v34 = vmul.f32 0.70710677, %v7055_v10  ;;  %v3980_v41 = vadd.f32 1.0, %v8040_v57  ;;  %5215 = vmatprep.mubr.bf16.mxu0 %v4340_v63  ;;  %5601 = vmatprep.mubr.bf16.mxu1 %v4340_v63 }
 0x4cc   : > { %v11218_v6 = vpop.f32.mrb[32].mxu0  ;;  %v11220_v28 = vpop.f32.mrb[32].mxu1  ;;  %v3982_v0 = vadd.f32 1.0, %v8042_v8  ;;  %v3734_v44 = vmul.f32 0.70710677, %v7119_v53  ;;  %v7056_v39 = vadd.f32 %v11052_v60, %v10857_v20  ;;  %v7120_v2 = vadd.f32 %v11054_v49, %v10861_v13  ;;  %5369 = vmatpush1.bf16.msra.mxu0 %v7911_v29  ;;  %5755 = vmatpush1.bf16.msra.mxu1 %v7914_v25 }
 0x4cd   : > { %v11224_v38 = vpop.f32.mrb[33].mxu0  ;;  %v11226_v3 = vpop.f32.mrb[33].mxu1  ;;  %8055 = verf.f32 %v3732_v34  ;;  %v4339_v47 = vpack.c.bf16 %v11097_v40, %v11031_v56  ;;  %v7917_v59 = vld [vmem:[%s8843_s20 + $0x2e0] ss:$16 sps:$4 sm:$0xff]   ;;  %v7920_v26 = vld [vmem:[%s8843_s20 + $0x2e8] ss:$16 sps:$4 sm:$0xff]   ;;  %v11241_v34 = vmul.f32 %v3979_v16, %v11113_v48  ;;  %v7057_v56 = vadd.f32 %v11061_v30, %v10865_v62  ;;  %5370 = vmatprep.subr.bf16.mxu0 %v7919_v1  ;;  %5756 = vmatprep.subr.bf16.mxu1 %v7922_v37 }
 0x4ce   : > { %v11234_v57 = vpop.f32.mrb[34].mxu0  ;;  %v11236_v61 = vpop.f32.mrb[34].mxu1  ;;  %8057 = verf.f32 %v3734_v44  ;;  %v7121_v60 = vadd.f32 %v11063_v15, %v10869_v24  ;;  %v7925_v29 = vld [vmem:[%s8843_s20 + $0x304] ss:$16 sps:$4 sm:$0xff]   ;;  %v7928_v25 = vld [vmem:[%s8843_s20 + $0x30c] ss:$16 sps:$4 sm:$0xff]   ;;  %v11254_v48 = vmul.f32 %v3981_v51, %v11125_v55  ;;  %v11261_v30 = vmul.f32 %v3980_v41, %v11129_v52 }
 0x4cf   : > { %v8044_v8 = vpop.eup %8043  ;;  %v11247_v49 = vpop.f32.mrb[35].mxu0  ;;  %v11256_v16 = vmul.f32 0.5, %v7055_v10  ;;  %v11258_v44 = vmul.f32 0.5, %v7119_v53  ;;  %v3735_v63 = vmul.f32 0.70710677, %v7056_v39  ;;  %5216 = vmatmul.mubr.bf16.gmra.mrb[72].mxu0 %v4339_v47  ;;  %5602 = vmatmul.mubr.bf16.gmra.mrb[72].mxu1 %v4339_v47  ;;  %v11264_v15 = vmul.f32 %v3982_v0, %v11149_v23 }
 0x4d0   : > { %v11249_v40 = vpop.f32.mrb[35].mxu1  ;;  %v8046_v33 = vpop.eup %8045  ;;  %12985 = vst [vmem:[#allocation154_spill] sm:$0xff] %v11254_v48  ;;  %v3737_v5 = vmul.f32 0.70710677, %v7120_v2  ;;  %v7923_v55 = vld [vmem:[%s8843_s20 + $0x300] ss:$16 sps:$4 sm:$0xff]   ;;  %5371 = vmatpush1.bf16.msra.mxu0 %v7917_v59  ;;  %5757 = vmatpush1.bf16.msra.mxu1 %v7920_v26  ;;  %v7058_v23 = vadd.f32 %v11092_v27, %v10857_v20  ;;  %v7122_v37 = vadd.f32 %v11102_v9, %v10861_v13 }
 0x4d1   : > { %12984 = vst [vmem:[#allocation153_spill] sm:$0xff] %v11249_v40  ;;  %12986 = vst [vmem:[#allocation155_spill] sm:$0xff] %v11264_v15  ;;  %v3736_v40 = vmul.f32 0.70710677, %v7057_v56  ;;  %v3983_v10 = vadd.f32 1.0, %v8044_v8  ;;  %v11267_v53 = vmul.f32 0.5, %v7056_v39  ;;  %8059 = verf.f32 %v3735_v63  ;;  %v8048_v52 = vpop.eup %8047  ;;  %5372 = vmatprep.subr.bf16.mxu0 %v7925_v29  ;;  %5758 = vmatprep.subr.bf16.mxu1 %v7928_v25 }
 0x4d2   : > { %v3738_v51 = vmul.f32 0.70710677, %v7121_v60  ;;  %v7926_v47 = vld [vmem:[%s8843_s20 + $0x308] ss:$16 sps:$4 sm:$0xff]   ;;  %v3985_v41 = vadd.f32 1.0, %v8046_v33  ;;  %8061 = verf.f32 %v3737_v5  ;;  %v3984_v8 = vadd.f32 1.0, %v8048_v52 }
 0x4d3   : > { %v7931_v1 = vld [vmem:[%s8843_s20 + $0x324] ss:$16 sps:$4 sm:$0xff]   ;;  %v7934_v0 = vld [vmem:[%s8843_s20 + $0x32c] ss:$16 sps:$4 sm:$0xff]   ;;  %v8050_v39 = vpop.eup %8049  ;;  %v11276_v59 = vmul.f32 0.5, %v7120_v2  ;;  %8063 = verf.f32 %v3736_v40  ;;  %v7059_v33 = vadd.f32 %v11104_v45, %v10865_v62  ;;  %v11286_v9 = vmul.f32 0.5, %v7057_v56 }
 0x4d4   : > { %v11280_v26 = vpop.f32.mrb[36].mxu0  ;;  %v11282_v5 = vpop.f32.mrb[36].mxu1  ;;  %v7929_v27 = vld [vmem:[%s8843_s20 + $0x320] ss:$16 sps:$4 sm:$0xff]   ;;  %v7932_v63 = vld [vmem:[%s8843_s20 + $0x328] ss:$16 sps:$4 sm:$0xff]   ;;  %8065 = verf.f32 %v3738_v51  ;;  %v7123_v25 = vadd.f32 %v11109_v32, %v10869_v24  ;;  %v11295_v45 = vmul.f32 %v3983_v10, %v11173_v4  ;;  %5373 = vmatpush1.bf16.msra.mxu0 %v7923_v55  ;;  %5759 = vmatpush1.bf16.msra.mxu1 %v7926_v47  ;;  %v11304_v32 = vmul.f32 %v3985_v41, %v11175_v11 }
 0x4d5   : > { %12987 = vst [vmem:[#allocation156_spill] sm:$0xff] %v11280_v26  ;;  %12988 = vst [vmem:[#allocation157_spill] sm:$0xff] %v11282_v5  ;;  %v8052_v48 = vpop.eup %8051  ;;  %v3739_v29 = vmul.f32 0.70710677, %v7058_v23  ;;  %v11290_v2 = vpop.f32.mrb[37].mxu0  ;;  %v3986_v15 = vadd.f32 1.0, %v8050_v39  ;;  %5374 = vmatprep.subr.bf16.mxu0 %v7931_v1  ;;  %5760 = vmatprep.subr.bf16.mxu1 %v7934_v0 }
 0x4d6   : > { %v11292_v40 = vpop.f32.mrb[37].mxu1  ;;  %v8054_v52 = vpop.eup %8053  ;;  %v11297_v5 = vmul.f32 0.5, %v7121_v60  ;;  %v3741_v26 = vmul.f32 0.70710677, %v7122_v37  ;;  %12991 = vst [vmem:[#allocation160_spill] sm:$0xff] %v11304_v32  ;;  %v11309_v4 = vmul.f32 0.5, %v7058_v23  ;;  %v4344_v32 = vpack.c.bf16 %v11204_v14, %v11161_v12 }
 0x4d7   : > { %12989 = vst [vmem:[#allocation158_spill] sm:$0xff] %v11292_v40  ;;  %v11299_v56 = vpop.f32.mrb[38].mxu0  ;;  %v11301_v51 = vpop.f32.mrb[38].mxu1  ;;  %v11307_v40 = vmul.f32 %v3984_v8, %v11196_v7  ;;  %8067 = verf.f32 %v3739_v29  ;;  %v7937_v39 = vld [vmem:[%s8843_s20 + $0x344] ss:$16 sps:$4 sm:$0xff]   ;;  %v3987_v55 = vadd.f32 1.0, %v8052_v48  ;;  %v11322_v1 = vmul.f32 %v3986_v15, %v11206_v58 }
 0x4d8   : > { %12990 = vst [vmem:[#allocation159_spill] sm:$0xff] %v11301_v51  ;;  %v11311_v10 = vpop.f32.mrb[39].mxu0  ;;  %v11313_v60 = vpop.f32.mrb[39].mxu1  ;;  %v11316_v47 = vmul.f32 0.5, %v7122_v37  ;;  %8069 = verf.f32 %v3741_v26  ;;  %v3740_v11 = vmul.f32 0.70710677, %v7059_v33  ;;  %v7060_v48 = vadd.f32 %v11111_v42, %v10857_v20  ;;  %5375 = vmatpush1.bf16.msra.mxu0 %v7929_v27  ;;  %5761 = vmatpush1.bf16.msra.mxu1 %v7932_v63 }
 0x4d9   : > { %v8056_v51 = vpop.eup %8055  ;;  %v7940_v7 = vld [vmem:[%s8843_s20 + $0x34c] ss:$16 sps:$4 sm:$0xff]   ;;  %v3989_v23 = vadd.f32 1.0, %v8054_v52  ;;  %v3742_v29 = vmul.f32 0.70710677, %v7123_v25  ;;  %12992 = vst [vmem:[#allocation161_spill] sm:$0xff] %v11322_v1  ;;  %v7124_v37 = vadd.f32 %v11117_v54, %v10861_v13  ;;  %5225 = vmatprep.mubr.bf16.mxu0 %v4344_v32  ;;  %5611 = vmatprep.mubr.bf16.mxu1 %v4344_v32  ;;  %v4343_v12 = vpack.c.bf16 %v11187_v17, %v11139_v46 }
 0x4da   : > { %v8058_v41 = vpop.eup %8057  ;;  %v3988_v8 = vadd.f32 1.0, %v8056_v51  ;;  %8071 = verf.f32 %v3740_v11  ;;  %v7935_v0 = vld [vmem:[%s8843_s20 + $0x340] ss:$16 sps:$4 sm:$0xff]   ;;  %v7938_v26 = vld [vmem:[%s8843_s20 + $0x348] ss:$16 sps:$4 sm:$0xff]   ;;  %v11330_v51 = vmul.f32 0.5, %v7059_v33  ;;  %v7061_v14 = vadd.f32 %v11119_v19, %v10865_v62  ;;  %5376 = vmatprep.subr.bf16.mxu0 %v7937_v39  ;;  %5762 = vmatprep.subr.bf16.mxu1 %v7940_v7 }
 0x4db   : > { %v3990_v52 = vadd.f32 1.0, %v8058_v41  ;;  %v7943_v58 = vld [vmem:[%s8843_s20 + $0x364] ss:$16 sps:$4 sm:$0xff]   ;;  %v7946_v42 = vld [vmem:[%s8843_s20 + $0x36c] ss:$16 sps:$4 sm:$0xff]   ;;  %v8060_v15 = vpop.eup %8059  ;;  %v11339_v54 = vmul.f32 %v3987_v55, %v11212_v18  ;;  %v11341_v27 = vmul.f32 0.5, %v7123_v25  ;;  %8073 = verf.f32 %v3742_v29  ;;  %5226 = vmatmul.mubr.bf16.gmra.mrb[76].mxu0 %v4343_v12  ;;  %5612 = vmatmul.mubr.bf16.gmra.mrb[76].mxu1 %v4343_v12 }
 0x4dc   : > { %v3743_v33 = vmul.f32 0.70710677, %v7060_v48  ;;  %v11343_v63 = vpop.f32.mrb[40].mxu0  ;;  %v11345_v32 = vpop.f32.mrb[40].mxu1  ;;  %v11348_v19 = vmul.f32 %v3989_v23, %v11216_v43  ;;  %v11351_v17 = vmul.f32 %v3988_v8, %v11256_v16  ;;  %v3745_v18 = vmul.f32 0.70710677, %v7124_v37  ;;  %5377 = vmatpush1.bf16.msra.mxu0 %v7935_v0  ;;  %5763 = vmatpush1.bf16.msra.mxu1 %v7938_v26 }
 0x4dd   : > { %v8062_v46 = vpop.eup %8061  ;;  %v3744_v25 = vmul.f32 0.70710677, %v7061_v14  ;;  %v7941_v55 = vld [vmem:[%s8843_s20 + $0x360] ss:$16 sps:$4 sm:$0xff]   ;;  %v3991_v41 = vadd.f32 1.0, %v8060_v15  ;;  %v7125_v39 = vadd.f32 %v11127_v21, %v10869_v24  ;;  %v7062_v43 = vadd.f32 %v11154_v36, %v10857_v20  ;;  %v11358_v7 = vpop.f32.mrb[41].mxu0  ;;  %5378 = vmatprep.subr.bf16.mxu0 %v7943_v58  ;;  %5764 = vmatprep.subr.bf16.mxu1 %v7946_v42 }
 0x4de   : > { %12993 = vst [vmem:[#allocation162_spill] sm:$0xff] %v11348_v19  ;;  %v8064_v11 = vpop.eup %8063  ;;  %8075 = verf.f32 %v3743_v33  ;;  %v11360_v23 = vpop.f32.mrb[41].mxu1  ;;  %v7944_v16 = vld [vmem:[%s8843_s20 + $0x368] ss:$16 sps:$4 sm:$0xff]   ;;  %v11364_v29 = vmul.f32 %v3990_v52, %v11258_v44  ;;  %v11366_v12 = vmul.f32 0.5, %v7060_v48  ;;  %v12996_v21 = vld [vmem:[#allocation147_spill] sm:$0xff] }
 0x4df   : > { %12994 = vst [vmem:[#allocation163_spill] sm:$0xff] %v11360_v23  ;;  %v8066_v8 = vpop.eup %8065  ;;  %8077 = verf.f32 %v3745_v18  ;;  %v7126_v15 = vadd.f32 %v12996_v21, %v10861_v13  ;;  %v11370_v33 = vpop.f32.mrb[42].mxu0  ;;  %v7949_v19 = vld [vmem:[%s8843_s20 + $0x384] ss:$16 sps:$4 sm:$0xff]   ;;  %v3993_v0 = vadd.f32 1.0, %v8062_v46  ;;  %v11375_v26 = vmul.f32 0.5, %v7124_v37 }
 0x4e0   : > { %12995 = vst [vmem:[#allocation164_spill] sm:$0xff] %v11364_v29  ;;  %12997 = vst [vmem:[#allocation147_spill] sm:$0xff] %v11370_v33  ;;  %v11372_v36 = vpop.f32.mrb[42].mxu1  ;;  %v11377_v1 = vmul.f32 0.5, %v7061_v14  ;;  %8079 = verf.f32 %v3744_v25  ;;  %v11379_v44 = vpop.f32.mrb[43].mxu0  ;;  %v3992_v18 = vadd.f32 1.0, %v8064_v11  ;;  %v11384_v46 = vmul.f32 %v3991_v41, %v11267_v53  ;;  %5379 = vmatpush1.bf16.msra.mxu0 %v7941_v55  ;;  %5765 = vmatpush1.bf16.msra.mxu1 %v7944_v16 }
 0x4e1   : > { %12998 = vst [vmem:[#allocation165_spill] sm:$0xff] %v11372_v36  ;;  %12999 = vst [vmem:[#allocation166_spill] sm:$0xff] %v11379_v44  ;;  %v11381_v48 = vpop.f32.mrb[43].mxu1  ;;  %v8068_v52 = vpop.eup %8067  ;;  %v3994_v21 = vadd.f32 1.0, %v8066_v8  ;;  %v3746_v29 = vmul.f32 0.70710677, %v7125_v39  ;;  %5380 = vmatprep.subr.bf16.mxu0 %v7949_v19  ;;  %v4348_v55 = vpack.c.bf16 %v11307_v40, %v11261_v30  ;;  %v7064_v16 = vadd.f32 %v11177_v31, %v10857_v20 }
 0x4e2   : > { %13000 = vst [vmem:[#allocation167_spill] sm:$0xff] %v11381_v48  ;;  %v3747_v58 = vmul.f32 0.70710677, %v7062_v43  ;;  %v8070_v42 = vpop.eup %8069  ;;  %v3995_v37 = vadd.f32 1.0, %v8068_v52  ;;  %v11386_v14 = vmul.f32 0.5, %v7125_v39  ;;  %v13001_v11 = vld [vmem:[#allocation148_spill] sm:$0xff]  ;;  %v11396_v39 = vmul.f32 %v3993_v0, %v11276_v59 }
 0x4e3   : > { %v3749_v36 = vmul.f32 0.70710677, %v7126_v15  ;;  %v7952_v25 = vld [vmem:[%s8843_s20 + $0x38c] ss:$16 sps:$4 sm:$0xff]   ;;  %v3997_v48 = vadd.f32 1.0, %v8070_v42  ;;  %8081 = verf.f32 %v3746_v29  ;;  %v7063_v8 = vadd.f32 %v13001_v11, %v10865_v62  ;;  %5235 = vmatprep.mubr.bf16.mxu0 %v4348_v55  ;;  %5621 = vmatprep.mubr.bf16.mxu1 %v4348_v55 }
 0x4e4   : > { %v13002_v44 = vld [vmem:[#allocation149_spill] sm:$0xff]  ;;  %v7950_v53 = vld [vmem:[%s8843_s20 + $0x388] ss:$16 sps:$4 sm:$0xff]   ;;  %v8072_v41 = vpop.eup %8071  ;;  %13003 = vst [vmem:[#allocation148_spill] sm:$0xff] %v11396_v39  ;;  %8083 = verf.f32 %v3747_v58  ;;  %v11402_v29 = vpop.f32.mrb[44].mxu0  ;;  %5766 = vmatprep.subr.bf16.mxu1 %v7952_v25  ;;  %v11409_v42 = vmul.f32 %v3992_v18, %v11286_v9  ;;  %v11411_v59 = vmul.f32 0.5, %v7062_v43  ;;  %v11421_v11 = vmul.f32 %v3994_v21, %v11297_v5 }
 0x4e5   : > { %v7127_v33 = vadd.f32 %v13002_v44, %v10869_v24  ;;  %v7947_v23 = vld [vmem:[%s8843_s20 + $0x380] ss:$16 sps:$4 sm:$0xff]   ;;  %v11404_v52 = vpop.f32.mrb[44].mxu1  ;;  %v7955_v44 = vld [vmem:[%s8843_s20 + $0x3a4] ss:$16 sps:$4 sm:$0xff]   ;;  %v11413_v0 = vmul.f32 0.5, %v7126_v15  ;;  %8085 = verf.f32 %v3749_v36  ;;  %v8074_v58 = vpop.eup %8073  ;;  %v11424_v25 = vmul.f32 %v3995_v37, %v11309_v4  ;;  %5767 = vmatpush1.bf16.msra.mxu1 %v7950_v53 }
 0x4e6   : > { %v7958_v19 = vld [vmem:[%s8843_s20 + $0x3ac] ss:$16 sps:$4 sm:$0xff]   ;;  %v11415_v30 = vpop.f32.mrb[45].mxu0  ;;  %v11417_v40 = vpop.f32.mrb[45].mxu1  ;;  %v7953_v31 = vld [vmem:[%s8843_s20 + $0x3a0] ss:$16 sps:$4 sm:$0xff]   ;;  %v11428_v15 = vmul.f32 %v3997_v48, %v11316_v47  ;;  %5381 = vmatpush1.bf16.msra.mxu0 %v7947_v23  ;;  %v4347_v47 = vpack.c.bf16 %v11295_v45, %v11241_v34  ;;  %v7065_v48 = vadd.f32 %v11184_v50, %v10865_v62 }
 0x4e7   : > { %13004 = vst [vmem:[#allocation149_spill] sm:$0xff] %v11415_v30  ;;  %13005 = vst [vmem:[#allocation168_spill] sm:$0xff] %v11417_v40  ;;  %v3748_v39 = vmul.f32 0.70710677, %v7063_v8  ;;  %v3750_v9 = vmul.f32 0.70710677, %v7127_v33  ;;  %v7128_v40 = vadd.f32 %v11179_v35, %v10861_v13  ;;  %5382 = vmatprep.subr.bf16.mxu0 %v7955_v44  ;;  %5768 = vmatprep.subr.bf16.mxu1 %v7958_v19 }
 0x4e8   : > { %13006 = vst [vmem:[#allocation169_spill] sm:$0xff] %v11421_v11  ;;  %v7956_v43 = vld [vmem:[%s8843_s20 + $0x3a8] ss:$16 sps:$4 sm:$0xff]   ;;  %13007 = vst [vmem:[#allocation170_spill] sm:$0xff] %v11428_v15  ;;  %v3996_v36 = vadd.f32 1.0, %v8072_v41  ;;  %v11432_v30 = vpop.f32.mrb[46].mxu0  ;;  %v8076_v4 = vpop.eup %8075  ;;  %5236 = vmatmul.mubr.bf16.gmra.mrb[80].mxu0 %v4347_v47  ;;  %5622 = vmatmul.mubr.bf16.gmra.mrb[80].mxu1 %v4347_v47 }
 0x4e9   : > { %v3751_v18 = vmul.f32 0.70710677, %v7064_v16  ;;  %v11434_v5 = vpop.f32.mrb[46].mxu1  ;;  %v11436_v21 = vmul.f32 0.5, %v7063_v8  ;;  %8087 = verf.f32 %v3748_v39  ;;  %v11442_v37 = vpop.f32.mrb[47].mxu0  ;;  %v3998_v53 = vadd.f32 1.0, %v8074_v58  ;;  %5769 = vmatpush1.bf16.msra.mxu1 %v7956_v43 }
 0x4ea   : > { %v11444_v35 = vpop.f32.mrb[47].mxu1  ;;  %v7961_v41 = vld [vmem:[%s8843_s20 + $0x3c4] ss:$16 sps:$4 sm:$0xff]   ;;  %v8078_v23 = vpop.eup %8077  ;;  %v11447_v55 = vmul.f32 0.5, %v7127_v33  ;;  %8089 = verf.f32 %v3750_v9  ;;  %v3753_v8 = vmul.f32 0.70710677, %v7128_v40  ;;  %v7129_v33 = vadd.f32 %v11194_v22, %v10869_v24  ;;  %5383 = vmatpush1.bf16.msra.mxu0 %v7953_v31 }
 0x4eb   : > { %v7964_v39 = vld [vmem:[%s8843_s20 + $0x3cc] ss:$16 sps:$4 sm:$0xff]   ;;  %v8080_v34 = vpop.eup %8079  ;;  %v3999_v45 = vadd.f32 1.0, %v8076_v4  ;;  %v4001_v15 = vadd.f32 1.0, %v8078_v23  ;;  %8091 = verf.f32 %v3751_v18  ;;  %v3752_v50 = vmul.f32 0.70710677, %v7065_v48  ;;  %5384 = vmatprep.subr.bf16.mxu0 %v7961_v41 }
 0x4ec   : > { %v4000_v11 = vadd.f32 1.0, %v8080_v34  ;;  %v11450_v44 = vmul.f32 0.5, %v7064_v16  ;;  %8093 = verf.f32 %v3753_v8  ;;  %v7959_v19 = vld [vmem:[%s8843_s20 + $0x3c0] ss:$16 sps:$4 sm:$0xff]   ;;  %v7962_v58 = vld [vmem:[%s8843_s20 + $0x3c8] ss:$16 sps:$4 sm:$0xff]   ;;  %v11457_v9 = vmul.f32 %v3996_v36, %v11330_v51  ;;  %5770 = vmatprep.subr.bf16.mxu1 %v7964_v39 }
 0x4ed   : > { %8095 = verf.f32 %v3752_v50  ;;  %v7066_v18 = vadd.f32 %v11218_v6, %v10857_v20  ;;  %v7130_v16 = vadd.f32 %v11220_v28, %v10861_v13  ;;  %v11463_v4 = vpop.f32.mrb[48].mxu0  ;;  %v11465_v47 = vpop.f32.mrb[48].mxu1  ;;  %v7967_v22 = vld [vmem:[%s8843_s20 + $0x3e4] ss:$16 sps:$4 sm:$0xff]   ;;  %v7970_v31 = vld [vmem:[%s8843_s20 + $0x3ec] ss:$16 sps:$4 sm:$0xff]   ;;  %v11470_v51 = vmul.f32 %v3998_v53, %v11341_v27  ;;  %5771 = vmatpush1.bf16.msra.mxu1 %v7962_v58 }
 0x4ee   : > { %13008 = vst [vmem:[#allocation171_spill] sm:$0xff] %v11463_v4  ;;  %13009 = vst [vmem:[#allocation172_spill] sm:$0xff] %v11465_v47  ;;  %v8082_v43 = vpop.eup %8081  ;;  %v11472_v36 = vmul.f32 0.5, %v7128_v40  ;;  %v3754_v6 = vmul.f32 0.70710677, %v7129_v33  ;;  %v7067_v28 = vadd.f32 %v11224_v38, %v10865_v62  ;;  %v11476_v23 = vpop.f32.mrb[49].mxu0  ;;  %v11481_v39 = vmul.f32 %v3999_v45, %v11366_v12  ;;  %5385 = vmatpush1.bf16.msra.mxu0 %v7959_v19 }
 0x4ef   : > { %13010 = vst [vmem:[#allocation173_spill] sm:$0xff] %v11470_v51  ;;  %13011 = vst [vmem:[#allocation174_spill] sm:$0xff] %v11476_v23  ;;  %v11478_v8 = vpop.f32.mrb[49].mxu1  ;;  %v8084_v41 = vpop.eup %8083  ;;  %v11484_v34 = vmul.f32 %v4001_v15, %v11375_v26  ;;  %v11486_v50 = vmul.f32 0.5, %v7065_v48  ;;  %v3755_v27 = vmul.f32 0.70710677, %v7066_v18  ;;  %v11493_v38 = vmul.f32 %v4000_v11, %v11377_v1  ;;  %5386 = vmatprep.subr.bf16.mxu0 %v7967_v22 }
 0x4f0   : > { %13012 = vst [vmem:[#allocation175_spill] sm:$0xff] %v11478_v8  ;;  %v11488_v40 = vpop.f32.mrb[50].mxu0  ;;  %v7965_v53 = vld [vmem:[%s8843_s20 + $0x3e0] ss:$16 sps:$4 sm:$0xff]   ;;  %v7968_v51 = vld [vmem:[%s8843_s20 + $0x3e8] ss:$16 sps:$4 sm:$0xff]   ;;  %v8086_v47 = vpop.eup %8085  ;;  %8097 = verf.f32 %v3754_v6  ;;  %5772 = vmatprep.subr.bf16.mxu1 %v7970_v31  ;;  %v7131_v1 = vadd.f32 %v11226_v3, %v10869_v24  ;;  %v4352_v11 = vpack.c.bf16 %v11409_v42, %v11351_v17  ;;  %v7068_v58 = vadd.f32 %v11234_v57, %v10857_v20 }
 0x4f1   : > { %13013 = vst [vmem:[#allocation176_spill] sm:$0xff] %v11484_v34  ;;  %v4002_v23 = vadd.f32 1.0, %v8082_v43  ;;  %v3757_v8 = vmul.f32 0.70710677, %v7130_v16  ;;  %v11495_v4 = vpop.f32.mrb[50].mxu1  ;;  %v11497_v12 = vpop.f32.mrb[51].mxu0  ;;  %8099 = verf.f32 %v3755_v27  ;;  %v4351_v3 = vpack.c.bf16 %v11384_v46, %v11339_v54  ;;  %5773 = vmatpush1.bf16.msra.mxu1 %v7968_v51 }
 0x4f2   : > { %v4003_v26 = vadd.f32 1.0, %v8084_v41  ;;  %v4005_v15 = vadd.f32 1.0, %v8086_v47  ;;  %v3756_v48 = vmul.f32 0.70710677, %v7067_v28  ;;  %v11499_v45 = vpop.f32.mrb[51].mxu1  ;;  %v11501_v34 = vmul.f32 0.5, %v7129_v33  ;;  %5245 = vmatprep.mubr.bf16.mxu0 %v4352_v11  ;;  %5631 = vmatprep.mubr.bf16.mxu1 %v4352_v11 }
 0x4f3   : > { %8101 = verf.f32 %v3757_v8  ;;  %v8088_v43 = vpop.eup %8087  ;;  %v11507_v19 = vmul.f32 0.5, %v7066_v18  ;;  %v7132_v47 = vadd.f32 %v11236_v61, %v10861_v13  ;;  %v11513_v33 = vmul.f32 0.5, %v7130_v16  ;;  %5387 = vmatpush1.bf16.msra.mxu0 %v7965_v53  ;;  %5632 = vmatmul.mubr.bf16.gmra.mrb[84].mxu1 %v4351_v3 }
 0x4f4   : > { %8103 = verf.f32 %v3756_v48  ;;  %v8090_v22 = vpop.eup %8089  ;;  %v11515_v31 = vmul.f32 0.5, %v7067_v28  ;;  %v3758_v6 = vmul.f32 0.70710677, %v7131_v1  ;;  %v11520_v42 = vmul.f32 %v4002_v23, %v11386_v14  ;;  %v11528_v16 = vpop.f32.mrb[52].mxu0  ;;  %5246 = vmatmul.mubr.bf16.gmra.mrb[84].mxu0 %v4351_v3  ;;  %v13016_v48 = vld [vmem:[#allocation153_spill] sm:$0xff] }
 0x4f5   : > { %v8092_v17 = vpop.eup %8091  ;;  %v11523_v57 = vmul.f32 %v4003_v26, %v11411_v59  ;;  %v11526_v61 = vmul.f32 %v4005_v15, %v11413_v0  ;;  %v3759_v18 = vmul.f32 0.70710677, %v7068_v58  ;;  %v4004_v8 = vadd.f32 1.0, %v8088_v43  ;;  %v11530_v46 = vpop.f32.mrb[52].mxu1 }
 0x4f6   : > { %13014 = vst [vmem:[#allocation177_spill] sm:$0xff] %v11520_v42  ;;  %v8094_v28 = vpop.eup %8093  ;;  %v4006_v41 = vadd.f32 1.0, %v8090_v22  ;;  %8105 = verf.f32 %v3758_v6  ;;  %v3761_v54 = vmul.f32 0.70710677, %v7132_v47  ;;  %v11532_v14 = vpop.f32.mrb[53].mxu0  ;;  %v4007_v23 = vadd.f32 1.0, %v8092_v17 }
 0x4f7   : > { %13015 = vst [vmem:[#allocation178_spill] sm:$0xff] %v11526_v61  ;;  %v8096_v59 = vpop.eup %8095  ;;  %v4009_v0 = vadd.f32 1.0, %v8094_v28  ;;  %8107 = verf.f32 %v3759_v18  ;;  %v7069_v27 = vadd.f32 %v11247_v49, %v10865_v62  ;;  %v11536_v53 = vpop.f32.mrb[53].mxu1  ;;  %v11540_v26 = vmul.f32 0.5, %v7131_v1  ;;  %v13019_v17 = vld [vmem:[#allocation156_spill] sm:$0xff]  ;;  %v13022_v61 = vld [vmem:[#allocation157_spill] sm:$0xff] }
 0x4f8   : > { %v11538_v51 = vpop.f32.mrb[54].mxu0  ;;  %v11542_v15 = vmul.f32 0.5, %v7068_v58  ;;  %8109 = verf.f32 %v3761_v54  ;;  %v7133_v11 = vadd.f32 %v13016_v48, %v10869_v24  ;;  %v11546_v43 = vpop.f32.mrb[54].mxu1  ;;  %v4008_v6 = vadd.f32 1.0, %v8096_v59 }
 0x4f9   : > { %13017 = vst [vmem:[#allocation153_spill] sm:$0xff] %v11546_v43  ;;  %v11548_v22 = vpop.f32.mrb[55].mxu0  ;;  %v11550_v3 = vmul.f32 0.5, %v7132_v47  ;;  %v3760_v49 = vmul.f32 0.70710677, %v7069_v27  ;;  %v7070_v18 = vadd.f32 %v13019_v17, %v10857_v20  ;;  %v11554_v28 = vpop.f32.mrb[55].mxu1  ;;  %v11557_v58 = vmul.f32 %v4004_v8, %v11436_v21 }
 0x4fa   : > { %13018 = vst [vmem:[#allocation179_spill] sm:$0xff] %v11548_v22  ;;  %13020 = vst [vmem:[#allocation156_spill] sm:$0xff] %v11554_v28  ;;  %v8098_v1 = vpop.eup %8097  ;;  %v11560_v54 = vmul.f32 %v4006_v41, %v11447_v55  ;;  %v3762_v48 = vmul.f32 0.70710677, %v7133_v11  ;;  %v7134_v42 = vadd.f32 %v13022_v61, %v10861_v13  ;;  %v11565_v47 = vmul.f32 %v4007_v23, %v11450_v44 }
 0x4fb   : > { %v8100_v59 = vpop.eup %8099  ;;  %v11568_v22 = vmul.f32 %v4009_v0, %v11472_v36  ;;  %8111 = verf.f32 %v3760_v49  ;;  %v3763_v17 = vmul.f32 0.70710677, %v7070_v18  ;;  %v4010_v43 = vadd.f32 1.0, %v8098_v1 }
 0x4fc   : > { %13021 = vst [vmem:[#allocation180_spill] sm:$0xff] %v11560_v54  ;;  %v11570_v21 = vmul.f32 0.5, %v7069_v27  ;;  %8113 = verf.f32 %v3762_v48  ;;  %v3765_v55 = vmul.f32 0.70710677, %v7134_v42  ;;  %v11573_v41 = vmul.f32 %v4008_v6, %v11486_v50  ;;  %v11577_v23 = vpop.f32.mrb[56].mxu0  ;;  %v11579_v36 = vpop.f32.mrb[56].mxu1 }
 0x4fd   : > { %13023 = vst [vmem:[#allocation157_spill] sm:$0xff] %v11568_v22  ;;  %v8102_v28 = vpop.eup %8101  ;;  %v4011_v61 = vadd.f32 1.0, %v8100_v59  ;;  %8115 = verf.f32 %v3763_v17  ;;  %v7071_v44 = vadd.f32 %v11290_v2, %v10865_v62  ;;  %v11581_v49 = vmul.f32 0.5, %v7133_v11  ;;  %v13024_v27 = vld [vmem:[#allocation158_spill] sm:$0xff]  ;;  %v11585_v48 = vpop.f32.mrb[57].mxu0 }
 0x4fe   : > { %v8104_v8 = vpop.eup %8103  ;;  %v4013_v0 = vadd.f32 1.0, %v8102_v28  ;;  %8117 = verf.f32 %v3765_v55  ;;  %v7135_v1 = vadd.f32 %v13024_v27, %v10869_v24  ;;  %13025 = vst [vmem:[#allocation158_spill] sm:$0xff] %v11585_v48  ;;  %v11587_v50 = vpop.f32.mrb[57].mxu1  ;;  %v11589_v6 = vmul.f32 0.5, %v7070_v18 }
 0x4ff   : > { %13026 = vst [vmem:[#allocation181_spill] sm:$0xff] %v11587_v50  ;;  %v11591_v59 = vmul.f32 0.5, %v7134_v42  ;;  %v3764_v2 = vmul.f32 0.70710677, %v7071_v44  ;;  %v4356_v17 = vpack.c.bf16 %v11493_v38, %v11457_v9  ;;  %v11595_v22 = vpop.f32.mrb[58].mxu0  ;;  %v11597_v11 = vpop.f32.mrb[58].mxu1  ;;  %v11600_v55 = vmul.f32 %v4010_v43, %v11501_v34 }
 0x500   : > { %13027 = vst [vmem:[#allocation182_spill] sm:$0xff] %v11597_v11  ;;  %v8106_v28 = vpop.eup %8105  ;;  %v4012_v27 = vadd.f32 1.0, %v8104_v8  ;;  %v3766_v54 = vmul.f32 0.70710677, %v7135_v1  ;;  %v7072_v18 = vadd.f32 %v11299_v56, %v10857_v20  ;;  %v11604_v50 = vpop.f32.mrb[59].mxu0  ;;  %v11609_v9 = vmul.f32 %v4011_v61, %v11507_v19  ;;  %v13031_v38 = vld [vmem:[#allocation159_spill] sm:$0xff] }
 0x501   : > { %13028 = vst [vmem:[#allocation183_spill] sm:$0xff] %v11600_v55  ;;  %13029 = vst [vmem:[#allocation184_spill] sm:$0xff] %v11604_v50  ;;  %v11606_v42 = vpop.f32.mrb[59].mxu1  ;;  %v8108_v48 = vpop.eup %8107  ;;  %8119 = verf.f32 %v3764_v2  ;;  %5255 = vmatprep.mubr.bf16.mxu0 %v4356_v17  ;;  %5641 = vmatprep.mubr.bf16.mxu1 %v4356_v17  ;;  %v7136_v34 = vadd.f32 %v13031_v38, %v10861_v13  ;;  %v4355_v43 = vpack.c.bf16 %v11481_v39, %v11424_v25 }
 0x502   : > { %13030 = vst [vmem:[#allocation185_spill] sm:$0xff] %v11606_v42  ;;  %v8110_v8 = vpop.eup %8109  ;;  %v11616_v56 = vmul.f32 %v4013_v0, %v11513_v33  ;;  %v4014_v55 = vadd.f32 1.0, %v8106_v28  ;;  %8121 = verf.f32 %v3766_v54  ;;  %v3767_v42 = vmul.f32 0.70710677, %v7072_v18 }
 0x503   : > { %v4015_v50 = vadd.f32 1.0, %v8108_v48  ;;  %v4017_v11 = vadd.f32 1.0, %v8110_v8  ;;  %v11618_v19 = vmul.f32 0.5, %v7071_v44  ;;  %v3769_v61 = vmul.f32 0.70710677, %v7136_v34  ;;  %5256 = vmatmul.mubr.bf16.gmra.mrb[88].mxu0 %v4355_v43  ;;  %5642 = vmatmul.mubr.bf16.gmra.mrb[88].mxu1 %v4355_v43 }
 0x504   : > { %13032 = vst [vmem:[#allocation159_spill] sm:$0xff] %v11616_v56  ;;  %v11621_v2 = vmul.f32 %v4012_v27, %v11515_v31  ;;  %8123 = verf.f32 %v3767_v42  ;;  %v7073_v25 = vadd.f32 %v11311_v10, %v10865_v62  ;;  %v7137_v39 = vadd.f32 %v11313_v60, %v10869_v24  ;;  %v11633_v48 = vpop.f32.mrb[60].mxu0  ;;  %v11635_v31 = vpop.f32.mrb[60].mxu1 }
 0x505   : > { %v8112_v33 = vpop.eup %8111  ;;  %v11627_v54 = vmul.f32 0.5, %v7135_v1  ;;  %8125 = verf.f32 %v3769_v61  ;;  %v7074_v44 = vadd.f32 %v11343_v63, %v10857_v20  ;;  %v7138_v0 = vadd.f32 %v11345_v32, %v10861_v13  ;;  %v11644_v27 = vpop.f32.mrb[61].mxu0 }
 0x506   : > { %v8114_v17 = vpop.eup %8113  ;;  %v11638_v10 = vmul.f32 %v4014_v55, %v11540_v26  ;;  %v11640_v28 = vmul.f32 0.5, %v7072_v18  ;;  %v11642_v60 = vmul.f32 0.5, %v7136_v34  ;;  %v3768_v1 = vmul.f32 0.70710677, %v7073_v25  ;;  %v11654_v18 = vpop.f32.mrb[61].mxu1 }
 0x507   : > { %v8116_v42 = vpop.eup %8115  ;;  %v11647_v63 = vmul.f32 %v4015_v50, %v11542_v15  ;;  %v11650_v32 = vmul.f32 %v4017_v11, %v11550_v3  ;;  %v3770_v38 = vmul.f32 0.70710677, %v7137_v39  ;;  %v3771_v43 = vmul.f32 0.70710677, %v7074_v44  ;;  %v11656_v34 = vpop.f32.mrb[62].mxu0 }
 0x508   : > { %13033 = vst [vmem:[#allocation186_spill] sm:$0xff] %v11638_v10  ;;  %v8118_v8 = vpop.eup %8117  ;;  %v4016_v61 = vadd.f32 1.0, %v8112_v33  ;;  %v4018_v26 = vadd.f32 1.0, %v8114_v17  ;;  %v11652_v55 = vmul.f32 0.5, %v7073_v25  ;;  %8127 = verf.f32 %v3768_v1  ;;  %v11658_v50 = vpop.f32.mrb[62].mxu1  ;;  %v13037_v33 = vld [vmem:[#allocation163_spill] sm:$0xff] }
 0x509   : > { %13034 = vst [vmem:[#allocation187_spill] sm:$0xff] %v11650_v32  ;;  %v4019_v56 = vadd.f32 1.0, %v8116_v42  ;;  %v4021_v10 = vadd.f32 1.0, %v8118_v8  ;;  %8129 = verf.f32 %v3770_v38  ;;  %v3773_v15 = vmul.f32 0.70710677, %v7138_v0  ;;  %13035 = vst [vmem:[#allocation188_spill] sm:$0xff] %v11658_v50 }
 0x50a   : > { %v11660_v3 = vpop.f32.mrb[63].mxu0  ;;  %v11662_v11 = vmul.f32 0.5, %v7137_v39  ;;  %8131 = verf.f32 %v3771_v43  ;;  %v7075_v25 = vadd.f32 %v11358_v7, %v10865_v62  ;;  %v7139_v17 = vadd.f32 %v13037_v33, %v10869_v24  ;;  %v11668_v1 = vpop.f32.mrb[63].mxu1  ;;  %v13039_v8 = vld [vmem:[#allocation147_spill] sm:$0xff] }
 0x50b   : > { %13036 = vst [vmem:[#allocation189_spill] sm:$0xff] %v11660_v3  ;;  %13038 = vst [vmem:[#allocation163_spill] sm:$0xff] %v11668_v1  ;;  %v8120_v32 = vpop.eup %8119  ;;  %v11670_v42 = vmul.f32 0.5, %v7074_v44  ;;  %8133 = verf.f32 %v3773_v15  ;;  %v4360_v38 = vpack.c.bf16 %v11573_v41, %v11557_v58  ;;  %v7076_v39 = vadd.f32 %v13039_v8, %v10857_v20 }
 0x50c   : > { %v8122_v3 = vpop.eup %8121  ;;  %v4144_v43 = vmul.f32 %v4016_v61, %v11570_v21  ;;  %v11678_v7 = vmul.f32 %v4018_v26, %v11581_v49  ;;  %v11680_v50 = vmul.f32 0.5, %v7138_v0  ;;  %v3772_v33 = vmul.f32 0.70710677, %v7075_v25  ;;  %v13042_v21 = vld [vmem:[#allocation165_spill] sm:$0xff] }
 0x50d   : > { %v11683_v1 = vmul.f32 %v4019_v56, %v11589_v6  ;;  %v11686_v44 = vmul.f32 %v4021_v10, %v11591_v59  ;;  %v3774_v15 = vmul.f32 0.70710677, %v7139_v17  ;;  %5265 = vmatprep.mubr.bf16.mxu0 %v4360_v38  ;;  %5651 = vmatprep.mubr.bf16.mxu1 %v4360_v38  ;;  %v3775_v58 = vmul.f32 0.70710677, %v7076_v39  ;;  %v13043_v59 = vld [vmem:[#allocation166_spill] sm:$0xff] }
 0x50e   : > { %13040 = vst [vmem:[#allocation147_spill] sm:$0xff] %v11678_v7  ;;  %v8124_v41 = vpop.eup %8123  ;;  %v4020_v8 = vadd.f32 1.0, %v8120_v32  ;;  %8135 = verf.f32 %v3772_v33  ;;  %v7140_v49 = vadd.f32 %v13042_v21, %v10861_v13  ;;  %v4359_v0 = vpack.c.bf16 %v11565_v47, %v11523_v57  ;;  %v13044_v57 = vld [vmem:[#allocation167_spill] sm:$0xff] }
 0x50f   : > { %13041 = vst [vmem:[#allocation190_spill] sm:$0xff] %v11686_v44  ;;  %v8126_v61 = vpop.eup %8125  ;;  %v4022_v26 = vadd.f32 1.0, %v8122_v3  ;;  %v11692_v6 = vmul.f32 0.5, %v7075_v25  ;;  %8137 = verf.f32 %v3774_v15  ;;  %v7077_v56 = vadd.f32 %v13043_v59, %v10865_v62 }
 0x510   : > { %v4023_v10 = vadd.f32 1.0, %v8124_v41  ;;  %v4025_v38 = vadd.f32 1.0, %v8126_v61  ;;  %8139 = verf.f32 %v3775_v58  ;;  %v3777_v44 = vmul.f32 0.70710677, %v7140_v49  ;;  %5266 = vmatmul.mubr.bf16.gmra.mrb[92].mxu0 %v4359_v0  ;;  %5652 = vmatmul.mubr.bf16.gmra.mrb[92].mxu1 %v4359_v0 }
 0x511   : > { %v11696_v32 = vmul.f32 0.5, %v7139_v17  ;;  %v11698_v33 = vmul.f32 0.5, %v7076_v39  ;;  %v3776_v21 = vmul.f32 0.70710677, %v7077_v56  ;;  %v7141_v47 = vadd.f32 %v13044_v57, %v10869_v24 }
 0x512   : > { %v8128_v3 = vpop.eup %8127  ;;  %v11703_v25 = vmul.f32 %v4020_v8, %v11618_v19  ;;  %8141 = verf.f32 %v3777_v44  ;;  %v7078_v15 = vadd.f32 %v11402_v29, %v10857_v20  ;;  %v7142_v58 = vadd.f32 %v11404_v52, %v10861_v13 }
 0x513   : > { %v8130_v41 = vpop.eup %8129  ;;  %v11710_v17 = vmul.f32 %v4022_v26, %v11627_v54  ;;  %v11712_v39 = vmul.f32 0.5, %v7140_v49  ;;  %8143 = verf.f32 %v3776_v21  ;;  %v3778_v0 = vmul.f32 0.70710677, %v7141_v47  ;;  %v13046_v21 = vld [vmem:[#allocation149_spill] sm:$0xff] }
 0x514   : > { %v8132_v61 = vpop.eup %8131  ;;  %v11715_v59 = vmul.f32 %v4023_v10, %v11640_v28  ;;  %v11718_v19 = vmul.f32 %v4025_v38, %v11642_v60  ;;  %v11720_v44 = vmul.f32 0.5, %v7077_v56  ;;  %v3779_v29 = vmul.f32 0.70710677, %v7078_v15  ;;  %v13047_v28 = vld [vmem:[#allocation168_spill] sm:$0xff] }
 0x515   : > { %13045 = vst [vmem:[#allocation165_spill] sm:$0xff] %v11710_v17  ;;  %v8134_v8 = vpop.eup %8133  ;;  %v4024_v52 = vadd.f32 1.0, %v8128_v3  ;;  %v4026_v57 = vadd.f32 1.0, %v8130_v41  ;;  %8145 = verf.f32 %v3778_v0  ;;  %v3781_v54 = vmul.f32 0.70710677, %v7142_v58 }
 0x516   : > { %v4027_v26 = vadd.f32 1.0, %v8132_v61  ;;  %v4029_v49 = vadd.f32 1.0, %v8134_v8  ;;  %8147 = verf.f32 %v3779_v29  ;;  %v7079_v17 = vadd.f32 %v13046_v21, %v10865_v62 }
 0x517   : > { %v11724_v7 = vmul.f32 0.5, %v7141_v47  ;;  %8149 = verf.f32 %v3781_v54  ;;  %v7143_v60 = vadd.f32 %v13047_v28, %v10869_v24  ;;  %v4364_v56 = vpack.c.bf16 %v4144_v43, %v11621_v2 }
 0x518   : > { %v8136_v10 = vpop.eup %8135  ;;  %v11729_v38 = vmul.f32 0.5, %v7078_v15  ;;  %v11731_v3 = vmul.f32 0.5, %v7142_v58  ;;  %v3780_v41 = vmul.f32 0.70710677, %v7079_v17  ;;  %v7080_v0 = vadd.f32 %v11432_v30, %v10857_v20 }
 0x519   : > { %v8138_v61 = vpop.eup %8137  ;;  %v4152_v29 = vmul.f32 %v4024_v52, %v11652_v55  ;;  %v11737_v47 = vmul.f32 %v4026_v57, %v11662_v11  ;;  %v3782_v8 = vmul.f32 0.70710677, %v7143_v60  ;;  %5275 = vmatprep.mubr.bf16.mxu0 %v4364_v56  ;;  %5661 = vmatprep.mubr.bf16.mxu1 %v4364_v56  ;;  %v7144_v2 = vadd.f32 %v11434_v5, %v10861_v13  ;;  %v13048_v56 = vld [vmem:[#allocation171_spill] sm:$0xff] }
 0x51a   : > { %v8140_v43 = vpop.eup %8139  ;;  %v11742_v15 = vmul.f32 %v4027_v26, %v11670_v42  ;;  %v11745_v58 = vmul.f32 %v4029_v49, %v11680_v50  ;;  %8151 = verf.f32 %v3780_v41  ;;  %v3783_v30 = vmul.f32 0.70710677, %v7080_v0 }
 0x51b   : > { %v4028_v54 = vadd.f32 1.0, %v8136_v10  ;;  %v4030_v55 = vadd.f32 1.0, %v8138_v61  ;;  %v11747_v52 = vmul.f32 0.5, %v7079_v17  ;;  %8153 = verf.f32 %v3782_v8 }
 0x51c   : > { %v8142_v11 = vpop.eup %8141  ;;  %v4031_v57 = vadd.f32 1.0, %v8140_v43  ;;  %8155 = verf.f32 %v3783_v30  ;;  %v3785_v21 = vmul.f32 0.70710677, %v7144_v2  ;;  %v4363_v5 = vpack.c.bf16 %v11647_v63, %v11609_v9  ;;  %v13049_v9 = vld [vmem:[#allocation172_spill] sm:$0xff] }
 0x51d   : > { %v8144_v28 = vpop.eup %8143  ;;  %v4033_v42 = vadd.f32 1.0, %v8142_v11  ;;  %v11751_v26 = vmul.f32 0.5, %v7143_v60  ;;  %v7081_v50 = vadd.f32 %v11442_v37, %v10865_v62  ;;  %v7145_v49 = vadd.f32 %v11444_v35, %v10869_v24 }
 0x51e   : > { %v11757_v17 = vmul.f32 0.5, %v7080_v0  ;;  %8157 = verf.f32 %v3785_v21  ;;  %5276 = vmatmul.mubr.bf16.gmra.mrb[96].mxu0 %v4363_v5  ;;  %5662 = vmatmul.mubr.bf16.gmra.mrb[96].mxu1 %v4363_v5  ;;  %v7082_v10 = vadd.f32 %v13048_v56, %v10857_v20  ;;  %v7146_v63 = vadd.f32 %v13049_v9, %v10861_v13 }
 0x51f   : > { %v8146_v41 = vpop.eup %8145  ;;  %v11764_v60 = vmul.f32 %v4028_v54, %v11692_v6  ;;  %v11767_v37 = vmul.f32 %v4030_v55, %v11696_v32  ;;  %v11769_v61 = vmul.f32 0.5, %v7144_v2  ;;  %v3784_v35 = vmul.f32 0.70710677, %v7081_v50 }
 0x520   : > { %v8148_v0 = vpop.eup %8147  ;;  %v11772_v8 = vmul.f32 %v4031_v57, %v11698_v33  ;;  %v11775_v43 = vmul.f32 %v4033_v42, %v11712_v39  ;;  %v4032_v30 = vadd.f32 1.0, %v8144_v28  ;;  %v3786_v11 = vmul.f32 0.70710677, %v7145_v49  ;;  %v13050_v33 = vld [vmem:[#allocation174_spill] sm:$0xff]  ;;  %v13051_v39 = vld [vmem:[#allocation175_spill] sm:$0xff] }
 0x521   : > { %v8150_v21 = vpop.eup %8149  ;;  %v4034_v5 = vadd.f32 1.0, %v8146_v41  ;;  %v11777_v56 = vmul.f32 0.5, %v7081_v50  ;;  %8159 = verf.f32 %v3784_v35  ;;  %v3787_v6 = vmul.f32 0.70710677, %v7082_v10 }
 0x522   : > { %v4035_v32 = vadd.f32 1.0, %v8148_v0  ;;  %v4037_v54 = vadd.f32 1.0, %v8150_v21  ;;  %8161 = verf.f32 %v3786_v11  ;;  %v3789_v2 = vmul.f32 0.70710677, %v7146_v63 }
 0x523   : > { %v11779_v55 = vmul.f32 0.5, %v7145_v49  ;;  %8163 = verf.f32 %v3787_v6  ;;  %v7083_v57 = vadd.f32 %v13050_v33, %v10865_v62  ;;  %v7147_v28 = vadd.f32 %v13051_v39, %v10869_v24 }
 0x524   : > { %v8152_v42 = vpop.eup %8151  ;;  %v11786_v9 = vmul.f32 %v4032_v30, %v11720_v44  ;;  %8165 = verf.f32 %v3789_v2  ;;  %v4368_v50 = vpack.c.bf16 %v4152_v29, %v11703_v25  ;;  %v7084_v41 = vadd.f32 %v11488_v40, %v10857_v20 }
 0x525   : > { %v8154_v35 = vpop.eup %8153  ;;  %v11792_v49 = vmul.f32 %v4034_v5, %v11724_v7  ;;  %v11794_v0 = vmul.f32 0.5, %v7082_v10  ;;  %v11796_v11 = vmul.f32 0.5, %v7146_v63  ;;  %v3788_v21 = vmul.f32 0.70710677, %v7083_v57 }
 0x526   : > { %v8156_v6 = vpop.eup %8155  ;;  %v11799_v33 = vmul.f32 %v4035_v32, %v11729_v38  ;;  %v11802_v44 = vmul.f32 %v4037_v54, %v11731_v3  ;;  %v3790_v25 = vmul.f32 0.70710677, %v7147_v28  ;;  %5285 = vmatprep.mubr.bf16.mxu0 %v4368_v50  ;;  %5671 = vmatprep.mubr.bf16.mxu1 %v4368_v50  ;;  %v3791_v40 = vmul.f32 0.70710677, %v7084_v41 }
 0x527   : > { %v4036_v29 = vadd.f32 1.0, %v8152_v42  ;;  %v4038_v30 = vadd.f32 1.0, %v8154_v35  ;;  %8167 = verf.f32 %v3788_v21  ;;  %v7148_v7 = vadd.f32 %v11495_v4, %v10861_v13 }
 0x528   : > { %v8158_v10 = vpop.eup %8157  ;;  %v11806_v63 = vmul.f32 0.5, %v7083_v57  ;;  %8169 = verf.f32 %v3790_v25  ;;  %v4367_v38 = vpack.c.bf16 %v11715_v59, %v11683_v1  ;;  %v7085_v3 = vadd.f32 %v11497_v12, %v10865_v62 }
 0x529   : > { %v4039_v5 = vadd.f32 1.0, %v8156_v6  ;;  %v11812_v32 = vmul.f32 0.5, %v7147_v28  ;;  %v11814_v54 = vmul.f32 0.5, %v7084_v41  ;;  %8171 = verf.f32 %v3791_v40 }
 0x52a   : > { %v4041_v2 = vadd.f32 1.0, %v8158_v10  ;;  %v3793_v39 = vmul.f32 0.70710677, %v7148_v7  ;;  %5286 = vmatmul.mubr.bf16.gmra.mrb[100].mxu0 %v4367_v38  ;;  %5672 = vmatmul.mubr.bf16.gmra.mrb[100].mxu1 %v4367_v38  ;;  %v3792_v4 = vmul.f32 0.70710677, %v7085_v3  ;;  %v7149_v57 = vadd.f32 %v11499_v45, %v10869_v24 }
 0x52b   : > { %v8160_v42 = vpop.eup %8159  ;;  %v11819_v1 = vmul.f32 %v4036_v29, %v11747_v52  ;;  %v11822_v12 = vmul.f32 %v4038_v30, %v11751_v26  ;;  %v7086_v59 = vadd.f32 %v11528_v16, %v10857_v20  ;;  %v7150_v28 = vadd.f32 %v11530_v46, %v10861_v13 }
 0x52c   : > { %v8162_v50 = vpop.eup %8161  ;;  %v4040_v41 = vadd.f32 1.0, %v8160_v42  ;;  %8173 = verf.f32 %v3793_v39  ;;  %v3794_v35 = vmul.f32 0.70710677, %v7149_v57  ;;  %v7087_v45 = vadd.f32 %v11532_v14, %v10865_v62 }
 0x52d   : > { %v8164_v21 = vpop.eup %8163  ;;  %v11831_v52 = vmul.f32 %v4039_v5, %v11757_v17  ;;  %v11833_v6 = vmul.f32 0.5, %v7148_v7  ;;  %8175 = verf.f32 %v3792_v4  ;;  %v3795_v26 = vmul.f32 0.70710677, %v7086_v59 }
 0x52e   : > { %v8166_v25 = vpop.eup %8165  ;;  %v11836_v16 = vmul.f32 %v4041_v2, %v11769_v61  ;;  %v4042_v46 = vadd.f32 1.0, %v8162_v50  ;;  %v11838_v40 = vmul.f32 0.5, %v7085_v3  ;;  %8177 = verf.f32 %v3794_v35 }
 0x52f   : > { %v4043_v29 = vadd.f32 1.0, %v8164_v21  ;;  %v11840_v30 = vmul.f32 0.5, %v7149_v57  ;;  %8179 = verf.f32 %v3795_v26  ;;  %v3797_v14 = vmul.f32 0.70710677, %v7150_v28 }
 0x530   : > { %v11843_v17 = vmul.f32 %v4040_v41, %v11777_v56  ;;  %v11845_v7 = vmul.f32 0.5, %v7086_v59  ;;  %v3796_v10 = vmul.f32 0.70710677, %v7087_v45  ;;  %v7151_v38 = vadd.f32 %v11536_v53, %v10869_v24 }
 0x531   : > { %v8168_v61 = vpop.eup %8167  ;;  %v4045_v5 = vadd.f32 1.0, %v8166_v25  ;;  %8181 = verf.f32 %v3797_v14  ;;  %v4372_v3 = vpack.c.bf16 %v11786_v9, %v11764_v60  ;;  %v7088_v2 = vadd.f32 %v11538_v51, %v10857_v20  ;;  %v13052_v9 = vld [vmem:[#allocation153_spill] sm:$0xff]  ;;  %v13053_v25 = vld [vmem:[#allocation179_spill] sm:$0xff] }
 0x532   : > { %v8170_v39 = vpop.eup %8169  ;;  %v11854_v4 = vmul.f32 %v4042_v46, %v11779_v55  ;;  %v11856_v56 = vmul.f32 0.5, %v7150_v28  ;;  %8183 = verf.f32 %v3796_v10  ;;  %v3798_v57 = vmul.f32 0.70710677, %v7151_v38 }
 0x533   : > { %v8172_v42 = vpop.eup %8171  ;;  %v11859_v53 = vmul.f32 %v4043_v29, %v11794_v0  ;;  %v11861_v59 = vmul.f32 0.5, %v7087_v45  ;;  %5295 = vmatprep.mubr.bf16.mxu0 %v4372_v3  ;;  %5681 = vmatprep.mubr.bf16.mxu1 %v4372_v3  ;;  %v3799_v60 = vmul.f32 0.70710677, %v7088_v2  ;;  %v7152_v51 = vadd.f32 %v13052_v9, %v10861_v13  ;;  %v13054_v29 = vld [vmem:[#allocation156_spill] sm:$0xff] }
 0x534   : > { %v4044_v50 = vadd.f32 1.0, %v8168_v61  ;;  %v4046_v41 = vadd.f32 1.0, %v8170_v39  ;;  %8185 = verf.f32 %v3798_v57  ;;  %v4371_v55 = vpack.c.bf16 %v11772_v8, %v11742_v15 }
 0x535   : > { %v11868_v28 = vmul.f32 %v4045_v5, %v11796_v11  ;;  %v4047_v35 = vadd.f32 1.0, %v8172_v42  ;;  %8187 = verf.f32 %v3799_v60  ;;  %v3801_v0 = vmul.f32 0.70710677, %v7152_v51 }
 0x536   : > { %v8174_v45 = vpop.eup %8173  ;;  %v11870_v21 = vmul.f32 0.5, %v7151_v38  ;;  %v11872_v26 = vmul.f32 0.5, %v7088_v2  ;;  %5296 = vmatmul.mubr.bf16.gmra.mrb[104].mxu0 %v4371_v55  ;;  %5682 = vmatmul.mubr.bf16.gmra.mrb[104].mxu1 %v4371_v55  ;;  %v7089_v46 = vadd.f32 %v13053_v25, %v10865_v62  ;;  %v7153_v14 = vadd.f32 %v13054_v29, %v10869_v24 }
 0x537   : > { %v8176_v15 = vpop.eup %8175  ;;  %v4049_v8 = vadd.f32 1.0, %v8174_v45  ;;  %8189 = verf.f32 %v3801_v0  ;;  %v7090_v11 = vadd.f32 %v11577_v23, %v10857_v20  ;;  %v7154_v10 = vadd.f32 %v11579_v36, %v10861_v13 }
 0x538   : > { %v8178_v38 = vpop.eup %8177  ;;  %v11883_v61 = vmul.f32 %v4044_v50, %v11806_v63  ;;  %v11886_v5 = vmul.f32 %v4046_v41, %v11812_v32  ;;  %v11888_v3 = vmul.f32 0.5, %v7152_v51  ;;  %v3800_v2 = vmul.f32 0.70710677, %v7089_v46 }
 0x539   : > { %v8180_v39 = vpop.eup %8179  ;;  %v11891_v57 = vmul.f32 %v4047_v35, %v11814_v54  ;;  %v4048_v42 = vadd.f32 1.0, %v8176_v15  ;;  %v11893_v60 = vmul.f32 0.5, %v7089_v46  ;;  %v3802_v23 = vmul.f32 0.70710677, %v7153_v14  ;;  %v13055_v35 = vld [vmem:[#allocation158_spill] sm:$0xff]  ;;  %v13056_v46 = vld [vmem:[#allocation181_spill] sm:$0xff] }
 0x53a   : > { %v4050_v9 = vadd.f32 1.0, %v8178_v38  ;;  %8191 = verf.f32 %v3800_v2  ;;  %v11895_v36 = vmul.f32 0.5, %v7153_v14  ;;  %v3803_v63 = vmul.f32 0.70710677, %v7090_v11 }
 0x53b   : > { %v8182_v50 = vpop.eup %8181  ;;  %v11898_v32 = vmul.f32 %v4049_v8, %v11833_v6  ;;  %v4051_v51 = vadd.f32 1.0, %v8180_v39  ;;  %8193 = verf.f32 %v3802_v23  ;;  %v3805_v41 = vmul.f32 0.70710677, %v7154_v10 }
 0x53c   : > { %v8184_v55 = vpop.eup %8183  ;;  %v4053_v0 = vadd.f32 1.0, %v8182_v50  ;;  %v11900_v54 = vmul.f32 0.5, %v7090_v11  ;;  %8195 = verf.f32 %v3803_v63  ;;  %v7091_v45 = vadd.f32 %v13055_v35, %v10865_v62  ;;  %v13059_v35 = vld [vmem:[#allocation185_spill] sm:$0xff] }
 0x53d   : > { %v4176_v25 = vmul.f32 %v4048_v42, %v11838_v40  ;;  %8197 = verf.f32 %v3805_v41  ;;  %v7155_v29 = vadd.f32 %v13056_v46, %v10869_v24  ;;  %v4376_v6 = vpack.c.bf16 %v11843_v17, %v11819_v1 }
 0x53e   : > { %v8186_v14 = vpop.eup %8185  ;;  %v11910_v15 = vmul.f32 %v4050_v9, %v11840_v30  ;;  %v4052_v8 = vadd.f32 1.0, %v8184_v55  ;;  %v3804_v11 = vmul.f32 0.70710677, %v7091_v45  ;;  %v7092_v38 = vadd.f32 %v11595_v22, %v10857_v20  ;;  %v13057_v22 = vld [vmem:[#allocation182_spill] sm:$0xff] }
 0x53f   : > { %v8188_v2 = vpop.eup %8187  ;;  %v11915_v39 = vmul.f32 %v4051_v51, %v11845_v7  ;;  %v11918_v40 = vmul.f32 %v4053_v0, %v11856_v56  ;;  %v11920_v42 = vmul.f32 0.5, %v7154_v10  ;;  %v3806_v23 = vmul.f32 0.70710677, %v7155_v29  ;;  %5305 = vmatprep.mubr.bf16.mxu0 %v4376_v6  ;;  %5691 = vmatprep.mubr.bf16.mxu1 %v4376_v6  ;;  %v13058_v51 = vld [vmem:[#allocation184_spill] sm:$0xff] }
 0x540   : > { %v4054_v1 = vadd.f32 1.0, %v8186_v14  ;;  %v11922_v30 = vmul.f32 0.5, %v7091_v45  ;;  %8199 = verf.f32 %v3804_v11  ;;  %v3807_v17 = vmul.f32 0.70710677, %v7092_v38 }
 0x541   : > { %v8190_v9 = vpop.eup %8189  ;;  %v4055_v63 = vadd.f32 1.0, %v8188_v2  ;;  %8201 = verf.f32 %v3806_v23  ;;  %v7156_v7 = vadd.f32 %v13057_v22, %v10861_v13  ;;  %v4375_v56 = vpack.c.bf16 %v11831_v52, %v11799_v33 }
 0x542   : > { %v11929_v10 = vmul.f32 %v4052_v8, %v11861_v59  ;;  %v4057_v50 = vadd.f32 1.0, %v8190_v9  ;;  %8203 = verf.f32 %v3807_v17  ;;  %v7093_v41 = vadd.f32 %v13058_v51, %v10865_v62 }
 0x543   : > { %v11933_v55 = vmul.f32 0.5, %v7155_v29  ;;  %v3809_v0 = vmul.f32 0.70710677, %v7156_v7  ;;  %5306 = vmatmul.mubr.bf16.gmra.mrb[108].mxu0 %v4375_v56  ;;  %5692 = vmatmul.mubr.bf16.gmra.mrb[108].mxu1 %v4375_v56  ;;  %v7157_v45 = vadd.f32 %v13059_v35, %v10869_v24  ;;  %v7094_v46 = vadd.f32 %v11633_v48, %v10857_v20  ;;  %v13060_v35 = vld [vmem:[#allocation188_spill] sm:$0xff] }
 0x544   : > { %v8192_v33 = vpop.eup %8191  ;;  %v11940_v52 = vmul.f32 %v4054_v1, %v11870_v21  ;;  %v3679_v59 = vmul.f32 0.5, %v7092_v38  ;;  %v3808_v6 = vmul.f32 0.70710677, %v7093_v41  ;;  %v7158_v14 = vadd.f32 %v11635_v31, %v10861_v13 }
 0x545   : > { %v8194_v29 = vpop.eup %8193  ;;  %v4183_v8 = vmul.f32 %v4055_v63, %v11872_v26  ;;  %v11945_v11 = vmul.f32 0.5, %v7156_v7  ;;  %8205 = verf.f32 %v3809_v0  ;;  %v3810_v2 = vmul.f32 0.70710677, %v7157_v45 }
 0x546   : > { %v8196_v23 = vpop.eup %8195  ;;  %v11948_v17 = vmul.f32 %v4057_v50, %v11888_v3  ;;  %v4056_v48 = vadd.f32 1.0, %v8192_v33  ;;  %8207 = verf.f32 %v3808_v6  ;;  %v3811_v21 = vmul.f32 0.70710677, %v7094_v46 }
 0x547   : > { %v8198_v1 = vpop.eup %8197  ;;  %v4058_v38 = vadd.f32 1.0, %v8194_v29  ;;  %v4059_v9 = vadd.f32 1.0, %v8196_v23  ;;  %v3680_v22 = vmul.f32 0.5, %v7093_v41  ;;  %8209 = verf.f32 %v3810_v2 }
 0x548   : > { %v4061_v31 = vadd.f32 1.0, %v8198_v1  ;;  %v3682_v56 = vmul.f32 0.5, %v7157_v45  ;;  %8211 = verf.f32 %v3811_v21  ;;  %v3813_v26 = vmul.f32 0.70710677, %v7158_v14  ;;  %v13062_v1 = vld [vmem:[#allocation163_spill] sm:$0xff] }
 0x549   : > { %v3683_v63 = vmul.f32 0.5, %v7094_v46  ;;  %v7095_v7 = vadd.f32 %v11644_v27, %v10865_v62  ;;  %v11954_v3 = vadd.f32 %v11654_v18, %v10869_v24  ;;  %v4380_v50 = vpack.c.bf16 %v4176_v25, %v11883_v61 }
 0x54a   : > { %v8200_v51 = vpop.eup %8199  ;;  %v4184_v0 = vmul.f32 %v4056_v48, %v11893_v60  ;;  %8213 = verf.f32 %v3813_v26  ;;  %v7096_v41 = vadd.f32 %v11656_v34, %v10857_v20  ;;  %v11962_v45 = vadd.f32 %v13060_v35, %v10861_v13  ;;  %v13061_v48 = vld [vmem:[#allocation189_spill] sm:$0xff] }
 0x54b   : > { %v8202_v46 = vpop.eup %8201  ;;  %v11965_v27 = vmul.f32 %v4058_v38, %v11895_v36  ;;  %v4187_v18 = vmul.f32 %v4059_v9, %v11900_v54  ;;  %v3685_v33 = vmul.f32 0.5, %v7158_v14  ;;  %v3812_v6 = vmul.f32 0.70710677, %v7095_v7  ;;  %5315 = vmatprep.mubr.bf16.mxu0 %v4380_v50  ;;  %5701 = vmatprep.mubr.bf16.mxu1 %v4380_v50 }
 0x54c   : > { %v8204_v61 = vpop.eup %8203  ;;  %v11969_v60 = vmul.f32 %v4061_v31, %v11920_v42  ;;  %v4060_v25 = vadd.f32 1.0, %v8200_v51  ;;  %v3814_v20 = vmul.f32 0.70710677, %v11954_v3  ;;  %v3815_v34 = vmul.f32 0.70710677, %v7096_v41 }
 0x54d   : > { %v4062_v13 = vadd.f32 1.0, %v8202_v46  ;;  %v4063_v29 = vadd.f32 1.0, %v8204_v61  ;;  %v11972_v2 = vmul.f32 0.5, %v7095_v7  ;;  %8215 = verf.f32 %v3812_v6  ;;  %v13065_v61 = vld [vmem:[#allocation139_spill] sm:$0xff] }
 0x54e   : > { %8217 = verf.f32 %v3814_v20  ;;  %v11974_v36 = vmul.f32 0.5, %v7096_v41  ;;  %v3817_v54 = vmul.f32 0.70710677, %v11962_v45  ;;  %v4379_v14 = vpack.c.bf16 %v11891_v57, %v11859_v53  ;;  %v13067_v20 = vld [vmem:[#allocation138_spill] sm:$0xff] }
 0x54f   : > { %v8206_v23 = vpop.eup %8205  ;;  %v4191_v42 = vmul.f32 %v4063_v29, %v3679_v59  ;;  %8219 = verf.f32 %v3815_v34  ;;  %v7097_v21 = vadd.f32 %v13061_v48, %v10865_v62  ;;  %v11983_v38 = vadd.f32 %v13062_v1, %v10869_v24  ;;  %v13068_v34 = vld [vmem:[#allocation140_spill] sm:$0xff] }
 0x550   : > { %v8208_v9 = vpop.eup %8207  ;;  %v4065_v31 = vadd.f32 1.0, %v8206_v23  ;;  %8221 = verf.f32 %v3817_v54  ;;  %5316 = vmatmul.mubr.bf16.gmra.mrb[112].mxu0 %v4379_v14  ;;  %5702 = vmatmul.mubr.bf16.gmra.mrb[112].mxu1 %v4379_v14  ;;  %v4384_v26 = vpack.c.bf16 %v4184_v0, %v11929_v10  ;;  %v4383_v7 = vpack.c.bf16 %v4183_v8, %v11915_v39  ;;  %v13064_v0 = vld [vmem:[#allocation137_spill] sm:$0xff]  ;;  %v13069_v54 = vld [vmem:[#allocation143_spill] sm:$0xff]  ;;  %v13072_v48 = vld [vmem:[#allocation144_spill] sm:$0xff] }
 0x551   : > { %v8210_v53 = vpop.eup %8209  ;;  %v4188_v57 = vmul.f32 %v4060_v25, %v11922_v30  ;;  %v11989_v59 = vmul.f32 %v4062_v13, %v11933_v55  ;;  %v4064_v62 = vadd.f32 1.0, %v8208_v9  ;;  %v3816_v50 = vmul.f32 0.70710677, %v7097_v21  ;;  %v13063_v30 = vld [vmem:[#allocation135_spill] sm:$0xff]  ;;  %v13070_v14 = vld [vmem:[#allocation145_spill] sm:$0xff]  ;;  %v13074_v9 = vld [vmem:[#allocation152_spill] sm:$0xff] }
 0x552   : > { %v8212_v51 = vpop.eup %8211  ;;  %v11992_v24 = vmul.f32 %v4065_v31, %v11945_v11  ;;  %v4066_v41 = vadd.f32 1.0, %v8210_v53  ;;  %v3818_v35 = vmul.f32 0.70710677, %v11983_v38  ;;  %5325 = vmatprep.mubr.bf16.mxu0 %v4384_v26  ;;  %5711 = vmatprep.mubr.bf16.mxu1 %v4384_v26  ;;  %v11995_v10 = vpack.c.bf16 %v4191_v42, %v4187_v18  ;;  %v13066_v11 = vld [vmem:[#allocation141_spill] sm:$0xff]  ;;  %v13071_v42 = vld [vmem:[#allocation142_spill] sm:$0xff]  ;;  %v13076_v53 = vld [vmem:[#allocation151_spill] sm:$0xff] }
 0x553   : > { %v4192_v39 = vmul.f32 %v4064_v62, %v3680_v22  ;;  %v4067_v8 = vadd.f32 1.0, %v8212_v51  ;;  %8223 = verf.f32 %v3816_v50  ;;  %v11999_v55 = vpack.c.bf16 %v13064_v0, %v13063_v30  ;;  %v13075_v26 = vld [vmem:[#allocation146_spill] sm:$0xff]  ;;  %v13077_v50 = vld [vmem:[#allocation155_spill] sm:$0xff]  ;;  %v13081_v30 = vld [vmem:[#allocation164_spill] sm:$0xff] }
 0x554   : > { %v8214_v46 = vpop.eup %8213  ;;  %v4194_v6 = vmul.f32 %v4066_v41, %v3682_v56  ;;  %8225 = verf.f32 %v3818_v35  ;;  %v12003_v25 = vpack.c.bf16 %v13066_v11, %v13065_v61  ;;  %v12007_v13 = vpack.c.bf16 %v13068_v34, %v13067_v20  ;;  %v13073_v56 = vld [vmem:[#allocation150_spill] sm:$0xff]  ;;  %v13082_v0 = vld [vmem:[#allocation169_spill] sm:$0xff]  ;;  %v13084_v11 = vld [vmem:[#allocation148_spill] sm:$0xff] }
 0x555   : > { %v4195_v18 = vmul.f32 %v4067_v8, %v3683_v63  ;;  %v4069_v29 = vadd.f32 1.0, %v8214_v46  ;;  %v4388_v22 = vpack.c.bf16 %v4192_v39, %v4188_v57  ;;  %v12011_v23 = vpack.c.bf16 %v13070_v14, %v13069_v54  ;;  %v13078_v63 = vld [vmem:[#allocation161_spill] sm:$0xff]  ;;  %v13079_v35 = vld [vmem:[#allocation154_spill] sm:$0xff]  ;;  %v13080_v39 = vld [vmem:[#allocation160_spill] sm:$0xff] }
 0x556   : > { %v12015_v1 = vpack.c.bf16 %v13072_v48, %v13071_v42  ;;  %v12019_v31 = vpack.c.bf16 %v13074_v9, %v13073_v56  ;;  %v12023_v62 = vpack.c.bf16 %v13076_v53, %v13075_v26  ;;  %v12027_v51 = vpack.c.bf16 %v13078_v63, %v13077_v50  ;;  %v13083_v61 = vld [vmem:[#allocation162_spill] sm:$0xff]  ;;  %v13085_v14 = vld [vmem:[#allocation173_spill] sm:$0xff]  ;;  %v13088_v48 = vld [vmem:[#allocation176_spill] sm:$0xff] }
 0x557   : > { %v8216_v57 = vpop.eup %8215  ;;  %v4197_v41 = vmul.f32 %v4069_v29, %v3685_v33  ;;  %v12031_v8 = vpack.c.bf16 %v13080_v39, %v13079_v35  ;;  %v12035_v46 = vpack.c.bf16 %v13082_v0, %v13081_v30  ;;  %v12039_v20 = vpack.c.bf16 %v13084_v11, %v13083_v61  ;;  %v13086_v42 = vld [vmem:[#allocation177_spill] sm:$0xff]  ;;  %v13087_v29 = vld [vmem:[#allocation170_spill] sm:$0xff]  ;;  %v13089_v9 = vld [vmem:[#allocation180_spill] sm:$0xff] }
 0x558   : > { %v8218_v34 = vpop.eup %8217  ;;  %v3689_v54 = vmul.f32 0.5, %v11962_v45  ;;  %5326 = vmatmul.mubr.bf16.gmra.mrb[116].mxu0 %v4383_v7  ;;  %5712 = vmatmul.mubr.bf16.gmra.mrb[116].mxu1 %v4383_v7  ;;  %v12044_v33 = vpack.c.bf16 %v13086_v42, %v13085_v14  ;;  %v12048_v56 = vpack.c.bf16 %v13088_v48, %v13087_v29  ;;  %v13090_v26 = vld [vmem:[#allocation183_spill] sm:$0xff]  ;;  %v3688_v63 = vmul.f32 0.5, %v7097_v21  ;;  %v13091_v35 = vld [vmem:[#allocation178_spill] sm:$0xff]  ;;  %v13092_v45 = vld [vmem:[#allocation157_spill] sm:$0xff] }
 0x559   : > { %v12052_v53 = vpack.c.bf16 %v13090_v26, %v13089_v9  ;;  %v8220_v50 = vpop.eup %8219  ;;  %5335 = vmatprep.mubr.bf16.mxu0 %v4388_v22  ;;  %5721 = vmatprep.mubr.bf16.mxu1 %v4388_v22  ;;  %v12056_v39 = vpack.c.bf16 %v13092_v45, %v13091_v35  ;;  %v13093_v7 = vld [vmem:[#allocation186_spill] sm:$0xff]  ;;  %v13094_v30 = vld [vmem:[#allocation147_spill] sm:$0xff]  ;;  %v4068_v29 = vadd.f32 1.0, %v8216_v57  ;;  %v13097_v9 = vld [vmem:[#allocation165_spill] sm:$0xff]  ;;  %v4070_v35 = vadd.f32 1.0, %v8218_v34 }
 0x55a   : > { %v12060_v0 = vpack.c.bf16 %v13094_v30, %v13093_v7  ;;  %v13095_v61 = vld [vmem:[#allocation159_spill] sm:$0xff]  ;;  %v8222_v42 = vpop.eup %8221  ;;  %v4071_v48 = vadd.f32 1.0, %v8220_v50  ;;  %v12068_v21 = vpack.c.bf16 %v11737_v47, %v13097_v9  ;;  %v13098_v22 = vld [vmem:[#allocation190_spill] sm:$0xff]  ;;  %v12076_v7 = vpack.c.bf16 %v11792_v49, %v11767_v37 }
 0x55b   : > { %v13096_v11 = vld [vmem:[#allocation187_spill] sm:$0xff]  ;;  %v12072_v26 = vpack.c.bf16 %v11718_v19, %v13098_v22  ;;  %v4073_v45 = vadd.f32 1.0, %v8222_v42  ;;  %v12080_v30 = vpack.c.bf16 %v11775_v43, %v11745_v58  ;;  %v12085_v47 = vpack.c.bf16 %v11854_v4, %v11822_v12  ;;  %v4217_v9 = vld [vmem:[#allocation3 + $0x70] sm:$0xff] }
 0x55c   : > { %v12064_v14 = vpack.c.bf16 %v13096_v11, %v13095_v61  ;;  %v4199_v57 = vmul.f32 %v4071_v48, %v11974_v36  ;;  %v12089_v19 = vpack.c.bf16 %v11836_v16, %v11802_v44  ;;  %v12093_v34 = vpack.c.bf16 %v11910_v15, %v11886_v5  ;;  %v4213_v61 = vld [vmem:[#allocation3 + $0x50] sm:$0xff]  ;;  %v4212_v11 = vld [vmem:[#allocation3 + $0x48] sm:$0xff]  ;;  %v4215_v48 = vld [vmem:[#allocation3 + $0x60] sm:$0xff] }
 0x55d   : > { %v8224_v37 = vpop.eup %8223  ;;  %v4201_v49 = vmul.f32 %v4073_v45, %v3689_v54  ;;  %v12097_v58 = vpack.c.bf16 %v11898_v32, %v11868_v28  ;;  %v12101_v43 = vpack.c.bf16 %v11965_v27, %v11940_v52  ;;  %v12105_v12 = vpack.c.bf16 %v11948_v17, %v11918_v40  ;;  %v4216_v45 = vld [vmem:[#allocation3 + $0x68] sm:$0xff] }
 0x55e   : > { %v8226_v44 = vpop.eup %8225  ;;  %v4072_v16 = vadd.f32 1.0, %v8224_v37  ;;  %v4391_v4 = vpack.c.bf16 %v4199_v57, %v4195_v18  ;;  %v12108_v5 = vpack.c.bf16 %v4194_v6, %v11989_v59  ;;  %v12112_v15 = vpack.c.bf16 %v11992_v24, %v11969_v60  ;;  %v4203_v60 = vld [vmem:[#allocation3] sm:$0xff]  ;;  %v4206_v24 = vld [vmem:[#allocation3 + $0x18] sm:$0xff] }
 0x55f   : > { %v3686_v28 = vmul.f32 0.5, %v11954_v3  ;;  %v3690_v32 = vmul.f32 0.5, %v11983_v38  ;;  %v4074_v52 = vadd.f32 1.0, %v8226_v44  ;;  %v12116_v27 = vpack.c.bf16 %v4201_v49, %v4197_v41  ;;  %v13099_v3 = vld [vmem:[#allocation136_spill] sm:$0xff]  ;;  %v4210_v41 = vld [vmem:[#allocation3 + $0x38] sm:$0xff] }
 0x560   : > { %v4196_v40 = vmul.f32 %v4068_v29, %v11972_v2  ;;  %v4200_v17 = vmul.f32 %v4072_v16, %v3688_v63  ;;  %5336 = vmatmul.mubr.bf16.gmra.mrb[120].mxu0 %v11995_v10  ;;  %5722 = vmatmul.mubr.bf16.gmra.mrb[120].mxu1 %v11995_v10  ;;  %v4205_v2 = vld [vmem:[#allocation3 + $0x10] sm:$0xff]  ;;  %v4204_v38 = vld [vmem:[#allocation3 + $0x8] sm:$0xff]  ;;  %v4219_v44 = vld [vmem:[#allocation3 + $0x80] sm:$0xff] }
 0x561   : > { %v4198_v36 = vmul.f32 %v4070_v35, %v3686_v28  ;;  %v4202_v59 = vmul.f32 %v4074_v52, %v3690_v32  ;;  %v4221_v16 = vld [vmem:[#allocation3 + $0x90] sm:$0xff]  ;;  %v4223_v32 = vld [vmem:[#allocation3 + $0xa0] sm:$0xff] }
 0x562   : > { %v4392_v6 = vpack.c.bf16 %v4200_v17, %v4196_v40  ;;  %v4225_v52 = vld [vmem:[#allocation3 + $0xb0] sm:$0xff] }
 0x563   : > { %v12121_v18 = vpack.c.bf16 %v4202_v59, %v4198_v36  ;;  %v4224_v59 = vld [vmem:[#allocation3 + $0xa8] sm:$0xff] }
 0x564   : > { %5345 = vmatprep.mubr.bf16.mxu0 %v4392_v6  ;;  %5731 = vmatprep.mubr.bf16.mxu1 %v4392_v6  ;;  %v4226_v6 = vld [vmem:[#allocation3 + $0xb8] sm:$0xff] }
 0x568   : > { %5346 = vmatmul.mubr.bf16.gmra.mrb[124].mxu0 %v4391_v4  ;;  %5732 = vmatmul.mubr.bf16.gmra.mrb[124].mxu1 %v4391_v4  ;;  %v4220_v4 = vld [vmem:[#allocation3 + $0x88] sm:$0xff] }
 0x569   : > { %5388 = vmatprep.mubr.bf16.mxu0 %v11999_v55  ;;  %5774 = vmatprep.mubr.bf16.mxu1 %v11999_v55 }
 0x570   : > { %5389 = vmatmul.mubr.bf16.vlgmr.msra.gmra.mrb[64].mxu0 %v13099_v3  ;;  %5775 = vmatmul.mubr.bf16.vlgmr.msra.gmra.mrb[64].mxu1 %v13099_v3 }
 0x571   : > { %5398 = vmatprep.mubr.bf16.mxu0 %v12003_v25  ;;  %5784 = vmatprep.mubr.bf16.mxu1 %v12003_v25  ;;  %v4207_v25 = vld [vmem:[#allocation3 + $0x20] sm:$0xff] }
 0x578   : > { %5399 = vmatmul.mubr.bf16.gmra.mrb[68].mxu0 %v12007_v13  ;;  %5785 = vmatmul.mubr.bf16.gmra.mrb[68].mxu1 %v12007_v13  ;;  %v4209_v13 = vld [vmem:[#allocation3 + $0x30] sm:$0xff] }
 0x579   : > { %5408 = vmatprep.mubr.bf16.mxu0 %v12011_v23  ;;  %5794 = vmatprep.mubr.bf16.mxu1 %v12011_v23 }
 0x580   : > { %5409 = vmatmul.mubr.bf16.gmra.mrb[72].mxu0 %v12015_v1  ;;  %5795 = vmatmul.mubr.bf16.gmra.mrb[72].mxu1 %v12015_v1 }
 0x581   : > { %5418 = vmatprep.mubr.bf16.mxu0 %v12019_v31  ;;  %5804 = vmatprep.mubr.bf16.mxu1 %v12019_v31 }
 0x588   : > { %5419 = vmatmul.mubr.bf16.gmra.mrb[76].mxu0 %v12023_v62  ;;  %5805 = vmatmul.mubr.bf16.gmra.mrb[76].mxu1 %v12023_v62 }
 0x589   : > { %5428 = vmatprep.mubr.bf16.mxu0 %v12027_v51  ;;  %5814 = vmatprep.mubr.bf16.mxu1 %v12027_v51  ;;  %v4208_v51 = vld [vmem:[#allocation3 + $0x28] sm:$0xff] }
 0x590   : > { %5429 = vmatmul.mubr.bf16.gmra.mrb[80].mxu0 %v12031_v8  ;;  %5815 = vmatmul.mubr.bf16.gmra.mrb[80].mxu1 %v12031_v8 }
 0x591   : > { %5438 = vmatprep.mubr.bf16.mxu0 %v12035_v46  ;;  %5824 = vmatprep.mubr.bf16.mxu1 %v12035_v46 }
 0x598   : > { %5439 = vmatmul.mubr.bf16.gmra.mrb[84].mxu0 %v12039_v20  ;;  %5825 = vmatmul.mubr.bf16.gmra.mrb[84].mxu1 %v12039_v20 }
 0x599   : > { %5448 = vmatprep.mubr.bf16.mxu0 %v12044_v33  ;;  %5834 = vmatprep.mubr.bf16.mxu1 %v12044_v33 }
 0x5a0   : > { %5449 = vmatmul.mubr.bf16.gmra.mrb[88].mxu0 %v12048_v56  ;;  %5835 = vmatmul.mubr.bf16.gmra.mrb[88].mxu1 %v12048_v56 }
 0x5a1   : > { %5458 = vmatprep.mubr.bf16.mxu0 %v12052_v53  ;;  %5844 = vmatprep.mubr.bf16.mxu1 %v12052_v53 }
 0x5a8   : > { %5459 = vmatmul.mubr.bf16.gmra.mrb[92].mxu0 %v12056_v39  ;;  %5845 = vmatmul.mubr.bf16.gmra.mrb[92].mxu1 %v12056_v39 }
 0x5a9   : > { %5468 = vmatprep.mubr.bf16.mxu0 %v12060_v0  ;;  %5854 = vmatprep.mubr.bf16.mxu1 %v12060_v0  ;;  %v4211_v0 = vld [vmem:[#allocation3 + $0x40] sm:$0xff] }
 0x5b0   : > { %5469 = vmatmul.mubr.bf16.gmra.mrb[96].mxu0 %v12064_v14  ;;  %5855 = vmatmul.mubr.bf16.gmra.mrb[96].mxu1 %v12064_v14  ;;  %v4214_v14 = vld [vmem:[#allocation3 + $0x58] sm:$0xff] }
 0x5b1   : > { %5478 = vmatprep.mubr.bf16.mxu0 %v12068_v21  ;;  %5864 = vmatprep.mubr.bf16.mxu1 %v12068_v21 }
 0x5b8   : > { %5479 = vmatmul.mubr.bf16.gmra.mrb[100].mxu0 %v12072_v26  ;;  %5865 = vmatmul.mubr.bf16.gmra.mrb[100].mxu1 %v12072_v26 }
 0x5b9   : > { %5488 = vmatprep.mubr.bf16.mxu0 %v12076_v7  ;;  %5874 = vmatprep.mubr.bf16.mxu1 %v12076_v7  ;;  %v4218_v7 = vld [vmem:[#allocation3 + $0x78] sm:$0xff] }
 0x5c0   : > { %5489 = vmatmul.mubr.bf16.gmra.mrb[104].mxu0 %v12080_v30  ;;  %5875 = vmatmul.mubr.bf16.gmra.mrb[104].mxu1 %v12080_v30 }
 0x5c1   : > { %5498 = vmatprep.mubr.bf16.mxu0 %v12085_v47  ;;  %5884 = vmatprep.mubr.bf16.mxu1 %v12085_v47 }
 0x5c8   : > { %5499 = vmatmul.mubr.bf16.gmra.mrb[108].mxu0 %v12089_v19  ;;  %5885 = vmatmul.mubr.bf16.gmra.mrb[108].mxu1 %v12089_v19 }
 0x5c9   : > { %5508 = vmatprep.mubr.bf16.mxu0 %v12093_v34  ;;  %5894 = vmatprep.mubr.bf16.mxu1 %v12093_v34 }
 0x5d0   : > { %5509 = vmatmul.mubr.bf16.gmra.mrb[112].mxu0 %v12097_v58  ;;  %5895 = vmatmul.mubr.bf16.gmra.mrb[112].mxu1 %v12097_v58 }
 0x5d1   : > { %5518 = vmatprep.mubr.bf16.mxu0 %v12101_v43  ;;  %5904 = vmatprep.mubr.bf16.mxu1 %v12101_v43 }
 0x5d8   : > { %5519 = vmatmul.mubr.bf16.gmra.mrb[116].mxu0 %v12105_v12  ;;  %5905 = vmatmul.mubr.bf16.gmra.mrb[116].mxu1 %v12105_v12 }
 0x5d9   : > { %5528 = vmatprep.mubr.bf16.mxu0 %v12108_v5  ;;  %5914 = vmatprep.mubr.bf16.mxu1 %v12108_v5  ;;  %v4222_v5 = vld [vmem:[#allocation3 + $0x98] sm:$0xff] }
 0x5e0   : > { %5529 = vmatmul.mubr.bf16.gmra.mrb[120].mxu0 %v12112_v15  ;;  %5915 = vmatmul.mubr.bf16.gmra.mrb[120].mxu1 %v12112_v15 }
 0x5e1   : > { %5538 = vmatprep.mubr.bf16.mxu0 %v12121_v18  ;;  %5924 = vmatprep.mubr.bf16.mxu1 %v12121_v18 }
 0x5e8   : > { %5539 = vmatmul.mubr.bf16.gmra.mrb[124].mxu0 %v12116_v27  ;;  %5925 = vmatmul.mubr.bf16.gmra.mrb[124].mxu1 %v12116_v27 }
 0x643   : > { %v5390_v10 = vpop.f32.mrb[64].mxu0  ;;  %v5776_v55 = vpop.f32.mrb[64].mxu1 }
 0x644   : > { %v5935_v23 = vadd.f32 %v5390_v10, %v4203_v60  ;;  %v5937_v1 = vadd.f32 %v5776_v55, %v4205_v2  ;;  %v5392_v31 = vpop.f32.mrb[65].mxu0  ;;  %v5778_v62 = vpop.f32.mrb[65].mxu1 }
 0x645   : > { %v5936_v8 = vadd.f32 %v5392_v31, %v4204_v38  ;;  %v5938_v46 = vadd.f32 %v5778_v62, %v4206_v24  ;;  %v5394_v20 = vpop.f32.mrb[66].mxu0  ;;  %v5780_v54 = vpop.f32.mrb[66].mxu1  ;;  %v4228_v31 = vld [vmem:[#allocation3 + $0xc8] sm:$0xff]  ;;  %v4230_v62 = vld [vmem:[#allocation3 + $0xd8] sm:$0xff] }
 0x646   : > { %6063 = vst [vmem:[#allocation3] sm:$0xff] %v5935_v23  ;;  %6065 = vst [vmem:[#allocation3 + $0x10] sm:$0xff] %v5937_v1  ;;  %v5939_v33 = vadd.f32 %v5394_v20, %v4207_v25  ;;  %v5941_v56 = vadd.f32 %v5780_v54, %v4209_v13  ;;  %v5396_v53 = vpop.f32.mrb[67].mxu0  ;;  %v5782_v50 = vpop.f32.mrb[67].mxu1  ;;  %v4227_v23 = vld [vmem:[#allocation3 + $0xc0] sm:$0xff]  ;;  %v4229_v1 = vld [vmem:[#allocation3 + $0xd0] sm:$0xff] }
 0x647   : > { %6064 = vst [vmem:[#allocation3 + $0x8] sm:$0xff] %v5936_v8  ;;  %6066 = vst [vmem:[#allocation3 + $0x18] sm:$0xff] %v5938_v46  ;;  %v5940_v63 = vadd.f32 %v5396_v53, %v4208_v51  ;;  %v5942_v39 = vadd.f32 %v5782_v50, %v4210_v41  ;;  %v4231_v8 = vld [vmem:[#allocation3 + $0xe0] sm:$0xff]  ;;  %v4233_v46 = vld [vmem:[#allocation3 + $0xf0] sm:$0xff] }
 0x648   : > { %6067 = vst [vmem:[#allocation3 + $0x20] sm:$0xff] %v5939_v33  ;;  %6069 = vst [vmem:[#allocation3 + $0x30] sm:$0xff] %v5941_v56  ;;  %v4232_v53 = vld [vmem:[#allocation3 + $0xe8] sm:$0xff]  ;;  %v4234_v50 = vld [vmem:[#allocation3 + $0xf8] sm:$0xff] }
 0x649   : > { %6068 = vst [vmem:[#allocation3 + $0x28] sm:$0xff] %v5940_v63  ;;  %6070 = vst [vmem:[#allocation3 + $0x38] sm:$0xff] %v5942_v39 }
 0x64b   : > { %v5400_v42 = vpop.f32.mrb[68].mxu0  ;;  %v5786_v29 = vpop.f32.mrb[68].mxu1 }
 0x64c   : > { %v5943_v21 = vadd.f32 %v5400_v42, %v4211_v0  ;;  %v5945_v22 = vadd.f32 %v5786_v29, %v4213_v61  ;;  %v5402_v26 = vpop.f32.mrb[69].mxu0  ;;  %v5788_v35 = vpop.f32.mrb[69].mxu1 }
 0x64d   : > { %v5944_v30 = vadd.f32 %v5402_v26, %v4212_v11  ;;  %v5946_v57 = vadd.f32 %v5788_v35, %v4214_v14  ;;  %v5404_v47 = vpop.f32.mrb[70].mxu0  ;;  %v5790_v19 = vpop.f32.mrb[70].mxu1  ;;  %v4236_v26 = vld [vmem:[#allocation3 + $0x108] sm:$0xff]  ;;  %v4238_v35 = vld [vmem:[#allocation3 + $0x118] sm:$0xff] }
 0x64e   : > { %6071 = vst [vmem:[#allocation3 + $0x40] sm:$0xff] %v5943_v21  ;;  %6073 = vst [vmem:[#allocation3 + $0x50] sm:$0xff] %v5945_v22  ;;  %v5947_v34 = vadd.f32 %v5404_v47, %v4215_v48  ;;  %v5949_v37 = vadd.f32 %v5790_v19, %v4217_v9  ;;  %v5406_v49 = vpop.f32.mrb[71].mxu0  ;;  %v5792_v58 = vpop.f32.mrb[71].mxu1  ;;  %v4235_v21 = vld [vmem:[#allocation3 + $0x100] sm:$0xff]  ;;  %v4237_v22 = vld [vmem:[#allocation3 + $0x110] sm:$0xff] }
 0x64f   : > { %6072 = vst [vmem:[#allocation3 + $0x48] sm:$0xff] %v5944_v30  ;;  %6074 = vst [vmem:[#allocation3 + $0x58] sm:$0xff] %v5946_v57  ;;  %v5948_v43 = vadd.f32 %v5406_v49, %v4216_v45  ;;  %v5950_v12 = vadd.f32 %v5792_v58, %v4218_v7  ;;  %v4239_v30 = vld [vmem:[#allocation3 + $0x120] sm:$0xff]  ;;  %v4241_v57 = vld [vmem:[#allocation3 + $0x130] sm:$0xff] }
 0x650   : > { %6075 = vst [vmem:[#allocation3 + $0x60] sm:$0xff] %v5947_v34  ;;  %6077 = vst [vmem:[#allocation3 + $0x70] sm:$0xff] %v5949_v37  ;;  %v4240_v49 = vld [vmem:[#allocation3 + $0x128] sm:$0xff]  ;;  %v4242_v58 = vld [vmem:[#allocation3 + $0x138] sm:$0xff] }
 0x651   : > { %6076 = vst [vmem:[#allocation3 + $0x68] sm:$0xff] %v5948_v43  ;;  %6078 = vst [vmem:[#allocation3 + $0x78] sm:$0xff] %v5950_v12 }
 0x653   : > { %v5410_v15 = vpop.f32.mrb[72].mxu0  ;;  %v5796_v28 = vpop.f32.mrb[72].mxu1 }
 0x654   : > { %v5951_v27 = vadd.f32 %v5410_v15, %v4219_v44  ;;  %v5953_v40 = vadd.f32 %v5796_v28, %v4221_v16  ;;  %v5412_v17 = vpop.f32.mrb[73].mxu0  ;;  %v5798_v36 = vpop.f32.mrb[73].mxu1 }
 0x655   : > { %v5952_v18 = vadd.f32 %v5412_v17, %v4220_v4  ;;  %v5954_v3 = vadd.f32 %v5798_v36, %v4222_v5  ;;  %v5414_v60 = vpop.f32.mrb[74].mxu0  ;;  %v5800_v2 = vpop.f32.mrb[74].mxu1  ;;  %v4244_v17 = vld [vmem:[#allocation3 + $0x148] sm:$0xff]  ;;  %v4246_v36 = vld [vmem:[#allocation3 + $0x158] sm:$0xff] }
 0x656   : > { %6079 = vst [vmem:[#allocation3 + $0x80] sm:$0xff] %v5951_v27  ;;  %6081 = vst [vmem:[#allocation3 + $0x90] sm:$0xff] %v5953_v40  ;;  %v5955_v38 = vadd.f32 %v5414_v60, %v4223_v32  ;;  %v5957_v24 = vadd.f32 %v5800_v2, %v4225_v52  ;;  %v5416_v10 = vpop.f32.mrb[75].mxu0  ;;  %v5802_v55 = vpop.f32.mrb[75].mxu1  ;;  %v4243_v27 = vld [vmem:[#allocation3 + $0x140] sm:$0xff]  ;;  %v4245_v40 = vld [vmem:[#allocation3 + $0x150] sm:$0xff] }
 0x657   : > { %6080 = vst [vmem:[#allocation3 + $0x88] sm:$0xff] %v5952_v18  ;;  %6082 = vst [vmem:[#allocation3 + $0x98] sm:$0xff] %v5954_v3  ;;  %v5956_v25 = vadd.f32 %v5416_v10, %v4224_v59  ;;  %v5958_v13 = vadd.f32 %v5802_v55, %v4226_v6  ;;  %v4247_v18 = vld [vmem:[#allocation3 + $0x160] sm:$0xff]  ;;  %v4249_v3 = vld [vmem:[#allocation3 + $0x170] sm:$0xff] }
 0x658   : > { %6083 = vst [vmem:[#allocation3 + $0xa0] sm:$0xff] %v5955_v38  ;;  %6085 = vst [vmem:[#allocation3 + $0xb0] sm:$0xff] %v5957_v24  ;;  %v4248_v10 = vld [vmem:[#allocation3 + $0x168] sm:$0xff]  ;;  %v4250_v55 = vld [vmem:[#allocation3 + $0x178] sm:$0xff] }
 0x659   : > { %6084 = vst [vmem:[#allocation3 + $0xa8] sm:$0xff] %v5956_v25  ;;  %6086 = vst [vmem:[#allocation3 + $0xb8] sm:$0xff] %v5958_v13 }
 0x65b   : > { %v5420_v51 = vpop.f32.mrb[76].mxu0  ;;  %v5806_v41 = vpop.f32.mrb[76].mxu1 }
 0x65c   : > { %v5959_v20 = vadd.f32 %v5420_v51, %v4227_v23  ;;  %v5961_v54 = vadd.f32 %v5806_v41, %v4229_v1  ;;  %v5422_v33 = vpop.f32.mrb[77].mxu0  ;;  %v5808_v56 = vpop.f32.mrb[77].mxu1 }
 0x65d   : > { %v5960_v63 = vadd.f32 %v5422_v33, %v4228_v31  ;;  %v5962_v39 = vadd.f32 %v5808_v56, %v4230_v62  ;;  %v5424_v0 = vpop.f32.mrb[78].mxu0  ;;  %v5810_v61 = vpop.f32.mrb[78].mxu1  ;;  %v4252_v33 = vld [vmem:[#allocation3 + $0x188] sm:$0xff]  ;;  %v4254_v56 = vld [vmem:[#allocation3 + $0x198] sm:$0xff] }
 0x65e   : > { %6087 = vst [vmem:[#allocation3 + $0xc0] sm:$0xff] %v5959_v20  ;;  %6089 = vst [vmem:[#allocation3 + $0xd0] sm:$0xff] %v5961_v54  ;;  %v5963_v11 = vadd.f32 %v5424_v0, %v4231_v8  ;;  %v5965_v14 = vadd.f32 %v5810_v61, %v4233_v46  ;;  %v5426_v42 = vpop.f32.mrb[79].mxu0  ;;  %v5812_v29 = vpop.f32.mrb[79].mxu1  ;;  %v4251_v20 = vld [vmem:[#allocation3 + $0x180] sm:$0xff]  ;;  %v4253_v54 = vld [vmem:[#allocation3 + $0x190] sm:$0xff] }
 0x65f   : > { %6088 = vst [vmem:[#allocation3 + $0xc8] sm:$0xff] %v5960_v63  ;;  %6090 = vst [vmem:[#allocation3 + $0xd8] sm:$0xff] %v5962_v39  ;;  %v5964_v48 = vadd.f32 %v5426_v42, %v4232_v53  ;;  %v5966_v9 = vadd.f32 %v5812_v29, %v4234_v50  ;;  %v4255_v63 = vld [vmem:[#allocation3 + $0x1a0] sm:$0xff]  ;;  %v4257_v39 = vld [vmem:[#allocation3 + $0x1b0] sm:$0xff] }
 0x660   : > { %6091 = vst [vmem:[#allocation3 + $0xe0] sm:$0xff] %v5963_v11  ;;  %6093 = vst [vmem:[#allocation3 + $0xf0] sm:$0xff] %v5965_v14  ;;  %v4256_v42 = vld [vmem:[#allocation3 + $0x1a8] sm:$0xff]  ;;  %v4258_v29 = vld [vmem:[#allocation3 + $0x1b8] sm:$0xff] }
 0x661   : > { %6092 = vst [vmem:[#allocation3 + $0xe8] sm:$0xff] %v5964_v48  ;;  %6094 = vst [vmem:[#allocation3 + $0xf8] sm:$0xff] %v5966_v9 }
 0x663   : > { %v5430_v45 = vpop.f32.mrb[80].mxu0  ;;  %v5816_v7 = vpop.f32.mrb[80].mxu1 }
 0x664   : > { %v5967_v47 = vadd.f32 %v5430_v45, %v4235_v21  ;;  %v5969_v19 = vadd.f32 %v5816_v7, %v4237_v22  ;;  %v5432_v34 = vpop.f32.mrb[81].mxu0  ;;  %v5818_v37 = vpop.f32.mrb[81].mxu1 }
 0x665   : > { %v5968_v43 = vadd.f32 %v5432_v34, %v4236_v26  ;;  %v5970_v12 = vadd.f32 %v5818_v37, %v4238_v35  ;;  %v5434_v44 = vpop.f32.mrb[82].mxu0  ;;  %v5820_v16 = vpop.f32.mrb[82].mxu1  ;;  %v4260_v34 = vld [vmem:[#allocation3 + $0x1c8] sm:$0xff]  ;;  %v4262_v37 = vld [vmem:[#allocation3 + $0x1d8] sm:$0xff] }
 0x666   : > { %6095 = vst [vmem:[#allocation3 + $0x100] sm:$0xff] %v5967_v47  ;;  %6097 = vst [vmem:[#allocation3 + $0x110] sm:$0xff] %v5969_v19  ;;  %v5971_v4 = vadd.f32 %v5434_v44, %v4239_v30  ;;  %v5973_v5 = vadd.f32 %v5820_v16, %v4241_v57  ;;  %v5436_v15 = vpop.f32.mrb[83].mxu0  ;;  %v5822_v28 = vpop.f32.mrb[83].mxu1  ;;  %v4259_v47 = vld [vmem:[#allocation3 + $0x1c0] sm:$0xff]  ;;  %v4261_v19 = vld [vmem:[#allocation3 + $0x1d0] sm:$0xff] }
 0x667   : > { %6096 = vst [vmem:[#allocation3 + $0x108] sm:$0xff] %v5968_v43  ;;  %6098 = vst [vmem:[#allocation3 + $0x118] sm:$0xff] %v5970_v12  ;;  %v5972_v32 = vadd.f32 %v5436_v15, %v4240_v49  ;;  %v5974_v52 = vadd.f32 %v5822_v28, %v4242_v58  ;;  %v4263_v43 = vld [vmem:[#allocation3 + $0x1e0] sm:$0xff]  ;;  %v4265_v12 = vld [vmem:[#allocation3 + $0x1f0] sm:$0xff] }
 0x668   : > { %6099 = vst [vmem:[#allocation3 + $0x120] sm:$0xff] %v5971_v4  ;;  %6101 = vst [vmem:[#allocation3 + $0x130] sm:$0xff] %v5973_v5  ;;  %v4264_v15 = vld [vmem:[#allocation3 + $0x1e8] sm:$0xff]  ;;  %v4266_v28 = vld [vmem:[#allocation3 + $0x1f8] sm:$0xff] }
 0x669   : > { %6100 = vst [vmem:[#allocation3 + $0x128] sm:$0xff] %v5972_v32  ;;  %6102 = vst [vmem:[#allocation3 + $0x138] sm:$0xff] %v5974_v52 }
 0x66b   : > { %v5440_v59 = vpop.f32.mrb[84].mxu0  ;;  %v5826_v6 = vpop.f32.mrb[84].mxu1 }
 0x66c   : > { %v5975_v60 = vadd.f32 %v5440_v59, %v4243_v27  ;;  %v5977_v2 = vadd.f32 %v5826_v6, %v4245_v40  ;;  %v5442_v38 = vpop.f32.mrb[85].mxu0  ;;  %v5828_v24 = vpop.f32.mrb[85].mxu1 }
 0x66d   : > { %v5976_v25 = vadd.f32 %v5442_v38, %v4244_v17  ;;  %v5978_v13 = vadd.f32 %v5828_v24, %v4246_v36  ;;  %v5444_v23 = vpop.f32.mrb[86].mxu0  ;;  %v5830_v1 = vpop.f32.mrb[86].mxu1  ;;  %v4268_v38 = vld [vmem:[#allocation3 + $0x208] sm:$0xff]  ;;  %v4270_v24 = vld [vmem:[#allocation3 + $0x218] sm:$0xff] }
 0x66e   : > { %6103 = vst [vmem:[#allocation3 + $0x140] sm:$0xff] %v5975_v60  ;;  %6105 = vst [vmem:[#allocation3 + $0x150] sm:$0xff] %v5977_v2  ;;  %v5979_v31 = vadd.f32 %v5444_v23, %v4247_v18  ;;  %v5981_v62 = vadd.f32 %v5830_v1, %v4249_v3  ;;  %v5446_v51 = vpop.f32.mrb[87].mxu0  ;;  %v5832_v41 = vpop.f32.mrb[87].mxu1  ;;  %v4267_v60 = vld [vmem:[#allocation3 + $0x200] sm:$0xff]  ;;  %v4269_v2 = vld [vmem:[#allocation3 + $0x210] sm:$0xff] }
 0x66f   : > { %6104 = vst [vmem:[#allocation3 + $0x148] sm:$0xff] %v5976_v25  ;;  %6106 = vst [vmem:[#allocation3 + $0x158] sm:$0xff] %v5978_v13  ;;  %v5980_v8 = vadd.f32 %v5446_v51, %v4248_v10  ;;  %v5982_v46 = vadd.f32 %v5832_v41, %v4250_v55  ;;  %v4271_v25 = vld [vmem:[#allocation3 + $0x220] sm:$0xff]  ;;  %v4273_v13 = vld [vmem:[#allocation3 + $0x230] sm:$0xff] }
 0x670   : > { %6107 = vst [vmem:[#allocation3 + $0x160] sm:$0xff] %v5979_v31  ;;  %6109 = vst [vmem:[#allocation3 + $0x170] sm:$0xff] %v5981_v62  ;;  %v4272_v51 = vld [vmem:[#allocation3 + $0x228] sm:$0xff]  ;;  %v4274_v41 = vld [vmem:[#allocation3 + $0x238] sm:$0xff] }
 0x671   : > { %6108 = vst [vmem:[#allocation3 + $0x168] sm:$0xff] %v5980_v8  ;;  %6110 = vst [vmem:[#allocation3 + $0x178] sm:$0xff] %v5982_v46 }
 0x673   : > { %v5450_v53 = vpop.f32.mrb[88].mxu0  ;;  %v5836_v50 = vpop.f32.mrb[88].mxu1 }
 0x674   : > { %v5983_v0 = vadd.f32 %v5450_v53, %v4251_v20  ;;  %v5985_v61 = vadd.f32 %v5836_v50, %v4253_v54  ;;  %v5452_v11 = vpop.f32.mrb[89].mxu0  ;;  %v5838_v14 = vpop.f32.mrb[89].mxu1 }
 0x675   : > { %v5984_v48 = vadd.f32 %v5452_v11, %v4252_v33  ;;  %v5986_v9 = vadd.f32 %v5838_v14, %v4254_v56  ;;  %v5454_v21 = vpop.f32.mrb[90].mxu0  ;;  %v5840_v22 = vpop.f32.mrb[90].mxu1  ;;  %v4276_v11 = vld [vmem:[#allocation3 + $0x248] sm:$0xff]  ;;  %v4278_v14 = vld [vmem:[#allocation3 + $0x258] sm:$0xff] }
 0x676   : > { %6111 = vst [vmem:[#allocation3 + $0x180] sm:$0xff] %v5983_v0  ;;  %6113 = vst [vmem:[#allocation3 + $0x190] sm:$0xff] %v5985_v61  ;;  %v5987_v26 = vadd.f32 %v5454_v21, %v4255_v63  ;;  %v5989_v35 = vadd.f32 %v5840_v22, %v4257_v39  ;;  %v5456_v45 = vpop.f32.mrb[91].mxu0  ;;  %v5842_v7 = vpop.f32.mrb[91].mxu1  ;;  %v4275_v0 = vld [vmem:[#allocation3 + $0x240] sm:$0xff]  ;;  %v4277_v61 = vld [vmem:[#allocation3 + $0x250] sm:$0xff] }
 0x677   : > { %6112 = vst [vmem:[#allocation3 + $0x188] sm:$0xff] %v5984_v48  ;;  %6114 = vst [vmem:[#allocation3 + $0x198] sm:$0xff] %v5986_v9  ;;  %v5988_v30 = vadd.f32 %v5456_v45, %v4256_v42  ;;  %v5990_v57 = vadd.f32 %v5842_v7, %v4258_v29  ;;  %v4279_v48 = vld [vmem:[#allocation3 + $0x260] sm:$0xff]  ;;  %v4281_v9 = vld [vmem:[#allocation3 + $0x270] sm:$0xff] }
 0x678   : > { %6115 = vst [vmem:[#allocation3 + $0x1a0] sm:$0xff] %v5987_v26  ;;  %6117 = vst [vmem:[#allocation3 + $0x1b0] sm:$0xff] %v5989_v35  ;;  %v4280_v45 = vld [vmem:[#allocation3 + $0x268] sm:$0xff]  ;;  %v4282_v7 = vld [vmem:[#allocation3 + $0x278] sm:$0xff] }
 0x679   : > { %6116 = vst [vmem:[#allocation3 + $0x1a8] sm:$0xff] %v5988_v30  ;;  %6118 = vst [vmem:[#allocation3 + $0x1b8] sm:$0xff] %v5990_v57 }
 0x67b   : > { %v5460_v49 = vpop.f32.mrb[92].mxu0  ;;  %v5846_v58 = vpop.f32.mrb[92].mxu1 }
 0x67c   : > { %v5991_v44 = vadd.f32 %v5460_v49, %v4259_v47  ;;  %v5993_v16 = vadd.f32 %v5846_v58, %v4261_v19  ;;  %v5462_v4 = vpop.f32.mrb[93].mxu0  ;;  %v5848_v5 = vpop.f32.mrb[93].mxu1 }
 0x67d   : > { %v5992_v32 = vadd.f32 %v5462_v4, %v4260_v34  ;;  %v5994_v52 = vadd.f32 %v5848_v5, %v4262_v37  ;;  %v5464_v27 = vpop.f32.mrb[94].mxu0  ;;  %v5850_v40 = vpop.f32.mrb[94].mxu1  ;;  %v4284_v4 = vld [vmem:[#allocation3 + $0x288] sm:$0xff]  ;;  %v4286_v5 = vld [vmem:[#allocation3 + $0x298] sm:$0xff] }
 0x67e   : > { %6119 = vst [vmem:[#allocation3 + $0x1c0] sm:$0xff] %v5991_v44  ;;  %6121 = vst [vmem:[#allocation3 + $0x1d0] sm:$0xff] %v5993_v16  ;;  %v5995_v17 = vadd.f32 %v5464_v27, %v4263_v43  ;;  %v5997_v36 = vadd.f32 %v5850_v40, %v4265_v12  ;;  %v5466_v59 = vpop.f32.mrb[95].mxu0  ;;  %v5852_v6 = vpop.f32.mrb[95].mxu1  ;;  %v4283_v44 = vld [vmem:[#allocation3 + $0x280] sm:$0xff]  ;;  %v4285_v16 = vld [vmem:[#allocation3 + $0x290] sm:$0xff] }
 0x67f   : > { %6120 = vst [vmem:[#allocation3 + $0x1c8] sm:$0xff] %v5992_v32  ;;  %6122 = vst [vmem:[#allocation3 + $0x1d8] sm:$0xff] %v5994_v52  ;;  %v5996_v18 = vadd.f32 %v5466_v59, %v4264_v15  ;;  %v5998_v3 = vadd.f32 %v5852_v6, %v4266_v28  ;;  %v4287_v32 = vld [vmem:[#allocation3 + $0x2a0] sm:$0xff]  ;;  %v4289_v52 = vld [vmem:[#allocation3 + $0x2b0] sm:$0xff] }
 0x680   : > { %6123 = vst [vmem:[#allocation3 + $0x1e0] sm:$0xff] %v5995_v17  ;;  %6125 = vst [vmem:[#allocation3 + $0x1f0] sm:$0xff] %v5997_v36  ;;  %v4288_v59 = vld [vmem:[#allocation3 + $0x2a8] sm:$0xff]  ;;  %v4290_v6 = vld [vmem:[#allocation3 + $0x2b8] sm:$0xff] }
 0x681   : > { %6124 = vst [vmem:[#allocation3 + $0x1e8] sm:$0xff] %v5996_v18  ;;  %6126 = vst [vmem:[#allocation3 + $0x1f8] sm:$0xff] %v5998_v3 }
 0x683   : > { %v5470_v10 = vpop.f32.mrb[96].mxu0  ;;  %v5856_v55 = vpop.f32.mrb[96].mxu1 }
 0x684   : > { %v5999_v23 = vadd.f32 %v5470_v10, %v4267_v60  ;;  %v6001_v1 = vadd.f32 %v5856_v55, %v4269_v2  ;;  %v5472_v31 = vpop.f32.mrb[97].mxu0  ;;  %v5858_v62 = vpop.f32.mrb[97].mxu1 }
 0x685   : > { %v6000_v8 = vadd.f32 %v5472_v31, %v4268_v38  ;;  %v6002_v46 = vadd.f32 %v5858_v62, %v4270_v24  ;;  %v5474_v20 = vpop.f32.mrb[98].mxu0  ;;  %v5860_v54 = vpop.f32.mrb[98].mxu1  ;;  %v4292_v31 = vld [vmem:[#allocation3 + $0x2c8] sm:$0xff]  ;;  %v4294_v62 = vld [vmem:[#allocation3 + $0x2d8] sm:$0xff] }
 0x686   : > { %6127 = vst [vmem:[#allocation3 + $0x200] sm:$0xff] %v5999_v23  ;;  %6129 = vst [vmem:[#allocation3 + $0x210] sm:$0xff] %v6001_v1  ;;  %v6003_v33 = vadd.f32 %v5474_v20, %v4271_v25  ;;  %v6005_v56 = vadd.f32 %v5860_v54, %v4273_v13  ;;  %v5476_v53 = vpop.f32.mrb[99].mxu0  ;;  %v5862_v50 = vpop.f32.mrb[99].mxu1  ;;  %v4291_v23 = vld [vmem:[#allocation3 + $0x2c0] sm:$0xff]  ;;  %v4293_v1 = vld [vmem:[#allocation3 + $0x2d0] sm:$0xff] }
 0x687   : > { %6128 = vst [vmem:[#allocation3 + $0x208] sm:$0xff] %v6000_v8  ;;  %6130 = vst [vmem:[#allocation3 + $0x218] sm:$0xff] %v6002_v46  ;;  %v6004_v63 = vadd.f32 %v5476_v53, %v4272_v51  ;;  %v6006_v39 = vadd.f32 %v5862_v50, %v4274_v41  ;;  %v4295_v8 = vld [vmem:[#allocation3 + $0x2e0] sm:$0xff]  ;;  %v4297_v46 = vld [vmem:[#allocation3 + $0x2f0] sm:$0xff] }
 0x688   : > { %6131 = vst [vmem:[#allocation3 + $0x220] sm:$0xff] %v6003_v33  ;;  %6133 = vst [vmem:[#allocation3 + $0x230] sm:$0xff] %v6005_v56  ;;  %v4296_v53 = vld [vmem:[#allocation3 + $0x2e8] sm:$0xff]  ;;  %v4298_v50 = vld [vmem:[#allocation3 + $0x2f8] sm:$0xff] }
 0x689   : > { %6132 = vst [vmem:[#allocation3 + $0x228] sm:$0xff] %v6004_v63  ;;  %6134 = vst [vmem:[#allocation3 + $0x238] sm:$0xff] %v6006_v39 }
 0x68b   : > { %v5480_v42 = vpop.f32.mrb[100].mxu0  ;;  %v5866_v29 = vpop.f32.mrb[100].mxu1 }
 0x68c   : > { %v6007_v21 = vadd.f32 %v5480_v42, %v4275_v0  ;;  %v6009_v22 = vadd.f32 %v5866_v29, %v4277_v61  ;;  %v5482_v26 = vpop.f32.mrb[101].mxu0  ;;  %v5868_v35 = vpop.f32.mrb[101].mxu1 }
 0x68d   : > { %v6008_v30 = vadd.f32 %v5482_v26, %v4276_v11  ;;  %v6010_v57 = vadd.f32 %v5868_v35, %v4278_v14  ;;  %v5484_v47 = vpop.f32.mrb[102].mxu0  ;;  %v5870_v19 = vpop.f32.mrb[102].mxu1  ;;  %v4300_v26 = vld [vmem:[#allocation3 + $0x308] sm:$0xff]  ;;  %v4302_v35 = vld [vmem:[#allocation3 + $0x318] sm:$0xff] }
 0x68e   : > { %6135 = vst [vmem:[#allocation3 + $0x240] sm:$0xff] %v6007_v21  ;;  %6137 = vst [vmem:[#allocation3 + $0x250] sm:$0xff] %v6009_v22  ;;  %v6011_v34 = vadd.f32 %v5484_v47, %v4279_v48  ;;  %v6013_v37 = vadd.f32 %v5870_v19, %v4281_v9  ;;  %v5486_v49 = vpop.f32.mrb[103].mxu0  ;;  %v5872_v58 = vpop.f32.mrb[103].mxu1  ;;  %v4299_v21 = vld [vmem:[#allocation3 + $0x300] sm:$0xff]  ;;  %v4301_v22 = vld [vmem:[#allocation3 + $0x310] sm:$0xff] }
 0x68f   : > { %6136 = vst [vmem:[#allocation3 + $0x248] sm:$0xff] %v6008_v30  ;;  %6138 = vst [vmem:[#allocation3 + $0x258] sm:$0xff] %v6010_v57  ;;  %v6012_v43 = vadd.f32 %v5486_v49, %v4280_v45  ;;  %v6014_v12 = vadd.f32 %v5872_v58, %v4282_v7  ;;  %v4303_v30 = vld [vmem:[#allocation3 + $0x320] sm:$0xff]  ;;  %v4305_v57 = vld [vmem:[#allocation3 + $0x330] sm:$0xff] }
 0x690   : > { %6139 = vst [vmem:[#allocation3 + $0x260] sm:$0xff] %v6011_v34  ;;  %6141 = vst [vmem:[#allocation3 + $0x270] sm:$0xff] %v6013_v37  ;;  %v4304_v49 = vld [vmem:[#allocation3 + $0x328] sm:$0xff]  ;;  %v4306_v58 = vld [vmem:[#allocation3 + $0x338] sm:$0xff] }
 0x691   : > { %6140 = vst [vmem:[#allocation3 + $0x268] sm:$0xff] %v6012_v43  ;;  %6142 = vst [vmem:[#allocation3 + $0x278] sm:$0xff] %v6014_v12 }
 0x693   : > { %v5490_v15 = vpop.f32.mrb[104].mxu0  ;;  %v5876_v28 = vpop.f32.mrb[104].mxu1 }
 0x694   : > { %v6015_v27 = vadd.f32 %v5490_v15, %v4283_v44  ;;  %v6017_v40 = vadd.f32 %v5876_v28, %v4285_v16  ;;  %v5492_v17 = vpop.f32.mrb[105].mxu0  ;;  %v5878_v36 = vpop.f32.mrb[105].mxu1 }
 0x695   : > { %v6016_v18 = vadd.f32 %v5492_v17, %v4284_v4  ;;  %v6018_v3 = vadd.f32 %v5878_v36, %v4286_v5  ;;  %v5494_v60 = vpop.f32.mrb[106].mxu0  ;;  %v5880_v2 = vpop.f32.mrb[106].mxu1  ;;  %v4308_v17 = vld [vmem:[#allocation3 + $0x348] sm:$0xff]  ;;  %v4310_v36 = vld [vmem:[#allocation3 + $0x358] sm:$0xff] }
 0x696   : > { %6143 = vst [vmem:[#allocation3 + $0x280] sm:$0xff] %v6015_v27  ;;  %6145 = vst [vmem:[#allocation3 + $0x290] sm:$0xff] %v6017_v40  ;;  %v6019_v38 = vadd.f32 %v5494_v60, %v4287_v32  ;;  %v6021_v24 = vadd.f32 %v5880_v2, %v4289_v52  ;;  %v5496_v10 = vpop.f32.mrb[107].mxu0  ;;  %v5882_v55 = vpop.f32.mrb[107].mxu1  ;;  %v4307_v27 = vld [vmem:[#allocation3 + $0x340] sm:$0xff]  ;;  %v4309_v40 = vld [vmem:[#allocation3 + $0x350] sm:$0xff] }
 0x697   : > { %6144 = vst [vmem:[#allocation3 + $0x288] sm:$0xff] %v6016_v18  ;;  %6146 = vst [vmem:[#allocation3 + $0x298] sm:$0xff] %v6018_v3  ;;  %v6020_v25 = vadd.f32 %v5496_v10, %v4288_v59  ;;  %v6022_v13 = vadd.f32 %v5882_v55, %v4290_v6  ;;  %v4311_v18 = vld [vmem:[#allocation3 + $0x360] sm:$0xff]  ;;  %v4313_v3 = vld [vmem:[#allocation3 + $0x370] sm:$0xff] }
 0x698   : > { %6147 = vst [vmem:[#allocation3 + $0x2a0] sm:$0xff] %v6019_v38  ;;  %6149 = vst [vmem:[#allocation3 + $0x2b0] sm:$0xff] %v6021_v24  ;;  %v4312_v10 = vld [vmem:[#allocation3 + $0x368] sm:$0xff]  ;;  %v4314_v55 = vld [vmem:[#allocation3 + $0x378] sm:$0xff] }
 0x699   : > { %6148 = vst [vmem:[#allocation3 + $0x2a8] sm:$0xff] %v6020_v25  ;;  %6150 = vst [vmem:[#allocation3 + $0x2b8] sm:$0xff] %v6022_v13 }
 0x69b   : > { %v5500_v51 = vpop.f32.mrb[108].mxu0  ;;  %v5886_v41 = vpop.f32.mrb[108].mxu1 }
 0x69c   : > { %v6023_v20 = vadd.f32 %v5500_v51, %v4291_v23  ;;  %v6025_v54 = vadd.f32 %v5886_v41, %v4293_v1  ;;  %v5502_v33 = vpop.f32.mrb[109].mxu0  ;;  %v5888_v56 = vpop.f32.mrb[109].mxu1 }
 0x69d   : > { %v6024_v63 = vadd.f32 %v5502_v33, %v4292_v31  ;;  %v6026_v39 = vadd.f32 %v5888_v56, %v4294_v62  ;;  %v5504_v0 = vpop.f32.mrb[110].mxu0  ;;  %v5890_v61 = vpop.f32.mrb[110].mxu1  ;;  %v4316_v33 = vld [vmem:[#allocation3 + $0x388] sm:$0xff]  ;;  %v4318_v56 = vld [vmem:[#allocation3 + $0x398] sm:$0xff] }
 0x69e   : > { %6151 = vst [vmem:[#allocation3 + $0x2c0] sm:$0xff] %v6023_v20  ;;  %6153 = vst [vmem:[#allocation3 + $0x2d0] sm:$0xff] %v6025_v54  ;;  %v6027_v11 = vadd.f32 %v5504_v0, %v4295_v8  ;;  %v6029_v14 = vadd.f32 %v5890_v61, %v4297_v46  ;;  %v5506_v42 = vpop.f32.mrb[111].mxu0  ;;  %v5892_v29 = vpop.f32.mrb[111].mxu1  ;;  %v4315_v20 = vld [vmem:[#allocation3 + $0x380] sm:$0xff]  ;;  %v4317_v54 = vld [vmem:[#allocation3 + $0x390] sm:$0xff] }
 0x69f   : > { %6152 = vst [vmem:[#allocation3 + $0x2c8] sm:$0xff] %v6024_v63  ;;  %6154 = vst [vmem:[#allocation3 + $0x2d8] sm:$0xff] %v6026_v39  ;;  %v6028_v48 = vadd.f32 %v5506_v42, %v4296_v53  ;;  %v6030_v9 = vadd.f32 %v5892_v29, %v4298_v50  ;;  %v4319_v63 = vld [vmem:[#allocation3 + $0x3a0] sm:$0xff]  ;;  %v4321_v39 = vld [vmem:[#allocation3 + $0x3b0] sm:$0xff] }
 0x6a0   : > { %6155 = vst [vmem:[#allocation3 + $0x2e0] sm:$0xff] %v6027_v11  ;;  %6157 = vst [vmem:[#allocation3 + $0x2f0] sm:$0xff] %v6029_v14  ;;  %v4320_v42 = vld [vmem:[#allocation3 + $0x3a8] sm:$0xff]  ;;  %v4322_v29 = vld [vmem:[#allocation3 + $0x3b8] sm:$0xff] }
 0x6a1   : > { %6156 = vst [vmem:[#allocation3 + $0x2e8] sm:$0xff] %v6028_v48  ;;  %6158 = vst [vmem:[#allocation3 + $0x2f8] sm:$0xff] %v6030_v9 }
 0x6a3   : > { %v5510_v45 = vpop.f32.mrb[112].mxu0  ;;  %v5896_v7 = vpop.f32.mrb[112].mxu1 }
 0x6a4   : > { %v6031_v47 = vadd.f32 %v5510_v45, %v4299_v21  ;;  %v6033_v19 = vadd.f32 %v5896_v7, %v4301_v22  ;;  %v5512_v34 = vpop.f32.mrb[113].mxu0  ;;  %v5898_v37 = vpop.f32.mrb[113].mxu1 }
 0x6a5   : > { %v6032_v43 = vadd.f32 %v5512_v34, %v4300_v26  ;;  %v6034_v12 = vadd.f32 %v5898_v37, %v4302_v35  ;;  %v5514_v44 = vpop.f32.mrb[114].mxu0  ;;  %v5900_v16 = vpop.f32.mrb[114].mxu1  ;;  %v4324_v34 = vld [vmem:[#allocation3 + $0x3c8] sm:$0xff]  ;;  %v4326_v37 = vld [vmem:[#allocation3 + $0x3d8] sm:$0xff] }
 0x6a6   : > { %6159 = vst [vmem:[#allocation3 + $0x300] sm:$0xff] %v6031_v47  ;;  %6161 = vst [vmem:[#allocation3 + $0x310] sm:$0xff] %v6033_v19  ;;  %v6035_v4 = vadd.f32 %v5514_v44, %v4303_v30  ;;  %v6037_v5 = vadd.f32 %v5900_v16, %v4305_v57  ;;  %v5516_v15 = vpop.f32.mrb[115].mxu0  ;;  %v5902_v28 = vpop.f32.mrb[115].mxu1  ;;  %v4323_v47 = vld [vmem:[#allocation3 + $0x3c0] sm:$0xff]  ;;  %v4325_v19 = vld [vmem:[#allocation3 + $0x3d0] sm:$0xff] }
 0x6a7   : > { %6160 = vst [vmem:[#allocation3 + $0x308] sm:$0xff] %v6032_v43  ;;  %6162 = vst [vmem:[#allocation3 + $0x318] sm:$0xff] %v6034_v12  ;;  %v6036_v32 = vadd.f32 %v5516_v15, %v4304_v49  ;;  %v6038_v52 = vadd.f32 %v5902_v28, %v4306_v58  ;;  %v4327_v43 = vld [vmem:[#allocation3 + $0x3e0] sm:$0xff]  ;;  %v4329_v12 = vld [vmem:[#allocation3 + $0x3f0] sm:$0xff] }
 0x6a8   : > { %6163 = vst [vmem:[#allocation3 + $0x320] sm:$0xff] %v6035_v4  ;;  %6165 = vst [vmem:[#allocation3 + $0x330] sm:$0xff] %v6037_v5  ;;  %v4328_v15 = vld [vmem:[#allocation3 + $0x3e8] sm:$0xff]  ;;  %v4330_v28 = vld [vmem:[#allocation3 + $0x3f8] sm:$0xff] }
 0x6a9   : > { %6164 = vst [vmem:[#allocation3 + $0x328] sm:$0xff] %v6036_v32  ;;  %6166 = vst [vmem:[#allocation3 + $0x338] sm:$0xff] %v6038_v52 }
 0x6ab   : > { %v5520_v59 = vpop.f32.mrb[116].mxu0  ;;  %v5906_v6 = vpop.f32.mrb[116].mxu1 }
 0x6ac   : > { %v6039_v60 = vadd.f32 %v5520_v59, %v4307_v27  ;;  %v6041_v2 = vadd.f32 %v5906_v6, %v4309_v40  ;;  %v5522_v38 = vpop.f32.mrb[117].mxu0  ;;  %v5908_v24 = vpop.f32.mrb[117].mxu1 }
 0x6ad   : > { %v6040_v25 = vadd.f32 %v5522_v38, %v4308_v17  ;;  %v6042_v13 = vadd.f32 %v5908_v24, %v4310_v36  ;;  %v5524_v23 = vpop.f32.mrb[118].mxu0  ;;  %v5910_v1 = vpop.f32.mrb[118].mxu1  ;;  %v6196_v38 = vld [vmem:[#allocation3 + $0x8] sm:$0xff] (!%p7025_p8)  ;;  %v13100_v24 = vld [vmem:[#allocation134_spill] sm:$0xff] (!%p7025_p8) }
 0x6ae   : > { %6167 = vst [vmem:[#allocation3 + $0x340] sm:$0xff] %v6039_v60  ;;  %6169 = vst [vmem:[#allocation3 + $0x350] sm:$0xff] %v6041_v2  ;;  %v6043_v31 = vadd.f32 %v5524_v23, %v4311_v18  ;;  %v6045_v62 = vadd.f32 %v5910_v1, %v4313_v3  ;;  %v5526_v51 = vpop.f32.mrb[119].mxu0  ;;  %v5912_v41 = vpop.f32.mrb[119].mxu1  ;;  %v6195_v60 = vld [vmem:[#allocation3] sm:$0xff] (!%p7025_p8)  ;;  %v6197_v23 = vld [vmem:[#allocation3 + $0x10] sm:$0xff] (!%p7025_p8) }
 0x6af   : > { %6168 = vst [vmem:[#allocation3 + $0x348] sm:$0xff] %v6040_v25  ;;  %6170 = vst [vmem:[#allocation3 + $0x358] sm:$0xff] %v6042_v13  ;;  %v6044_v8 = vadd.f32 %v5526_v51, %v4312_v10  ;;  %v6046_v46 = vadd.f32 %v5912_v41, %v4314_v55  ;;  %v6323_v2 = vld [vmem:[#allocation15] sm:$0xf] (!%p7025_p8)  ;;  %v13101_v10 = vsub.s32 (!%p7025_p8), 0, %v13100_v24  ;;  %v13102_v25 = vsub.s32 (!%p7025_p8), 1, %v13100_v24 }
 0x6b0   : > { %6171 = vst [vmem:[#allocation3 + $0x360] sm:$0xff] %v6043_v31  ;;  %6173 = vst [vmem:[#allocation3 + $0x370] sm:$0xff] %v6045_v62  ;;  %v13103_v1 = vsub.s32 (!%p7025_p8), 2, %v13100_v24  ;;  %v6198_v62 = vld [vmem:[#allocation3 + $0x18] sm:$0xff] (!%p7025_p8)  ;;  %v13104_v51 = vsub.s32 (!%p7025_p8), 3, %v13100_v24 }
 0x6b1   : > { %6172 = vst [vmem:[#allocation3 + $0x368] sm:$0xff] %v6044_v8  ;;  %6174 = vst [vmem:[#allocation3 + $0x378] sm:$0xff] %v6046_v46  ;;  %v12190_v55 = vrot.slane (!%p7025_p8), %v6323_v2, %v13101_v10  ;;  %v12194_v13 = vrot.slane (!%p7025_p8), %v6323_v2, %v13102_v25  ;;  %v6199_v8 = vld [vmem:[#allocation3 + $0x20] sm:$0xff] (!%p7025_p8)  ;;  %v6200_v46 = vld [vmem:[#allocation3 + $0x28] sm:$0xff] (!%p7025_p8) }
 0x6b2   : > { %v12198_v31 = vrot.slane (!%p7025_p8), %v6323_v2, %v13103_v1  ;;  %v12202_v41 = vrot.slane (!%p7025_p8), %v6323_v2, %v13104_v51  ;;  %v6224_v10 = vld [vmem:[#allocation3 + $0xe8] sm:$0xff] (!%p7025_p8)  ;;  %v6225_v25 = vld [vmem:[#allocation3 + $0xf0] sm:$0xff] (!%p7025_p8) }
 0x6b3   : > { %v5530_v53 = vpop.f32.mrb[120].mxu0  ;;  %v5916_v50 = vpop.f32.mrb[120].mxu1  ;;  %v6374_v1 = vadd.f32 (!%p7025_p8), %v12194_v13, %v6224_v10  ;;  %v6254_v10 = vld [vmem:[#allocation3 + $0x1d8] sm:$0xff] (!%p7025_p8) }
 0x6b4   : > { %v6047_v0 = vadd.f32 %v5530_v53, %v4315_v20  ;;  %v6049_v61 = vadd.f32 %v5916_v50, %v4317_v54  ;;  %v5532_v11 = vpop.f32.mrb[121].mxu0  ;;  %v5918_v14 = vpop.f32.mrb[121].mxu1  ;;  %v6201_v20 = vld [vmem:[#allocation3 + $0x30] sm:$0xff] (!%p7025_p8)  ;;  %v6202_v54 = vld [vmem:[#allocation3 + $0x38] sm:$0xff] (!%p7025_p8)  ;;  %v6347_v53 = vadd.f32 (!%p7025_p8), %v12198_v31, %v6197_v23  ;;  %v6348_v50 = vadd.f32 (!%p7025_p8), %v12202_v41, %v6198_v62 }
 0x6b5   : > { %v6048_v48 = vadd.f32 %v5532_v11, %v4316_v33  ;;  %v6050_v9 = vadd.f32 %v5918_v14, %v4318_v56  ;;  %v5534_v21 = vpop.f32.mrb[122].mxu0  ;;  %v5920_v22 = vpop.f32.mrb[122].mxu1  ;;  %v6345_v33 = vadd.f32 (!%p7025_p8), %v12190_v55, %v6195_v60  ;;  %v6346_v56 = vadd.f32 (!%p7025_p8), %v12194_v13, %v6196_v38  ;;  %v6223_v60 = vld [vmem:[#allocation3 + $0xe0] sm:$0xff] (!%p7025_p8)  ;;  %v6226_v23 = vld [vmem:[#allocation3 + $0xf8] sm:$0xff] (!%p7025_p8)  ;;  %6502 = vst [vmem:[#allocation16 + $0xe8] sm:$0xff] (!%p7025_p8), %v6374_v1 }
 0x6b6   : > { %6175 = vst [vmem:[#allocation3 + $0x380] sm:$0xff] %v6047_v0  ;;  %6177 = vst [vmem:[#allocation3 + $0x390] sm:$0xff] %v6049_v61  ;;  %v6051_v26 = vadd.f32 %v5534_v21, %v4319_v63  ;;  %v6053_v35 = vadd.f32 %v5920_v22, %v4321_v39  ;;  %v5536_v45 = vpop.f32.mrb[123].mxu0  ;;  %v5922_v7 = vpop.f32.mrb[123].mxu1  ;;  %v6203_v63 = vld [vmem:[#allocation3 + $0x40] sm:$0xff] (!%p7025_p8)  ;;  %v6204_v39 = vld [vmem:[#allocation3 + $0x48] sm:$0xff] (!%p7025_p8)  ;;  %v6349_v61 = vadd.f32 (!%p7025_p8), %v12190_v55, %v6199_v8 }
 0x6b7   : > { %6176 = vst [vmem:[#allocation3 + $0x388] sm:$0xff] %v6048_v48  ;;  %6178 = vst [vmem:[#allocation3 + $0x398] sm:$0xff] %v6050_v9  ;;  %v6052_v30 = vadd.f32 %v5536_v45, %v4320_v42  ;;  %v6054_v57 = vadd.f32 %v5922_v7, %v4322_v29  ;;  %v6205_v0 = vld [vmem:[#allocation3 + $0x50] sm:$0xff] (!%p7025_p8)  ;;  %v6350_v11 = vadd.f32 (!%p7025_p8), %v12194_v13, %v6200_v46  ;;  %v6206_v29 = vld [vmem:[#allocation3 + $0x58] sm:$0xff] (!%p7025_p8) }
 0x6b8   : > { %6179 = vst [vmem:[#allocation3 + $0x3a0] sm:$0xff] %v6051_v26  ;;  %6181 = vst [vmem:[#allocation3 + $0x3b0] sm:$0xff] %v6053_v35  ;;  %v6351_v14 = vadd.f32 (!%p7025_p8), %v12198_v31, %v6201_v20  ;;  %v6352_v42 = vadd.f32 (!%p7025_p8), %v12202_v41, %v6202_v54  ;;  %v6207_v48 = vld [vmem:[#allocation3 + $0x60] sm:$0xff] (!%p7025_p8)  ;;  %v6208_v9 = vld [vmem:[#allocation3 + $0x68] sm:$0xff] (!%p7025_p8)  ;;  %v6353_v21 = vadd.f32 (!%p7025_p8), %v12190_v55, %v6203_v63 }
 0x6b9   : > { %6180 = vst [vmem:[#allocation3 + $0x3a8] sm:$0xff] %v6052_v30  ;;  %6182 = vst [vmem:[#allocation3 + $0x3b8] sm:$0xff] %v6054_v57  ;;  %v6354_v22 = vadd.f32 (!%p7025_p8), %v12194_v13, %v6204_v39  ;;  %v6355_v26 = vadd.f32 (!%p7025_p8), %v12198_v31, %v6205_v0  ;;  %v6356_v35 = vadd.f32 (!%p7025_p8), %v12202_v41, %v6206_v29  ;;  %v6209_v45 = vld [vmem:[#allocation3 + $0x70] sm:$0xff] (!%p7025_p8)  ;;  %v6210_v7 = vld [vmem:[#allocation3 + $0x78] sm:$0xff] (!%p7025_p8) }
 0x6ba   : > { %6473 = vst [vmem:[#allocation16] sm:$0xff] (!%p7025_p8), %v6345_v33  ;;  %6474 = vst [vmem:[#allocation16 + $0x8] sm:$0xff] (!%p7025_p8), %v6346_v56  ;;  %v6211_v30 = vld [vmem:[#allocation3 + $0x80] sm:$0xff] (!%p7025_p8)  ;;  %v6357_v57 = vadd.f32 (!%p7025_p8), %v12190_v55, %v6207_v48  ;;  %v6373_v24 = vadd.f32 (!%p7025_p8), %v12190_v55, %v6223_v60  ;;  %v6375_v62 = vadd.f32 (!%p7025_p8), %v12198_v31, %v6225_v25  ;;  %v6228_v46 = vld [vmem:[#allocation3 + $0x108] sm:$0xff] (!%p7025_p8) }
 0x6bb   : > { %v5540_v49 = vpop.f32.mrb[124].mxu0  ;;  %v5926_v58 = vpop.f32.mrb[124].mxu1  ;;  %6194 = sbr.rel (%p7025_p8) target bundleno = 1790 (0x6fe), region = 84  ;;  %6475 = vst [vmem:[#allocation16 + $0x10] sm:$0xff] (!%p7025_p8), %v6347_v53  ;;  %6476 = vst [vmem:[#allocation16 + $0x18] sm:$0xff] (!%p7025_p8), %v6348_v50  ;;  %v6376_v51 = vadd.f32 (!%p7025_p8), %v12202_v41, %v6226_v23  ;;  %v6227_v8 = vld [vmem:[#allocation3 + $0x100] sm:$0xff] (!%p7025_p8)  ;;  %v6378_v33 = vadd.f32 (!%p7025_p8), %v12194_v13, %v6228_v46  ;;  %v6404_v1 = vadd.f32 (!%p7025_p8), %v12202_v41, %v6254_v10 }
 0x6bc   : > { %v6055_v44 = vadd.f32 %v5540_v49, %v4323_v47  ;;  %v6057_v16 = vadd.f32 %v5926_v58, %v4325_v19  ;;  %v5542_v4 = vpop.f32.mrb[125].mxu0  ;;  %v5928_v5 = vpop.f32.mrb[125].mxu1  ;;  %6477 = vst [vmem:[#allocation16 + $0x20] sm:$0xff] (!%p7025_p8), %v6349_v61  ;;  %6478 = vst [vmem:[#allocation16 + $0x28] sm:$0xff] (!%p7025_p8), %v6350_v11  ;;  %v6358_v47 = vadd.f32 (!%p7025_p8), %v12194_v13, %v6208_v9  ;;  %v6213_v49 = vld [vmem:[#allocation3 + $0x90] sm:$0xff] (!%p7025_p8)  ;;  %v6214_v58 = vld [vmem:[#allocation3 + $0x98] sm:$0xff] (!%p7025_p8) }
 0x6bd   : > { %v6056_v32 = vadd.f32 %v5542_v4, %v4324_v34  ;;  %v6058_v52 = vadd.f32 %v5928_v5, %v4326_v37  ;;  %v5544_v27 = vpop.f32.mrb[126].mxu0  ;;  %v5930_v40 = vpop.f32.mrb[126].mxu1  ;;  %6479 = vst [vmem:[#allocation16 + $0x30] sm:$0xff] (!%p7025_p8), %v6351_v14  ;;  %6480 = vst [vmem:[#allocation16 + $0x38] sm:$0xff] (!%p7025_p8), %v6352_v42  ;;  %v6359_v19 = vadd.f32 (!%p7025_p8), %v12198_v31, %v6209_v45  ;;  %v6212_v37 = vld [vmem:[#allocation3 + $0x88] sm:$0xff] (!%p7025_p8)  ;;  %v6215_v4 = vld [vmem:[#allocation3 + $0xa0] sm:$0xff] (!%p7025_p8) }
 0x6be   : > { %6183 = vst [vmem:[#allocation3 + $0x3c0] sm:$0xff] %v6055_v44  ;;  %6185 = vst [vmem:[#allocation3 + $0x3d0] sm:$0xff] %v6057_v16  ;;  %v6059_v17 = vadd.f32 %v5544_v27, %v4327_v43  ;;  %v6061_v36 = vadd.f32 %v5930_v40, %v4329_v12  ;;  %v5546_v59 = vpop.f32.mrb[127].mxu0  ;;  %v5932_v6 = vpop.f32.mrb[127].mxu1  ;;  %v6360_v34 = vadd.f32 (!%p7025_p8), %v12202_v41, %v6210_v7  ;;  %v6216_v5 = vld [vmem:[#allocation3 + $0xa8] sm:$0xff] (!%p7025_p8)  ;;  %v6218_v27 = vld [vmem:[#allocation3 + $0xb8] sm:$0xff] (!%p7025_p8) }
 0x6bf   : > { %6184 = vst [vmem:[#allocation3 + $0x3c8] sm:$0xff] %v6056_v32  ;;  %6186 = vst [vmem:[#allocation3 + $0x3d8] sm:$0xff] %v6058_v52  ;;  %v6060_v18 = vadd.f32 %v5546_v59, %v4328_v15  ;;  %v6062_v3 = vadd.f32 %v5932_v6, %v4330_v28  ;;  %v6361_v43 = vadd.f32 (!%p7025_p8), %v12190_v55, %v6211_v30  ;;  %v6217_v15 = vld [vmem:[#allocation3 + $0xb0] sm:$0xff] (!%p7025_p8)  ;;  %v6219_v40 = vld [vmem:[#allocation3 + $0xc0] sm:$0xff] (!%p7025_p8) }
 0x6c0   : > { %6187 = vst [vmem:[#allocation3 + $0x3e0] sm:$0xff] %v6059_v17  ;;  %6189 = vst [vmem:[#allocation3 + $0x3f0] sm:$0xff] %v6061_v36  ;;  %v6362_v12 = vadd.f32 (!%p7025_p8), %v12194_v13, %v6212_v37  ;;  %v6363_v44 = vadd.f32 (!%p7025_p8), %v12198_v31, %v6213_v49  ;;  %v6364_v16 = vadd.f32 (!%p7025_p8), %v12202_v41, %v6214_v58  ;;  %v6220_v17 = vld [vmem:[#allocation3 + $0xc8] sm:$0xff] (!%p7025_p8)  ;;  %v6229_v20 = vld [vmem:[#allocation3 + $0x110] sm:$0xff] (!%p7025_p8) }
 0x6c1   : > { %6188 = vst [vmem:[#allocation3 + $0x3e8] sm:$0xff] %v6060_v18  ;;  %6190 = vst [vmem:[#allocation3 + $0x3f8] sm:$0xff] %v6062_v3  ;;  %v6365_v28 = vadd.f32 (!%p7025_p8), %v12190_v55, %v6215_v4  ;;  %v6366_v32 = vadd.f32 (!%p7025_p8), %v12194_v13, %v6216_v5  ;;  %v6367_v52 = vadd.f32 (!%p7025_p8), %v12198_v31, %v6217_v15  ;;  %v6221_v18 = vld [vmem:[#allocation3 + $0xd0] sm:$0xff] (!%p7025_p8)  ;;  %v6222_v3 = vld [vmem:[#allocation3 + $0xd8] sm:$0xff] (!%p7025_p8) }
 0x6c2   : > { %6481 = vst [vmem:[#allocation16 + $0x40] sm:$0xff] %v6353_v21  ;;  %6482 = vst [vmem:[#allocation16 + $0x48] sm:$0xff] %v6354_v22  ;;  %v6368_v36 = vadd.f32 %v12202_v41, %v6218_v27  ;;  %v6369_v59 = vadd.f32 %v12190_v55, %v6219_v40  ;;  %v6370_v6 = vadd.f32 %v12194_v13, %v6220_v17  ;;  %v6230_v53 = vld [vmem:[#allocation3 + $0x118] sm:$0xff]  ;;  %v6231_v50 = vld [vmem:[#allocation3 + $0x120] sm:$0xff] }
 0x6c3   : > { %6483 = vst [vmem:[#allocation16 + $0x50] sm:$0xff] %v6355_v26  ;;  %6484 = vst [vmem:[#allocation16 + $0x58] sm:$0xff] %v6356_v35  ;;  %v6371_v2 = vadd.f32 %v12198_v31, %v6221_v18  ;;  %v6372_v38 = vadd.f32 %v12202_v41, %v6222_v3  ;;  %v6377_v54 = vadd.f32 %v12190_v55, %v6227_v8  ;;  %v6232_v63 = vld [vmem:[#allocation3 + $0x128] sm:$0xff]  ;;  %v6233_v11 = vld [vmem:[#allocation3 + $0x130] sm:$0xff] }
 0x6c4   : > { %6485 = vst [vmem:[#allocation16 + $0x60] sm:$0xff] %v6357_v57  ;;  %6486 = vst [vmem:[#allocation16 + $0x68] sm:$0xff] %v6358_v47  ;;  %v6379_v56 = vadd.f32 %v12198_v31, %v6229_v20  ;;  %v6380_v39 = vadd.f32 %v12202_v41, %v6230_v53  ;;  %v6381_v0 = vadd.f32 %v12190_v55, %v6231_v50  ;;  %v6234_v14 = vld [vmem:[#allocation3 + $0x138] sm:$0xff]  ;;  %v6235_v42 = vld [vmem:[#allocation3 + $0x140] sm:$0xff] }
 0x6c5   : > { %6487 = vst [vmem:[#allocation16 + $0x70] sm:$0xff] %v6359_v19  ;;  %6488 = vst [vmem:[#allocation16 + $0x78] sm:$0xff] %v6360_v34  ;;  %v6382_v61 = vadd.f32 %v12194_v13, %v6232_v63  ;;  %v6383_v29 = vadd.f32 %v12198_v31, %v6233_v11  ;;  %v6384_v48 = vadd.f32 %v12202_v41, %v6234_v14  ;;  %v6236_v21 = vld [vmem:[#allocation3 + $0x148] sm:$0xff]  ;;  %v6237_v22 = vld [vmem:[#allocation3 + $0x150] sm:$0xff] }
 0x6c6   : > { %6489 = vst [vmem:[#allocation16 + $0x80] sm:$0xff] %v6361_v43  ;;  %6490 = vst [vmem:[#allocation16 + $0x88] sm:$0xff] %v6362_v12  ;;  %v6385_v9 = vadd.f32 %v12190_v55, %v6235_v42  ;;  %v6238_v26 = vld [vmem:[#allocation3 + $0x158] sm:$0xff]  ;;  %v6386_v35 = vadd.f32 %v12194_v13, %v6236_v21  ;;  %v6387_v45 = vadd.f32 %v12198_v31, %v6237_v22  ;;  %v6239_v30 = vld [vmem:[#allocation3 + $0x160] sm:$0xff] }
 0x6c7   : > { %6491 = vst [vmem:[#allocation16 + $0x90] sm:$0xff] %v6363_v44  ;;  %6492 = vst [vmem:[#allocation16 + $0x98] sm:$0xff] %v6364_v16  ;;  %v6388_v7 = vadd.f32 %v12202_v41, %v6238_v26  ;;  %v6240_v57 = vld [vmem:[#allocation3 + $0x168] sm:$0xff]  ;;  %v6241_v47 = vld [vmem:[#allocation3 + $0x170] sm:$0xff]  ;;  %v6389_v19 = vadd.f32 %v12190_v55, %v6239_v30 }
 0x6c8   : > { %6493 = vst [vmem:[#allocation16 + $0xa0] sm:$0xff] %v6365_v28  ;;  %6494 = vst [vmem:[#allocation16 + $0xa8] sm:$0xff] %v6366_v32  ;;  %v6390_v34 = vadd.f32 %v12194_v13, %v6240_v57  ;;  %v6391_v37 = vadd.f32 %v12198_v31, %v6241_v47  ;;  %v6242_v49 = vld [vmem:[#allocation3 + $0x178] sm:$0xff]  ;;  %v6243_v58 = vld [vmem:[#allocation3 + $0x180] sm:$0xff] }
 0x6c9   : > { %6495 = vst [vmem:[#allocation16 + $0xb0] sm:$0xff] %v6367_v52  ;;  %6496 = vst [vmem:[#allocation16 + $0xb8] sm:$0xff] %v6368_v36  ;;  %v6244_v43 = vld [vmem:[#allocation3 + $0x188] sm:$0xff]  ;;  %v6392_v12 = vadd.f32 %v12202_v41, %v6242_v49  ;;  %v6393_v44 = vadd.f32 %v12190_v55, %v6243_v58  ;;  %v6245_v4 = vld [vmem:[#allocation3 + $0x190] sm:$0xff] }
 0x6ca   : > { %6497 = vst [vmem:[#allocation16 + $0xc0] sm:$0xff] %v6369_v59  ;;  %6498 = vst [vmem:[#allocation16 + $0xc8] sm:$0xff] %v6370_v6  ;;  %v6394_v16 = vadd.f32 %v12194_v13, %v6244_v43  ;;  %v6246_v5 = vld [vmem:[#allocation3 + $0x198] sm:$0xff]  ;;  %v6247_v15 = vld [vmem:[#allocation3 + $0x1a0] sm:$0xff]  ;;  %v6395_v28 = vadd.f32 %v12198_v31, %v6245_v4 }
 0x6cb   : > { %6499 = vst [vmem:[#allocation16 + $0xd0] sm:$0xff] %v6371_v2  ;;  %6500 = vst [vmem:[#allocation16 + $0xd8] sm:$0xff] %v6372_v38  ;;  %v6396_v32 = vadd.f32 %v12202_v41, %v6246_v5  ;;  %v6397_v52 = vadd.f32 %v12190_v55, %v6247_v15  ;;  %v6248_v27 = vld [vmem:[#allocation3 + $0x1a8] sm:$0xff]  ;;  %v6249_v40 = vld [vmem:[#allocation3 + $0x1b0] sm:$0xff] }
 0x6cc   : > { %6501 = vst [vmem:[#allocation16 + $0xe0] sm:$0xff] %v6373_v24  ;;  %6503 = vst [vmem:[#allocation16 + $0xf0] sm:$0xff] %v6375_v62  ;;  %v6250_v17 = vld [vmem:[#allocation3 + $0x1b8] sm:$0xff]  ;;  %v6398_v36 = vadd.f32 %v12194_v13, %v6248_v27  ;;  %v6399_v59 = vadd.f32 %v12198_v31, %v6249_v40  ;;  %v6251_v18 = vld [vmem:[#allocation3 + $0x1c0] sm:$0xff] }
 0x6cd   : > { %6504 = vst [vmem:[#allocation16 + $0xf8] sm:$0xff] %v6376_v51  ;;  %6505 = vst [vmem:[#allocation16 + $0x100] sm:$0xff] %v6377_v54  ;;  %v6400_v6 = vadd.f32 %v12202_v41, %v6250_v17  ;;  %v6252_v3 = vld [vmem:[#allocation3 + $0x1c8] sm:$0xff]  ;;  %v6253_v60 = vld [vmem:[#allocation3 + $0x1d0] sm:$0xff]  ;;  %v6401_v2 = vadd.f32 %v12190_v55, %v6251_v18 }
 0x6ce   : > { %6506 = vst [vmem:[#allocation16 + $0x108] sm:$0xff] %v6378_v33  ;;  %6507 = vst [vmem:[#allocation16 + $0x110] sm:$0xff] %v6379_v56  ;;  %v6402_v38 = vadd.f32 %v12194_v13, %v6252_v3  ;;  %v6403_v24 = vadd.f32 %v12198_v31, %v6253_v60  ;;  %v6255_v25 = vld [vmem:[#allocation3 + $0x1e0] sm:$0xff]  ;;  %v6256_v23 = vld [vmem:[#allocation3 + $0x1e8] sm:$0xff] }
 0x6cf   : > { %6508 = vst [vmem:[#allocation16 + $0x118] sm:$0xff] %v6380_v39  ;;  %6509 = vst [vmem:[#allocation16 + $0x120] sm:$0xff] %v6381_v0  ;;  %v6405_v62 = vadd.f32 %v12190_v55, %v6255_v25  ;;  %v6406_v51 = vadd.f32 %v12194_v13, %v6256_v23  ;;  %v6257_v8 = vld [vmem:[#allocation3 + $0x1f0] sm:$0xff]  ;;  %v6258_v46 = vld [vmem:[#allocation3 + $0x1f8] sm:$0xff] }
 0x6d0   : > { %6510 = vst [vmem:[#allocation16 + $0x128] sm:$0xff] %v6382_v61  ;;  %6511 = vst [vmem:[#allocation16 + $0x130] sm:$0xff] %v6383_v29  ;;  %v6259_v20 = vld [vmem:[#allocation3 + $0x200] sm:$0xff]  ;;  %v6407_v54 = vadd.f32 %v12198_v31, %v6257_v8  ;;  %v6408_v33 = vadd.f32 %v12202_v41, %v6258_v46  ;;  %v6260_v53 = vld [vmem:[#allocation3 + $0x208] sm:$0xff] }
 0x6d1   : > { %6512 = vst [vmem:[#allocation16 + $0x138] sm:$0xff] %v6384_v48  ;;  %6513 = vst [vmem:[#allocation16 + $0x140] sm:$0xff] %v6385_v9  ;;  %v6409_v56 = vadd.f32 %v12190_v55, %v6259_v20  ;;  %v6261_v50 = vld [vmem:[#allocation3 + $0x210] sm:$0xff]  ;;  %v6262_v63 = vld [vmem:[#allocation3 + $0x218] sm:$0xff]  ;;  %v6410_v39 = vadd.f32 %v12194_v13, %v6260_v53 }
 0x6d2   : > { %6514 = vst [vmem:[#allocation16 + $0x148] sm:$0xff] %v6386_v35  ;;  %6515 = vst [vmem:[#allocation16 + $0x150] sm:$0xff] %v6387_v45  ;;  %v6411_v0 = vadd.f32 %v12198_v31, %v6261_v50  ;;  %v6412_v61 = vadd.f32 %v12202_v41, %v6262_v63  ;;  %v6263_v11 = vld [vmem:[#allocation3 + $0x220] sm:$0xff]  ;;  %v6264_v14 = vld [vmem:[#allocation3 + $0x228] sm:$0xff] }
 0x6d3   : > { %6516 = vst [vmem:[#allocation16 + $0x158] sm:$0xff] %v6388_v7  ;;  %6517 = vst [vmem:[#allocation16 + $0x160] sm:$0xff] %v6389_v19  ;;  %v6265_v42 = vld [vmem:[#allocation3 + $0x230] sm:$0xff]  ;;  %v6413_v29 = vadd.f32 %v12190_v55, %v6263_v11  ;;  %v6414_v48 = vadd.f32 %v12194_v13, %v6264_v14  ;;  %v6266_v21 = vld [vmem:[#allocation3 + $0x238] sm:$0xff] }
 0x6d4   : > { %6518 = vst [vmem:[#allocation16 + $0x168] sm:$0xff] %v6390_v34  ;;  %6519 = vst [vmem:[#allocation16 + $0x170] sm:$0xff] %v6391_v37  ;;  %v6415_v9 = vadd.f32 %v12198_v31, %v6265_v42  ;;  %v6267_v22 = vld [vmem:[#allocation3 + $0x240] sm:$0xff]  ;;  %v6268_v26 = vld [vmem:[#allocation3 + $0x248] sm:$0xff]  ;;  %v6416_v35 = vadd.f32 %v12202_v41, %v6266_v21 }
 0x6d5   : > { %6520 = vst [vmem:[#allocation16 + $0x178] sm:$0xff] %v6392_v12  ;;  %6521 = vst [vmem:[#allocation16 + $0x180] sm:$0xff] %v6393_v44  ;;  %v6417_v45 = vadd.f32 %v12190_v55, %v6267_v22  ;;  %v6418_v7 = vadd.f32 %v12194_v13, %v6268_v26  ;;  %v6269_v30 = vld [vmem:[#allocation3 + $0x250] sm:$0xff]  ;;  %v6270_v57 = vld [vmem:[#allocation3 + $0x258] sm:$0xff] }
 0x6d6   : > { %6522 = vst [vmem:[#allocation16 + $0x188] sm:$0xff] %v6394_v16  ;;  %6523 = vst [vmem:[#allocation16 + $0x190] sm:$0xff] %v6395_v28  ;;  %v6271_v47 = vld [vmem:[#allocation3 + $0x260] sm:$0xff]  ;;  %v6419_v19 = vadd.f32 %v12198_v31, %v6269_v30  ;;  %v6420_v34 = vadd.f32 %v12202_v41, %v6270_v57  ;;  %v6272_v49 = vld [vmem:[#allocation3 + $0x268] sm:$0xff] }
 0x6d7   : > { %6524 = vst [vmem:[#allocation16 + $0x198] sm:$0xff] %v6396_v32  ;;  %6525 = vst [vmem:[#allocation16 + $0x1a0] sm:$0xff] %v6397_v52  ;;  %v6421_v37 = vadd.f32 %v12190_v55, %v6271_v47  ;;  %v6273_v58 = vld [vmem:[#allocation3 + $0x270] sm:$0xff]  ;;  %v6274_v43 = vld [vmem:[#allocation3 + $0x278] sm:$0xff]  ;;  %v6422_v12 = vadd.f32 %v12194_v13, %v6272_v49 }
 0x6d8   : > { %6526 = vst [vmem:[#allocation16 + $0x1a8] sm:$0xff] %v6398_v36  ;;  %6527 = vst [vmem:[#allocation16 + $0x1b0] sm:$0xff] %v6399_v59  ;;  %v6423_v44 = vadd.f32 %v12198_v31, %v6273_v58  ;;  %v6424_v16 = vadd.f32 %v12202_v41, %v6274_v43  ;;  %v6275_v4 = vld [vmem:[#allocation3 + $0x280] sm:$0xff]  ;;  %v6276_v5 = vld [vmem:[#allocation3 + $0x288] sm:$0xff] }
 0x6d9   : > { %6528 = vst [vmem:[#allocation16 + $0x1b8] sm:$0xff] %v6400_v6  ;;  %6529 = vst [vmem:[#allocation16 + $0x1c0] sm:$0xff] %v6401_v2  ;;  %v6277_v15 = vld [vmem:[#allocation3 + $0x290] sm:$0xff]  ;;  %v6425_v28 = vadd.f32 %v12190_v55, %v6275_v4  ;;  %v6426_v32 = vadd.f32 %v12194_v13, %v6276_v5  ;;  %v6278_v27 = vld [vmem:[#allocation3 + $0x298] sm:$0xff] }
 0x6da   : > { %6530 = vst [vmem:[#allocation16 + $0x1c8] sm:$0xff] %v6402_v38  ;;  %6531 = vst [vmem:[#allocation16 + $0x1d0] sm:$0xff] %v6403_v24  ;;  %v6427_v52 = vadd.f32 %v12198_v31, %v6277_v15  ;;  %v6279_v40 = vld [vmem:[#allocation3 + $0x2a0] sm:$0xff]  ;;  %v6280_v17 = vld [vmem:[#allocation3 + $0x2a8] sm:$0xff]  ;;  %v6428_v36 = vadd.f32 %v12202_v41, %v6278_v27 }
 0x6db   : > { %6532 = vst [vmem:[#allocation16 + $0x1d8] sm:$0xff] %v6404_v1  ;;  %6533 = vst [vmem:[#allocation16 + $0x1e0] sm:$0xff] %v6405_v62  ;;  %v6429_v59 = vadd.f32 %v12190_v55, %v6279_v40  ;;  %v6430_v6 = vadd.f32 %v12194_v13, %v6280_v17  ;;  %v6281_v18 = vld [vmem:[#allocation3 + $0x2b0] sm:$0xff]  ;;  %v6282_v3 = vld [vmem:[#allocation3 + $0x2b8] sm:$0xff] }
 0x6dc   : > { %6534 = vst [vmem:[#allocation16 + $0x1e8] sm:$0xff] %v6406_v51  ;;  %6535 = vst [vmem:[#allocation16 + $0x1f0] sm:$0xff] %v6407_v54  ;;  %v6283_v60 = vld [vmem:[#allocation3 + $0x2c0] sm:$0xff]  ;;  %v6431_v2 = vadd.f32 %v12198_v31, %v6281_v18  ;;  %v6432_v38 = vadd.f32 %v12202_v41, %v6282_v3  ;;  %v6284_v10 = vld [vmem:[#allocation3 + $0x2c8] sm:$0xff] }
 0x6dd   : > { %6536 = vst [vmem:[#allocation16 + $0x1f8] sm:$0xff] %v6408_v33  ;;  %6537 = vst [vmem:[#allocation16 + $0x200] sm:$0xff] %v6409_v56  ;;  %v6433_v24 = vadd.f32 %v12190_v55, %v6283_v60  ;;  %v6285_v25 = vld [vmem:[#allocation3 + $0x2d0] sm:$0xff]  ;;  %v6286_v23 = vld [vmem:[#allocation3 + $0x2d8] sm:$0xff]  ;;  %v6434_v1 = vadd.f32 %v12194_v13, %v6284_v10 }
 0x6de   : > { %6538 = vst [vmem:[#allocation16 + $0x208] sm:$0xff] %v6410_v39  ;;  %6539 = vst [vmem:[#allocation16 + $0x210] sm:$0xff] %v6411_v0  ;;  %v6435_v62 = vadd.f32 %v12198_v31, %v6285_v25  ;;  %v6436_v51 = vadd.f32 %v12202_v41, %v6286_v23  ;;  %v6287_v8 = vld [vmem:[#allocation3 + $0x2e0] sm:$0xff]  ;;  %v6288_v46 = vld [vmem:[#allocation3 + $0x2e8] sm:$0xff] }
 0x6df   : > { %6540 = vst [vmem:[#allocation16 + $0x218] sm:$0xff] %v6412_v61  ;;  %6541 = vst [vmem:[#allocation16 + $0x220] sm:$0xff] %v6413_v29  ;;  %v6289_v20 = vld [vmem:[#allocation3 + $0x2f0] sm:$0xff]  ;;  %v6437_v54 = vadd.f32 %v12190_v55, %v6287_v8  ;;  %v6438_v33 = vadd.f32 %v12194_v13, %v6288_v46  ;;  %v6290_v53 = vld [vmem:[#allocation3 + $0x2f8] sm:$0xff] }
 0x6e0   : > { %6542 = vst [vmem:[#allocation16 + $0x228] sm:$0xff] %v6414_v48  ;;  %6543 = vst [vmem:[#allocation16 + $0x230] sm:$0xff] %v6415_v9  ;;  %v6439_v56 = vadd.f32 %v12198_v31, %v6289_v20  ;;  %v6291_v50 = vld [vmem:[#allocation3 + $0x300] sm:$0xff]  ;;  %v6292_v63 = vld [vmem:[#allocation3 + $0x308] sm:$0xff]  ;;  %v6440_v39 = vadd.f32 %v12202_v41, %v6290_v53 }
 0x6e1   : > { %6544 = vst [vmem:[#allocation16 + $0x238] sm:$0xff] %v6416_v35  ;;  %6545 = vst [vmem:[#allocation16 + $0x240] sm:$0xff] %v6417_v45  ;;  %v6441_v0 = vadd.f32 %v12190_v55, %v6291_v50  ;;  %v6442_v61 = vadd.f32 %v12194_v13, %v6292_v63  ;;  %v6293_v11 = vld [vmem:[#allocation3 + $0x310] sm:$0xff]  ;;  %v6294_v14 = vld [vmem:[#allocation3 + $0x318] sm:$0xff] }
 0x6e2   : > { %6546 = vst [vmem:[#allocation16 + $0x248] sm:$0xff] %v6418_v7  ;;  %6547 = vst [vmem:[#allocation16 + $0x250] sm:$0xff] %v6419_v19  ;;  %v6295_v42 = vld [vmem:[#allocation3 + $0x320] sm:$0xff]  ;;  %v6443_v29 = vadd.f32 %v12198_v31, %v6293_v11  ;;  %v6444_v48 = vadd.f32 %v12202_v41, %v6294_v14  ;;  %v6296_v21 = vld [vmem:[#allocation3 + $0x328] sm:$0xff] }
 0x6e3   : > { %6548 = vst [vmem:[#allocation16 + $0x258] sm:$0xff] %v6420_v34  ;;  %6549 = vst [vmem:[#allocation16 + $0x260] sm:$0xff] %v6421_v37  ;;  %v6445_v9 = vadd.f32 %v12190_v55, %v6295_v42  ;;  %v6297_v22 = vld [vmem:[#allocation3 + $0x330] sm:$0xff]  ;;  %v6298_v26 = vld [vmem:[#allocation3 + $0x338] sm:$0xff]  ;;  %v6446_v35 = vadd.f32 %v12194_v13, %v6296_v21 }
 0x6e4   : > { %6550 = vst [vmem:[#allocation16 + $0x268] sm:$0xff] %v6422_v12  ;;  %6551 = vst [vmem:[#allocation16 + $0x270] sm:$0xff] %v6423_v44  ;;  %v6447_v45 = vadd.f32 %v12198_v31, %v6297_v22  ;;  %v6448_v7 = vadd.f32 %v12202_v41, %v6298_v26  ;;  %v6299_v30 = vld [vmem:[#allocation3 + $0x340] sm:$0xff]  ;;  %v6300_v57 = vld [vmem:[#allocation3 + $0x348] sm:$0xff] }
 0x6e5   : > { %6552 = vst [vmem:[#allocation16 + $0x278] sm:$0xff] %v6424_v16  ;;  %6553 = vst [vmem:[#allocation16 + $0x280] sm:$0xff] %v6425_v28  ;;  %v6301_v47 = vld [vmem:[#allocation3 + $0x350] sm:$0xff]  ;;  %v6449_v19 = vadd.f32 %v12190_v55, %v6299_v30  ;;  %v6450_v34 = vadd.f32 %v12194_v13, %v6300_v57  ;;  %v6302_v49 = vld [vmem:[#allocation3 + $0x358] sm:$0xff] }
 0x6e6   : > { %6554 = vst [vmem:[#allocation16 + $0x288] sm:$0xff] %v6426_v32  ;;  %6555 = vst [vmem:[#allocation16 + $0x290] sm:$0xff] %v6427_v52  ;;  %v6451_v37 = vadd.f32 %v12198_v31, %v6301_v47  ;;  %v6303_v58 = vld [vmem:[#allocation3 + $0x360] sm:$0xff]  ;;  %v6304_v43 = vld [vmem:[#allocation3 + $0x368] sm:$0xff]  ;;  %v6452_v12 = vadd.f32 %v12202_v41, %v6302_v49 }
 0x6e7   : > { %6556 = vst [vmem:[#allocation16 + $0x298] sm:$0xff] %v6428_v36  ;;  %6557 = vst [vmem:[#allocation16 + $0x2a0] sm:$0xff] %v6429_v59  ;;  %v6453_v44 = vadd.f32 %v12190_v55, %v6303_v58  ;;  %v6454_v16 = vadd.f32 %v12194_v13, %v6304_v43  ;;  %v6305_v4 = vld [vmem:[#allocation3 + $0x370] sm:$0xff]  ;;  %v6306_v5 = vld [vmem:[#allocation3 + $0x378] sm:$0xff] }
 0x6e8   : > { %6558 = vst [vmem:[#allocation16 + $0x2a8] sm:$0xff] %v6430_v6  ;;  %6559 = vst [vmem:[#allocation16 + $0x2b0] sm:$0xff] %v6431_v2  ;;  %v6307_v15 = vld [vmem:[#allocation3 + $0x380] sm:$0xff]  ;;  %v6455_v28 = vadd.f32 %v12198_v31, %v6305_v4  ;;  %v6456_v32 = vadd.f32 %v12202_v41, %v6306_v5  ;;  %v6308_v27 = vld [vmem:[#allocation3 + $0x388] sm:$0xff] }
 0x6e9   : > { %6560 = vst [vmem:[#allocation16 + $0x2b8] sm:$0xff] %v6432_v38  ;;  %6561 = vst [vmem:[#allocation16 + $0x2c0] sm:$0xff] %v6433_v24  ;;  %v6457_v52 = vadd.f32 %v12190_v55, %v6307_v15  ;;  %v6309_v40 = vld [vmem:[#allocation3 + $0x390] sm:$0xff]  ;;  %v6310_v17 = vld [vmem:[#allocation3 + $0x398] sm:$0xff]  ;;  %v6458_v36 = vadd.f32 %v12194_v13, %v6308_v27 }
 0x6ea   : > { %6562 = vst [vmem:[#allocation16 + $0x2c8] sm:$0xff] %v6434_v1  ;;  %6563 = vst [vmem:[#allocation16 + $0x2d0] sm:$0xff] %v6435_v62  ;;  %v6459_v59 = vadd.f32 %v12198_v31, %v6309_v40  ;;  %v6460_v6 = vadd.f32 %v12202_v41, %v6310_v17  ;;  %v6311_v18 = vld [vmem:[#allocation3 + $0x3a0] sm:$0xff]  ;;  %v6312_v3 = vld [vmem:[#allocation3 + $0x3a8] sm:$0xff] }
 0x6eb   : > { %6564 = vst [vmem:[#allocation16 + $0x2d8] sm:$0xff] %v6436_v51  ;;  %6565 = vst [vmem:[#allocation16 + $0x2e0] sm:$0xff] %v6437_v54  ;;  %v6313_v60 = vld [vmem:[#allocation3 + $0x3b0] sm:$0xff]  ;;  %v6461_v2 = vadd.f32 %v12190_v55, %v6311_v18  ;;  %v6462_v38 = vadd.f32 %v12194_v13, %v6312_v3  ;;  %v6314_v10 = vld [vmem:[#allocation3 + $0x3b8] sm:$0xff] }
 0x6ec   : > { %6566 = vst [vmem:[#allocation16 + $0x2e8] sm:$0xff] %v6438_v33  ;;  %6567 = vst [vmem:[#allocation16 + $0x2f0] sm:$0xff] %v6439_v56  ;;  %v6463_v24 = vadd.f32 %v12198_v31, %v6313_v60  ;;  %v6315_v25 = vld [vmem:[#allocation3 + $0x3c0] sm:$0xff]  ;;  %v6316_v23 = vld [vmem:[#allocation3 + $0x3c8] sm:$0xff]  ;;  %v6464_v1 = vadd.f32 %v12202_v41, %v6314_v10 }
 0x6ed   : > { %6568 = vst [vmem:[#allocation16 + $0x2f8] sm:$0xff] %v6440_v39  ;;  %6569 = vst [vmem:[#allocation16 + $0x300] sm:$0xff] %v6441_v0  ;;  %v6465_v62 = vadd.f32 %v12190_v55, %v6315_v25  ;;  %v6466_v51 = vadd.f32 %v12194_v13, %v6316_v23  ;;  %v6317_v8 = vld [vmem:[#allocation3 + $0x3d0] sm:$0xff]  ;;  %v6318_v46 = vld [vmem:[#allocation3 + $0x3d8] sm:$0xff] }
 0x6ee   : > { %6570 = vst [vmem:[#allocation16 + $0x308] sm:$0xff] %v6442_v61  ;;  %6571 = vst [vmem:[#allocation16 + $0x310] sm:$0xff] %v6443_v29  ;;  %v6319_v20 = vld [vmem:[#allocation3 + $0x3e0] sm:$0xff]  ;;  %v6467_v54 = vadd.f32 %v12198_v31, %v6317_v8  ;;  %v6468_v33 = vadd.f32 %v12202_v41, %v6318_v46  ;;  %v6320_v53 = vld [vmem:[#allocation3 + $0x3e8] sm:$0xff] }
 0x6ef   : > { %6572 = vst [vmem:[#allocation16 + $0x318] sm:$0xff] %v6444_v48  ;;  %6573 = vst [vmem:[#allocation16 + $0x320] sm:$0xff] %v6445_v9  ;;  %v6469_v56 = vadd.f32 %v12190_v55, %v6319_v20  ;;  %v6321_v50 = vld [vmem:[#allocation3 + $0x3f0] sm:$0xff]  ;;  %v6322_v63 = vld [vmem:[#allocation3 + $0x3f8] sm:$0xff]  ;;  %v6470_v39 = vadd.f32 %v12194_v13, %v6320_v53 }
 0x6f0   : > { %6574 = vst [vmem:[#allocation16 + $0x328] sm:$0xff] %v6446_v35  ;;  %6575 = vst [vmem:[#allocation16 + $0x330] sm:$0xff] %v6447_v45  ;;  %v6471_v0 = vadd.f32 %v12198_v31, %v6321_v50  ;;  %v6472_v61 = vadd.f32 %v12202_v41, %v6322_v63 }
 0x6f1   : > { %6576 = vst [vmem:[#allocation16 + $0x338] sm:$0xff] %v6448_v7  ;;  %6577 = vst [vmem:[#allocation16 + $0x340] sm:$0xff] %v6449_v19 }
 0x6f2   : > { %6578 = vst [vmem:[#allocation16 + $0x348] sm:$0xff] %v6450_v34  ;;  %6579 = vst [vmem:[#allocation16 + $0x350] sm:$0xff] %v6451_v37 }
 0x6f3   : > { %6580 = vst [vmem:[#allocation16 + $0x358] sm:$0xff] %v6452_v12  ;;  %6581 = vst [vmem:[#allocation16 + $0x360] sm:$0xff] %v6453_v44 }
 0x6f4   : > { %6582 = vst [vmem:[#allocation16 + $0x368] sm:$0xff] %v6454_v16  ;;  %6583 = vst [vmem:[#allocation16 + $0x370] sm:$0xff] %v6455_v28 }
 0x6f5   : > { %6584 = vst [vmem:[#allocation16 + $0x378] sm:$0xff] %v6456_v32  ;;  %6585 = vst [vmem:[#allocation16 + $0x380] sm:$0xff] %v6457_v52 }
 0x6f6   : > { %6586 = vst [vmem:[#allocation16 + $0x388] sm:$0xff] %v6458_v36  ;;  %6587 = vst [vmem:[#allocation16 + $0x390] sm:$0xff] %v6459_v59 }
 0x6f7   : > { %6588 = vst [vmem:[#allocation16 + $0x398] sm:$0xff] %v6460_v6  ;;  %6589 = vst [vmem:[#allocation16 + $0x3a0] sm:$0xff] %v6461_v2 }
 0x6f8   : > { %6590 = vst [vmem:[#allocation16 + $0x3a8] sm:$0xff] %v6462_v38  ;;  %6591 = vst [vmem:[#allocation16 + $0x3b0] sm:$0xff] %v6463_v24 }
 0x6f9   : > { %6592 = vst [vmem:[#allocation16 + $0x3b8] sm:$0xff] %v6464_v1  ;;  %6593 = vst [vmem:[#allocation16 + $0x3c0] sm:$0xff] %v6465_v62 }
 0x6fa   : > { %6594 = vst [vmem:[#allocation16 + $0x3c8] sm:$0xff] %v6466_v51  ;;  %6595 = vst [vmem:[#allocation16 + $0x3d0] sm:$0xff] %v6467_v54 }
 0x6fb   : > { %6596 = vst [vmem:[#allocation16 + $0x3d8] sm:$0xff] %v6468_v33  ;;  %6597 = vst [vmem:[#allocation16 + $0x3e0] sm:$0xff] %v6469_v56 }
 0x6fc   : > { %6598 = vst [vmem:[#allocation16 + $0x3e8] sm:$0xff] %v6470_v39  ;;  %6599 = vst [vmem:[#allocation16 + $0x3f0] sm:$0xff] %v6471_v0 }
 0x6fd   : > { %6600 = vst [vmem:[#allocation16 + $0x3f8] sm:$0xff] %v6472_v61 }
 0x6fe PF: > { %p7476_p2 = scmp.eq.s32.totalorder %s8586_s28, 3  ;;  %s8524_s8 = smov [#allocation16]  }
 0x6ff   : > { %s6607_s12 = sshll.u32 %s8524_s8, 4  ;;  %s6608_s12 = int_to_ptr.vmem [resolvable:$true] %s6607_s12 }
 0x700   : > { %s8429_s21 = scalar_lea.vmem %s6608_s12, 16384  ;;  %p8436_p6 = scmp.lt.s32.totalorder %s6608_s12, %s6608_s12 }
 0x701   : > { %p8430_p11 = scmp.ne.s32.totalorder %s6608_s12, %s8429_s21  ;;  %p8437_p1 = scmp.lt.s32.totalorder %s8429_s21, %s8429_s21 }
 0x703   : > { %p8431_p4 = pnand %p8430_p11, %p7476_p2  ;;  %p8438_p12 = por %p8437_p1, %p8436_p6 }
 0x705   : > { %p8432_p5 = pneg %p8431_p4 }
 0x707   : > { %p8439_p0 = pnand %p8438_p12, %p8432_p5 }
 0x709   : > { %8442 = shalt.err (!%p8439_p0)
}
 0x70a   : > { %s13105_s3 = sld [smem:[#allocation194_spill]] }
 0x710   : > { %s8443_s13 = scalar_lea.hbm %s13105_s3, 16384 }
 0x711   : > { %p8444_p3 = scmp.ne.s32.totalorder %s13105_s3, %s8443_s13  ;;  %p8449_p10 = scmp.lt.u32.totalorder %s8443_s13, %s13105_s3 }
 0x713   : > { %p8445_p9 = pnand %p8444_p3, %p7476_p2 }
 0x715   : > { %p8446_p7 = pneg %p8445_p9 }
 0x717   : > { %p8451_p13 = pnand %p8449_p10, %p8446_p7 }
 0x719   : > { %8454 = shalt.err (!%p8451_p13)
}
 0x71a   : > { %s8525_s23 = smov 512   ;;  %s8526_s18 = smov 32  }
 0x71b   : > { %7441 = dma.vmem_to_hbm [thread:$0]  (%p7476_p2), %s6608_s12, 16384, %s13105_s3, [#allocation6], %s8525_s23, %s8525_s23, %s8526_s18  }
 0x71c   : > { %8492 = dma.done.wait (%p7476_p2), [#allocation6], 16384  }
 0x71d   : > { %8494 = vsyncadd (%p7476_p2), [#allocation6], 4294950912 }
 0x71e PF: > { %s13106_s27 = sld [smem:[#allocation24_spill]]  ;;  %s13107_s1 = sld [smem:[#allocation25_spill]] }
 0x71f   : > { %s13108_s24 = smov %s8501_s25  ;;  %s13109_s25 = smov %s8505_s26 }
 0x724   : > { %p23_p8 = scmp.ge.s32.totalorder %s13106_s27, 6   ;;  %s13110_s26 = smov %s13107_s1 }
 0x726   :  { %25 = sbr.rel (!%p23_p8) target bundleno = 13 (0xd), region = 134 }
 0x72d   :  { %6623 = vsyncpa [#allocation5], 1 }
 0x72e   :  { %6625 = vsyncpa [#allocation5 + $0x1], 1 }
 0x72f   :  { %6626 = vsyncpa [#allocation8], 1 }
 0x730   :  { %6627 = vsyncpa [#allocation11], 1 }
 0x731   :  { %6629 = vsyncpa [#allocation11 + $0x1], 1 }
 0x732   :  { %6630 = vsyncpa [#allocation14], 1 }
 0x733   :  { %6632 = vsyncpa [#allocation14 + $0x1], 1 }
 0x734   :  { %6633 = vsyncpa [#allocation6], 1 }
 0x735   :  { %6635 = vsyncpa [#allocation6 + $0x1], 1 }

</bundles_post_ra>
